<compile_context>
chip_gen: v7x
topology: tpu7x:2x2x1
jax: 0.10.0
libtpu: 0.0.40
codegen_flags: <defaults>
</compile_context>

<pallas_src>
import functools

import jax
import jax.numpy as jnp
from jax.experimental import pallas as pl
from jax.experimental.pallas import tpu as pltpu


def _round_up(x, m):
    return ((x + m - 1) // m) * m


# ----------------------------------------------------------------------------
# Pallas kernels
# ----------------------------------------------------------------------------

def _matmul_fused_kernel(a_ref, b_ref, scale_ref, shift_ref, *rest,
                         relu, has_residual):
    """K-tiled matmul, f32 accumulation directly in o_ref, fused BN epilogue.

    Epilogue (last K step): y = acc * scale + shift (+ residual) (+ ReLU).
    """
    if has_residual:
        res_ref, o_ref = rest
    else:
        (o_ref,) = rest

    k = pl.program_id(2)

    @pl.when(k == 0)
    def _():
        o_ref[...] = jnp.zeros_like(o_ref)

    o_ref[...] += jnp.dot(a_ref[...], b_ref[...],
                          preferred_element_type=jnp.float32)

    @pl.when(k == pl.num_programs(2) - 1)
    def _():
        y = o_ref[...] * scale_ref[...] + shift_ref[...]
        if has_residual:
            y = y + res_ref[...]
        if relu:
            y = jnp.maximum(y, 0.0)
        o_ref[...] = y


def pallas_matmul_fused(a, b, scale, shift, relu=False, residual=None,
                        tm_max=512, tn_max=512):
    """out = act((a @ b) * scale + shift [+ residual]) with a,b in bf16.

    a: (M, K), b: (K, N), scale/shift: (N,), residual: (M, N) f32 or None.
    Returns f32 (M, N).
    """
    M, K = a.shape
    K2, N = b.shape
    assert K == K2

    # --- tile selection ---------------------------------------------------
    tm = min(tm_max, _round_up(M, 8))
    Mp = _round_up(M, tm)
    tn = min(tn_max, _round_up(N, 128))
    Np = _round_up(N, tn)
    if K <= 1024:
        Kp, tk = K, K                      # full-extent K, no padding copy
    else:
        for cand in (512, 384, 256, 128):  # pick tk so Kp == K when possible
            if K % cand == 0:
                Kp, tk = K, cand
                break
        else:
            tk = 512
            Kp = _round_up(K, tk)

    # --- operand prep (bf16 for MXU, zero-pad only when needed) ------------
    a_bf = a.astype(jnp.bfloat16)
    b_bf = b.astype(jnp.bfloat16)
    if (Mp, Kp) != (M, K):
        a_bf = jnp.zeros((Mp, Kp), jnp.bfloat16).at[:M, :K].set(a_bf)
    if (Kp, Np) != (K, N):
        b_bf = jnp.zeros((Kp, Np), jnp.bfloat16).at[:K, :N].set(b_bf)
    s_p = jnp.zeros((1, Np), jnp.float32).at[0, :N].set(scale)
    t_p = jnp.zeros((1, Np), jnp.float32).at[0, :N].set(shift)

    in_specs = [
        pl.BlockSpec((tm, tk), lambda i, j, k: (i, k)),
        pl.BlockSpec((tk, tn), lambda i, j, k: (k, j)),
        pl.BlockSpec((1, tn), lambda i, j, k: (0, j)),
        pl.BlockSpec((1, tn), lambda i, j, k: (0, j)),
    ]
    args = [a_bf, b_bf, s_p, t_p]

    has_res = residual is not None
    if has_res:
        r_p = residual.astype(jnp.float32)
        if (Mp, Np) != (M, N):
            r_p = jnp.zeros((Mp, Np), jnp.float32).at[:M, :N].set(r_p)
        in_specs.append(pl.BlockSpec((tm, tn), lambda i, j, k: (i, j)))
        args.append(r_p)

    kernel = functools.partial(_matmul_fused_kernel,
                               relu=relu, has_residual=has_res)
    out = pl.pallas_call(
        kernel,
        out_shape=jax.ShapeDtypeStruct((Mp, Np), jnp.float32),
        grid=(Mp // tm, Np // tn, Kp // tk),
        in_specs=in_specs,
        out_specs=pl.BlockSpec((tm, tn), lambda i, j, k: (i, j)),
        compiler_params=pltpu.CompilerParams(
            dimension_semantics=("parallel", "parallel", "arbitrary")),
    )(*args)
    if (Mp, Np) != (M, N):
        out = out[:M, :N]
    return out


def _maxpool_kernel(p_ref, o_ref):
    o_ref[...] = jnp.max(p_ref[...], axis=0)


def _avgpool_kernel(x_ref, o_ref, *, inv_hw):
    o_ref[...] = jnp.sum(x_ref[...], axis=1) * inv_hw


# ----------------------------------------------------------------------------
# JAX glue: conv (im2col) + fused BN matmul, pooling
# ----------------------------------------------------------------------------

def conv2d_bn(x, w, stride, pad, scale, shift, relu, residual=None):
    """x: NHWC f32, w: (Cout, Cin, kh, kw) PyTorch layout.

    Computes conv -> BN(scale, shift) [-> +residual] [-> ReLU] in a single
    fused Pallas matmul kernel.
    """
    N, H, W, Cin = x.shape
    Cout, _, kh, kw = w.shape
    Ho = (H + 2 * pad - kh) // stride + 1
    Wo = (W + 2 * pad - kw) // stride + 1

    # TODO(synk): im2col patch gather is done host-side (XLA) instead of being
    # streamed via the matmul index_map; fusing it would remove the kh*kw x
    # activation materialization in HBM.
    xb = x.astype(jnp.bfloat16)
    xp = jnp.pad(xb, ((0, 0), (pad, pad), (pad, pad), (0, 0)))
    patches = []
    for i in range(kh):
        for j in range(kw):
            patches.append(
                xp[:, i:i + stride * Ho:stride, j:j + stride * Wo:stride, :])
    # (N, Ho, Wo, kh*kw, Cin) -> (M, K), K ordered as (kh, kw, Cin)
    a = jnp.stack(patches, axis=3).reshape(N * Ho * Wo, kh * kw * Cin)
    wm = jnp.transpose(w, (2, 3, 1, 0)).reshape(kh * kw * Cin, Cout)

    r2 = None if residual is None else residual.reshape(-1, Cout)
    out = pallas_matmul_fused(a, wm, scale, shift, relu=relu, residual=r2)
    return out.reshape(N, Ho, Wo, Cout)


def bn_scale_shift(bn, eps=1e-5):
    scale = bn["gamma"] / jnp.sqrt(bn["var"] + eps)
    shift = bn["beta"] - bn["mean"] * scale
    return scale, shift


def maxpool2d(x, k=3, stride=2, pad=1):
    N, H, W, C = x.shape
    Ho = (H + 2 * pad - k) // stride + 1
    Wo = (W + 2 * pad - k) // stride + 1
    xp = jnp.pad(x, ((0, 0), (pad, pad), (pad, pad), (0, 0)),
                 constant_values=-jnp.inf)
    patches = []
    for i in range(k):
        for j in range(k):
            patches.append(
                xp[:, i:i + stride * Ho:stride, j:j + stride * Wo:stride, :])
    M = N * Ho * Wo
    p = jnp.stack(patches, axis=0).reshape(k * k, M, C)

    tm = min(512, _round_up(M, 8))
    Mp = _round_up(M, tm)
    Cp = _round_up(C, 128)
    if (Mp, Cp) != (M, C):
        p = jnp.pad(p, ((0, 0), (0, Mp - M), (0, Cp - C)))

    out = pl.pallas_call(
        _maxpool_kernel,
        out_shape=jax.ShapeDtypeStruct((Mp, Cp), jnp.float32),
        grid=(Mp // tm,),
        in_specs=[pl.BlockSpec((k * k, tm, Cp), lambda m: (0, m, 0))],
        out_specs=pl.BlockSpec((tm, Cp), lambda m: (m, 0)),
        compiler_params=pltpu.CompilerParams(
            dimension_semantics=("parallel",)),
    )(p)
    return out[:M, :C].reshape(N, Ho, Wo, C)


def global_avgpool(x):
    """Adaptive average pool to 1x1, returned as (N, C)."""
    N, H, W, C = x.shape
    HW = H * W
    x2 = x.reshape(N, HW, C)
    Np_ = _round_up(N, 8)
    Cp = _round_up(C, 128)
    if (Np_, Cp) != (N, C):
        x2 = jnp.pad(x2, ((0, Np_ - N), (0, 0), (0, Cp - C)))
    tc = 128
    out = pl.pallas_call(
        functools.partial(_avgpool_kernel, inv_hw=1.0 / HW),
        out_shape=jax.ShapeDtypeStruct((Np_, Cp), jnp.float32),
        grid=(Cp // tc,),
        in_specs=[pl.BlockSpec((Np_, HW, tc), lambda c: (0, 0, c))],
        out_specs=pl.BlockSpec((Np_, tc), lambda c: (0, c)),
        compiler_params=pltpu.CompilerParams(
            dimension_semantics=("parallel",)),
    )(x2)
    return out[:N, :C]


# ----------------------------------------------------------------------------
# ResNet-18 parameters (deterministic synthetic init) and forward pass
# ----------------------------------------------------------------------------

def _conv_init(key, cout, cin, kh, kw):
    fan_in = cin * kh * kw
    return jax.random.normal(key, (cout, cin, kh, kw),
                             jnp.float32) * (2.0 / fan_in) ** 0.5


def _bn_init(c):
    return dict(gamma=jnp.ones((c,), jnp.float32),
                beta=jnp.zeros((c,), jnp.float32),
                mean=jnp.zeros((c,), jnp.float32),
                var=jnp.ones((c,), jnp.float32))


def init_tomato_leaf_net_params(key, num_classes=4):
    # TODO(synk): pretrained ImageNet weights cannot be loaded; synthetic init.
    keys = iter(jax.random.split(key, 64))
    p = {"conv1_w": _conv_init(next(keys), 64, 3, 7, 7), "bn1": _bn_init(64)}
    cfg = [(64, 64, 1), (64, 128, 2), (128, 256, 2), (256, 512, 2)]
    layers = []
    for cin, cout, stride in cfg:
        blocks = []
        for b in range(2):
            s = stride if b == 0 else 1
            in_c = cin if b == 0 else cout
            blk = {
                "conv1_w": _conv_init(next(keys), cout, in_c, 3, 3),
                "bn1": _bn_init(cout),
                "conv2_w": _conv_init(next(keys), cout, cout, 3, 3),
                "bn2": _bn_init(cout),
                "stride": s,
            }
            if s != 1 or in_c != cout:
                blk["ds_w"] = _conv_init(next(keys), cout, in_c, 1, 1)
                blk["ds_bn"] = _bn_init(cout)
            blocks.append(blk)
        layers.append(blocks)
    p["layers"] = layers
    p["fc_w"] = jax.random.normal(next(keys), (num_classes, 512),
                                  jnp.float32) * (1.0 / 512) ** 0.5
    p["fc_b"] = jnp.zeros((num_classes,), jnp.float32)
    return p


def basic_block(x, blk):
    s1, t1 = bn_scale_shift(blk["bn1"])
    s2, t2 = bn_scale_shift(blk["bn2"])
    out = conv2d_bn(x, blk["conv1_w"], blk["stride"], 1, s1, t1, relu=True)
    if "ds_w" in blk:
        sd, td = bn_scale_shift(blk["ds_bn"])
        identity = conv2d_bn(x, blk["ds_w"], blk["stride"], 0, sd, td,
                             relu=False)
    else:
        identity = x
    # conv2 + BN + residual add + ReLU, all in the matmul epilogue.
    return conv2d_bn(out, blk["conv2_w"], 1, 1, s2, t2, relu=True,
                     residual=identity)


def tomato_leaf_net(x_nchw, params):
    """Forward pass of TomatoLeafNet (resnet18 backbone, fc -> num_classes)."""
    x = jnp.transpose(x_nchw, (0, 2, 3, 1)).astype(jnp.float32)  # NCHW -> NHWC
    s1, t1 = bn_scale_shift(params["bn1"])
    x = conv2d_bn(x, params["conv1_w"], 2, 3, s1, t1, relu=True)
    x = maxpool2d(x, 3, 2, 1)
    for blocks in params["layers"]:
        for blk in blocks:
            x = basic_block(x, blk)
    feat = global_avgpool(x)                                   # (N, 512)
    num_classes = params["fc_b"].shape[0]
    ones = jnp.ones((num_classes,), jnp.float32)
    logits = pallas_matmul_fused(feat, params["fc_w"].T,
                                 ones, params["fc_b"], relu=False)
    return logits                                              # (N, num_classes)


if __name__ == "__main__":
    key = jax.random.PRNGKey(0)
    pkey, xkey = jax.random.split(key)
    params = init_tomato_leaf_net_params(pkey, num_classes=4)
    x = jax.random.normal(xkey, (2, 3, 32, 32), jnp.float32)   # NCHW input

    fwd = jax.jit(functools.partial(tomato_leaf_net, params=params))
    logits = fwd(x)
    jax.block_until_ready(logits)
    assert logits.shape == (2, 4) and logits.dtype == jnp.float32
    assert bool(jnp.all(jnp.isfinite(logits)))
    print("KERNEL_OK")
</pallas_src>

<mosaic_0001>
module attributes {stable_mosaic.version = 11 : i64} {
  func.func @_matmul_fused_kernel(%arg0: i32, %arg1: i32, %arg2: i32, %arg3: memref<512x147xbf16, #tpu.memory_space<vmem>>, %arg4: memref<147x128xbf16, #tpu.memory_space<vmem>>, %arg5: memref<1x128xf32, #tpu.memory_space<vmem>>, %arg6: memref<1x128xf32, #tpu.memory_space<vmem>>, %arg7: memref<512x128xf32, #tpu.memory_space<vmem>>) attributes {dimension_semantics = [#tpu.dimension_semantics<parallel>, #tpu.dimension_semantics<parallel>, #tpu.dimension_semantics<arbitrary>], iteration_bounds = array<i64: 1, 1, 1>, scalar_prefetch = 0 : i64, scratch_operands = 0 : i64, tpu.core_type = #tpu.core_type<tc>, window_params = [{transform_indices = @transform_0, window_bounds = array<i64: 512, 147>}, {transform_indices = @transform_1, window_bounds = array<i64: 147, 128>}, {transform_indices = @transform_2, window_bounds = array<i64: 1, 128>}, {transform_indices = @transform_3, window_bounds = array<i64: 1, 128>}, {transform_indices = @transform_4, window_bounds = array<i64: 512, 128>}]} {
    %c0_i32 = arith.constant 0 : i32
    %0 = arith.cmpi eq, %arg2, %c0_i32 : i32
    %1 = arith.extui %0 : i1 to i32
    %c0_i32_0 = arith.constant 0 : i32
    %2 = arith.cmpi ne, %1, %c0_i32_0 : i32
    scf.if %2 {
      %cst_10 = arith.constant 0.000000e+00 : f32
      %12 = vector.broadcast %cst_10 : f32 to vector<512x128xf32>
      %c0_11 = arith.constant 0 : index
      %c0_12 = arith.constant 0 : index
      %13 = vector.load %arg7[%c0_11, %c0_12] : memref<512x128xf32, #tpu.memory_space<vmem>>, vector<512x128xf32>
      tpu.vector_store %arg7[%c0_11, %c0_12], %12 {strides = array<i32>} : memref<512x128xf32, #tpu.memory_space<vmem>>, vector<512x128xf32>,
    } else {
    }
    %c0 = arith.constant 0 : index
    %c0_1 = arith.constant 0 : index
    %3 = vector.load %arg7[%c0, %c0_1] : memref<512x128xf32, #tpu.memory_space<vmem>>, vector<512x128xf32>
    %c0_2 = arith.constant 0 : index
    %c0_3 = arith.constant 0 : index
    %4 = vector.load %arg3[%c0_2, %c0_3] : memref<512x147xbf16, #tpu.memory_space<vmem>>, vector<512x147xbf16>
    %c0_4 = arith.constant 0 : index
    %c0_5 = arith.constant 0 : index
    %5 = vector.load %arg4[%c0_4, %c0_5] : memref<147x128xbf16, #tpu.memory_space<vmem>>, vector<147x128xbf16>
    %cst = arith.constant dense<0.000000e+00> : vector<512x128xf32>
    %6 = tpu.matmul %4, %5, %cst {dimension_numbers = #tpu.dot_dimension_numbers<[1], [0], [0], [1], [0, 0, 1, 1], [], []>} : vector<512x147xbf16>, vector<147x128xbf16>, vector<512x128xf32> -> vector<512x128xf32>
    %7 = arith.addf %3, %6 : vector<512x128xf32>
    %c0_6 = arith.constant 0 : index
    %c0_7 = arith.constant 0 : index
    %8 = vector.load %arg7[%c0_6, %c0_7] : memref<512x128xf32, #tpu.memory_space<vmem>>, vector<512x128xf32>
    tpu.vector_store %arg7[%c0_6, %c0_7], %7 {strides = array<i32>} : memref<512x128xf32, #tpu.memory_space<vmem>>, vector<512x128xf32>,
    %c0_i32_8 = arith.constant 0 : i32
    %9 = arith.cmpi eq, %arg2, %c0_i32_8 : i32
    %10 = arith.extui %9 : i1 to i32
    %c0_i32_9 = arith.constant 0 : i32
    %11 = arith.cmpi ne, %10, %c0_i32_9 : i32
    scf.if %11 {
      %c0_10 = arith.constant 0 : index
      %c0_11 = arith.constant 0 : index
      %12 = vector.load %arg7[%c0_10, %c0_11] : memref<512x128xf32, #tpu.memory_space<vmem>>, vector<512x128xf32>
      %c0_12 = arith.constant 0 : index
      %c0_13 = arith.constant 0 : index
      %13 = vector.load %arg5[%c0_12, %c0_13] : memref<1x128xf32, #tpu.memory_space<vmem>>, vector<1x128xf32>
      %14 = vector.broadcast %13 : vector<1x128xf32> to vector<512x128xf32>
      %15 = arith.mulf %12, %14 : vector<512x128xf32>
      %c0_14 = arith.constant 0 : index
      %c0_15 = arith.constant 0 : index
      %16 = vector.load %arg6[%c0_14, %c0_15] : memref<1x128xf32, #tpu.memory_space<vmem>>, vector<1x128xf32>
      %17 = vector.broadcast %16 : vector<1x128xf32> to vector<512x128xf32>
      %18 = arith.addf %15, %17 : vector<512x128xf32>
      %cst_16 = arith.constant 0.000000e+00 : f32
      %19 = vector.broadcast %cst_16 : f32 to vector<512x128xf32>
      %20 = arith.maximumf %18, %19 : vector<512x128xf32>
      %c0_17 = arith.constant 0 : index
      %c0_18 = arith.constant 0 : index
      %21 = vector.load %arg7[%c0_17, %c0_18] : memref<512x128xf32, #tpu.memory_space<vmem>>, vector<512x128xf32>
      tpu.vector_store %arg7[%c0_17, %c0_18], %20 {strides = array<i32>} : memref<512x128xf32, #tpu.memory_space<vmem>>, vector<512x128xf32>,
    } else {
    }
    return
  }
  func.func @transform_0(%arg0: i32, %arg1: i32, %arg2: i32) -> (i32, i32) {
    %c0_i32 = arith.constant 0 : i32
    return %arg0, %arg2 : i32, i32
  }
  func.func @transform_1(%arg0: i32, %arg1: i32, %arg2: i32) -> (i32, i32) {
    %c0_i32 = arith.constant 0 : i32
    return %arg2, %arg1 : i32, i32
  }
  func.func @transform_2(%arg0: i32, %arg1: i32, %arg2: i32) -> (i32, i32) {
    %c0_i32 = arith.constant 0 : i32
    %c0_i32_0 = arith.constant 0 : i32
    return %c0_i32, %arg1 : i32, i32
  }
  func.func @transform_3(%arg0: i32, %arg1: i32, %arg2: i32) -> (i32, i32) {
    %c0_i32 = arith.constant 0 : i32
    %c0_i32_0 = arith.constant 0 : i32
    return %c0_i32, %arg1 : i32, i32
  }
  func.func @transform_4(%arg0: i32, %arg1: i32, %arg2: i32) -> (i32, i32) {
    %c0_i32 = arith.constant 0 : i32
    return %arg0, %arg1 : i32, i32
  }
}

module attributes {stable_mosaic.version = 11 : i64} {
  func.func @_maxpool_kernel(%arg0: i32, %arg1: memref<9x128x128xf32, #tpu.memory_space<vmem>>, %arg2: memref<128x128xf32, #tpu.memory_space<vmem>>) attributes {dimension_semantics = [#tpu.dimension_semantics<parallel>], iteration_bounds = array<i64: 1>, scalar_prefetch = 0 : i64, scratch_operands = 0 : i64, tpu.core_type = #tpu.core_type<tc>, window_params = [{transform_indices = @transform_0, window_bounds = array<i64: 9, 128, 128>}, {transform_indices = @transform_1, window_bounds = array<i64: 128, 128>}]} {
    %c0 = arith.constant 0 : index
    %c0_0 = arith.constant 0 : index
    %c0_1 = arith.constant 0 : index
    %0 = vector.load %arg1[%c0, %c0_0, %c0_1] : memref<9x128x128xf32, #tpu.memory_space<vmem>>, vector<9x128x128xf32>
    %cst = arith.constant dense<0xFF800000> : vector<128x128xf32>
    %1 = vector.multi_reduction <maximumf>, %0, %cst [0] : vector<9x128x128xf32> to vector<128x128xf32>
    %c0_2 = arith.constant 0 : index
    %c0_3 = arith.constant 0 : index
    %2 = vector.load %arg2[%c0_2, %c0_3] : memref<128x128xf32, #tpu.memory_space<vmem>>, vector<128x128xf32>
    tpu.vector_store %arg2[%c0_2, %c0_3], %1 {strides = array<i32>} : memref<128x128xf32, #tpu.memory_space<vmem>>, vector<128x128xf32>,
    return
  }
  func.func @transform_0(%arg0: i32) -> (i32, i32, i32) {
    %c0_i32 = arith.constant 0 : i32
    %c0_i32_0 = arith.constant 0 : i32
    %c0_i32_1 = arith.constant 0 : i32
    return %c0_i32, %arg0, %c0_i32_0 : i32, i32, i32
  }
  func.func @transform_1(%arg0: i32) -> (i32, i32) {
    %c0_i32 = arith.constant 0 : i32
    %c0_i32_0 = arith.constant 0 : i32
    return %arg0, %c0_i32 : i32, i32
  }
}

module attributes {stable_mosaic.version = 11 : i64} {
  func.func @_matmul_fused_kernel(%arg0: i32, %arg1: i32, %arg2: i32, %arg3: memref<128x576xbf16, #tpu.memory_space<vmem>>, %arg4: memref<576x128xbf16, #tpu.memory_space<vmem>>, %arg5: memref<1x128xf32, #tpu.memory_space<vmem>>, %arg6: memref<1x128xf32, #tpu.memory_space<vmem>>, %arg7: memref<128x128xf32, #tpu.memory_space<vmem>>) attributes {dimension_semantics = [#tpu.dimension_semantics<parallel>, #tpu.dimension_semantics<parallel>, #tpu.dimension_semantics<arbitrary>], iteration_bounds = array<i64: 1, 1, 1>, scalar_prefetch = 0 : i64, scratch_operands = 0 : i64, tpu.core_type = #tpu.core_type<tc>, window_params = [{transform_indices = @transform_0, window_bounds = array<i64: 128, 576>}, {transform_indices = @transform_1, window_bounds = array<i64: 576, 128>}, {transform_indices = @transform_2, window_bounds = array<i64: 1, 128>}, {transform_indices = @transform_3, window_bounds = array<i64: 1, 128>}, {transform_indices = @transform_4, window_bounds = array<i64: 128, 128>}]} {
    %c0_i32 = arith.constant 0 : i32
    %0 = arith.cmpi eq, %arg2, %c0_i32 : i32
    %1 = arith.extui %0 : i1 to i32
    %c0_i32_0 = arith.constant 0 : i32
    %2 = arith.cmpi ne, %1, %c0_i32_0 : i32
    scf.if %2 {
      %cst_10 = arith.constant 0.000000e+00 : f32
      %12 = vector.broadcast %cst_10 : f32 to vector<128x128xf32>
      %c0_11 = arith.constant 0 : index
      %c0_12 = arith.constant 0 : index
      %13 = vector.load %arg7[%c0_11, %c0_12] : memref<128x128xf32, #tpu.memory_space<vmem>>, vector<128x128xf32>
      tpu.vector_store %arg7[%c0_11, %c0_12], %12 {strides = array<i32>} : memref<128x128xf32, #tpu.memory_space<vmem>>, vector<128x128xf32>,
    } else {
    }
    %c0 = arith.constant 0 : index
    %c0_1 = arith.constant 0 : index
    %3 = vector.load %arg7[%c0, %c0_1] : memref<128x128xf32, #tpu.memory_space<vmem>>, vector<128x128xf32>
    %c0_2 = arith.constant 0 : index
    %c0_3 = arith.constant 0 : index
    %4 = vector.load %arg3[%c0_2, %c0_3] : memref<128x576xbf16, #tpu.memory_space<vmem>>, vector<128x576xbf16>
    %c0_4 = arith.constant 0 : index
    %c0_5 = arith.constant 0 : index
    %5 = vector.load %arg4[%c0_4, %c0_5] : memref<576x128xbf16, #tpu.memory_space<vmem>>, vector<576x128xbf16>
    %cst = arith.constant dense<0.000000e+00> : vector<128x128xf32>
    %6 = tpu.matmul %4, %5, %cst {dimension_numbers = #tpu.dot_dimension_numbers<[1], [0], [0], [1], [0, 0, 1, 1], [], []>} : vector<128x576xbf16>, vector<576x128xbf16>, vector<128x128xf32> -> vector<128x128xf32>
    %7 = arith.addf %3, %6 : vector<128x128xf32>
    %c0_6 = arith.constant 0 : index
    %c0_7 = arith.constant 0 : index
    %8 = vector.load %arg7[%c0_6, %c0_7] : memref<128x128xf32, #tpu.memory_space<vmem>>, vector<128x128xf32>
    tpu.vector_store %arg7[%c0_6, %c0_7], %7 {strides = array<i32>} : memref<128x128xf32, #tpu.memory_space<vmem>>, vector<128x128xf32>,
    %c0_i32_8 = arith.constant 0 : i32
    %9 = arith.cmpi eq, %arg2, %c0_i32_8 : i32
    %10 = arith.extui %9 : i1 to i32
    %c0_i32_9 = arith.constant 0 : i32
    %11 = arith.cmpi ne, %10, %c0_i32_9 : i32
    scf.if %11 {
      %c0_10 = arith.constant 0 : index
      %c0_11 = arith.constant 0 : index
      %12 = vector.load %arg7[%c0_10, %c0_11] : memref<128x128xf32, #tpu.memory_space<vmem>>, vector<128x128xf32>
      %c0_12 = arith.constant 0 : index
      %c0_13 = arith.constant 0 : index
      %13 = vector.load %arg5[%c0_12, %c0_13] : memref<1x128xf32, #tpu.memory_space<vmem>>, vector<1x128xf32>
      %14 = vector.broadcast %13 : vector<1x128xf32> to vector<128x128xf32>
      %15 = arith.mulf %12, %14 : vector<128x128xf32>
      %c0_14 = arith.constant 0 : index
      %c0_15 = arith.constant 0 : index
      %16 = vector.load %arg6[%c0_14, %c0_15] : memref<1x128xf32, #tpu.memory_space<vmem>>, vector<1x128xf32>
      %17 = vector.broadcast %16 : vector<1x128xf32> to vector<128x128xf32>
      %18 = arith.addf %15, %17 : vector<128x128xf32>
      %cst_16 = arith.constant 0.000000e+00 : f32
      %19 = vector.broadcast %cst_16 : f32 to vector<128x128xf32>
      %20 = arith.maximumf %18, %19 : vector<128x128xf32>
      %c0_17 = arith.constant 0 : index
      %c0_18 = arith.constant 0 : index
      %21 = vector.load %arg7[%c0_17, %c0_18] : memref<128x128xf32, #tpu.memory_space<vmem>>, vector<128x128xf32>
      tpu.vector_store %arg7[%c0_17, %c0_18], %20 {strides = array<i32>} : memref<128x128xf32, #tpu.memory_space<vmem>>, vector<128x128xf32>,
    } else {
    }
    return
  }
  func.func @transform_0(%arg0: i32, %arg1: i32, %arg2: i32) -> (i32, i32) {
    %c0_i32 = arith.constant 0 : i32
    return %arg0, %arg2 : i32, i32
  }
  func.func @transform_1(%arg0: i32, %arg1: i32, %arg2: i32) -> (i32, i32) {
    %c0_i32 = arith.constant 0 : i32
    return %arg2, %arg1 : i32, i32
  }
  func.func @transform_2(%arg0: i32, %arg1: i32, %arg2: i32) -> (i32, i32) {
    %c0_i32 = arith.constant 0 : i32
    %c0_i32_0 = arith.constant 0 : i32
    return %c0_i32, %arg1 : i32, i32
  }
  func.func @transform_3(%arg0: i32, %arg1: i32, %arg2: i32) -> (i32, i32) {
    %c0_i32 = arith.constant 0 : i32
    %c0_i32_0 = arith.constant 0 : i32
    return %c0_i32, %arg1 : i32, i32
  }
  func.func @transform_4(%arg0: i32, %arg1: i32, %arg2: i32) -> (i32, i32) {
    %c0_i32 = arith.constant 0 : i32
    return %arg0, %arg1 : i32, i32
  }
}

module attributes {stable_mosaic.version = 11 : i64} {
  func.func @_matmul_fused_kernel(%arg0: i32, %arg1: i32, %arg2: i32, %arg3: memref<128x576xbf16, #tpu.memory_space<vmem>>, %arg4: memref<576x128xbf16, #tpu.memory_space<vmem>>, %arg5: memref<1x128xf32, #tpu.memory_space<vmem>>, %arg6: memref<1x128xf32, #tpu.memory_space<vmem>>, %arg7: memref<128x128xf32, #tpu.memory_space<vmem>>, %arg8: memref<128x128xf32, #tpu.memory_space<vmem>>) attributes {dimension_semantics = [#tpu.dimension_semantics<parallel>, #tpu.dimension_semantics<parallel>, #tpu.dimension_semantics<arbitrary>], iteration_bounds = array<i64: 1, 1, 1>, scalar_prefetch = 0 : i64, scratch_operands = 0 : i64, tpu.core_type = #tpu.core_type<tc>, window_params = [{transform_indices = @transform_0, window_bounds = array<i64: 128, 576>}, {transform_indices = @transform_1, window_bounds = array<i64: 576, 128>}, {transform_indices = @transform_2, window_bounds = array<i64: 1, 128>}, {transform_indices = @transform_3, window_bounds = array<i64: 1, 128>}, {transform_indices = @transform_4, window_bounds = array<i64: 128, 128>}, {transform_indices = @transform_5, window_bounds = array<i64: 128, 128>}]} {
    %c0_i32 = arith.constant 0 : i32
    %0 = arith.cmpi eq, %arg2, %c0_i32 : i32
    %1 = arith.extui %0 : i1 to i32
    %c0_i32_0 = arith.constant 0 : i32
    %2 = arith.cmpi ne, %1, %c0_i32_0 : i32
    scf.if %2 {
      %cst_10 = arith.constant 0.000000e+00 : f32
      %12 = vector.broadcast %cst_10 : f32 to vector<128x128xf32>
      %c0_11 = arith.constant 0 : index
      %c0_12 = arith.constant 0 : index
      %13 = vector.load %arg8[%c0_11, %c0_12] : memref<128x128xf32, #tpu.memory_space<vmem>>, vector<128x128xf32>
      tpu.vector_store %arg8[%c0_11, %c0_12], %12 {strides = array<i32>} : memref<128x128xf32, #tpu.memory_space<vmem>>, vector<128x128xf32>,
    } else {
    }
    %c0 = arith.constant 0 : index
    %c0_1 = arith.constant 0 : index
    %3 = vector.load %arg8[%c0, %c0_1] : memref<128x128xf32, #tpu.memory_space<vmem>>, vector<128x128xf32>
    %c0_2 = arith.constant 0 : index
    %c0_3 = arith.constant 0 : index
    %4 = vector.load %arg3[%c0_2, %c0_3] : memref<128x576xbf16, #tpu.memory_space<vmem>>, vector<128x576xbf16>
    %c0_4 = arith.constant 0 : index
    %c0_5 = arith.constant 0 : index
    %5 = vector.load %arg4[%c0_4, %c0_5] : memref<576x128xbf16, #tpu.memory_space<vmem>>, vector<576x128xbf16>
    %cst = arith.constant dense<0.000000e+00> : vector<128x128xf32>
    %6 = tpu.matmul %4, %5, %cst {dimension_numbers = #tpu.dot_dimension_numbers<[1], [0], [0], [1], [0, 0, 1, 1], [], []>} : vector<128x576xbf16>, vector<576x128xbf16>, vector<128x128xf32> -> vector<128x128xf32>
    %7 = arith.addf %3, %6 : vector<128x128xf32>
    %c0_6 = arith.constant 0 : index
    %c0_7 = arith.constant 0 : index
    %8 = vector.load %arg8[%c0_6, %c0_7] : memref<128x128xf32, #tpu.memory_space<vmem>>, vector<128x128xf32>
    tpu.vector_store %arg8[%c0_6, %c0_7], %7 {strides = array<i32>} : memref<128x128xf32, #tpu.memory_space<vmem>>, vector<128x128xf32>,
    %c0_i32_8 = arith.constant 0 : i32
    %9 = arith.cmpi eq, %arg2, %c0_i32_8 : i32
    %10 = arith.extui %9 : i1 to i32
    %c0_i32_9 = arith.constant 0 : i32
    %11 = arith.cmpi ne, %10, %c0_i32_9 : i32
    scf.if %11 {
      %c0_10 = arith.constant 0 : index
      %c0_11 = arith.constant 0 : index
      %12 = vector.load %arg8[%c0_10, %c0_11] : memref<128x128xf32, #tpu.memory_space<vmem>>, vector<128x128xf32>
      %c0_12 = arith.constant 0 : index
      %c0_13 = arith.constant 0 : index
      %13 = vector.load %arg5[%c0_12, %c0_13] : memref<1x128xf32, #tpu.memory_space<vmem>>, vector<1x128xf32>
      %14 = vector.broadcast %13 : vector<1x128xf32> to vector<128x128xf32>
      %15 = arith.mulf %12, %14 : vector<128x128xf32>
      %c0_14 = arith.constant 0 : index
      %c0_15 = arith.constant 0 : index
      %16 = vector.load %arg6[%c0_14, %c0_15] : memref<1x128xf32, #tpu.memory_space<vmem>>, vector<1x128xf32>
      %17 = vector.broadcast %16 : vector<1x128xf32> to vector<128x128xf32>
      %18 = arith.addf %15, %17 : vector<128x128xf32>
      %c0_16 = arith.constant 0 : index
      %c0_17 = arith.constant 0 : index
      %19 = vector.load %arg7[%c0_16, %c0_17] : memref<128x128xf32, #tpu.memory_space<vmem>>, vector<128x128xf32>
      %20 = arith.addf %18, %19 : vector<128x128xf32>
      %cst_18 = arith.constant 0.000000e+00 : f32
      %21 = vector.broadcast %cst_18 : f32 to vector<128x128xf32>
      %22 = arith.maximumf %20, %21 : vector<128x128xf32>
      %c0_19 = arith.constant 0 : index
      %c0_20 = arith.constant 0 : index
      %23 = vector.load %arg8[%c0_19, %c0_20] : memref<128x128xf32, #tpu.memory_space<vmem>>, vector<128x128xf32>
      tpu.vector_store %arg8[%c0_19, %c0_20], %22 {strides = array<i32>} : memref<128x128xf32, #tpu.memory_space<vmem>>, vector<128x128xf32>,
    } else {
    }
    return
  }
  func.func @transform_0(%arg0: i32, %arg1: i32, %arg2: i32) -> (i32, i32) {
    %c0_i32 = arith.constant 0 : i32
    return %arg0, %arg2 : i32, i32
  }
  func.func @transform_1(%arg0: i32, %arg1: i32, %arg2: i32) -> (i32, i32) {
    %c0_i32 = arith.constant 0 : i32
    return %arg2, %arg1 : i32, i32
  }
  func.func @transform_2(%arg0: i32, %arg1: i32, %arg2: i32) -> (i32, i32) {
    %c0_i32 = arith.constant 0 : i32
    %c0_i32_0 = arith.constant 0 : i32
    return %c0_i32, %arg1 : i32, i32
  }
  func.func @transform_3(%arg0: i32, %arg1: i32, %arg2: i32) -> (i32, i32) {
    %c0_i32 = arith.constant 0 : i32
    %c0_i32_0 = arith.constant 0 : i32
    return %c0_i32, %arg1 : i32, i32
  }
  func.func @transform_4(%arg0: i32, %arg1: i32, %arg2: i32) -> (i32, i32) {
    %c0_i32 = arith.constant 0 : i32
    return %arg0, %arg1 : i32, i32
  }
  func.func @transform_5(%arg0: i32, %arg1: i32, %arg2: i32) -> (i32, i32) {
    %c0_i32 = arith.constant 0 : i32
    return %arg0, %arg1 : i32, i32
  }
}

module attributes {stable_mosaic.version = 11 : i64} {
  func.func @_matmul_fused_kernel(%arg0: i32, %arg1: i32, %arg2: i32, %arg3: memref<32x576xbf16, #tpu.memory_space<vmem>>, %arg4: memref<576x128xbf16, #tpu.memory_space<vmem>>, %arg5: memref<1x128xf32, #tpu.memory_space<vmem>>, %arg6: memref<1x128xf32, #tpu.memory_space<vmem>>, %arg7: memref<32x128xf32, #tpu.memory_space<vmem>>) attributes {dimension_semantics = [#tpu.dimension_semantics<parallel>, #tpu.dimension_semantics<parallel>, #tpu.dimension_semantics<arbitrary>], iteration_bounds = array<i64: 1, 1, 1>, scalar_prefetch = 0 : i64, scratch_operands = 0 : i64, tpu.core_type = #tpu.core_type<tc>, window_params = [{transform_indices = @transform_0, window_bounds = array<i64: 32, 576>}, {transform_indices = @transform_1, window_bounds = array<i64: 576, 128>}, {transform_indices = @transform_2, window_bounds = array<i64: 1, 128>}, {transform_indices = @transform_3, window_bounds = array<i64: 1, 128>}, {transform_indices = @transform_4, window_bounds = array<i64: 32, 128>}]} {
    %c0_i32 = arith.constant 0 : i32
    %0 = arith.cmpi eq, %arg2, %c0_i32 : i32
    %1 = arith.extui %0 : i1 to i32
    %c0_i32_0 = arith.constant 0 : i32
    %2 = arith.cmpi ne, %1, %c0_i32_0 : i32
    scf.if %2 {
      %cst_10 = arith.constant 0.000000e+00 : f32
      %12 = vector.broadcast %cst_10 : f32 to vector<32x128xf32>
      %c0_11 = arith.constant 0 : index
      %c0_12 = arith.constant 0 : index
      %13 = vector.load %arg7[%c0_11, %c0_12] : memref<32x128xf32, #tpu.memory_space<vmem>>, vector<32x128xf32>
      tpu.vector_store %arg7[%c0_11, %c0_12], %12 {strides = array<i32>} : memref<32x128xf32, #tpu.memory_space<vmem>>, vector<32x128xf32>,
    } else {
    }
    %c0 = arith.constant 0 : index
    %c0_1 = arith.constant 0 : index
    %3 = vector.load %arg7[%c0, %c0_1] : memref<32x128xf32, #tpu.memory_space<vmem>>, vector<32x128xf32>
    %c0_2 = arith.constant 0 : index
    %c0_3 = arith.constant 0 : index
    %4 = vector.load %arg3[%c0_2, %c0_3] : memref<32x576xbf16, #tpu.memory_space<vmem>>, vector<32x576xbf16>
    %c0_4 = arith.constant 0 : index
    %c0_5 = arith.constant 0 : index
    %5 = vector.load %arg4[%c0_4, %c0_5] : memref<576x128xbf16, #tpu.memory_space<vmem>>, vector<576x128xbf16>
    %cst = arith.constant dense<0.000000e+00> : vector<32x128xf32>
    %6 = tpu.matmul %4, %5, %cst {dimension_numbers = #tpu.dot_dimension_numbers<[1], [0], [0], [1], [0, 0, 1, 1], [], []>} : vector<32x576xbf16>, vector<576x128xbf16>, vector<32x128xf32> -> vector<32x128xf32>
    %7 = arith.addf %3, %6 : vector<32x128xf32>
    %c0_6 = arith.constant 0 : index
    %c0_7 = arith.constant 0 : index
    %8 = vector.load %arg7[%c0_6, %c0_7] : memref<32x128xf32, #tpu.memory_space<vmem>>, vector<32x128xf32>
    tpu.vector_store %arg7[%c0_6, %c0_7], %7 {strides = array<i32>} : memref<32x128xf32, #tpu.memory_space<vmem>>, vector<32x128xf32>,
    %c0_i32_8 = arith.constant 0 : i32
    %9 = arith.cmpi eq, %arg2, %c0_i32_8 : i32
    %10 = arith.extui %9 : i1 to i32
    %c0_i32_9 = arith.constant 0 : i32
    %11 = arith.cmpi ne, %10, %c0_i32_9 : i32
    scf.if %11 {
      %c0_10 = arith.constant 0 : index
      %c0_11 = arith.constant 0 : index
      %12 = vector.load %arg7[%c0_10, %c0_11] : memref<32x128xf32, #tpu.memory_space<vmem>>, vector<32x128xf32>
      %c0_12 = arith.constant 0 : index
      %c0_13 = arith.constant 0 : index
      %13 = vector.load %arg5[%c0_12, %c0_13] : memref<1x128xf32, #tpu.memory_space<vmem>>, vector<1x128xf32>
      %14 = vector.broadcast %13 : vector<1x128xf32> to vector<32x128xf32>
      %15 = arith.mulf %12, %14 : vector<32x128xf32>
      %c0_14 = arith.constant 0 : index
      %c0_15 = arith.constant 0 : index
      %16 = vector.load %arg6[%c0_14, %c0_15] : memref<1x128xf32, #tpu.memory_space<vmem>>, vector<1x128xf32>
      %17 = vector.broadcast %16 : vector<1x128xf32> to vector<32x128xf32>
      %18 = arith.addf %15, %17 : vector<32x128xf32>
      %cst_16 = arith.constant 0.000000e+00 : f32
      %19 = vector.broadcast %cst_16 : f32 to vector<32x128xf32>
      %20 = arith.maximumf %18, %19 : vector<32x128xf32>
      %c0_17 = arith.constant 0 : index
      %c0_18 = arith.constant 0 : index
      %21 = vector.load %arg7[%c0_17, %c0_18] : memref<32x128xf32, #tpu.memory_space<vmem>>, vector<32x128xf32>
      tpu.vector_store %arg7[%c0_17, %c0_18], %20 {strides = array<i32>} : memref<32x128xf32, #tpu.memory_space<vmem>>, vector<32x128xf32>,
    } else {
    }
    return
  }
  func.func @transform_0(%arg0: i32, %arg1: i32, %arg2: i32) -> (i32, i32) {
    %c0_i32 = arith.constant 0 : i32
    return %arg0, %arg2 : i32, i32
  }
  func.func @transform_1(%arg0: i32, %arg1: i32, %arg2: i32) -> (i32, i32) {
    %c0_i32 = arith.constant 0 : i32
    return %arg2, %arg1 : i32, i32
  }
  func.func @transform_2(%arg0: i32, %arg1: i32, %arg2: i32) -> (i32, i32) {
    %c0_i32 = arith.constant 0 : i32
    %c0_i32_0 = arith.constant 0 : i32
    return %c0_i32, %arg1 : i32, i32
  }
  func.func @transform_3(%arg0: i32, %arg1: i32, %arg2: i32) -> (i32, i32) {
    %c0_i32 = arith.constant 0 : i32
    %c0_i32_0 = arith.constant 0 : i32
    return %c0_i32, %arg1 : i32, i32
  }
  func.func @transform_4(%arg0: i32, %arg1: i32, %arg2: i32) -> (i32, i32) {
    %c0_i32 = arith.constant 0 : i32
    return %arg0, %arg1 : i32, i32
  }
}

module attributes {stable_mosaic.version = 11 : i64} {
  func.func @_matmul_fused_kernel(%arg0: i32, %arg1: i32, %arg2: i32, %arg3: memref<32x64xbf16, #tpu.memory_space<vmem>>, %arg4: memref<64x128xbf16, #tpu.memory_space<vmem>>, %arg5: memref<1x128xf32, #tpu.memory_space<vmem>>, %arg6: memref<1x128xf32, #tpu.memory_space<vmem>>, %arg7: memref<32x128xf32, #tpu.memory_space<vmem>>) attributes {dimension_semantics = [#tpu.dimension_semantics<parallel>, #tpu.dimension_semantics<parallel>, #tpu.dimension_semantics<arbitrary>], iteration_bounds = array<i64: 1, 1, 1>, scalar_prefetch = 0 : i64, scratch_operands = 0 : i64, tpu.core_type = #tpu.core_type<tc>, window_params = [{transform_indices = @transform_0, window_bounds = array<i64: 32, 64>}, {transform_indices = @transform_1, window_bounds = array<i64: 64, 128>}, {transform_indices = @transform_2, window_bounds = array<i64: 1, 128>}, {transform_indices = @transform_3, window_bounds = array<i64: 1, 128>}, {transform_indices = @transform_4, window_bounds = array<i64: 32, 128>}]} {
    %c0_i32 = arith.constant 0 : i32
    %0 = arith.cmpi eq, %arg2, %c0_i32 : i32
    %1 = arith.extui %0 : i1 to i32
    %c0_i32_0 = arith.constant 0 : i32
    %2 = arith.cmpi ne, %1, %c0_i32_0 : i32
    scf.if %2 {
      %cst_10 = arith.constant 0.000000e+00 : f32
      %12 = vector.broadcast %cst_10 : f32 to vector<32x128xf32>
      %c0_11 = arith.constant 0 : index
      %c0_12 = arith.constant 0 : index
      %13 = vector.load %arg7[%c0_11, %c0_12] : memref<32x128xf32, #tpu.memory_space<vmem>>, vector<32x128xf32>
      tpu.vector_store %arg7[%c0_11, %c0_12], %12 {strides = array<i32>} : memref<32x128xf32, #tpu.memory_space<vmem>>, vector<32x128xf32>,
    } else {
    }
    %c0 = arith.constant 0 : index
    %c0_1 = arith.constant 0 : index
    %3 = vector.load %arg7[%c0, %c0_1] : memref<32x128xf32, #tpu.memory_space<vmem>>, vector<32x128xf32>
    %c0_2 = arith.constant 0 : index
    %c0_3 = arith.constant 0 : index
    %4 = vector.load %arg3[%c0_2, %c0_3] : memref<32x64xbf16, #tpu.memory_space<vmem>>, vector<32x64xbf16>
    %c0_4 = arith.constant 0 : index
    %c0_5 = arith.constant 0 : index
    %5 = vector.load %arg4[%c0_4, %c0_5] : memref<64x128xbf16, #tpu.memory_space<vmem>>, vector<64x128xbf16>
    %cst = arith.constant dense<0.000000e+00> : vector<32x128xf32>
    %6 = tpu.matmul %4, %5, %cst {dimension_numbers = #tpu.dot_dimension_numbers<[1], [0], [0], [1], [0, 0, 1, 1], [], []>} : vector<32x64xbf16>, vector<64x128xbf16>, vector<32x128xf32> -> vector<32x128xf32>
    %7 = arith.addf %3, %6 : vector<32x128xf32>
    %c0_6 = arith.constant 0 : index
    %c0_7 = arith.constant 0 : index
    %8 = vector.load %arg7[%c0_6, %c0_7] : memref<32x128xf32, #tpu.memory_space<vmem>>, vector<32x128xf32>
    tpu.vector_store %arg7[%c0_6, %c0_7], %7 {strides = array<i32>} : memref<32x128xf32, #tpu.memory_space<vmem>>, vector<32x128xf32>,
    %c0_i32_8 = arith.constant 0 : i32
    %9 = arith.cmpi eq, %arg2, %c0_i32_8 : i32
    %10 = arith.extui %9 : i1 to i32
    %c0_i32_9 = arith.constant 0 : i32
    %11 = arith.cmpi ne, %10, %c0_i32_9 : i32
    scf.if %11 {
      %c0_10 = arith.constant 0 : index
      %c0_11 = arith.constant 0 : index
      %12 = vector.load %arg7[%c0_10, %c0_11] : memref<32x128xf32, #tpu.memory_space<vmem>>, vector<32x128xf32>
      %c0_12 = arith.constant 0 : index
      %c0_13 = arith.constant 0 : index
      %13 = vector.load %arg5[%c0_12, %c0_13] : memref<1x128xf32, #tpu.memory_space<vmem>>, vector<1x128xf32>
      %14 = vector.broadcast %13 : vector<1x128xf32> to vector<32x128xf32>
      %15 = arith.mulf %12, %14 : vector<32x128xf32>
      %c0_14 = arith.constant 0 : index
      %c0_15 = arith.constant 0 : index
      %16 = vector.load %arg6[%c0_14, %c0_15] : memref<1x128xf32, #tpu.memory_space<vmem>>, vector<1x128xf32>
      %17 = vector.broadcast %16 : vector<1x128xf32> to vector<32x128xf32>
      %18 = arith.addf %15, %17 : vector<32x128xf32>
      %c0_16 = arith.constant 0 : index
      %c0_17 = arith.constant 0 : index
      %19 = vector.load %arg7[%c0_16, %c0_17] : memref<32x128xf32, #tpu.memory_space<vmem>>, vector<32x128xf32>
      tpu.vector_store %arg7[%c0_16, %c0_17], %18 {strides = array<i32>} : memref<32x128xf32, #tpu.memory_space<vmem>>, vector<32x128xf32>,
    } else {
    }
    return
  }
  func.func @transform_0(%arg0: i32, %arg1: i32, %arg2: i32) -> (i32, i32) {
    %c0_i32 = arith.constant 0 : i32
    return %arg0, %arg2 : i32, i32
  }
  func.func @transform_1(%arg0: i32, %arg1: i32, %arg2: i32) -> (i32, i32) {
    %c0_i32 = arith.constant 0 : i32
    return %arg2, %arg1 : i32, i32
  }
  func.func @transform_2(%arg0: i32, %arg1: i32, %arg2: i32) -> (i32, i32) {
    %c0_i32 = arith.constant 0 : i32
    %c0_i32_0 = arith.constant 0 : i32
    return %c0_i32, %arg1 : i32, i32
  }
  func.func @transform_3(%arg0: i32, %arg1: i32, %arg2: i32) -> (i32, i32) {
    %c0_i32 = arith.constant 0 : i32
    %c0_i32_0 = arith.constant 0 : i32
    return %c0_i32, %arg1 : i32, i32
  }
  func.func @transform_4(%arg0: i32, %arg1: i32, %arg2: i32) -> (i32, i32) {
    %c0_i32 = arith.constant 0 : i32
    return %arg0, %arg1 : i32, i32
  }
}

module attributes {stable_mosaic.version = 11 : i64} {
  func.func @_matmul_fused_kernel(%arg0: i32, %arg1: i32, %arg2: i32, %arg3: memref<32x384xbf16, #tpu.memory_space<vmem>>, %arg4: memref<384x128xbf16, #tpu.memory_space<vmem>>, %arg5: memref<1x128xf32, #tpu.memory_space<vmem>>, %arg6: memref<1x128xf32, #tpu.memory_space<vmem>>, %arg7: memref<32x128xf32, #tpu.memory_space<vmem>>, %arg8: memref<32x128xf32, #tpu.memory_space<vmem>>) attributes {dimension_semantics = [#tpu.dimension_semantics<parallel>, #tpu.dimension_semantics<parallel>, #tpu.dimension_semantics<arbitrary>], iteration_bounds = array<i64: 1, 1, 3>, scalar_prefetch = 0 : i64, scratch_operands = 0 : i64, tpu.core_type = #tpu.core_type<tc>, window_params = [{transform_indices = @transform_0, window_bounds = array<i64: 32, 384>}, {transform_indices = @transform_1, window_bounds = array<i64: 384, 128>}, {transform_indices = @transform_2, window_bounds = array<i64: 1, 128>}, {transform_indices = @transform_3, window_bounds = array<i64: 1, 128>}, {transform_indices = @transform_4, window_bounds = array<i64: 32, 128>}, {transform_indices = @transform_5, window_bounds = array<i64: 32, 128>}]} {
    %c0_i32 = arith.constant 0 : i32
    %0 = arith.cmpi eq, %arg2, %c0_i32 : i32
    %1 = arith.extui %0 : i1 to i32
    %c0_i32_0 = arith.constant 0 : i32
    %2 = arith.cmpi ne, %1, %c0_i32_0 : i32
    scf.if %2 {
      %cst_9 = arith.constant 0.000000e+00 : f32
      %12 = vector.broadcast %cst_9 : f32 to vector<32x128xf32>
      %c0_10 = arith.constant 0 : index
      %c0_11 = arith.constant 0 : index
      %13 = vector.load %arg8[%c0_10, %c0_11] : memref<32x128xf32, #tpu.memory_space<vmem>>, vector<32x128xf32>
      tpu.vector_store %arg8[%c0_10, %c0_11], %12 {strides = array<i32>} : memref<32x128xf32, #tpu.memory_space<vmem>>, vector<32x128xf32>,
    } else {
    }
    %c0 = arith.constant 0 : index
    %c0_1 = arith.constant 0 : index
    %3 = vector.load %arg8[%c0, %c0_1] : memref<32x128xf32, #tpu.memory_space<vmem>>, vector<32x128xf32>
    %c0_2 = arith.constant 0 : index
    %c0_3 = arith.constant 0 : index
    %4 = vector.load %arg3[%c0_2, %c0_3] : memref<32x384xbf16, #tpu.memory_space<vmem>>, vector<32x384xbf16>
    %c0_4 = arith.constant 0 : index
    %c0_5 = arith.constant 0 : index
    %5 = vector.load %arg4[%c0_4, %c0_5] : memref<384x128xbf16, #tpu.memory_space<vmem>>, vector<384x128xbf16>
    %cst = arith.constant dense<0.000000e+00> : vector<32x128xf32>
    %6 = tpu.matmul %4, %5, %cst {dimension_numbers = #tpu.dot_dimension_numbers<[1], [0], [0], [1], [0, 0, 1, 1], [], []>} : vector<32x384xbf16>, vector<384x128xbf16>, vector<32x128xf32> -> vector<32x128xf32>
    %7 = arith.addf %3, %6 : vector<32x128xf32>
    %c0_6 = arith.constant 0 : index
    %c0_7 = arith.constant 0 : index
    %8 = vector.load %arg8[%c0_6, %c0_7] : memref<32x128xf32, #tpu.memory_space<vmem>>, vector<32x128xf32>
    tpu.vector_store %arg8[%c0_6, %c0_7], %7 {strides = array<i32>} : memref<32x128xf32, #tpu.memory_space<vmem>>, vector<32x128xf32>,
    %c2_i32 = arith.constant 2 : i32
    %9 = arith.cmpi eq, %arg2, %c2_i32 : i32
    %10 = arith.extui %9 : i1 to i32
    %c0_i32_8 = arith.constant 0 : i32
    %11 = arith.cmpi ne, %10, %c0_i32_8 : i32
    scf.if %11 {
      %c0_9 = arith.constant 0 : index
      %c0_10 = arith.constant 0 : index
      %12 = vector.load %arg8[%c0_9, %c0_10] : memref<32x128xf32, #tpu.memory_space<vmem>>, vector<32x128xf32>
      %c0_11 = arith.constant 0 : index
      %c0_12 = arith.constant 0 : index
      %13 = vector.load %arg5[%c0_11, %c0_12] : memref<1x128xf32, #tpu.memory_space<vmem>>, vector<1x128xf32>
      %14 = vector.broadcast %13 : vector<1x128xf32> to vector<32x128xf32>
      %15 = arith.mulf %12, %14 : vector<32x128xf32>
      %c0_13 = arith.constant 0 : index
      %c0_14 = arith.constant 0 : index
      %16 = vector.load %arg6[%c0_13, %c0_14] : memref<1x128xf32, #tpu.memory_space<vmem>>, vector<1x128xf32>
      %17 = vector.broadcast %16 : vector<1x128xf32> to vector<32x128xf32>
      %18 = arith.addf %15, %17 : vector<32x128xf32>
      %c0_15 = arith.constant 0 : index
      %c0_16 = arith.constant 0 : index
      %19 = vector.load %arg7[%c0_15, %c0_16] : memref<32x128xf32, #tpu.memory_space<vmem>>, vector<32x128xf32>
      %20 = arith.addf %18, %19 : vector<32x128xf32>
      %cst_17 = arith.constant 0.000000e+00 : f32
      %21 = vector.broadcast %cst_17 : f32 to vector<32x128xf32>
      %22 = arith.maximumf %20, %21 : vector<32x128xf32>
      %c0_18 = arith.constant 0 : index
      %c0_19 = arith.constant 0 : index
      %23 = vector.load %arg8[%c0_18, %c0_19] : memref<32x128xf32, #tpu.memory_space<vmem>>, vector<32x128xf32>
      tpu.vector_store %arg8[%c0_18, %c0_19], %22 {strides = array<i32>} : memref<32x128xf32, #tpu.memory_space<vmem>>, vector<32x128xf32>,
    } else {
    }
    return
  }
  func.func @transform_0(%arg0: i32, %arg1: i32, %arg2: i32) -> (i32, i32) {
    %c0_i32 = arith.constant 0 : i32
    return %arg0, %arg2 : i32, i32
  }
  func.func @transform_1(%arg0: i32, %arg1: i32, %arg2: i32) -> (i32, i32) {
    %c0_i32 = arith.constant 0 : i32
    return %arg2, %arg1 : i32, i32
  }
  func.func @transform_2(%arg0: i32, %arg1: i32, %arg2: i32) -> (i32, i32) {
    %c0_i32 = arith.constant 0 : i32
    %c0_i32_0 = arith.constant 0 : i32
    return %c0_i32, %arg1 : i32, i32
  }
  func.func @transform_3(%arg0: i32, %arg1: i32, %arg2: i32) -> (i32, i32) {
    %c0_i32 = arith.constant 0 : i32
    %c0_i32_0 = arith.constant 0 : i32
    return %c0_i32, %arg1 : i32, i32
  }
  func.func @transform_4(%arg0: i32, %arg1: i32, %arg2: i32) -> (i32, i32) {
    %c0_i32 = arith.constant 0 : i32
    return %arg0, %arg1 : i32, i32
  }
  func.func @transform_5(%arg0: i32, %arg1: i32, %arg2: i32) -> (i32, i32) {
    %c0_i32 = arith.constant 0 : i32
    return %arg0, %arg1 : i32, i32
  }
}

module attributes {stable_mosaic.version = 11 : i64} {
  func.func @_matmul_fused_kernel(%arg0: i32, %arg1: i32, %arg2: i32, %arg3: memref<32x384xbf16, #tpu.memory_space<vmem>>, %arg4: memref<384x128xbf16, #tpu.memory_space<vmem>>, %arg5: memref<1x128xf32, #tpu.memory_space<vmem>>, %arg6: memref<1x128xf32, #tpu.memory_space<vmem>>, %arg7: memref<32x128xf32, #tpu.memory_space<vmem>>) attributes {dimension_semantics = [#tpu.dimension_semantics<parallel>, #tpu.dimension_semantics<parallel>, #tpu.dimension_semantics<arbitrary>], iteration_bounds = array<i64: 1, 1, 3>, scalar_prefetch = 0 : i64, scratch_operands = 0 : i64, tpu.core_type = #tpu.core_type<tc>, window_params = [{transform_indices = @transform_0, window_bounds = array<i64: 32, 384>}, {transform_indices = @transform_1, window_bounds = array<i64: 384, 128>}, {transform_indices = @transform_2, window_bounds = array<i64: 1, 128>}, {transform_indices = @transform_3, window_bounds = array<i64: 1, 128>}, {transform_indices = @transform_4, window_bounds = array<i64: 32, 128>}]} {
    %c0_i32 = arith.constant 0 : i32
    %0 = arith.cmpi eq, %arg2, %c0_i32 : i32
    %1 = arith.extui %0 : i1 to i32
    %c0_i32_0 = arith.constant 0 : i32
    %2 = arith.cmpi ne, %1, %c0_i32_0 : i32
    scf.if %2 {
      %cst_9 = arith.constant 0.000000e+00 : f32
      %12 = vector.broadcast %cst_9 : f32 to vector<32x128xf32>
      %c0_10 = arith.constant 0 : index
      %c0_11 = arith.constant 0 : index
      %13 = vector.load %arg7[%c0_10, %c0_11] : memref<32x128xf32, #tpu.memory_space<vmem>>, vector<32x128xf32>
      tpu.vector_store %arg7[%c0_10, %c0_11], %12 {strides = array<i32>} : memref<32x128xf32, #tpu.memory_space<vmem>>, vector<32x128xf32>,
    } else {
    }
    %c0 = arith.constant 0 : index
    %c0_1 = arith.constant 0 : index
    %3 = vector.load %arg7[%c0, %c0_1] : memref<32x128xf32, #tpu.memory_space<vmem>>, vector<32x128xf32>
    %c0_2 = arith.constant 0 : index
    %c0_3 = arith.constant 0 : index
    %4 = vector.load %arg3[%c0_2, %c0_3] : memref<32x384xbf16, #tpu.memory_space<vmem>>, vector<32x384xbf16>
    %c0_4 = arith.constant 0 : index
    %c0_5 = arith.constant 0 : index
    %5 = vector.load %arg4[%c0_4, %c0_5] : memref<384x128xbf16, #tpu.memory_space<vmem>>, vector<384x128xbf16>
    %cst = arith.constant dense<0.000000e+00> : vector<32x128xf32>
    %6 = tpu.matmul %4, %5, %cst {dimension_numbers = #tpu.dot_dimension_numbers<[1], [0], [0], [1], [0, 0, 1, 1], [], []>} : vector<32x384xbf16>, vector<384x128xbf16>, vector<32x128xf32> -> vector<32x128xf32>
    %7 = arith.addf %3, %6 : vector<32x128xf32>
    %c0_6 = arith.constant 0 : index
    %c0_7 = arith.constant 0 : index
    %8 = vector.load %arg7[%c0_6, %c0_7] : memref<32x128xf32, #tpu.memory_space<vmem>>, vector<32x128xf32>
    tpu.vector_store %arg7[%c0_6, %c0_7], %7 {strides = array<i32>} : memref<32x128xf32, #tpu.memory_space<vmem>>, vector<32x128xf32>,
    %c2_i32 = arith.constant 2 : i32
    %9 = arith.cmpi eq, %arg2, %c2_i32 : i32
    %10 = arith.extui %9 : i1 to i32
    %c0_i32_8 = arith.constant 0 : i32
    %11 = arith.cmpi ne, %10, %c0_i32_8 : i32
    scf.if %11 {
      %c0_9 = arith.constant 0 : index
      %c0_10 = arith.constant 0 : index
      %12 = vector.load %arg7[%c0_9, %c0_10] : memref<32x128xf32, #tpu.memory_space<vmem>>, vector<32x128xf32>
      %c0_11 = arith.constant 0 : index
      %c0_12 = arith.constant 0 : index
      %13 = vector.load %arg5[%c0_11, %c0_12] : memref<1x128xf32, #tpu.memory_space<vmem>>, vector<1x128xf32>
      %14 = vector.broadcast %13 : vector<1x128xf32> to vector<32x128xf32>
      %15 = arith.mulf %12, %14 : vector<32x128xf32>
      %c0_13 = arith.constant 0 : index
      %c0_14 = arith.constant 0 : index
      %16 = vector.load %arg6[%c0_13, %c0_14] : memref<1x128xf32, #tpu.memory_space<vmem>>, vector<1x128xf32>
      %17 = vector.broadcast %16 : vector<1x128xf32> to vector<32x128xf32>
      %18 = arith.addf %15, %17 : vector<32x128xf32>
      %cst_15 = arith.constant 0.000000e+00 : f32
      %19 = vector.broadcast %cst_15 : f32 to vector<32x128xf32>
      %20 = arith.maximumf %18, %19 : vector<32x128xf32>
      %c0_16 = arith.constant 0 : index
      %c0_17 = arith.constant 0 : index
      %21 = vector.load %arg7[%c0_16, %c0_17] : memref<32x128xf32, #tpu.memory_space<vmem>>, vector<32x128xf32>
      tpu.vector_store %arg7[%c0_16, %c0_17], %20 {strides = array<i32>} : memref<32x128xf32, #tpu.memory_space<vmem>>, vector<32x128xf32>,
    } else {
    }
    return
  }
  func.func @transform_0(%arg0: i32, %arg1: i32, %arg2: i32) -> (i32, i32) {
    %c0_i32 = arith.constant 0 : i32
    return %arg0, %arg2 : i32, i32
  }
  func.func @transform_1(%arg0: i32, %arg1: i32, %arg2: i32) -> (i32, i32) {
    %c0_i32 = arith.constant 0 : i32
    return %arg2, %arg1 : i32, i32
  }
  func.func @transform_2(%arg0: i32, %arg1: i32, %arg2: i32) -> (i32, i32) {
    %c0_i32 = arith.constant 0 : i32
    %c0_i32_0 = arith.constant 0 : i32
    return %c0_i32, %arg1 : i32, i32
  }
  func.func @transform_3(%arg0: i32, %arg1: i32, %arg2: i32) -> (i32, i32) {
    %c0_i32 = arith.constant 0 : i32
    %c0_i32_0 = arith.constant 0 : i32
    return %c0_i32, %arg1 : i32, i32
  }
  func.func @transform_4(%arg0: i32, %arg1: i32, %arg2: i32) -> (i32, i32) {
    %c0_i32 = arith.constant 0 : i32
    return %arg0, %arg1 : i32, i32
  }
}

module attributes {stable_mosaic.version = 11 : i64} {
  func.func @_matmul_fused_kernel(%arg0: i32, %arg1: i32, %arg2: i32, %arg3: memref<8x384xbf16, #tpu.memory_space<vmem>>, %arg4: memref<384x256xbf16, #tpu.memory_space<vmem>>, %arg5: memref<1x256xf32, #tpu.memory_space<vmem>>, %arg6: memref<1x256xf32, #tpu.memory_space<vmem>>, %arg7: memref<8x256xf32, #tpu.memory_space<vmem>>) attributes {dimension_semantics = [#tpu.dimension_semantics<parallel>, #tpu.dimension_semantics<parallel>, #tpu.dimension_semantics<arbitrary>], iteration_bounds = array<i64: 1, 1, 3>, scalar_prefetch = 0 : i64, scratch_operands = 0 : i64, tpu.core_type = #tpu.core_type<tc>, window_params = [{transform_indices = @transform_0, window_bounds = array<i64: 8, 384>}, {transform_indices = @transform_1, window_bounds = array<i64: 384, 256>}, {transform_indices = @transform_2, window_bounds = array<i64: 1, 256>}, {transform_indices = @transform_3, window_bounds = array<i64: 1, 256>}, {transform_indices = @transform_4, window_bounds = array<i64: 8, 256>}]} {
    %c0_i32 = arith.constant 0 : i32
    %0 = arith.cmpi eq, %arg2, %c0_i32 : i32
    %1 = arith.extui %0 : i1 to i32
    %c0_i32_0 = arith.constant 0 : i32
    %2 = arith.cmpi ne, %1, %c0_i32_0 : i32
    scf.if %2 {
      %cst_9 = arith.constant 0.000000e+00 : f32
      %12 = vector.broadcast %cst_9 : f32 to vector<8x256xf32>
      %c0_10 = arith.constant 0 : index
      %c0_11 = arith.constant 0 : index
      %13 = vector.load %arg7[%c0_10, %c0_11] : memref<8x256xf32, #tpu.memory_space<vmem>>, vector<8x256xf32>
      tpu.vector_store %arg7[%c0_10, %c0_11], %12 {strides = array<i32>} : memref<8x256xf32, #tpu.memory_space<vmem>>, vector<8x256xf32>,
    } else {
    }
    %c0 = arith.constant 0 : index
    %c0_1 = arith.constant 0 : index
    %3 = vector.load %arg7[%c0, %c0_1] : memref<8x256xf32, #tpu.memory_space<vmem>>, vector<8x256xf32>
    %c0_2 = arith.constant 0 : index
    %c0_3 = arith.constant 0 : index
    %4 = vector.load %arg3[%c0_2, %c0_3] : memref<8x384xbf16, #tpu.memory_space<vmem>>, vector<8x384xbf16>
    %c0_4 = arith.constant 0 : index
    %c0_5 = arith.constant 0 : index
    %5 = vector.load %arg4[%c0_4, %c0_5] : memref<384x256xbf16, #tpu.memory_space<vmem>>, vector<384x256xbf16>
    %cst = arith.constant dense<0.000000e+00> : vector<8x256xf32>
    %6 = tpu.matmul %4, %5, %cst {dimension_numbers = #tpu.dot_dimension_numbers<[1], [0], [0], [1], [0, 0, 1, 1], [], []>} : vector<8x384xbf16>, vector<384x256xbf16>, vector<8x256xf32> -> vector<8x256xf32>
    %7 = arith.addf %3, %6 : vector<8x256xf32>
    %c0_6 = arith.constant 0 : index
    %c0_7 = arith.constant 0 : index
    %8 = vector.load %arg7[%c0_6, %c0_7] : memref<8x256xf32, #tpu.memory_space<vmem>>, vector<8x256xf32>
    tpu.vector_store %arg7[%c0_6, %c0_7], %7 {strides = array<i32>} : memref<8x256xf32, #tpu.memory_space<vmem>>, vector<8x256xf32>,
    %c2_i32 = arith.constant 2 : i32
    %9 = arith.cmpi eq, %arg2, %c2_i32 : i32
    %10 = arith.extui %9 : i1 to i32
    %c0_i32_8 = arith.constant 0 : i32
    %11 = arith.cmpi ne, %10, %c0_i32_8 : i32
    scf.if %11 {
      %c0_9 = arith.constant 0 : index
      %c0_10 = arith.constant 0 : index
      %12 = vector.load %arg7[%c0_9, %c0_10] : memref<8x256xf32, #tpu.memory_space<vmem>>, vector<8x256xf32>
      %c0_11 = arith.constant 0 : index
      %c0_12 = arith.constant 0 : index
      %13 = vector.load %arg5[%c0_11, %c0_12] : memref<1x256xf32, #tpu.memory_space<vmem>>, vector<1x256xf32>
      %14 = vector.broadcast %13 : vector<1x256xf32> to vector<8x256xf32>
      %15 = arith.mulf %12, %14 : vector<8x256xf32>
      %c0_13 = arith.constant 0 : index
      %c0_14 = arith.constant 0 : index
      %16 = vector.load %arg6[%c0_13, %c0_14] : memref<1x256xf32, #tpu.memory_space<vmem>>, vector<1x256xf32>
      %17 = vector.broadcast %16 : vector<1x256xf32> to vector<8x256xf32>
      %18 = arith.addf %15, %17 : vector<8x256xf32>
      %cst_15 = arith.constant 0.000000e+00 : f32
      %19 = vector.broadcast %cst_15 : f32 to vector<8x256xf32>
      %20 = arith.maximumf %18, %19 : vector<8x256xf32>
      %c0_16 = arith.constant 0 : index
      %c0_17 = arith.constant 0 : index
      %21 = vector.load %arg7[%c0_16, %c0_17] : memref<8x256xf32, #tpu.memory_space<vmem>>, vector<8x256xf32>
      tpu.vector_store %arg7[%c0_16, %c0_17], %20 {strides = array<i32>} : memref<8x256xf32, #tpu.memory_space<vmem>>, vector<8x256xf32>,
    } else {
    }
    return
  }
  func.func @transform_0(%arg0: i32, %arg1: i32, %arg2: i32) -> (i32, i32) {
    %c0_i32 = arith.constant 0 : i32
    return %arg0, %arg2 : i32, i32
  }
  func.func @transform_1(%arg0: i32, %arg1: i32, %arg2: i32) -> (i32, i32) {
    %c0_i32 = arith.constant 0 : i32
    return %arg2, %arg1 : i32, i32
  }
  func.func @transform_2(%arg0: i32, %arg1: i32, %arg2: i32) -> (i32, i32) {
    %c0_i32 = arith.constant 0 : i32
    %c0_i32_0 = arith.constant 0 : i32
    return %c0_i32, %arg1 : i32, i32
  }
  func.func @transform_3(%arg0: i32, %arg1: i32, %arg2: i32) -> (i32, i32) {
    %c0_i32 = arith.constant 0 : i32
    %c0_i32_0 = arith.constant 0 : i32
    return %c0_i32, %arg1 : i32, i32
  }
  func.func @transform_4(%arg0: i32, %arg1: i32, %arg2: i32) -> (i32, i32) {
    %c0_i32 = arith.constant 0 : i32
    return %arg0, %arg1 : i32, i32
  }
}

module attributes {stable_mosaic.version = 11 : i64} {
  func.func @_matmul_fused_kernel(%arg0: i32, %arg1: i32, %arg2: i32, %arg3: memref<8x128xbf16, #tpu.memory_space<vmem>>, %arg4: memref<128x256xbf16, #tpu.memory_space<vmem>>, %arg5: memref<1x256xf32, #tpu.memory_space<vmem>>, %arg6: memref<1x256xf32, #tpu.memory_space<vmem>>, %arg7: memref<8x256xf32, #tpu.memory_space<vmem>>) attributes {dimension_semantics = [#tpu.dimension_semantics<parallel>, #tpu.dimension_semantics<parallel>, #tpu.dimension_semantics<arbitrary>], iteration_bounds = array<i64: 1, 1, 1>, scalar_prefetch = 0 : i64, scratch_operands = 0 : i64, tpu.core_type = #tpu.core_type<tc>, window_params = [{transform_indices = @transform_0, window_bounds = array<i64: 8, 128>}, {transform_indices = @transform_1, window_bounds = array<i64: 128, 256>}, {transform_indices = @transform_2, window_bounds = array<i64: 1, 256>}, {transform_indices = @transform_3, window_bounds = array<i64: 1, 256>}, {transform_indices = @transform_4, window_bounds = array<i64: 8, 256>}]} {
    %c0_i32 = arith.constant 0 : i32
    %0 = arith.cmpi eq, %arg2, %c0_i32 : i32
    %1 = arith.extui %0 : i1 to i32
    %c0_i32_0 = arith.constant 0 : i32
    %2 = arith.cmpi ne, %1, %c0_i32_0 : i32
    scf.if %2 {
      %cst_10 = arith.constant 0.000000e+00 : f32
      %12 = vector.broadcast %cst_10 : f32 to vector<8x256xf32>
      %c0_11 = arith.constant 0 : index
      %c0_12 = arith.constant 0 : index
      %13 = vector.load %arg7[%c0_11, %c0_12] : memref<8x256xf32, #tpu.memory_space<vmem>>, vector<8x256xf32>
      tpu.vector_store %arg7[%c0_11, %c0_12], %12 {strides = array<i32>} : memref<8x256xf32, #tpu.memory_space<vmem>>, vector<8x256xf32>,
    } else {
    }
    %c0 = arith.constant 0 : index
    %c0_1 = arith.constant 0 : index
    %3 = vector.load %arg7[%c0, %c0_1] : memref<8x256xf32, #tpu.memory_space<vmem>>, vector<8x256xf32>
    %c0_2 = arith.constant 0 : index
    %c0_3 = arith.constant 0 : index
    %4 = vector.load %arg3[%c0_2, %c0_3] : memref<8x128xbf16, #tpu.memory_space<vmem>>, vector<8x128xbf16>
    %c0_4 = arith.constant 0 : index
    %c0_5 = arith.constant 0 : index
    %5 = vector.load %arg4[%c0_4, %c0_5] : memref<128x256xbf16, #tpu.memory_space<vmem>>, vector<128x256xbf16>
    %cst = arith.constant dense<0.000000e+00> : vector<8x256xf32>
    %6 = tpu.matmul %4, %5, %cst {dimension_numbers = #tpu.dot_dimension_numbers<[1], [0], [0], [1], [0, 0, 1, 1], [], []>} : vector<8x128xbf16>, vector<128x256xbf16>, vector<8x256xf32> -> vector<8x256xf32>
    %7 = arith.addf %3, %6 : vector<8x256xf32>
    %c0_6 = arith.constant 0 : index
    %c0_7 = arith.constant 0 : index
    %8 = vector.load %arg7[%c0_6, %c0_7] : memref<8x256xf32, #tpu.memory_space<vmem>>, vector<8x256xf32>
    tpu.vector_store %arg7[%c0_6, %c0_7], %7 {strides = array<i32>} : memref<8x256xf32, #tpu.memory_space<vmem>>, vector<8x256xf32>,
    %c0_i32_8 = arith.constant 0 : i32
    %9 = arith.cmpi eq, %arg2, %c0_i32_8 : i32
    %10 = arith.extui %9 : i1 to i32
    %c0_i32_9 = arith.constant 0 : i32
    %11 = arith.cmpi ne, %10, %c0_i32_9 : i32
    scf.if %11 {
      %c0_10 = arith.constant 0 : index
      %c0_11 = arith.constant 0 : index
      %12 = vector.load %arg7[%c0_10, %c0_11] : memref<8x256xf32, #tpu.memory_space<vmem>>, vector<8x256xf32>
      %c0_12 = arith.constant 0 : index
      %c0_13 = arith.constant 0 : index
      %13 = vector.load %arg5[%c0_12, %c0_13] : memref<1x256xf32, #tpu.memory_space<vmem>>, vector<1x256xf32>
      %14 = vector.broadcast %13 : vector<1x256xf32> to vector<8x256xf32>
      %15 = arith.mulf %12, %14 : vector<8x256xf32>
      %c0_14 = arith.constant 0 : index
      %c0_15 = arith.constant 0 : index
      %16 = vector.load %arg6[%c0_14, %c0_15] : memref<1x256xf32, #tpu.memory_space<vmem>>, vector<1x256xf32>
      %17 = vector.broadcast %16 : vector<1x256xf32> to vector<8x256xf32>
      %18 = arith.addf %15, %17 : vector<8x256xf32>
      %c0_16 = arith.constant 0 : index
      %c0_17 = arith.constant 0 : index
      %19 = vector.load %arg7[%c0_16, %c0_17] : memref<8x256xf32, #tpu.memory_space<vmem>>, vector<8x256xf32>
      tpu.vector_store %arg7[%c0_16, %c0_17], %18 {strides = array<i32>} : memref<8x256xf32, #tpu.memory_space<vmem>>, vector<8x256xf32>,
    } else {
    }
    return
  }
  func.func @transform_0(%arg0: i32, %arg1: i32, %arg2: i32) -> (i32, i32) {
    %c0_i32 = arith.constant 0 : i32
    return %arg0, %arg2 : i32, i32
  }
  func.func @transform_1(%arg0: i32, %arg1: i32, %arg2: i32) -> (i32, i32) {
    %c0_i32 = arith.constant 0 : i32
    return %arg2, %arg1 : i32, i32
  }
  func.func @transform_2(%arg0: i32, %arg1: i32, %arg2: i32) -> (i32, i32) {
    %c0_i32 = arith.constant 0 : i32
    %c0_i32_0 = arith.constant 0 : i32
    return %c0_i32, %arg1 : i32, i32
  }
  func.func @transform_3(%arg0: i32, %arg1: i32, %arg2: i32) -> (i32, i32) {
    %c0_i32 = arith.constant 0 : i32
    %c0_i32_0 = arith.constant 0 : i32
    return %c0_i32, %arg1 : i32, i32
  }
  func.func @transform_4(%arg0: i32, %arg1: i32, %arg2: i32) -> (i32, i32) {
    %c0_i32 = arith.constant 0 : i32
    return %arg0, %arg1 : i32, i32
  }
}

module attributes {stable_mosaic.version = 11 : i64} {
  func.func @_matmul_fused_kernel(%arg0: i32, %arg1: i32, %arg2: i32, %arg3: memref<8x384xbf16, #tpu.memory_space<vmem>>, %arg4: memref<384x256xbf16, #tpu.memory_space<vmem>>, %arg5: memref<1x256xf32, #tpu.memory_space<vmem>>, %arg6: memref<1x256xf32, #tpu.memory_space<vmem>>, %arg7: memref<8x256xf32, #tpu.memory_space<vmem>>, %arg8: memref<8x256xf32, #tpu.memory_space<vmem>>) attributes {dimension_semantics = [#tpu.dimension_semantics<parallel>, #tpu.dimension_semantics<parallel>, #tpu.dimension_semantics<arbitrary>], iteration_bounds = array<i64: 1, 1, 6>, scalar_prefetch = 0 : i64, scratch_operands = 0 : i64, tpu.core_type = #tpu.core_type<tc>, window_params = [{transform_indices = @transform_0, window_bounds = array<i64: 8, 384>}, {transform_indices = @transform_1, window_bounds = array<i64: 384, 256>}, {transform_indices = @transform_2, window_bounds = array<i64: 1, 256>}, {transform_indices = @transform_3, window_bounds = array<i64: 1, 256>}, {transform_indices = @transform_4, window_bounds = array<i64: 8, 256>}, {transform_indices = @transform_5, window_bounds = array<i64: 8, 256>}]} {
    %c0_i32 = arith.constant 0 : i32
    %0 = arith.cmpi eq, %arg2, %c0_i32 : i32
    %1 = arith.extui %0 : i1 to i32
    %c0_i32_0 = arith.constant 0 : i32
    %2 = arith.cmpi ne, %1, %c0_i32_0 : i32
    scf.if %2 {
      %cst_9 = arith.constant 0.000000e+00 : f32
      %12 = vector.broadcast %cst_9 : f32 to vector<8x256xf32>
      %c0_10 = arith.constant 0 : index
      %c0_11 = arith.constant 0 : index
      %13 = vector.load %arg8[%c0_10, %c0_11] : memref<8x256xf32, #tpu.memory_space<vmem>>, vector<8x256xf32>
      tpu.vector_store %arg8[%c0_10, %c0_11], %12 {strides = array<i32>} : memref<8x256xf32, #tpu.memory_space<vmem>>, vector<8x256xf32>,
    } else {
    }
    %c0 = arith.constant 0 : index
    %c0_1 = arith.constant 0 : index
    %3 = vector.load %arg8[%c0, %c0_1] : memref<8x256xf32, #tpu.memory_space<vmem>>, vector<8x256xf32>
    %c0_2 = arith.constant 0 : index
    %c0_3 = arith.constant 0 : index
    %4 = vector.load %arg3[%c0_2, %c0_3] : memref<8x384xbf16, #tpu.memory_space<vmem>>, vector<8x384xbf16>
    %c0_4 = arith.constant 0 : index
    %c0_5 = arith.constant 0 : index
    %5 = vector.load %arg4[%c0_4, %c0_5] : memref<384x256xbf16, #tpu.memory_space<vmem>>, vector<384x256xbf16>
    %cst = arith.constant dense<0.000000e+00> : vector<8x256xf32>
    %6 = tpu.matmul %4, %5, %cst {dimension_numbers = #tpu.dot_dimension_numbers<[1], [0], [0], [1], [0, 0, 1, 1], [], []>} : vector<8x384xbf16>, vector<384x256xbf16>, vector<8x256xf32> -> vector<8x256xf32>
    %7 = arith.addf %3, %6 : vector<8x256xf32>
    %c0_6 = arith.constant 0 : index
    %c0_7 = arith.constant 0 : index
    %8 = vector.load %arg8[%c0_6, %c0_7] : memref<8x256xf32, #tpu.memory_space<vmem>>, vector<8x256xf32>
    tpu.vector_store %arg8[%c0_6, %c0_7], %7 {strides = array<i32>} : memref<8x256xf32, #tpu.memory_space<vmem>>, vector<8x256xf32>,
    %c5_i32 = arith.constant 5 : i32
    %9 = arith.cmpi eq, %arg2, %c5_i32 : i32
    %10 = arith.extui %9 : i1 to i32
    %c0_i32_8 = arith.constant 0 : i32
    %11 = arith.cmpi ne, %10, %c0_i32_8 : i32
    scf.if %11 {
      %c0_9 = arith.constant 0 : index
      %c0_10 = arith.constant 0 : index
      %12 = vector.load %arg8[%c0_9, %c0_10] : memref<8x256xf32, #tpu.memory_space<vmem>>, vector<8x256xf32>
      %c0_11 = arith.constant 0 : index
      %c0_12 = arith.constant 0 : index
      %13 = vector.load %arg5[%c0_11, %c0_12] : memref<1x256xf32, #tpu.memory_space<vmem>>, vector<1x256xf32>
      %14 = vector.broadcast %13 : vector<1x256xf32> to vector<8x256xf32>
      %15 = arith.mulf %12, %14 : vector<8x256xf32>
      %c0_13 = arith.constant 0 : index
      %c0_14 = arith.constant 0 : index
      %16 = vector.load %arg6[%c0_13, %c0_14] : memref<1x256xf32, #tpu.memory_space<vmem>>, vector<1x256xf32>
      %17 = vector.broadcast %16 : vector<1x256xf32> to vector<8x256xf32>
      %18 = arith.addf %15, %17 : vector<8x256xf32>
      %c0_15 = arith.constant 0 : index
      %c0_16 = arith.constant 0 : index
      %19 = vector.load %arg7[%c0_15, %c0_16] : memref<8x256xf32, #tpu.memory_space<vmem>>, vector<8x256xf32>
      %20 = arith.addf %18, %19 : vector<8x256xf32>
      %cst_17 = arith.constant 0.000000e+00 : f32
      %21 = vector.broadcast %cst_17 : f32 to vector<8x256xf32>
      %22 = arith.maximumf %20, %21 : vector<8x256xf32>
      %c0_18 = arith.constant 0 : index
      %c0_19 = arith.constant 0 : index
      %23 = vector.load %arg8[%c0_18, %c0_19] : memref<8x256xf32, #tpu.memory_space<vmem>>, vector<8x256xf32>
      tpu.vector_store %arg8[%c0_18, %c0_19], %22 {strides = array<i32>} : memref<8x256xf32, #tpu.memory_space<vmem>>, vector<8x256xf32>,
    } else {
    }
    return
  }
  func.func @transform_0(%arg0: i32, %arg1: i32, %arg2: i32) -> (i32, i32) {
    %c0_i32 = arith.constant 0 : i32
    return %arg0, %arg2 : i32, i32
  }
  func.func @transform_1(%arg0: i32, %arg1: i32, %arg2: i32) -> (i32, i32) {
    %c0_i32 = arith.constant 0 : i32
    return %arg2, %arg1 : i32, i32
  }
  func.func @transform_2(%arg0: i32, %arg1: i32, %arg2: i32) -> (i32, i32) {
    %c0_i32 = arith.constant 0 : i32
    %c0_i32_0 = arith.constant 0 : i32
    return %c0_i32, %arg1 : i32, i32
  }
  func.func @transform_3(%arg0: i32, %arg1: i32, %arg2: i32) -> (i32, i32) {
    %c0_i32 = arith.constant 0 : i32
    %c0_i32_0 = arith.constant 0 : i32
    return %c0_i32, %arg1 : i32, i32
  }
  func.func @transform_4(%arg0: i32, %arg1: i32, %arg2: i32) -> (i32, i32) {
    %c0_i32 = arith.constant 0 : i32
    return %arg0, %arg1 : i32, i32
  }
  func.func @transform_5(%arg0: i32, %arg1: i32, %arg2: i32) -> (i32, i32) {
    %c0_i32 = arith.constant 0 : i32
    return %arg0, %arg1 : i32, i32
  }
}

module attributes {stable_mosaic.version = 11 : i64} {
  func.func @_matmul_fused_kernel(%arg0: i32, %arg1: i32, %arg2: i32, %arg3: memref<8x384xbf16, #tpu.memory_space<vmem>>, %arg4: memref<384x256xbf16, #tpu.memory_space<vmem>>, %arg5: memref<1x256xf32, #tpu.memory_space<vmem>>, %arg6: memref<1x256xf32, #tpu.memory_space<vmem>>, %arg7: memref<8x256xf32, #tpu.memory_space<vmem>>) attributes {dimension_semantics = [#tpu.dimension_semantics<parallel>, #tpu.dimension_semantics<parallel>, #tpu.dimension_semantics<arbitrary>], iteration_bounds = array<i64: 1, 1, 6>, scalar_prefetch = 0 : i64, scratch_operands = 0 : i64, tpu.core_type = #tpu.core_type<tc>, window_params = [{transform_indices = @transform_0, window_bounds = array<i64: 8, 384>}, {transform_indices = @transform_1, window_bounds = array<i64: 384, 256>}, {transform_indices = @transform_2, window_bounds = array<i64: 1, 256>}, {transform_indices = @transform_3, window_bounds = array<i64: 1, 256>}, {transform_indices = @transform_4, window_bounds = array<i64: 8, 256>}]} {
    %c0_i32 = arith.constant 0 : i32
    %0 = arith.cmpi eq, %arg2, %c0_i32 : i32
    %1 = arith.extui %0 : i1 to i32
    %c0_i32_0 = arith.constant 0 : i32
    %2 = arith.cmpi ne, %1, %c0_i32_0 : i32
    scf.if %2 {
      %cst_9 = arith.constant 0.000000e+00 : f32
      %12 = vector.broadcast %cst_9 : f32 to vector<8x256xf32>
      %c0_10 = arith.constant 0 : index
      %c0_11 = arith.constant 0 : index
      %13 = vector.load %arg7[%c0_10, %c0_11] : memref<8x256xf32, #tpu.memory_space<vmem>>, vector<8x256xf32>
      tpu.vector_store %arg7[%c0_10, %c0_11], %12 {strides = array<i32>} : memref<8x256xf32, #tpu.memory_space<vmem>>, vector<8x256xf32>,
    } else {
    }
    %c0 = arith.constant 0 : index
    %c0_1 = arith.constant 0 : index
    %3 = vector.load %arg7[%c0, %c0_1] : memref<8x256xf32, #tpu.memory_space<vmem>>, vector<8x256xf32>
    %c0_2 = arith.constant 0 : index
    %c0_3 = arith.constant 0 : index
    %4 = vector.load %arg3[%c0_2, %c0_3] : memref<8x384xbf16, #tpu.memory_space<vmem>>, vector<8x384xbf16>
    %c0_4 = arith.constant 0 : index
    %c0_5 = arith.constant 0 : index
    %5 = vector.load %arg4[%c0_4, %c0_5] : memref<384x256xbf16, #tpu.memory_space<vmem>>, vector<384x256xbf16>
    %cst = arith.constant dense<0.000000e+00> : vector<8x256xf32>
    %6 = tpu.matmul %4, %5, %cst {dimension_numbers = #tpu.dot_dimension_numbers<[1], [0], [0], [1], [0, 0, 1, 1], [], []>} : vector<8x384xbf16>, vector<384x256xbf16>, vector<8x256xf32> -> vector<8x256xf32>
    %7 = arith.addf %3, %6 : vector<8x256xf32>
    %c0_6 = arith.constant 0 : index
    %c0_7 = arith.constant 0 : index
    %8 = vector.load %arg7[%c0_6, %c0_7] : memref<8x256xf32, #tpu.memory_space<vmem>>, vector<8x256xf32>
    tpu.vector_store %arg7[%c0_6, %c0_7], %7 {strides = array<i32>} : memref<8x256xf32, #tpu.memory_space<vmem>>, vector<8x256xf32>,
    %c5_i32 = arith.constant 5 : i32
    %9 = arith.cmpi eq, %arg2, %c5_i32 : i32
    %10 = arith.extui %9 : i1 to i32
    %c0_i32_8 = arith.constant 0 : i32
    %11 = arith.cmpi ne, %10, %c0_i32_8 : i32
    scf.if %11 {
      %c0_9 = arith.constant 0 : index
      %c0_10 = arith.constant 0 : index
      %12 = vector.load %arg7[%c0_9, %c0_10] : memref<8x256xf32, #tpu.memory_space<vmem>>, vector<8x256xf32>
      %c0_11 = arith.constant 0 : index
      %c0_12 = arith.constant 0 : index
      %13 = vector.load %arg5[%c0_11, %c0_12] : memref<1x256xf32, #tpu.memory_space<vmem>>, vector<1x256xf32>
      %14 = vector.broadcast %13 : vector<1x256xf32> to vector<8x256xf32>
      %15 = arith.mulf %12, %14 : vector<8x256xf32>
      %c0_13 = arith.constant 0 : index
      %c0_14 = arith.constant 0 : index
      %16 = vector.load %arg6[%c0_13, %c0_14] : memref<1x256xf32, #tpu.memory_space<vmem>>, vector<1x256xf32>
      %17 = vector.broadcast %16 : vector<1x256xf32> to vector<8x256xf32>
      %18 = arith.addf %15, %17 : vector<8x256xf32>
      %cst_15 = arith.constant 0.000000e+00 : f32
      %19 = vector.broadcast %cst_15 : f32 to vector<8x256xf32>
      %20 = arith.maximumf %18, %19 : vector<8x256xf32>
      %c0_16 = arith.constant 0 : index
      %c0_17 = arith.constant 0 : index
      %21 = vector.load %arg7[%c0_16, %c0_17] : memref<8x256xf32, #tpu.memory_space<vmem>>, vector<8x256xf32>
      tpu.vector_store %arg7[%c0_16, %c0_17], %20 {strides = array<i32>} : memref<8x256xf32, #tpu.memory_space<vmem>>, vector<8x256xf32>,
    } else {
    }
    return
  }
  func.func @transform_0(%arg0: i32, %arg1: i32, %arg2: i32) -> (i32, i32) {
    %c0_i32 = arith.constant 0 : i32
    return %arg0, %arg2 : i32, i32
  }
  func.func @transform_1(%arg0: i32, %arg1: i32, %arg2: i32) -> (i32, i32) {
    %c0_i32 = arith.constant 0 : i32
    return %arg2, %arg1 : i32, i32
  }
  func.func @transform_2(%arg0: i32, %arg1: i32, %arg2: i32) -> (i32, i32) {
    %c0_i32 = arith.constant 0 : i32
    %c0_i32_0 = arith.constant 0 : i32
    return %c0_i32, %arg1 : i32, i32
  }
  func.func @transform_3(%arg0: i32, %arg1: i32, %arg2: i32) -> (i32, i32) {
    %c0_i32 = arith.constant 0 : i32
    %c0_i32_0 = arith.constant 0 : i32
    return %c0_i32, %arg1 : i32, i32
  }
  func.func @transform_4(%arg0: i32, %arg1: i32, %arg2: i32) -> (i32, i32) {
    %c0_i32 = arith.constant 0 : i32
    return %arg0, %arg1 : i32, i32
  }
}

module attributes {stable_mosaic.version = 11 : i64} {
  func.func @_matmul_fused_kernel(%arg0: i32, %arg1: i32, %arg2: i32, %arg3: memref<8x384xbf16, #tpu.memory_space<vmem>>, %arg4: memref<384x512xbf16, #tpu.memory_space<vmem>>, %arg5: memref<1x512xf32, #tpu.memory_space<vmem>>, %arg6: memref<1x512xf32, #tpu.memory_space<vmem>>, %arg7: memref<8x512xf32, #tpu.memory_space<vmem>>) attributes {dimension_semantics = [#tpu.dimension_semantics<parallel>, #tpu.dimension_semantics<parallel>, #tpu.dimension_semantics<arbitrary>], iteration_bounds = array<i64: 1, 1, 6>, scalar_prefetch = 0 : i64, scratch_operands = 0 : i64, tpu.core_type = #tpu.core_type<tc>, window_params = [{transform_indices = @transform_0, window_bounds = array<i64: 8, 384>}, {transform_indices = @transform_1, window_bounds = array<i64: 384, 512>}, {transform_indices = @transform_2, window_bounds = array<i64: 1, 512>}, {transform_indices = @transform_3, window_bounds = array<i64: 1, 512>}, {transform_indices = @transform_4, window_bounds = array<i64: 8, 512>}]} {
    %c0_i32 = arith.constant 0 : i32
    %0 = arith.cmpi eq, %arg2, %c0_i32 : i32
    %1 = arith.extui %0 : i1 to i32
    %c0_i32_0 = arith.constant 0 : i32
    %2 = arith.cmpi ne, %1, %c0_i32_0 : i32
    scf.if %2 {
      %cst_9 = arith.constant 0.000000e+00 : f32
      %12 = vector.broadcast %cst_9 : f32 to vector<8x512xf32>
      %c0_10 = arith.constant 0 : index
      %c0_11 = arith.constant 0 : index
      %13 = vector.load %arg7[%c0_10, %c0_11] : memref<8x512xf32, #tpu.memory_space<vmem>>, vector<8x512xf32>
      tpu.vector_store %arg7[%c0_10, %c0_11], %12 {strides = array<i32>} : memref<8x512xf32, #tpu.memory_space<vmem>>, vector<8x512xf32>,
    } else {
    }
    %c0 = arith.constant 0 : index
    %c0_1 = arith.constant 0 : index
    %3 = vector.load %arg7[%c0, %c0_1] : memref<8x512xf32, #tpu.memory_space<vmem>>, vector<8x512xf32>
    %c0_2 = arith.constant 0 : index
    %c0_3 = arith.constant 0 : index
    %4 = vector.load %arg3[%c0_2, %c0_3] : memref<8x384xbf16, #tpu.memory_space<vmem>>, vector<8x384xbf16>
    %c0_4 = arith.constant 0 : index
    %c0_5 = arith.constant 0 : index
    %5 = vector.load %arg4[%c0_4, %c0_5] : memref<384x512xbf16, #tpu.memory_space<vmem>>, vector<384x512xbf16>
    %cst = arith.constant dense<0.000000e+00> : vector<8x512xf32>
    %6 = tpu.matmul %4, %5, %cst {dimension_numbers = #tpu.dot_dimension_numbers<[1], [0], [0], [1], [0, 0, 1, 1], [], []>} : vector<8x384xbf16>, vector<384x512xbf16>, vector<8x512xf32> -> vector<8x512xf32>
    %7 = arith.addf %3, %6 : vector<8x512xf32>
    %c0_6 = arith.constant 0 : index
    %c0_7 = arith.constant 0 : index
    %8 = vector.load %arg7[%c0_6, %c0_7] : memref<8x512xf32, #tpu.memory_space<vmem>>, vector<8x512xf32>
    tpu.vector_store %arg7[%c0_6, %c0_7], %7 {strides = array<i32>} : memref<8x512xf32, #tpu.memory_space<vmem>>, vector<8x512xf32>,
    %c5_i32 = arith.constant 5 : i32
    %9 = arith.cmpi eq, %arg2, %c5_i32 : i32
    %10 = arith.extui %9 : i1 to i32
    %c0_i32_8 = arith.constant 0 : i32
    %11 = arith.cmpi ne, %10, %c0_i32_8 : i32
    scf.if %11 {
      %c0_9 = arith.constant 0 : index
      %c0_10 = arith.constant 0 : index
      %12 = vector.load %arg7[%c0_9, %c0_10] : memref<8x512xf32, #tpu.memory_space<vmem>>, vector<8x512xf32>
      %c0_11 = arith.constant 0 : index
      %c0_12 = arith.constant 0 : index
      %13 = vector.load %arg5[%c0_11, %c0_12] : memref<1x512xf32, #tpu.memory_space<vmem>>, vector<1x512xf32>
      %14 = vector.broadcast %13 : vector<1x512xf32> to vector<8x512xf32>
      %15 = arith.mulf %12, %14 : vector<8x512xf32>
      %c0_13 = arith.constant 0 : index
      %c0_14 = arith.constant 0 : index
      %16 = vector.load %arg6[%c0_13, %c0_14] : memref<1x512xf32, #tpu.memory_space<vmem>>, vector<1x512xf32>
      %17 = vector.broadcast %16 : vector<1x512xf32> to vector<8x512xf32>
      %18 = arith.addf %15, %17 : vector<8x512xf32>
      %cst_15 = arith.constant 0.000000e+00 : f32
      %19 = vector.broadcast %cst_15 : f32 to vector<8x512xf32>
      %20 = arith.maximumf %18, %19 : vector<8x512xf32>
      %c0_16 = arith.constant 0 : index
      %c0_17 = arith.constant 0 : index
      %21 = vector.load %arg7[%c0_16, %c0_17] : memref<8x512xf32, #tpu.memory_space<vmem>>, vector<8x512xf32>
      tpu.vector_store %arg7[%c0_16, %c0_17], %20 {strides = array<i32>} : memref<8x512xf32, #tpu.memory_space<vmem>>, vector<8x512xf32>,
    } else {
    }
    return
  }
  func.func @transform_0(%arg0: i32, %arg1: i32, %arg2: i32) -> (i32, i32) {
    %c0_i32 = arith.constant 0 : i32
    return %arg0, %arg2 : i32, i32
  }
  func.func @transform_1(%arg0: i32, %arg1: i32, %arg2: i32) -> (i32, i32) {
    %c0_i32 = arith.constant 0 : i32
    return %arg2, %arg1 : i32, i32
  }
  func.func @transform_2(%arg0: i32, %arg1: i32, %arg2: i32) -> (i32, i32) {
    %c0_i32 = arith.constant 0 : i32
    %c0_i32_0 = arith.constant 0 : i32
    return %c0_i32, %arg1 : i32, i32
  }
  func.func @transform_3(%arg0: i32, %arg1: i32, %arg2: i32) -> (i32, i32) {
    %c0_i32 = arith.constant 0 : i32
    %c0_i32_0 = arith.constant 0 : i32
    return %c0_i32, %arg1 : i32, i32
  }
  func.func @transform_4(%arg0: i32, %arg1: i32, %arg2: i32) -> (i32, i32) {
    %c0_i32 = arith.constant 0 : i32
    return %arg0, %arg1 : i32, i32
  }
}

module attributes {stable_mosaic.version = 11 : i64} {
  func.func @_matmul_fused_kernel(%arg0: i32, %arg1: i32, %arg2: i32, %arg3: memref<8x256xbf16, #tpu.memory_space<vmem>>, %arg4: memref<256x512xbf16, #tpu.memory_space<vmem>>, %arg5: memref<1x512xf32, #tpu.memory_space<vmem>>, %arg6: memref<1x512xf32, #tpu.memory_space<vmem>>, %arg7: memref<8x512xf32, #tpu.memory_space<vmem>>) attributes {dimension_semantics = [#tpu.dimension_semantics<parallel>, #tpu.dimension_semantics<parallel>, #tpu.dimension_semantics<arbitrary>], iteration_bounds = array<i64: 1, 1, 1>, scalar_prefetch = 0 : i64, scratch_operands = 0 : i64, tpu.core_type = #tpu.core_type<tc>, window_params = [{transform_indices = @transform_0, window_bounds = array<i64: 8, 256>}, {transform_indices = @transform_1, window_bounds = array<i64: 256, 512>}, {transform_indices = @transform_2, window_bounds = array<i64: 1, 512>}, {transform_indices = @transform_3, window_bounds = array<i64: 1, 512>}, {transform_indices = @transform_4, window_bounds = array<i64: 8, 512>}]} {
    %c0_i32 = arith.constant 0 : i32
    %0 = arith.cmpi eq, %arg2, %c0_i32 : i32
    %1 = arith.extui %0 : i1 to i32
    %c0_i32_0 = arith.constant 0 : i32
    %2 = arith.cmpi ne, %1, %c0_i32_0 : i32
    scf.if %2 {
      %cst_10 = arith.constant 0.000000e+00 : f32
      %12 = vector.broadcast %cst_10 : f32 to vector<8x512xf32>
      %c0_11 = arith.constant 0 : index
      %c0_12 = arith.constant 0 : index
      %13 = vector.load %arg7[%c0_11, %c0_12] : memref<8x512xf32, #tpu.memory_space<vmem>>, vector<8x512xf32>
      tpu.vector_store %arg7[%c0_11, %c0_12], %12 {strides = array<i32>} : memref<8x512xf32, #tpu.memory_space<vmem>>, vector<8x512xf32>,
    } else {
    }
    %c0 = arith.constant 0 : index
    %c0_1 = arith.constant 0 : index
    %3 = vector.load %arg7[%c0, %c0_1] : memref<8x512xf32, #tpu.memory_space<vmem>>, vector<8x512xf32>
    %c0_2 = arith.constant 0 : index
    %c0_3 = arith.constant 0 : index
    %4 = vector.load %arg3[%c0_2, %c0_3] : memref<8x256xbf16, #tpu.memory_space<vmem>>, vector<8x256xbf16>
    %c0_4 = arith.constant 0 : index
    %c0_5 = arith.constant 0 : index
    %5 = vector.load %arg4[%c0_4, %c0_5] : memref<256x512xbf16, #tpu.memory_space<vmem>>, vector<256x512xbf16>
    %cst = arith.constant dense<0.000000e+00> : vector<8x512xf32>
    %6 = tpu.matmul %4, %5, %cst {dimension_numbers = #tpu.dot_dimension_numbers<[1], [0], [0], [1], [0, 0, 1, 1], [], []>} : vector<8x256xbf16>, vector<256x512xbf16>, vector<8x512xf32> -> vector<8x512xf32>
    %7 = arith.addf %3, %6 : vector<8x512xf32>
    %c0_6 = arith.constant 0 : index
    %c0_7 = arith.constant 0 : index
    %8 = vector.load %arg7[%c0_6, %c0_7] : memref<8x512xf32, #tpu.memory_space<vmem>>, vector<8x512xf32>
    tpu.vector_store %arg7[%c0_6, %c0_7], %7 {strides = array<i32>} : memref<8x512xf32, #tpu.memory_space<vmem>>, vector<8x512xf32>,
    %c0_i32_8 = arith.constant 0 : i32
    %9 = arith.cmpi eq, %arg2, %c0_i32_8 : i32
    %10 = arith.extui %9 : i1 to i32
    %c0_i32_9 = arith.constant 0 : i32
    %11 = arith.cmpi ne, %10, %c0_i32_9 : i32
    scf.if %11 {
      %c0_10 = arith.constant 0 : index
      %c0_11 = arith.constant 0 : index
      %12 = vector.load %arg7[%c0_10, %c0_11] : memref<8x512xf32, #tpu.memory_space<vmem>>, vector<8x512xf32>
      %c0_12 = arith.constant 0 : index
      %c0_13 = arith.constant 0 : index
      %13 = vector.load %arg5[%c0_12, %c0_13] : memref<1x512xf32, #tpu.memory_space<vmem>>, vector<1x512xf32>
      %14 = vector.broadcast %13 : vector<1x512xf32> to vector<8x512xf32>
      %15 = arith.mulf %12, %14 : vector<8x512xf32>
      %c0_14 = arith.constant 0 : index
      %c0_15 = arith.constant 0 : index
      %16 = vector.load %arg6[%c0_14, %c0_15] : memref<1x512xf32, #tpu.memory_space<vmem>>, vector<1x512xf32>
      %17 = vector.broadcast %16 : vector<1x512xf32> to vector<8x512xf32>
      %18 = arith.addf %15, %17 : vector<8x512xf32>
      %c0_16 = arith.constant 0 : index
      %c0_17 = arith.constant 0 : index
      %19 = vector.load %arg7[%c0_16, %c0_17] : memref<8x512xf32, #tpu.memory_space<vmem>>, vector<8x512xf32>
      tpu.vector_store %arg7[%c0_16, %c0_17], %18 {strides = array<i32>} : memref<8x512xf32, #tpu.memory_space<vmem>>, vector<8x512xf32>,
    } else {
    }
    return
  }
  func.func @transform_0(%arg0: i32, %arg1: i32, %arg2: i32) -> (i32, i32) {
    %c0_i32 = arith.constant 0 : i32
    return %arg0, %arg2 : i32, i32
  }
  func.func @transform_1(%arg0: i32, %arg1: i32, %arg2: i32) -> (i32, i32) {
    %c0_i32 = arith.constant 0 : i32
    return %arg2, %arg1 : i32, i32
  }
  func.func @transform_2(%arg0: i32, %arg1: i32, %arg2: i32) -> (i32, i32) {
    %c0_i32 = arith.constant 0 : i32
    %c0_i32_0 = arith.constant 0 : i32
    return %c0_i32, %arg1 : i32, i32
  }
  func.func @transform_3(%arg0: i32, %arg1: i32, %arg2: i32) -> (i32, i32) {
    %c0_i32 = arith.constant 0 : i32
    %c0_i32_0 = arith.constant 0 : i32
    return %c0_i32, %arg1 : i32, i32
  }
  func.func @transform_4(%arg0: i32, %arg1: i32, %arg2: i32) -> (i32, i32) {
    %c0_i32 = arith.constant 0 : i32
    return %arg0, %arg1 : i32, i32
  }
}

module attributes {stable_mosaic.version = 11 : i64} {
  func.func @_matmul_fused_kernel(%arg0: i32, %arg1: i32, %arg2: i32, %arg3: memref<8x512xbf16, #tpu.memory_space<vmem>>, %arg4: memref<512x512xbf16, #tpu.memory_space<vmem>>, %arg5: memref<1x512xf32, #tpu.memory_space<vmem>>, %arg6: memref<1x512xf32, #tpu.memory_space<vmem>>, %arg7: memref<8x512xf32, #tpu.memory_space<vmem>>, %arg8: memref<8x512xf32, #tpu.memory_space<vmem>>) attributes {dimension_semantics = [#tpu.dimension_semantics<parallel>, #tpu.dimension_semantics<parallel>, #tpu.dimension_semantics<arbitrary>], iteration_bounds = array<i64: 1, 1, 9>, scalar_prefetch = 0 : i64, scratch_operands = 0 : i64, tpu.core_type = #tpu.core_type<tc>, window_params = [{transform_indices = @transform_0, window_bounds = array<i64: 8, 512>}, {transform_indices = @transform_1, window_bounds = array<i64: 512, 512>}, {transform_indices = @transform_2, window_bounds = array<i64: 1, 512>}, {transform_indices = @transform_3, window_bounds = array<i64: 1, 512>}, {transform_indices = @transform_4, window_bounds = array<i64: 8, 512>}, {transform_indices = @transform_5, window_bounds = array<i64: 8, 512>}]} {
    %c0_i32 = arith.constant 0 : i32
    %0 = arith.cmpi eq, %arg2, %c0_i32 : i32
    %1 = arith.extui %0 : i1 to i32
    %c0_i32_0 = arith.constant 0 : i32
    %2 = arith.cmpi ne, %1, %c0_i32_0 : i32
    scf.if %2 {
      %cst_9 = arith.constant 0.000000e+00 : f32
      %12 = vector.broadcast %cst_9 : f32 to vector<8x512xf32>
      %c0_10 = arith.constant 0 : index
      %c0_11 = arith.constant 0 : index
      %13 = vector.load %arg8[%c0_10, %c0_11] : memref<8x512xf32, #tpu.memory_space<vmem>>, vector<8x512xf32>
      tpu.vector_store %arg8[%c0_10, %c0_11], %12 {strides = array<i32>} : memref<8x512xf32, #tpu.memory_space<vmem>>, vector<8x512xf32>,
    } else {
    }
    %c0 = arith.constant 0 : index
    %c0_1 = arith.constant 0 : index
    %3 = vector.load %arg8[%c0, %c0_1] : memref<8x512xf32, #tpu.memory_space<vmem>>, vector<8x512xf32>
    %c0_2 = arith.constant 0 : index
    %c0_3 = arith.constant 0 : index
    %4 = vector.load %arg3[%c0_2, %c0_3] : memref<8x512xbf16, #tpu.memory_space<vmem>>, vector<8x512xbf16>
    %c0_4 = arith.constant 0 : index
    %c0_5 = arith.constant 0 : index
    %5 = vector.load %arg4[%c0_4, %c0_5] : memref<512x512xbf16, #tpu.memory_space<vmem>>, vector<512x512xbf16>
    %cst = arith.constant dense<0.000000e+00> : vector<8x512xf32>
    %6 = tpu.matmul %4, %5, %cst {dimension_numbers = #tpu.dot_dimension_numbers<[1], [0], [0], [1], [0, 0, 1, 1], [], []>} : vector<8x512xbf16>, vector<512x512xbf16>, vector<8x512xf32> -> vector<8x512xf32>
    %7 = arith.addf %3, %6 : vector<8x512xf32>
    %c0_6 = arith.constant 0 : index
    %c0_7 = arith.constant 0 : index
    %8 = vector.load %arg8[%c0_6, %c0_7] : memref<8x512xf32, #tpu.memory_space<vmem>>, vector<8x512xf32>
    tpu.vector_store %arg8[%c0_6, %c0_7], %7 {strides = array<i32>} : memref<8x512xf32, #tpu.memory_space<vmem>>, vector<8x512xf32>,
    %c8_i32 = arith.constant 8 : i32
    %9 = arith.cmpi eq, %arg2, %c8_i32 : i32
    %10 = arith.extui %9 : i1 to i32
    %c0_i32_8 = arith.constant 0 : i32
    %11 = arith.cmpi ne, %10, %c0_i32_8 : i32
    scf.if %11 {
      %c0_9 = arith.constant 0 : index
      %c0_10 = arith.constant 0 : index
      %12 = vector.load %arg8[%c0_9, %c0_10] : memref<8x512xf32, #tpu.memory_space<vmem>>, vector<8x512xf32>
      %c0_11 = arith.constant 0 : index
      %c0_12 = arith.constant 0 : index
      %13 = vector.load %arg5[%c0_11, %c0_12] : memref<1x512xf32, #tpu.memory_space<vmem>>, vector<1x512xf32>
      %14 = vector.broadcast %13 : vector<1x512xf32> to vector<8x512xf32>
      %15 = arith.mulf %12, %14 : vector<8x512xf32>
      %c0_13 = arith.constant 0 : index
      %c0_14 = arith.constant 0 : index
      %16 = vector.load %arg6[%c0_13, %c0_14] : memref<1x512xf32, #tpu.memory_space<vmem>>, vector<1x512xf32>
      %17 = vector.broadcast %16 : vector<1x512xf32> to vector<8x512xf32>
      %18 = arith.addf %15, %17 : vector<8x512xf32>
      %c0_15 = arith.constant 0 : index
      %c0_16 = arith.constant 0 : index
      %19 = vector.load %arg7[%c0_15, %c0_16] : memref<8x512xf32, #tpu.memory_space<vmem>>, vector<8x512xf32>
      %20 = arith.addf %18, %19 : vector<8x512xf32>
      %cst_17 = arith.constant 0.000000e+00 : f32
      %21 = vector.broadcast %cst_17 : f32 to vector<8x512xf32>
      %22 = arith.maximumf %20, %21 : vector<8x512xf32>
      %c0_18 = arith.constant 0 : index
      %c0_19 = arith.constant 0 : index
      %23 = vector.load %arg8[%c0_18, %c0_19] : memref<8x512xf32, #tpu.memory_space<vmem>>, vector<8x512xf32>
      tpu.vector_store %arg8[%c0_18, %c0_19], %22 {strides = array<i32>} : memref<8x512xf32, #tpu.memory_space<vmem>>, vector<8x512xf32>,
    } else {
    }
    return
  }
  func.func @transform_0(%arg0: i32, %arg1: i32, %arg2: i32) -> (i32, i32) {
    %c0_i32 = arith.constant 0 : i32
    return %arg0, %arg2 : i32, i32
  }
  func.func @transform_1(%arg0: i32, %arg1: i32, %arg2: i32) -> (i32, i32) {
    %c0_i32 = arith.constant 0 : i32
    return %arg2, %arg1 : i32, i32
  }
  func.func @transform_2(%arg0: i32, %arg1: i32, %arg2: i32) -> (i32, i32) {
    %c0_i32 = arith.constant 0 : i32
    %c0_i32_0 = arith.constant 0 : i32
    return %c0_i32, %arg1 : i32, i32
  }
  func.func @transform_3(%arg0: i32, %arg1: i32, %arg2: i32) -> (i32, i32) {
    %c0_i32 = arith.constant 0 : i32
    %c0_i32_0 = arith.constant 0 : i32
    return %c0_i32, %arg1 : i32, i32
  }
  func.func @transform_4(%arg0: i32, %arg1: i32, %arg2: i32) -> (i32, i32) {
    %c0_i32 = arith.constant 0 : i32
    return %arg0, %arg1 : i32, i32
  }
  func.func @transform_5(%arg0: i32, %arg1: i32, %arg2: i32) -> (i32, i32) {
    %c0_i32 = arith.constant 0 : i32
    return %arg0, %arg1 : i32, i32
  }
}

module attributes {stable_mosaic.version = 11 : i64} {
  func.func @_matmul_fused_kernel(%arg0: i32, %arg1: i32, %arg2: i32, %arg3: memref<8x512xbf16, #tpu.memory_space<vmem>>, %arg4: memref<512x512xbf16, #tpu.memory_space<vmem>>, %arg5: memref<1x512xf32, #tpu.memory_space<vmem>>, %arg6: memref<1x512xf32, #tpu.memory_space<vmem>>, %arg7: memref<8x512xf32, #tpu.memory_space<vmem>>) attributes {dimension_semantics = [#tpu.dimension_semantics<parallel>, #tpu.dimension_semantics<parallel>, #tpu.dimension_semantics<arbitrary>], iteration_bounds = array<i64: 1, 1, 9>, scalar_prefetch = 0 : i64, scratch_operands = 0 : i64, tpu.core_type = #tpu.core_type<tc>, window_params = [{transform_indices = @transform_0, window_bounds = array<i64: 8, 512>}, {transform_indices = @transform_1, window_bounds = array<i64: 512, 512>}, {transform_indices = @transform_2, window_bounds = array<i64: 1, 512>}, {transform_indices = @transform_3, window_bounds = array<i64: 1, 512>}, {transform_indices = @transform_4, window_bounds = array<i64: 8, 512>}]} {
    %c0_i32 = arith.constant 0 : i32
    %0 = arith.cmpi eq, %arg2, %c0_i32 : i32
    %1 = arith.extui %0 : i1 to i32
    %c0_i32_0 = arith.constant 0 : i32
    %2 = arith.cmpi ne, %1, %c0_i32_0 : i32
    scf.if %2 {
      %cst_9 = arith.constant 0.000000e+00 : f32
      %12 = vector.broadcast %cst_9 : f32 to vector<8x512xf32>
      %c0_10 = arith.constant 0 : index
      %c0_11 = arith.constant 0 : index
      %13 = vector.load %arg7[%c0_10, %c0_11] : memref<8x512xf32, #tpu.memory_space<vmem>>, vector<8x512xf32>
      tpu.vector_store %arg7[%c0_10, %c0_11], %12 {strides = array<i32>} : memref<8x512xf32, #tpu.memory_space<vmem>>, vector<8x512xf32>,
    } else {
    }
    %c0 = arith.constant 0 : index
    %c0_1 = arith.constant 0 : index
    %3 = vector.load %arg7[%c0, %c0_1] : memref<8x512xf32, #tpu.memory_space<vmem>>, vector<8x512xf32>
    %c0_2 = arith.constant 0 : index
    %c0_3 = arith.constant 0 : index
    %4 = vector.load %arg3[%c0_2, %c0_3] : memref<8x512xbf16, #tpu.memory_space<vmem>>, vector<8x512xbf16>
    %c0_4 = arith.constant 0 : index
    %c0_5 = arith.constant 0 : index
    %5 = vector.load %arg4[%c0_4, %c0_5] : memref<512x512xbf16, #tpu.memory_space<vmem>>, vector<512x512xbf16>
    %cst = arith.constant dense<0.000000e+00> : vector<8x512xf32>
    %6 = tpu.matmul %4, %5, %cst {dimension_numbers = #tpu.dot_dimension_numbers<[1], [0], [0], [1], [0, 0, 1, 1], [], []>} : vector<8x512xbf16>, vector<512x512xbf16>, vector<8x512xf32> -> vector<8x512xf32>
    %7 = arith.addf %3, %6 : vector<8x512xf32>
    %c0_6 = arith.constant 0 : index
    %c0_7 = arith.constant 0 : index
    %8 = vector.load %arg7[%c0_6, %c0_7] : memref<8x512xf32, #tpu.memory_space<vmem>>, vector<8x512xf32>
    tpu.vector_store %arg7[%c0_6, %c0_7], %7 {strides = array<i32>} : memref<8x512xf32, #tpu.memory_space<vmem>>, vector<8x512xf32>,
    %c8_i32 = arith.constant 8 : i32
    %9 = arith.cmpi eq, %arg2, %c8_i32 : i32
    %10 = arith.extui %9 : i1 to i32
    %c0_i32_8 = arith.constant 0 : i32
    %11 = arith.cmpi ne, %10, %c0_i32_8 : i32
    scf.if %11 {
      %c0_9 = arith.constant 0 : index
      %c0_10 = arith.constant 0 : index
      %12 = vector.load %arg7[%c0_9, %c0_10] : memref<8x512xf32, #tpu.memory_space<vmem>>, vector<8x512xf32>
      %c0_11 = arith.constant 0 : index
      %c0_12 = arith.constant 0 : index
      %13 = vector.load %arg5[%c0_11, %c0_12] : memref<1x512xf32, #tpu.memory_space<vmem>>, vector<1x512xf32>
      %14 = vector.broadcast %13 : vector<1x512xf32> to vector<8x512xf32>
      %15 = arith.mulf %12, %14 : vector<8x512xf32>
      %c0_13 = arith.constant 0 : index
      %c0_14 = arith.constant 0 : index
      %16 = vector.load %arg6[%c0_13, %c0_14] : memref<1x512xf32, #tpu.memory_space<vmem>>, vector<1x512xf32>
      %17 = vector.broadcast %16 : vector<1x512xf32> to vector<8x512xf32>
      %18 = arith.addf %15, %17 : vector<8x512xf32>
      %cst_15 = arith.constant 0.000000e+00 : f32
      %19 = vector.broadcast %cst_15 : f32 to vector<8x512xf32>
      %20 = arith.maximumf %18, %19 : vector<8x512xf32>
      %c0_16 = arith.constant 0 : index
      %c0_17 = arith.constant 0 : index
      %21 = vector.load %arg7[%c0_16, %c0_17] : memref<8x512xf32, #tpu.memory_space<vmem>>, vector<8x512xf32>
      tpu.vector_store %arg7[%c0_16, %c0_17], %20 {strides = array<i32>} : memref<8x512xf32, #tpu.memory_space<vmem>>, vector<8x512xf32>,
    } else {
    }
    return
  }
  func.func @transform_0(%arg0: i32, %arg1: i32, %arg2: i32) -> (i32, i32) {
    %c0_i32 = arith.constant 0 : i32
    return %arg0, %arg2 : i32, i32
  }
  func.func @transform_1(%arg0: i32, %arg1: i32, %arg2: i32) -> (i32, i32) {
    %c0_i32 = arith.constant 0 : i32
    return %arg2, %arg1 : i32, i32
  }
  func.func @transform_2(%arg0: i32, %arg1: i32, %arg2: i32) -> (i32, i32) {
    %c0_i32 = arith.constant 0 : i32
    %c0_i32_0 = arith.constant 0 : i32
    return %c0_i32, %arg1 : i32, i32
  }
  func.func @transform_3(%arg0: i32, %arg1: i32, %arg2: i32) -> (i32, i32) {
    %c0_i32 = arith.constant 0 : i32
    %c0_i32_0 = arith.constant 0 : i32
    return %c0_i32, %arg1 : i32, i32
  }
  func.func @transform_4(%arg0: i32, %arg1: i32, %arg2: i32) -> (i32, i32) {
    %c0_i32 = arith.constant 0 : i32
    return %arg0, %arg1 : i32, i32
  }
}

module attributes {stable_mosaic.version = 11 : i64} {
  func.func @_avgpool_kernel(%arg0: i32, %arg1: memref<8x1x128xf32, #tpu.memory_space<vmem>>, %arg2: memref<8x128xf32, #tpu.memory_space<vmem>>) attributes {dimension_semantics = [#tpu.dimension_semantics<parallel>], iteration_bounds = array<i64: 4>, scalar_prefetch = 0 : i64, scratch_operands = 0 : i64, tpu.core_type = #tpu.core_type<tc>, window_params = [{transform_indices = @transform_0, window_bounds = array<i64: 8, 1, 128>}, {transform_indices = @transform_1, window_bounds = array<i64: 8, 128>}]} {
    %c0 = arith.constant 0 : index
    %c0_0 = arith.constant 0 : index
    %c0_1 = arith.constant 0 : index
    %0 = vector.load %arg1[%c0, %c0_0, %c0_1] : memref<8x1x128xf32, #tpu.memory_space<vmem>>, vector<8x1x128xf32>
    %cst = arith.constant dense<0.000000e+00> : vector<8x128xf32>
    %1 = vector.multi_reduction <add>, %0, %cst [1] : vector<8x1x128xf32> to vector<8x128xf32>
    %cst_2 = arith.constant 1.000000e+00 : f32
    %2 = vector.broadcast %cst_2 : f32 to vector<8x128xf32>
    %3 = arith.mulf %1, %2 : vector<8x128xf32>
    %c0_3 = arith.constant 0 : index
    %c0_4 = arith.constant 0 : index
    %4 = vector.load %arg2[%c0_3, %c0_4] : memref<8x128xf32, #tpu.memory_space<vmem>>, vector<8x128xf32>
    tpu.vector_store %arg2[%c0_3, %c0_4], %3 {strides = array<i32>} : memref<8x128xf32, #tpu.memory_space<vmem>>, vector<8x128xf32>,
    return
  }
  func.func @transform_0(%arg0: i32) -> (i32, i32, i32) {
    %c0_i32 = arith.constant 0 : i32
    %c0_i32_0 = arith.constant 0 : i32
    %c0_i32_1 = arith.constant 0 : i32
    return %c0_i32, %c0_i32_0, %arg0 : i32, i32, i32
  }
  func.func @transform_1(%arg0: i32) -> (i32, i32) {
    %c0_i32 = arith.constant 0 : i32
    %c0_i32_0 = arith.constant 0 : i32
    return %c0_i32, %arg0 : i32, i32
  }
}

module attributes {stable_mosaic.version = 11 : i64} {
  func.func @_matmul_fused_kernel(%arg0: i32, %arg1: i32, %arg2: i32, %arg3: memref<8x512xbf16, #tpu.memory_space<vmem>>, %arg4: memref<512x128xbf16, #tpu.memory_space<vmem>>, %arg5: memref<1x128xf32, #tpu.memory_space<vmem>>, %arg6: memref<1x128xf32, #tpu.memory_space<vmem>>, %arg7: memref<8x128xf32, #tpu.memory_space<vmem>>) attributes {dimension_semantics = [#tpu.dimension_semantics<parallel>, #tpu.dimension_semantics<parallel>, #tpu.dimension_semantics<arbitrary>], iteration_bounds = array<i64: 1, 1, 1>, scalar_prefetch = 0 : i64, scratch_operands = 0 : i64, tpu.core_type = #tpu.core_type<tc>, window_params = [{transform_indices = @transform_0, window_bounds = array<i64: 8, 512>}, {transform_indices = @transform_1, window_bounds = array<i64: 512, 128>}, {transform_indices = @transform_2, window_bounds = array<i64: 1, 128>}, {transform_indices = @transform_3, window_bounds = array<i64: 1, 128>}, {transform_indices = @transform_4, window_bounds = array<i64: 8, 128>}]} {
    %c0_i32 = arith.constant 0 : i32
    %0 = arith.cmpi eq, %arg2, %c0_i32 : i32
    %1 = arith.extui %0 : i1 to i32
    %c0_i32_0 = arith.constant 0 : i32
    %2 = arith.cmpi ne, %1, %c0_i32_0 : i32
    scf.if %2 {
      %cst_10 = arith.constant 0.000000e+00 : f32
      %12 = vector.broadcast %cst_10 : f32 to vector<8x128xf32>
      %c0_11 = arith.constant 0 : index
      %c0_12 = arith.constant 0 : index
      %13 = vector.load %arg7[%c0_11, %c0_12] : memref<8x128xf32, #tpu.memory_space<vmem>>, vector<8x128xf32>
      tpu.vector_store %arg7[%c0_11, %c0_12], %12 {strides = array<i32>} : memref<8x128xf32, #tpu.memory_space<vmem>>, vector<8x128xf32>,
    } else {
    }
    %c0 = arith.constant 0 : index
    %c0_1 = arith.constant 0 : index
    %3 = vector.load %arg7[%c0, %c0_1] : memref<8x128xf32, #tpu.memory_space<vmem>>, vector<8x128xf32>
    %c0_2 = arith.constant 0 : index
    %c0_3 = arith.constant 0 : index
    %4 = vector.load %arg3[%c0_2, %c0_3] : memref<8x512xbf16, #tpu.memory_space<vmem>>, vector<8x512xbf16>
    %c0_4 = arith.constant 0 : index
    %c0_5 = arith.constant 0 : index
    %5 = vector.load %arg4[%c0_4, %c0_5] : memref<512x128xbf16, #tpu.memory_space<vmem>>, vector<512x128xbf16>
    %cst = arith.constant dense<0.000000e+00> : vector<8x128xf32>
    %6 = tpu.matmul %4, %5, %cst {dimension_numbers = #tpu.dot_dimension_numbers<[1], [0], [0], [1], [0, 0, 1, 1], [], []>} : vector<8x512xbf16>, vector<512x128xbf16>, vector<8x128xf32> -> vector<8x128xf32>
    %7 = arith.addf %3, %6 : vector<8x128xf32>
    %c0_6 = arith.constant 0 : index
    %c0_7 = arith.constant 0 : index
    %8 = vector.load %arg7[%c0_6, %c0_7] : memref<8x128xf32, #tpu.memory_space<vmem>>, vector<8x128xf32>
    tpu.vector_store %arg7[%c0_6, %c0_7], %7 {strides = array<i32>} : memref<8x128xf32, #tpu.memory_space<vmem>>, vector<8x128xf32>,
    %c0_i32_8 = arith.constant 0 : i32
    %9 = arith.cmpi eq, %arg2, %c0_i32_8 : i32
    %10 = arith.extui %9 : i1 to i32
    %c0_i32_9 = arith.constant 0 : i32
    %11 = arith.cmpi ne, %10, %c0_i32_9 : i32
    scf.if %11 {
      %c0_10 = arith.constant 0 : index
      %c0_11 = arith.constant 0 : index
      %12 = vector.load %arg7[%c0_10, %c0_11] : memref<8x128xf32, #tpu.memory_space<vmem>>, vector<8x128xf32>
      %c0_12 = arith.constant 0 : index
      %c0_13 = arith.constant 0 : index
      %13 = vector.load %arg5[%c0_12, %c0_13] : memref<1x128xf32, #tpu.memory_space<vmem>>, vector<1x128xf32>
      %14 = vector.broadcast %13 : vector<1x128xf32> to vector<8x128xf32>
      %15 = arith.mulf %12, %14 : vector<8x128xf32>
      %c0_14 = arith.constant 0 : index
      %c0_15 = arith.constant 0 : index
      %16 = vector.load %arg6[%c0_14, %c0_15] : memref<1x128xf32, #tpu.memory_space<vmem>>, vector<1x128xf32>
      %17 = vector.broadcast %16 : vector<1x128xf32> to vector<8x128xf32>
      %18 = arith.addf %15, %17 : vector<8x128xf32>
      %c0_16 = arith.constant 0 : index
      %c0_17 = arith.constant 0 : index
      %19 = vector.load %arg7[%c0_16, %c0_17] : memref<8x128xf32, #tpu.memory_space<vmem>>, vector<8x128xf32>
      tpu.vector_store %arg7[%c0_16, %c0_17], %18 {strides = array<i32>} : memref<8x128xf32, #tpu.memory_space<vmem>>, vector<8x128xf32>,
    } else {
    }
    return
  }
  func.func @transform_0(%arg0: i32, %arg1: i32, %arg2: i32) -> (i32, i32) {
    %c0_i32 = arith.constant 0 : i32
    return %arg0, %arg2 : i32, i32
  }
  func.func @transform_1(%arg0: i32, %arg1: i32, %arg2: i32) -> (i32, i32) {
    %c0_i32 = arith.constant 0 : i32
    return %arg2, %arg1 : i32, i32
  }
  func.func @transform_2(%arg0: i32, %arg1: i32, %arg2: i32) -> (i32, i32) {
    %c0_i32 = arith.constant 0 : i32
    %c0_i32_0 = arith.constant 0 : i32
    return %c0_i32, %arg1 : i32, i32
  }
  func.func @transform_3(%arg0: i32, %arg1: i32, %arg2: i32) -> (i32, i32) {
    %c0_i32 = arith.constant 0 : i32
    %c0_i32_0 = arith.constant 0 : i32
    return %c0_i32, %arg1 : i32, i32
  }
  func.func @transform_4(%arg0: i32, %arg1: i32, %arg2: i32) -> (i32, i32) {
    %c0_i32 = arith.constant 0 : i32
    return %arg0, %arg1 : i32, i32
  }
}

</mosaic_0001>

<bundles_post_ra>
// kernel: tomato_leaf_net.23
= control target key start
LH: loop header
LB: loop body
LE: loop exit
PB: predicated region body
PF: predicated region fallthrough
CT: control target
= control target key end

     0   :  { %v1677_v0 = vmov 0   ;;  %vm578_vm0 = vcmask 154624   ;;  %vm675_vm1 = vcmask 1040384   ;;  %vm676_vm2 = vcmask 1041408   ;;  %s2288_s1 = inlined_call_operand.vmem [shape: bf16[147,128], index: 1, kind: input, shape index: {}]   ;;  %s2289_s0 = inlined_call_operand.vmem [shape: bf16[512,147], index: 0, kind: input, shape index: {}]   ;;  %s2290_s2 = inlined_call_operand.vmem [shape: f32[1,128], index: 2, kind: input, shape index: {}]   ;;  %s2291_s3 = inlined_call_operand.vmem [shape: f32[1,128], index: 3, kind: input, shape index: {}]   ;;  %s2292_s4 = inlined_call_operand.vmem [shape: f32[512,128], index: 4, kind: output, shape index: {}]  }
   0x1   :  { %682 = vmatprep.subr.bf16.mxu0 %v1677_v0  ;;  %1548 = vmatprep.subr.bf16.mxu1 %v1677_v0  ;;  %v1571_v1 = vld [vmem:[%s2288_s1] sm:$0xff]   ;;  %v1572_v2 = vld [vmem:[%s2288_s1 + $0x8] sm:$0xff]   ;;  %v1573_v3 = vld [vmem:[%s2288_s1 + $0x10] sm:$0xff]   ;;  %v1678_v11 = vmov 65535  }
   0x2   :  { %683 = vmatpush1.bf16.msra.mxu0 %v1571_v1  ;;  %1558 = vmatpush1.bf16.msra.mxu1 %v1571_v1  ;;  %v1574_v4 = vld [vmem:[%s2288_s1 + $0x18] sm:$0xff]   ;;  %v1583_v5 = vld [vmem:[%s2289_s0 + $0x4] ss:$8 sps:$4 sm:$0xff]   ;;  %v1577_v9 = vld [vmem:[%s2288_s1 + $0x30] sm:$0xff]   ;;  %v677_v12 = vsel %vm675_vm1, 4294967295, %v1678_v11 }
   0x3   :  { %684 = vmatprep.subr.bf16.mxu0 %v1677_v0  ;;  %1549 = vmatprep.subr.bf16.mxu1 %v1677_v0  ;;  %v1586_v6 = vld [vmem:[%s2289_s0 + $0x104] ss:$8 sps:$4 sm:$0xff]   ;;  %v1578_v10 = vld [vmem:[%s2288_s1 + $0x38] sm:$0xff]   ;;  %v1580_v14 = vld [vmem:[%s2288_s1 + $0x48] ss:$0 sps:$4 sm:$0x33]  }
   0x4   :  { %1514 = vmatprep.mubr.msk.bf16.mxu0 %vm578_vm0, %v1583_v5  ;;  %v1575_v7 = vld [vmem:[%s2288_s1 + $0x20] sm:$0xff]   ;;  %1530 = vmatprep.mubr.msk.bf16.mxu1 %vm578_vm0, %v1586_v6  ;;  %v1576_v8 = vld [vmem:[%s2288_s1 + $0x28] sm:$0xff]   ;;  %v678_v15 = vsel %vm676_vm2, %v677_v12, 0  ;;  %v1587_v19 = vld [vmem:[%s2289_s0 + $0x14] ss:$8 sps:$4 sm:$0xff]  }
   0x5   :  { %v1579_v13 = vld [vmem:[%s2288_s1 + $0x40] sm:$0xff]   ;;  %v680_v16 = vand.u32 %v1580_v14, %v678_v15  ;;  %v1589_v20 = vld [vmem:[%s2289_s0 + $0x114] ss:$8 sps:$4 sm:$0xff]   ;;  %v1591_v21 = vld [vmem:[%s2289_s0 + $0x10] ss:$8 sps:$4 sm:$0xff]  }
   0x6   :  { %685 = vmatpush1.bf16.msra.mxu0 %v1572_v2  ;;  %1559 = vmatpush1.bf16.msra.mxu1 %v1572_v2  ;;  %v1581_v17 = vld [vmem:[%s2289_s0] ss:$8 sps:$4 sm:$0xff]   ;;  %v1592_v22 = vld [vmem:[%s2289_s0 + $0x110] ss:$8 sps:$4 sm:$0xff]   ;;  %v1593_v23 = vld [vmem:[%s2289_s0 + $0x24] ss:$8 sps:$4 sm:$0xff]  }
   0x7   :  { %686 = vmatprep.subr.bf16.mxu0 %v1677_v0  ;;  %1550 = vmatprep.subr.bf16.mxu1 %v1677_v0  ;;  %v1584_v18 = vld [vmem:[%s2289_s0 + $0x100] ss:$8 sps:$4 sm:$0xff]   ;;  %v1595_v24 = vld [vmem:[%s2289_s0 + $0x124] ss:$8 sps:$4 sm:$0xff]   ;;  %v1599_v27 = vld [vmem:[%s2289_s0 + $0x34] ss:$8 sps:$4 sm:$0xff]  }
   0x8   :  { %v1597_v25 = vld [vmem:[%s2289_s0 + $0x20] ss:$8 sps:$4 sm:$0xff]   ;;  %v1601_v28 = vld [vmem:[%s2289_s0 + $0x134] ss:$8 sps:$4 sm:$0xff]   ;;  %v1603_v29 = vld [vmem:[%s2289_s0 + $0x30] ss:$8 sps:$4 sm:$0xff]  }
   0x9   :  { %v1598_v26 = vld [vmem:[%s2289_s0 + $0x120] ss:$8 sps:$4 sm:$0xff]   ;;  %v1604_v30 = vld [vmem:[%s2289_s0 + $0x130] ss:$8 sps:$4 sm:$0xff]   ;;  %v1605_v31 = vld [vmem:[%s2289_s0 + $0x44] ss:$8 sps:$4 sm:$0xff]  }
   0xa   :  { %687 = vmatpush1.bf16.msra.mxu0 %v1573_v3  ;;  %1560 = vmatpush1.bf16.msra.mxu1 %v1573_v3  ;;  %v1607_v32 = vld [vmem:[%s2289_s0 + $0x144] ss:$8 sps:$4 sm:$0xff]   ;;  %v1609_v33 = vld [vmem:[%s2289_s0 + $0x40] ss:$8 sps:$4 sm:$0xff]   ;;  %v1611_v35 = vld [vmem:[%s2289_s0 + $0x54] ss:$8 sps:$4 sm:$0xff]  }
   0xb   :  { %688 = vmatprep.subr.bf16.mxu0 %v1677_v0  ;;  %1551 = vmatprep.subr.bf16.mxu1 %v1677_v0  ;;  %v1610_v34 = vld [vmem:[%s2289_s0 + $0x140] ss:$8 sps:$4 sm:$0xff]   ;;  %v1613_v36 = vld [vmem:[%s2289_s0 + $0x154] ss:$8 sps:$4 sm:$0xff]   ;;  %v1615_v37 = vld [vmem:[%s2289_s0 + $0x50] ss:$8 sps:$4 sm:$0xff]  }
   0xc   :  { %v1616_v38 = vld [vmem:[%s2289_s0 + $0x150] ss:$8 sps:$4 sm:$0xff]   ;;  %v1617_v39 = vld [vmem:[%s2289_s0 + $0x64] ss:$8 sps:$4 sm:$0xff]   ;;  %v1621_v41 = vld [vmem:[%s2289_s0 + $0x60] ss:$8 sps:$4 sm:$0xff]  }
   0xd   :  { %v1619_v40 = vld [vmem:[%s2289_s0 + $0x164] ss:$8 sps:$4 sm:$0xff]   ;;  %v1622_v42 = vld [vmem:[%s2289_s0 + $0x160] ss:$8 sps:$4 sm:$0xff]   ;;  %v1623_v43 = vld [vmem:[%s2289_s0 + $0x74] ss:$8 sps:$4 sm:$0xff]  }
   0xe   :  { %689 = vmatpush1.bf16.msra.mxu0 %v1574_v4  ;;  %1561 = vmatpush1.bf16.msra.mxu1 %v1574_v4  ;;  %v1625_v44 = vld [vmem:[%s2289_s0 + $0x174] ss:$8 sps:$4 sm:$0xff]   ;;  %v1627_v45 = vld [vmem:[%s2289_s0 + $0x70] ss:$8 sps:$4 sm:$0xff]   ;;  %v1629_v47 = vld [vmem:[%s2289_s0 + $0x84] ss:$8 sps:$4 sm:$0xff]  }
   0xf   :  { %690 = vmatprep.subr.bf16.mxu0 %v1677_v0  ;;  %1552 = vmatprep.subr.bf16.mxu1 %v1677_v0  ;;  %v1628_v46 = vld [vmem:[%s2289_s0 + $0x170] ss:$8 sps:$4 sm:$0xff]   ;;  %v1631_v48 = vld [vmem:[%s2289_s0 + $0x184] ss:$8 sps:$4 sm:$0xff]   ;;  %v1633_v49 = vld [vmem:[%s2289_s0 + $0x80] ss:$8 sps:$4 sm:$0xff]  }
  0x10   :  { %v1634_v50 = vld [vmem:[%s2289_s0 + $0x180] ss:$8 sps:$4 sm:$0xff]   ;;  %v1635_v51 = vld [vmem:[%s2289_s0 + $0x94] ss:$8 sps:$4 sm:$0xff]   ;;  %v1639_v53 = vld [vmem:[%s2289_s0 + $0x90] ss:$8 sps:$4 sm:$0xff]  }
  0x11   :  { %v1637_v52 = vld [vmem:[%s2289_s0 + $0x194] ss:$8 sps:$4 sm:$0xff]   ;;  %v1640_v54 = vld [vmem:[%s2289_s0 + $0x190] ss:$8 sps:$4 sm:$0xff]   ;;  %v1641_v55 = vld [vmem:[%s2289_s0 + $0xa4] ss:$8 sps:$4 sm:$0xff]  }
  0x12   :  { %691 = vmatpush1.bf16.msra.mxu0 %v1575_v7  ;;  %1562 = vmatpush1.bf16.msra.mxu1 %v1575_v7  ;;  %v1643_v56 = vld [vmem:[%s2289_s0 + $0x1a4] ss:$8 sps:$4 sm:$0xff]   ;;  %v1645_v57 = vld [vmem:[%s2289_s0 + $0xa0] ss:$8 sps:$4 sm:$0xff]   ;;  %v1647_v59 = vld [vmem:[%s2289_s0 + $0xb4] ss:$8 sps:$4 sm:$0xff]  }
  0x13   :  { %692 = vmatprep.subr.bf16.mxu0 %v1677_v0  ;;  %1553 = vmatprep.subr.bf16.mxu1 %v1677_v0  ;;  %v1646_v58 = vld [vmem:[%s2289_s0 + $0x1a0] ss:$8 sps:$4 sm:$0xff]   ;;  %v1649_v60 = vld [vmem:[%s2289_s0 + $0x1b4] ss:$8 sps:$4 sm:$0xff]   ;;  %v1651_v61 = vld [vmem:[%s2289_s0 + $0xb0] ss:$8 sps:$4 sm:$0xff]  }
  0x14   :  { %v1652_v62 = vld [vmem:[%s2289_s0 + $0x1b0] ss:$8 sps:$4 sm:$0xff]   ;;  %v1653_v63 = vld [vmem:[%s2289_s0 + $0xc4] ss:$8 sps:$4 sm:$0xff]   ;;  %v1657_v1 = vld [vmem:[%s2289_s0 + $0xc0] ss:$8 sps:$4 sm:$0xff]  }
  0x15   :  { %v1658_v2 = vld [vmem:[%s2289_s0 + $0x1c0] ss:$8 sps:$4 sm:$0xff]   ;;  %v1659_v3 = vld [vmem:[%s2289_s0 + $0xd4] ss:$8 sps:$4 sm:$0xff]   ;;  %v1663_v5 = vld [vmem:[%s2289_s0 + $0xd0] ss:$8 sps:$4 sm:$0xff]  }
  0x16   :  { %693 = vmatpush1.bf16.msra.mxu0 %v1576_v8  ;;  %1563 = vmatpush1.bf16.msra.mxu1 %v1576_v8  ;;  %v1661_v4 = vld [vmem:[%s2289_s0 + $0x1d4] ss:$8 sps:$4 sm:$0xff]   ;;  %v1664_v6 = vld [vmem:[%s2289_s0 + $0x1d0] ss:$8 sps:$4 sm:$0xff]   ;;  %v1665_v7 = vld [vmem:[%s2289_s0 + $0xe4] ss:$8 sps:$4 sm:$0xff]  }
  0x17   :  { %694 = vmatprep.subr.bf16.mxu0 %v1677_v0  ;;  %1554 = vmatprep.subr.bf16.mxu1 %v1677_v0  ;;  %v1667_v8 = vld [vmem:[%s2289_s0 + $0x1e4] ss:$8 sps:$4 sm:$0xff]   ;;  %v1671_v11 = vld [vmem:[%s2289_s0 + $0xf4] ss:$8 sps:$4 sm:$0xff]   ;;  %v1676_v14 = vld [vmem:[%s2289_s0 + $0x1f0] ss:$8 sps:$4 sm:$0xff]  }
  0x18   :  { %v1673_v12 = vld [vmem:[%s2289_s0 + $0x1f4] ss:$8 sps:$4 sm:$0xff]  }
  0x1a   :  { %695 = vmatpush1.bf16.msra.mxu0 %v1577_v9  ;;  %1564 = vmatpush1.bf16.msra.mxu1 %v1577_v9  ;;  %v1669_v9 = vld [vmem:[%s2289_s0 + $0xe0] ss:$8 sps:$4 sm:$0xff]  }
  0x1b   :  { %696 = vmatprep.subr.bf16.mxu0 %v1677_v0  ;;  %1555 = vmatprep.subr.bf16.mxu1 %v1677_v0 }
  0x1e   :  { %697 = vmatpush1.bf16.msra.mxu0 %v1578_v10  ;;  %1565 = vmatpush1.bf16.msra.mxu1 %v1578_v10  ;;  %v1670_v10 = vld [vmem:[%s2289_s0 + $0x1e0] ss:$8 sps:$4 sm:$0xff]  }
  0x1f   :  { %698 = vmatprep.subr.bf16.mxu0 %v1677_v0  ;;  %1556 = vmatprep.subr.bf16.mxu1 %v1677_v0 }
  0x22   :  { %699 = vmatpush1.bf16.msra.mxu0 %v1579_v13  ;;  %1566 = vmatpush1.bf16.msra.mxu1 %v1579_v13  ;;  %v1675_v13 = vld [vmem:[%s2289_s0 + $0xf0] ss:$8 sps:$4 sm:$0xff]  }
  0x23   :  { %700 = vmatprep.subr.bf16.mxu0 %v1677_v0  ;;  %1557 = vmatprep.subr.bf16.mxu1 %v1677_v0  ;;  %v1655_v0 = vld [vmem:[%s2289_s0 + $0x1c4] ss:$8 sps:$4 sm:$0xff]  }
  0x26   :  { %701 = vmatpush1.bf16.msra.mxu0 %v680_v16  ;;  %1567 = vmatpush1.bf16.msra.mxu1 %v680_v16  ;;  %v1961_v16 = vld [vmem:[%s2290_s2] ss:$0 sm:$0xff] }
  0x29   :  { %715 = vmatmul.mubr.bf16.vlgmr.msra.gmra.mrb[0].mxu0 %v1581_v17  ;;  %843 = vmatmul.mubr.bf16.vlgmr.msra.gmra.mrb[0].mxu1 %v1584_v18 }
  0x2a   :  { %1515 = vmatprep.mubr.msk.bf16.mxu0 %vm578_vm0, %v1587_v19  ;;  %1531 = vmatprep.mubr.msk.bf16.mxu1 %vm578_vm0, %v1589_v20  ;;  %v1966_v20 = vld [vmem:[%s2291_s3] ss:$0 sm:$0xff] }
  0x31   :  { %723 = vmatmul.mubr.bf16.gmra.mrb[4].mxu0 %v1591_v21  ;;  %851 = vmatmul.mubr.bf16.gmra.mrb[4].mxu1 %v1592_v22 }
  0x32   :  { %1516 = vmatprep.mubr.msk.bf16.mxu0 %vm578_vm0, %v1593_v23  ;;  %1532 = vmatprep.mubr.msk.bf16.mxu1 %vm578_vm0, %v1595_v24 }
  0x39   :  { %731 = vmatmul.mubr.bf16.gmra.mrb[8].mxu0 %v1597_v25  ;;  %859 = vmatmul.mubr.bf16.gmra.mrb[8].mxu1 %v1598_v26 }
  0x3a   :  { %1517 = vmatprep.mubr.msk.bf16.mxu0 %vm578_vm0, %v1599_v27  ;;  %1533 = vmatprep.mubr.msk.bf16.mxu1 %vm578_vm0, %v1601_v28 }
  0x41   :  { %739 = vmatmul.mubr.bf16.gmra.mrb[12].mxu0 %v1603_v29  ;;  %867 = vmatmul.mubr.bf16.gmra.mrb[12].mxu1 %v1604_v30 }
  0x42   :  { %1518 = vmatprep.mubr.msk.bf16.mxu0 %vm578_vm0, %v1605_v31  ;;  %1534 = vmatprep.mubr.msk.bf16.mxu1 %vm578_vm0, %v1607_v32 }
  0x49   :  { %747 = vmatmul.mubr.bf16.gmra.mrb[16].mxu0 %v1609_v33  ;;  %875 = vmatmul.mubr.bf16.gmra.mrb[16].mxu1 %v1610_v34 }
  0x4a   :  { %1519 = vmatprep.mubr.msk.bf16.mxu0 %vm578_vm0, %v1611_v35  ;;  %1535 = vmatprep.mubr.msk.bf16.mxu1 %vm578_vm0, %v1613_v36 }
  0x51   :  { %755 = vmatmul.mubr.bf16.gmra.mrb[20].mxu0 %v1615_v37  ;;  %883 = vmatmul.mubr.bf16.gmra.mrb[20].mxu1 %v1616_v38 }
  0x52   :  { %1520 = vmatprep.mubr.msk.bf16.mxu0 %vm578_vm0, %v1617_v39  ;;  %1536 = vmatprep.mubr.msk.bf16.mxu1 %vm578_vm0, %v1619_v40 }
  0x59   :  { %763 = vmatmul.mubr.bf16.gmra.mrb[24].mxu0 %v1621_v41  ;;  %891 = vmatmul.mubr.bf16.gmra.mrb[24].mxu1 %v1622_v42 }
  0x5a   :  { %1521 = vmatprep.mubr.msk.bf16.mxu0 %vm578_vm0, %v1623_v43  ;;  %1537 = vmatprep.mubr.msk.bf16.mxu1 %vm578_vm0, %v1625_v44 }
  0x61   :  { %771 = vmatmul.mubr.bf16.gmra.mrb[28].mxu0 %v1627_v45  ;;  %899 = vmatmul.mubr.bf16.gmra.mrb[28].mxu1 %v1628_v46 }
  0x62   :  { %1522 = vmatprep.mubr.msk.bf16.mxu0 %vm578_vm0, %v1629_v47  ;;  %1538 = vmatprep.mubr.msk.bf16.mxu1 %vm578_vm0, %v1631_v48 }
  0x69   :  { %779 = vmatmul.mubr.bf16.gmra.mrb[32].mxu0 %v1633_v49  ;;  %907 = vmatmul.mubr.bf16.gmra.mrb[32].mxu1 %v1634_v50 }
  0x6a   :  { %1523 = vmatprep.mubr.msk.bf16.mxu0 %vm578_vm0, %v1635_v51  ;;  %1539 = vmatprep.mubr.msk.bf16.mxu1 %vm578_vm0, %v1637_v52 }
  0x71   :  { %787 = vmatmul.mubr.bf16.gmra.mrb[36].mxu0 %v1639_v53  ;;  %915 = vmatmul.mubr.bf16.gmra.mrb[36].mxu1 %v1640_v54 }
  0x72   :  { %1524 = vmatprep.mubr.msk.bf16.mxu0 %vm578_vm0, %v1641_v55  ;;  %1540 = vmatprep.mubr.msk.bf16.mxu1 %vm578_vm0, %v1643_v56 }
  0x79   :  { %795 = vmatmul.mubr.bf16.gmra.mrb[40].mxu0 %v1645_v57  ;;  %923 = vmatmul.mubr.bf16.gmra.mrb[40].mxu1 %v1646_v58 }
  0x7a   :  { %1525 = vmatprep.mubr.msk.bf16.mxu0 %vm578_vm0, %v1647_v59  ;;  %1541 = vmatprep.mubr.msk.bf16.mxu1 %vm578_vm0, %v1649_v60 }
  0x81   :  { %803 = vmatmul.mubr.bf16.gmra.mrb[44].mxu0 %v1651_v61  ;;  %931 = vmatmul.mubr.bf16.gmra.mrb[44].mxu1 %v1652_v62 }
  0x82   :  { %1526 = vmatprep.mubr.msk.bf16.mxu0 %vm578_vm0, %v1653_v63  ;;  %1542 = vmatprep.mubr.msk.bf16.mxu1 %vm578_vm0, %v1655_v0 }
  0x89   :  { %811 = vmatmul.mubr.bf16.gmra.mrb[48].mxu0 %v1657_v1  ;;  %939 = vmatmul.mubr.bf16.gmra.mrb[48].mxu1 %v1658_v2 }
  0x8a   :  { %1527 = vmatprep.mubr.msk.bf16.mxu0 %vm578_vm0, %v1659_v3  ;;  %1543 = vmatprep.mubr.msk.bf16.mxu1 %vm578_vm0, %v1661_v4 }
  0x91   :  { %819 = vmatmul.mubr.bf16.gmra.mrb[52].mxu0 %v1663_v5  ;;  %947 = vmatmul.mubr.bf16.gmra.mrb[52].mxu1 %v1664_v6 }
  0x92   :  { %1528 = vmatprep.mubr.msk.bf16.mxu0 %vm578_vm0, %v1665_v7  ;;  %1544 = vmatprep.mubr.msk.bf16.mxu1 %vm578_vm0, %v1667_v8 }
  0x99   :  { %827 = vmatmul.mubr.bf16.gmra.mrb[56].mxu0 %v1669_v9  ;;  %955 = vmatmul.mubr.bf16.gmra.mrb[56].mxu1 %v1670_v10 }
  0x9a   :  { %1529 = vmatprep.mubr.msk.bf16.mxu0 %vm578_vm0, %v1671_v11  ;;  %1545 = vmatprep.mubr.msk.bf16.mxu1 %vm578_vm0, %v1673_v12 }
  0xa1   :  { %835 = vmatmul.mubr.bf16.gmra.mrb[60].mxu0 %v1675_v13  ;;  %963 = vmatmul.mubr.bf16.gmra.mrb[60].mxu1 %v1676_v14 }
  0xfc   :  { %v716_v15 = vpop.f32.mrb[0].mxu0  ;;  %v844_v17 = vpop.f32.mrb[0].mxu1 }
  0xfd   :  { %v718_v18 = vpop.f32.mrb[1].mxu0  ;;  %v846_v19 = vpop.f32.mrb[1].mxu1  ;;  %v1173_v23 = vmul.f32 %v1961_v16, %v716_v15  ;;  %v1205_v24 = vmul.f32 %v1961_v16, %v844_v17 }
  0xfe   :  { %v719_v21 = vpop.f32.mrb[2].mxu0  ;;  %v847_v22 = vpop.f32.mrb[2].mxu1 }
  0xff   :  { %v721_v25 = vpop.f32.mrb[3].mxu0  ;;  %v849_v26 = vpop.f32.mrb[3].mxu1  ;;  %v1244_v27 = vadd.f32 %v1966_v20, %v1173_v23  ;;  %v1276_v28 = vadd.f32 %v1966_v20, %v1205_v24  ;;  %v1174_v29 = vmul.f32 %v1961_v16, %v719_v21  ;;  %v1206_v30 = vmul.f32 %v1961_v16, %v847_v22 }
 0x101   :  { %v1308_v31 = vmax.f32 %v1244_v27, 0.0  ;;  %v1340_v32 = vmax.f32 %v1276_v28, 0.0  ;;  %v1245_v33 = vadd.f32 %v1966_v20, %v1174_v29  ;;  %v1277_v34 = vadd.f32 %v1966_v20, %v1206_v30 }
 0x103   :  { %1372 = vst [vmem:[%s2292_s4] sm:$0xff] %v1308_v31  ;;  %1404 = vst [vmem:[%s2292_s4 + $0x100] sm:$0xff] %v1340_v32  ;;  %v1309_v37 = vmax.f32 %v1245_v33, 0.0  ;;  %v1341_v38 = vmax.f32 %v1277_v34, 0.0 }
 0x104   :  { %v724_v35 = vpop.f32.mrb[4].mxu0  ;;  %v852_v36 = vpop.f32.mrb[4].mxu1 }
 0x105   :  { %v726_v39 = vpop.f32.mrb[5].mxu0  ;;  %v854_v40 = vpop.f32.mrb[5].mxu1  ;;  %1373 = vst [vmem:[%s2292_s4 + $0x8] sm:$0xff] %v1309_v37  ;;  %1405 = vst [vmem:[%s2292_s4 + $0x108] sm:$0xff] %v1341_v38  ;;  %v1175_v43 = vmul.f32 %v1961_v16, %v724_v35  ;;  %v1207_v44 = vmul.f32 %v1961_v16, %v852_v36 }
 0x106   :  { %v727_v41 = vpop.f32.mrb[6].mxu0  ;;  %v855_v42 = vpop.f32.mrb[6].mxu1 }
 0x107   :  { %v729_v45 = vpop.f32.mrb[7].mxu0  ;;  %v857_v46 = vpop.f32.mrb[7].mxu1  ;;  %v1246_v47 = vadd.f32 %v1966_v20, %v1175_v43  ;;  %v1278_v48 = vadd.f32 %v1966_v20, %v1207_v44  ;;  %v1176_v49 = vmul.f32 %v1961_v16, %v727_v41  ;;  %v1208_v50 = vmul.f32 %v1961_v16, %v855_v42 }
 0x109   :  { %v1310_v51 = vmax.f32 %v1246_v47, 0.0  ;;  %v1342_v52 = vmax.f32 %v1278_v48, 0.0  ;;  %v1247_v53 = vadd.f32 %v1966_v20, %v1176_v49  ;;  %v1279_v54 = vadd.f32 %v1966_v20, %v1208_v50 }
 0x10b   :  { %1374 = vst [vmem:[%s2292_s4 + $0x10] sm:$0xff] %v1310_v51  ;;  %1406 = vst [vmem:[%s2292_s4 + $0x110] sm:$0xff] %v1342_v52  ;;  %v1311_v57 = vmax.f32 %v1247_v53, 0.0  ;;  %v1343_v58 = vmax.f32 %v1279_v54, 0.0 }
 0x10c   :  { %v732_v55 = vpop.f32.mrb[8].mxu0  ;;  %v860_v56 = vpop.f32.mrb[8].mxu1 }
 0x10d   :  { %v734_v59 = vpop.f32.mrb[9].mxu0  ;;  %v862_v60 = vpop.f32.mrb[9].mxu1  ;;  %1375 = vst [vmem:[%s2292_s4 + $0x18] sm:$0xff] %v1311_v57  ;;  %1407 = vst [vmem:[%s2292_s4 + $0x118] sm:$0xff] %v1343_v58  ;;  %v1177_v63 = vmul.f32 %v1961_v16, %v732_v55  ;;  %v1209_v0 = vmul.f32 %v1961_v16, %v860_v56 }
 0x10e   :  { %v735_v61 = vpop.f32.mrb[10].mxu0  ;;  %v863_v62 = vpop.f32.mrb[10].mxu1 }
 0x10f   :  { %v737_v1 = vpop.f32.mrb[11].mxu0  ;;  %v865_v2 = vpop.f32.mrb[11].mxu1  ;;  %v1248_v3 = vadd.f32 %v1966_v20, %v1177_v63  ;;  %v1280_v4 = vadd.f32 %v1966_v20, %v1209_v0  ;;  %v1178_v5 = vmul.f32 %v1961_v16, %v735_v61  ;;  %v1210_v6 = vmul.f32 %v1961_v16, %v863_v62 }
 0x111   :  { %v1312_v7 = vmax.f32 %v1248_v3, 0.0  ;;  %v1344_v8 = vmax.f32 %v1280_v4, 0.0  ;;  %v1249_v9 = vadd.f32 %v1966_v20, %v1178_v5  ;;  %v1281_v10 = vadd.f32 %v1966_v20, %v1210_v6 }
 0x113   :  { %1376 = vst [vmem:[%s2292_s4 + $0x20] sm:$0xff] %v1312_v7  ;;  %1408 = vst [vmem:[%s2292_s4 + $0x120] sm:$0xff] %v1344_v8  ;;  %v1313_v13 = vmax.f32 %v1249_v9, 0.0  ;;  %v1345_v14 = vmax.f32 %v1281_v10, 0.0 }
 0x114   :  { %v740_v11 = vpop.f32.mrb[12].mxu0  ;;  %v868_v12 = vpop.f32.mrb[12].mxu1 }
 0x115   :  { %v742_v15 = vpop.f32.mrb[13].mxu0  ;;  %v870_v17 = vpop.f32.mrb[13].mxu1  ;;  %1377 = vst [vmem:[%s2292_s4 + $0x28] sm:$0xff] %v1313_v13  ;;  %1409 = vst [vmem:[%s2292_s4 + $0x128] sm:$0xff] %v1345_v14  ;;  %v1179_v21 = vmul.f32 %v1961_v16, %v740_v11  ;;  %v1211_v22 = vmul.f32 %v1961_v16, %v868_v12 }
 0x116   :  { %v743_v18 = vpop.f32.mrb[14].mxu0  ;;  %v871_v19 = vpop.f32.mrb[14].mxu1 }
 0x117   :  { %v745_v23 = vpop.f32.mrb[15].mxu0  ;;  %v873_v24 = vpop.f32.mrb[15].mxu1  ;;  %v1250_v25 = vadd.f32 %v1966_v20, %v1179_v21  ;;  %v1282_v26 = vadd.f32 %v1966_v20, %v1211_v22  ;;  %v1180_v27 = vmul.f32 %v1961_v16, %v743_v18  ;;  %v1212_v28 = vmul.f32 %v1961_v16, %v871_v19 }
 0x119   :  { %v1314_v29 = vmax.f32 %v1250_v25, 0.0  ;;  %v1346_v30 = vmax.f32 %v1282_v26, 0.0  ;;  %v1251_v31 = vadd.f32 %v1966_v20, %v1180_v27  ;;  %v1283_v32 = vadd.f32 %v1966_v20, %v1212_v28 }
 0x11b   :  { %1378 = vst [vmem:[%s2292_s4 + $0x30] sm:$0xff] %v1314_v29  ;;  %1410 = vst [vmem:[%s2292_s4 + $0x130] sm:$0xff] %v1346_v30  ;;  %v1315_v35 = vmax.f32 %v1251_v31, 0.0  ;;  %v1347_v36 = vmax.f32 %v1283_v32, 0.0 }
 0x11c   :  { %v748_v33 = vpop.f32.mrb[16].mxu0  ;;  %v876_v34 = vpop.f32.mrb[16].mxu1 }
 0x11d   :  { %v750_v37 = vpop.f32.mrb[17].mxu0  ;;  %v878_v38 = vpop.f32.mrb[17].mxu1  ;;  %1379 = vst [vmem:[%s2292_s4 + $0x38] sm:$0xff] %v1315_v35  ;;  %1411 = vst [vmem:[%s2292_s4 + $0x138] sm:$0xff] %v1347_v36  ;;  %v1181_v41 = vmul.f32 %v1961_v16, %v748_v33  ;;  %v1213_v42 = vmul.f32 %v1961_v16, %v876_v34 }
 0x11e   :  { %v751_v39 = vpop.f32.mrb[18].mxu0  ;;  %v879_v40 = vpop.f32.mrb[18].mxu1 }
 0x11f   :  { %v753_v43 = vpop.f32.mrb[19].mxu0  ;;  %v881_v44 = vpop.f32.mrb[19].mxu1  ;;  %v1252_v45 = vadd.f32 %v1966_v20, %v1181_v41  ;;  %v1284_v46 = vadd.f32 %v1966_v20, %v1213_v42  ;;  %v1182_v47 = vmul.f32 %v1961_v16, %v751_v39  ;;  %v1214_v48 = vmul.f32 %v1961_v16, %v879_v40 }
 0x121   :  { %v1316_v49 = vmax.f32 %v1252_v45, 0.0  ;;  %v1348_v50 = vmax.f32 %v1284_v46, 0.0  ;;  %v1253_v51 = vadd.f32 %v1966_v20, %v1182_v47  ;;  %v1285_v52 = vadd.f32 %v1966_v20, %v1214_v48 }
 0x123   :  { %1380 = vst [vmem:[%s2292_s4 + $0x40] sm:$0xff] %v1316_v49  ;;  %1412 = vst [vmem:[%s2292_s4 + $0x140] sm:$0xff] %v1348_v50  ;;  %v1317_v55 = vmax.f32 %v1253_v51, 0.0  ;;  %v1349_v56 = vmax.f32 %v1285_v52, 0.0 }
 0x124   :  { %v756_v53 = vpop.f32.mrb[20].mxu0  ;;  %v884_v54 = vpop.f32.mrb[20].mxu1 }
 0x125   :  { %v758_v57 = vpop.f32.mrb[21].mxu0  ;;  %v886_v58 = vpop.f32.mrb[21].mxu1  ;;  %1381 = vst [vmem:[%s2292_s4 + $0x48] sm:$0xff] %v1317_v55  ;;  %1413 = vst [vmem:[%s2292_s4 + $0x148] sm:$0xff] %v1349_v56  ;;  %v1183_v61 = vmul.f32 %v1961_v16, %v756_v53  ;;  %v1215_v62 = vmul.f32 %v1961_v16, %v884_v54 }
 0x126   :  { %v759_v59 = vpop.f32.mrb[22].mxu0  ;;  %v887_v60 = vpop.f32.mrb[22].mxu1 }
 0x127   :  { %v761_v63 = vpop.f32.mrb[23].mxu0  ;;  %v889_v0 = vpop.f32.mrb[23].mxu1  ;;  %v1254_v1 = vadd.f32 %v1966_v20, %v1183_v61  ;;  %v1286_v2 = vadd.f32 %v1966_v20, %v1215_v62  ;;  %v1184_v3 = vmul.f32 %v1961_v16, %v759_v59  ;;  %v1216_v4 = vmul.f32 %v1961_v16, %v887_v60 }
 0x129   :  { %v1318_v5 = vmax.f32 %v1254_v1, 0.0  ;;  %v1350_v6 = vmax.f32 %v1286_v2, 0.0  ;;  %v1255_v7 = vadd.f32 %v1966_v20, %v1184_v3  ;;  %v1287_v8 = vadd.f32 %v1966_v20, %v1216_v4 }
 0x12b   :  { %1382 = vst [vmem:[%s2292_s4 + $0x50] sm:$0xff] %v1318_v5  ;;  %1414 = vst [vmem:[%s2292_s4 + $0x150] sm:$0xff] %v1350_v6  ;;  %v1319_v11 = vmax.f32 %v1255_v7, 0.0  ;;  %v1351_v12 = vmax.f32 %v1287_v8, 0.0 }
 0x12c   :  { %v764_v9 = vpop.f32.mrb[24].mxu0  ;;  %v892_v10 = vpop.f32.mrb[24].mxu1 }
 0x12d   :  { %v766_v13 = vpop.f32.mrb[25].mxu0  ;;  %v894_v14 = vpop.f32.mrb[25].mxu1  ;;  %1383 = vst [vmem:[%s2292_s4 + $0x58] sm:$0xff] %v1319_v11  ;;  %1415 = vst [vmem:[%s2292_s4 + $0x158] sm:$0xff] %v1351_v12  ;;  %v1185_v18 = vmul.f32 %v1961_v16, %v764_v9  ;;  %v1217_v19 = vmul.f32 %v1961_v16, %v892_v10 }
 0x12e   :  { %v767_v15 = vpop.f32.mrb[26].mxu0  ;;  %v895_v17 = vpop.f32.mrb[26].mxu1 }
 0x12f   :  { %v769_v21 = vpop.f32.mrb[27].mxu0  ;;  %v897_v22 = vpop.f32.mrb[27].mxu1  ;;  %v1256_v23 = vadd.f32 %v1966_v20, %v1185_v18  ;;  %v1288_v24 = vadd.f32 %v1966_v20, %v1217_v19  ;;  %v1186_v25 = vmul.f32 %v1961_v16, %v767_v15  ;;  %v1218_v26 = vmul.f32 %v1961_v16, %v895_v17 }
 0x131   :  { %v1320_v27 = vmax.f32 %v1256_v23, 0.0  ;;  %v1352_v28 = vmax.f32 %v1288_v24, 0.0  ;;  %v1257_v29 = vadd.f32 %v1966_v20, %v1186_v25  ;;  %v1289_v30 = vadd.f32 %v1966_v20, %v1218_v26 }
 0x133   :  { %1384 = vst [vmem:[%s2292_s4 + $0x60] sm:$0xff] %v1320_v27  ;;  %1416 = vst [vmem:[%s2292_s4 + $0x160] sm:$0xff] %v1352_v28  ;;  %v1321_v33 = vmax.f32 %v1257_v29, 0.0  ;;  %v1353_v34 = vmax.f32 %v1289_v30, 0.0 }
 0x134   :  { %v772_v31 = vpop.f32.mrb[28].mxu0  ;;  %v900_v32 = vpop.f32.mrb[28].mxu1 }
 0x135   :  { %v774_v35 = vpop.f32.mrb[29].mxu0  ;;  %v902_v36 = vpop.f32.mrb[29].mxu1  ;;  %1385 = vst [vmem:[%s2292_s4 + $0x68] sm:$0xff] %v1321_v33  ;;  %1417 = vst [vmem:[%s2292_s4 + $0x168] sm:$0xff] %v1353_v34  ;;  %v1187_v39 = vmul.f32 %v1961_v16, %v772_v31  ;;  %v1219_v40 = vmul.f32 %v1961_v16, %v900_v32 }
 0x136   :  { %v775_v37 = vpop.f32.mrb[30].mxu0  ;;  %v903_v38 = vpop.f32.mrb[30].mxu1 }
 0x137   :  { %v777_v41 = vpop.f32.mrb[31].mxu0  ;;  %v905_v42 = vpop.f32.mrb[31].mxu1  ;;  %v1258_v43 = vadd.f32 %v1966_v20, %v1187_v39  ;;  %v1290_v44 = vadd.f32 %v1966_v20, %v1219_v40  ;;  %v1188_v45 = vmul.f32 %v1961_v16, %v775_v37  ;;  %v1220_v46 = vmul.f32 %v1961_v16, %v903_v38 }
 0x139   :  { %v1322_v47 = vmax.f32 %v1258_v43, 0.0  ;;  %v1354_v48 = vmax.f32 %v1290_v44, 0.0  ;;  %v1259_v49 = vadd.f32 %v1966_v20, %v1188_v45  ;;  %v1291_v50 = vadd.f32 %v1966_v20, %v1220_v46 }
 0x13b   :  { %1386 = vst [vmem:[%s2292_s4 + $0x70] sm:$0xff] %v1322_v47  ;;  %1418 = vst [vmem:[%s2292_s4 + $0x170] sm:$0xff] %v1354_v48  ;;  %v1323_v53 = vmax.f32 %v1259_v49, 0.0  ;;  %v1355_v54 = vmax.f32 %v1291_v50, 0.0 }
 0x13c   :  { %v780_v51 = vpop.f32.mrb[32].mxu0  ;;  %v908_v52 = vpop.f32.mrb[32].mxu1 }
 0x13d   :  { %v782_v55 = vpop.f32.mrb[33].mxu0  ;;  %v910_v56 = vpop.f32.mrb[33].mxu1  ;;  %1387 = vst [vmem:[%s2292_s4 + $0x78] sm:$0xff] %v1323_v53  ;;  %1419 = vst [vmem:[%s2292_s4 + $0x178] sm:$0xff] %v1355_v54  ;;  %v1189_v59 = vmul.f32 %v1961_v16, %v780_v51  ;;  %v1221_v60 = vmul.f32 %v1961_v16, %v908_v52 }
 0x13e   :  { %v783_v57 = vpop.f32.mrb[34].mxu0  ;;  %v911_v58 = vpop.f32.mrb[34].mxu1 }
 0x13f   :  { %v785_v61 = vpop.f32.mrb[35].mxu0  ;;  %v913_v62 = vpop.f32.mrb[35].mxu1  ;;  %v1260_v63 = vadd.f32 %v1966_v20, %v1189_v59  ;;  %v1292_v0 = vadd.f32 %v1966_v20, %v1221_v60  ;;  %v1190_v1 = vmul.f32 %v1961_v16, %v783_v57  ;;  %v1222_v2 = vmul.f32 %v1961_v16, %v911_v58 }
 0x141   :  { %v1324_v3 = vmax.f32 %v1260_v63, 0.0  ;;  %v1356_v4 = vmax.f32 %v1292_v0, 0.0  ;;  %v1261_v5 = vadd.f32 %v1966_v20, %v1190_v1  ;;  %v1293_v6 = vadd.f32 %v1966_v20, %v1222_v2 }
 0x143   :  { %1388 = vst [vmem:[%s2292_s4 + $0x80] sm:$0xff] %v1324_v3  ;;  %1420 = vst [vmem:[%s2292_s4 + $0x180] sm:$0xff] %v1356_v4  ;;  %v1325_v9 = vmax.f32 %v1261_v5, 0.0  ;;  %v1357_v10 = vmax.f32 %v1293_v6, 0.0 }
 0x144   :  { %v788_v7 = vpop.f32.mrb[36].mxu0  ;;  %v916_v8 = vpop.f32.mrb[36].mxu1 }
 0x145   :  { %v790_v11 = vpop.f32.mrb[37].mxu0  ;;  %v918_v12 = vpop.f32.mrb[37].mxu1  ;;  %1389 = vst [vmem:[%s2292_s4 + $0x88] sm:$0xff] %v1325_v9  ;;  %1421 = vst [vmem:[%s2292_s4 + $0x188] sm:$0xff] %v1357_v10  ;;  %v1191_v15 = vmul.f32 %v1961_v16, %v788_v7  ;;  %v1223_v17 = vmul.f32 %v1961_v16, %v916_v8 }
 0x146   :  { %v791_v13 = vpop.f32.mrb[38].mxu0  ;;  %v919_v14 = vpop.f32.mrb[38].mxu1 }
 0x147   :  { %v793_v18 = vpop.f32.mrb[39].mxu0  ;;  %v921_v19 = vpop.f32.mrb[39].mxu1  ;;  %v1262_v21 = vadd.f32 %v1966_v20, %v1191_v15  ;;  %v1294_v22 = vadd.f32 %v1966_v20, %v1223_v17  ;;  %v1192_v23 = vmul.f32 %v1961_v16, %v791_v13  ;;  %v1224_v24 = vmul.f32 %v1961_v16, %v919_v14 }
 0x149   :  { %v1326_v25 = vmax.f32 %v1262_v21, 0.0  ;;  %v1358_v26 = vmax.f32 %v1294_v22, 0.0  ;;  %v1263_v27 = vadd.f32 %v1966_v20, %v1192_v23  ;;  %v1295_v28 = vadd.f32 %v1966_v20, %v1224_v24 }
 0x14b   :  { %1390 = vst [vmem:[%s2292_s4 + $0x90] sm:$0xff] %v1326_v25  ;;  %1422 = vst [vmem:[%s2292_s4 + $0x190] sm:$0xff] %v1358_v26  ;;  %v1327_v31 = vmax.f32 %v1263_v27, 0.0  ;;  %v1359_v32 = vmax.f32 %v1295_v28, 0.0 }
 0x14c   :  { %v796_v29 = vpop.f32.mrb[40].mxu0  ;;  %v924_v30 = vpop.f32.mrb[40].mxu1 }
 0x14d   :  { %v798_v33 = vpop.f32.mrb[41].mxu0  ;;  %v926_v34 = vpop.f32.mrb[41].mxu1  ;;  %1391 = vst [vmem:[%s2292_s4 + $0x98] sm:$0xff] %v1327_v31  ;;  %1423 = vst [vmem:[%s2292_s4 + $0x198] sm:$0xff] %v1359_v32  ;;  %v1193_v37 = vmul.f32 %v1961_v16, %v796_v29  ;;  %v1225_v38 = vmul.f32 %v1961_v16, %v924_v30 }
 0x14e   :  { %v799_v35 = vpop.f32.mrb[42].mxu0  ;;  %v927_v36 = vpop.f32.mrb[42].mxu1 }
 0x14f   :  { %v801_v39 = vpop.f32.mrb[43].mxu0  ;;  %v929_v40 = vpop.f32.mrb[43].mxu1  ;;  %v1264_v41 = vadd.f32 %v1966_v20, %v1193_v37  ;;  %v1296_v42 = vadd.f32 %v1966_v20, %v1225_v38  ;;  %v1194_v43 = vmul.f32 %v1961_v16, %v799_v35  ;;  %v1226_v44 = vmul.f32 %v1961_v16, %v927_v36 }
 0x151   :  { %v1328_v45 = vmax.f32 %v1264_v41, 0.0  ;;  %v1360_v46 = vmax.f32 %v1296_v42, 0.0  ;;  %v1265_v47 = vadd.f32 %v1966_v20, %v1194_v43  ;;  %v1297_v48 = vadd.f32 %v1966_v20, %v1226_v44 }
 0x153   :  { %1392 = vst [vmem:[%s2292_s4 + $0xa0] sm:$0xff] %v1328_v45  ;;  %1424 = vst [vmem:[%s2292_s4 + $0x1a0] sm:$0xff] %v1360_v46  ;;  %v1329_v51 = vmax.f32 %v1265_v47, 0.0  ;;  %v1361_v52 = vmax.f32 %v1297_v48, 0.0 }
 0x154   :  { %v804_v49 = vpop.f32.mrb[44].mxu0  ;;  %v932_v50 = vpop.f32.mrb[44].mxu1 }
 0x155   :  { %v806_v53 = vpop.f32.mrb[45].mxu0  ;;  %v934_v54 = vpop.f32.mrb[45].mxu1  ;;  %1393 = vst [vmem:[%s2292_s4 + $0xa8] sm:$0xff] %v1329_v51  ;;  %1425 = vst [vmem:[%s2292_s4 + $0x1a8] sm:$0xff] %v1361_v52  ;;  %v1195_v57 = vmul.f32 %v1961_v16, %v804_v49  ;;  %v1227_v58 = vmul.f32 %v1961_v16, %v932_v50 }
 0x156   :  { %v807_v55 = vpop.f32.mrb[46].mxu0  ;;  %v935_v56 = vpop.f32.mrb[46].mxu1 }
 0x157   :  { %v809_v59 = vpop.f32.mrb[47].mxu0  ;;  %v937_v60 = vpop.f32.mrb[47].mxu1  ;;  %v1266_v61 = vadd.f32 %v1966_v20, %v1195_v57  ;;  %v1298_v62 = vadd.f32 %v1966_v20, %v1227_v58  ;;  %v1196_v63 = vmul.f32 %v1961_v16, %v807_v55  ;;  %v1228_v0 = vmul.f32 %v1961_v16, %v935_v56 }
 0x159   :  { %v1330_v1 = vmax.f32 %v1266_v61, 0.0  ;;  %v1362_v2 = vmax.f32 %v1298_v62, 0.0  ;;  %v1267_v3 = vadd.f32 %v1966_v20, %v1196_v63  ;;  %v1299_v4 = vadd.f32 %v1966_v20, %v1228_v0 }
 0x15b   :  { %1394 = vst [vmem:[%s2292_s4 + $0xb0] sm:$0xff] %v1330_v1  ;;  %1426 = vst [vmem:[%s2292_s4 + $0x1b0] sm:$0xff] %v1362_v2  ;;  %v1331_v7 = vmax.f32 %v1267_v3, 0.0  ;;  %v1363_v8 = vmax.f32 %v1299_v4, 0.0 }
 0x15c   :  { %v812_v5 = vpop.f32.mrb[48].mxu0  ;;  %v940_v6 = vpop.f32.mrb[48].mxu1 }
 0x15d   :  { %v814_v9 = vpop.f32.mrb[49].mxu0  ;;  %v942_v10 = vpop.f32.mrb[49].mxu1  ;;  %1395 = vst [vmem:[%s2292_s4 + $0xb8] sm:$0xff] %v1331_v7  ;;  %1427 = vst [vmem:[%s2292_s4 + $0x1b8] sm:$0xff] %v1363_v8  ;;  %v1197_v13 = vmul.f32 %v1961_v16, %v812_v5  ;;  %v1229_v14 = vmul.f32 %v1961_v16, %v940_v6 }
 0x15e   :  { %v815_v11 = vpop.f32.mrb[50].mxu0  ;;  %v943_v12 = vpop.f32.mrb[50].mxu1 }
 0x15f   :  { %v817_v15 = vpop.f32.mrb[51].mxu0  ;;  %v945_v17 = vpop.f32.mrb[51].mxu1  ;;  %v1268_v18 = vadd.f32 %v1966_v20, %v1197_v13  ;;  %v1300_v19 = vadd.f32 %v1966_v20, %v1229_v14  ;;  %v1198_v21 = vmul.f32 %v1961_v16, %v815_v11  ;;  %v1230_v22 = vmul.f32 %v1961_v16, %v943_v12 }
 0x161   :  { %v1332_v23 = vmax.f32 %v1268_v18, 0.0  ;;  %v1364_v24 = vmax.f32 %v1300_v19, 0.0  ;;  %v1269_v25 = vadd.f32 %v1966_v20, %v1198_v21  ;;  %v1301_v26 = vadd.f32 %v1966_v20, %v1230_v22 }
 0x163   :  { %1396 = vst [vmem:[%s2292_s4 + $0xc0] sm:$0xff] %v1332_v23  ;;  %1428 = vst [vmem:[%s2292_s4 + $0x1c0] sm:$0xff] %v1364_v24  ;;  %v1333_v29 = vmax.f32 %v1269_v25, 0.0  ;;  %v1365_v30 = vmax.f32 %v1301_v26, 0.0 }
 0x164   :  { %v820_v27 = vpop.f32.mrb[52].mxu0  ;;  %v948_v28 = vpop.f32.mrb[52].mxu1 }
 0x165   :  { %v822_v31 = vpop.f32.mrb[53].mxu0  ;;  %v950_v32 = vpop.f32.mrb[53].mxu1  ;;  %1397 = vst [vmem:[%s2292_s4 + $0xc8] sm:$0xff] %v1333_v29  ;;  %1429 = vst [vmem:[%s2292_s4 + $0x1c8] sm:$0xff] %v1365_v30  ;;  %v1199_v35 = vmul.f32 %v1961_v16, %v820_v27  ;;  %v1231_v36 = vmul.f32 %v1961_v16, %v948_v28 }
 0x166   :  { %v823_v33 = vpop.f32.mrb[54].mxu0  ;;  %v951_v34 = vpop.f32.mrb[54].mxu1 }
 0x167   :  { %v825_v37 = vpop.f32.mrb[55].mxu0  ;;  %v953_v38 = vpop.f32.mrb[55].mxu1  ;;  %v1270_v39 = vadd.f32 %v1966_v20, %v1199_v35  ;;  %v1302_v40 = vadd.f32 %v1966_v20, %v1231_v36  ;;  %v1200_v41 = vmul.f32 %v1961_v16, %v823_v33  ;;  %v1232_v42 = vmul.f32 %v1961_v16, %v951_v34 }
 0x169   :  { %v1334_v43 = vmax.f32 %v1270_v39, 0.0  ;;  %v1366_v44 = vmax.f32 %v1302_v40, 0.0  ;;  %v1271_v45 = vadd.f32 %v1966_v20, %v1200_v41  ;;  %v1303_v46 = vadd.f32 %v1966_v20, %v1232_v42 }
 0x16b   :  { %1398 = vst [vmem:[%s2292_s4 + $0xd0] sm:$0xff] %v1334_v43  ;;  %1430 = vst [vmem:[%s2292_s4 + $0x1d0] sm:$0xff] %v1366_v44  ;;  %v1335_v49 = vmax.f32 %v1271_v45, 0.0  ;;  %v1367_v50 = vmax.f32 %v1303_v46, 0.0 }
 0x16c   :  { %v828_v47 = vpop.f32.mrb[56].mxu0  ;;  %v956_v48 = vpop.f32.mrb[56].mxu1 }
 0x16d   :  { %v830_v51 = vpop.f32.mrb[57].mxu0  ;;  %v958_v52 = vpop.f32.mrb[57].mxu1  ;;  %1399 = vst [vmem:[%s2292_s4 + $0xd8] sm:$0xff] %v1335_v49  ;;  %1431 = vst [vmem:[%s2292_s4 + $0x1d8] sm:$0xff] %v1367_v50  ;;  %v1201_v55 = vmul.f32 %v1961_v16, %v828_v47  ;;  %v1233_v56 = vmul.f32 %v1961_v16, %v956_v48 }
 0x16e   :  { %v831_v53 = vpop.f32.mrb[58].mxu0  ;;  %v959_v54 = vpop.f32.mrb[58].mxu1 }
 0x16f   :  { %v833_v57 = vpop.f32.mrb[59].mxu0  ;;  %v961_v58 = vpop.f32.mrb[59].mxu1  ;;  %v1272_v59 = vadd.f32 %v1966_v20, %v1201_v55  ;;  %v1304_v60 = vadd.f32 %v1966_v20, %v1233_v56  ;;  %v1202_v61 = vmul.f32 %v1961_v16, %v831_v53  ;;  %v1234_v62 = vmul.f32 %v1961_v16, %v959_v54 }
 0x171   :  { %v1336_v63 = vmax.f32 %v1272_v59, 0.0  ;;  %v1368_v0 = vmax.f32 %v1304_v60, 0.0  ;;  %v1273_v1 = vadd.f32 %v1966_v20, %v1202_v61  ;;  %v1305_v2 = vadd.f32 %v1966_v20, %v1234_v62 }
 0x173   :  { %1400 = vst [vmem:[%s2292_s4 + $0xe0] sm:$0xff] %v1336_v63  ;;  %1432 = vst [vmem:[%s2292_s4 + $0x1e0] sm:$0xff] %v1368_v0  ;;  %v1337_v5 = vmax.f32 %v1273_v1, 0.0  ;;  %v1369_v6 = vmax.f32 %v1305_v2, 0.0 }
 0x174   :  { %v836_v3 = vpop.f32.mrb[60].mxu0  ;;  %v964_v4 = vpop.f32.mrb[60].mxu1 }
 0x175   :  { %v838_v7 = vpop.f32.mrb[61].mxu0  ;;  %v966_v8 = vpop.f32.mrb[61].mxu1  ;;  %1401 = vst [vmem:[%s2292_s4 + $0xe8] sm:$0xff] %v1337_v5  ;;  %1433 = vst [vmem:[%s2292_s4 + $0x1e8] sm:$0xff] %v1369_v6  ;;  %v1203_v11 = vmul.f32 %v1961_v16, %v836_v3  ;;  %v1235_v12 = vmul.f32 %v1961_v16, %v964_v4 }
 0x176   :  { %v839_v9 = vpop.f32.mrb[62].mxu0  ;;  %v967_v10 = vpop.f32.mrb[62].mxu1 }
 0x177   :  { %v841_v13 = vpop.f32.mrb[63].mxu0  ;;  %v969_v14 = vpop.f32.mrb[63].mxu1  ;;  %v1274_v15 = vadd.f32 %v1966_v20, %v1203_v11  ;;  %v1306_v17 = vadd.f32 %v1966_v20, %v1235_v12  ;;  %v1204_v18 = vmul.f32 %v1961_v16, %v839_v9  ;;  %v1236_v19 = vmul.f32 %v1961_v16, %v967_v10 }
 0x179   :  { %v1338_v21 = vmax.f32 %v1274_v15, 0.0  ;;  %v1370_v22 = vmax.f32 %v1306_v17, 0.0  ;;  %v1275_v23 = vadd.f32 %v1966_v20, %v1204_v18  ;;  %v1307_v24 = vadd.f32 %v1966_v20, %v1236_v19 }
 0x17b   :  { %1402 = vst [vmem:[%s2292_s4 + $0xf0] sm:$0xff] %v1338_v21  ;;  %1434 = vst [vmem:[%s2292_s4 + $0x1f0] sm:$0xff] %v1370_v22  ;;  %v1339_v25 = vmax.f32 %v1275_v23, 0.0  ;;  %v1371_v26 = vmax.f32 %v1307_v24, 0.0 }
 0x17d   :  { %1403 = vst [vmem:[%s2292_s4 + $0xf8] sm:$0xff] %v1339_v25  ;;  %1435 = vst [vmem:[%s2292_s4 + $0x1f8] sm:$0xff] %v1371_v26 }

// kernel: tomato_leaf_net.24
= control target key start
LH: loop header
LB: loop body
LE: loop exit
PB: predicated region body
PF: predicated region fallthrough
CT: control target
= control target key end

     0   :  { %s790_s0 = inlined_call_operand.vmem [shape: f32[9,128,128], index: 0, kind: input, shape index: {}]   ;;  %s791_s1 = inlined_call_operand.vmem [shape: f32[128,128], index: 1, kind: output, shape index: {}]  }
   0x1   :  { %v8_v0 = vld [vmem:[%s790_s0] sm:$0xff]  ;;  %v9_v6 = vld [vmem:[%s790_s0 + $0x8] sm:$0xff]  ;;  %v10_v15 = vld [vmem:[%s790_s0 + $0x10] sm:$0xff] }
   0x2   :  { %v24_v1 = vld [vmem:[%s790_s0 + $0x80] sm:$0xff]  ;;  %v25_v7 = vld [vmem:[%s790_s0 + $0x88] sm:$0xff]  ;;  %v26_v16 = vld [vmem:[%s790_s0 + $0x90] sm:$0xff] }
   0x3   :  { %v40_v2 = vld [vmem:[%s790_s0 + $0x100] sm:$0xff]  ;;  %v152_v3 = vmax.f32 %v8_v0, %v24_v1  ;;  %v41_v8 = vld [vmem:[%s790_s0 + $0x108] sm:$0xff]  ;;  %v160_v10 = vmax.f32 %v9_v6, %v25_v7  ;;  %v42_v17 = vld [vmem:[%s790_s0 + $0x110] sm:$0xff]  ;;  %v168_v20 = vmax.f32 %v10_v15, %v26_v16 }
   0x4   :  { %v56_v4 = vld [vmem:[%s790_s0 + $0x180] sm:$0xff]  ;;  %v57_v13 = vld [vmem:[%s790_s0 + $0x188] sm:$0xff]  ;;  %v58_v24 = vld [vmem:[%s790_s0 + $0x190] sm:$0xff] }
   0x5   :  { %v153_v5 = vmax.f32 %v152_v3, %v40_v2  ;;  %v72_v9 = vld [vmem:[%s790_s0 + $0x200] sm:$0xff]  ;;  %v161_v14 = vmax.f32 %v160_v10, %v41_v8  ;;  %v73_v19 = vld [vmem:[%s790_s0 + $0x208] sm:$0xff]  ;;  %v169_v26 = vmax.f32 %v168_v20, %v42_v17  ;;  %v11_v27 = vld [vmem:[%s790_s0 + $0x18] sm:$0xff] }
   0x6   :  { %v88_v11 = vld [vmem:[%s790_s0 + $0x280] sm:$0xff]  ;;  %v89_v22 = vld [vmem:[%s790_s0 + $0x288] sm:$0xff]  ;;  %v27_v28 = vld [vmem:[%s790_s0 + $0x98] sm:$0xff] }
   0x7   :  { %v154_v12 = vmax.f32 %v153_v5, %v56_v4  ;;  %v104_v21 = vld [vmem:[%s790_s0 + $0x300] sm:$0xff]  ;;  %v162_v23 = vmax.f32 %v161_v14, %v57_v13  ;;  %v43_v29 = vld [vmem:[%s790_s0 + $0x118] sm:$0xff]  ;;  %v74_v33 = vld [vmem:[%s790_s0 + $0x210] sm:$0xff]  ;;  %v176_v34 = vmax.f32 %v11_v27, %v27_v28  ;;  %v170_v38 = vmax.f32 %v169_v26, %v58_v24 }
   0x8   :  { %v120_v30 = vld [vmem:[%s790_s0 + $0x380] sm:$0xff]  ;;  %v105_v36 = vld [vmem:[%s790_s0 + $0x308] sm:$0xff]  ;;  %v90_v37 = vld [vmem:[%s790_s0 + $0x290] sm:$0xff] }
   0x9   :  { %v155_v18 = vmax.f32 %v154_v12, %v72_v9  ;;  %v136_v31 = vld [vmem:[%s790_s0 + $0x400] sm:$0xff]  ;;  %v163_v32 = vmax.f32 %v162_v23, %v73_v19  ;;  %v59_v39 = vld [vmem:[%s790_s0 + $0x198] sm:$0xff]  ;;  %v177_v41 = vmax.f32 %v176_v34, %v43_v29  ;;  %v121_v46 = vld [vmem:[%s790_s0 + $0x388] sm:$0xff]  ;;  %v171_v48 = vmax.f32 %v170_v38, %v74_v33 }
   0xa   :  { %v12_v42 = vld [vmem:[%s790_s0 + $0x20] sm:$0xff]  ;;  %v137_v47 = vld [vmem:[%s790_s0 + $0x408] sm:$0xff]  ;;  %v75_v49 = vld [vmem:[%s790_s0 + $0x218] sm:$0xff] }
   0xb   :  { %v156_v25 = vmax.f32 %v155_v18, %v88_v11  ;;  %v164_v40 = vmax.f32 %v163_v32, %v89_v22  ;;  %v28_v43 = vld [vmem:[%s790_s0 + $0xa0] sm:$0xff]  ;;  %v106_v52 = vld [vmem:[%s790_s0 + $0x310] sm:$0xff]  ;;  %v91_v53 = vld [vmem:[%s790_s0 + $0x298] sm:$0xff]  ;;  %v178_v54 = vmax.f32 %v177_v41, %v59_v39  ;;  %v172_v57 = vmax.f32 %v171_v48, %v90_v37 }
   0xc   :  { %v44_v44 = vld [vmem:[%s790_s0 + $0x120] sm:$0xff]  ;;  %v184_v50 = vmax.f32 %v12_v42, %v28_v43  ;;  %v13_v59 = vld [vmem:[%s790_s0 + $0x28] sm:$0xff]  ;;  %v122_v63 = vld [vmem:[%s790_s0 + $0x390] sm:$0xff] }
   0xd   :  { %v157_v35 = vmax.f32 %v156_v25, %v104_v21  ;;  %v165_v51 = vmax.f32 %v164_v40, %v105_v36  ;;  %v60_v55 = vld [vmem:[%s790_s0 + $0x1a0] sm:$0xff]  ;;  %v29_v60 = vld [vmem:[%s790_s0 + $0xa8] sm:$0xff]  ;;  %v138_v0 = vld [vmem:[%s790_s0 + $0x410] sm:$0xff]  ;;  %v179_v1 = vmax.f32 %v178_v54, %v75_v49  ;;  %v173_v4 = vmax.f32 %v172_v57, %v106_v52 }
   0xe   :  { %v185_v58 = vmax.f32 %v184_v50, %v44_v44  ;;  %v45_v61 = vld [vmem:[%s790_s0 + $0x128] sm:$0xff]  ;;  %v76_v2 = vld [vmem:[%s790_s0 + $0x220] sm:$0xff]  ;;  %v192_v3 = vmax.f32 %v13_v59, %v29_v60  ;;  %v107_v5 = vld [vmem:[%s790_s0 + $0x318] sm:$0xff] }
   0xf   :  { %v158_v45 = vmax.f32 %v157_v35, %v120_v30  ;;  %v166_v62 = vmax.f32 %v165_v51, %v121_v46  ;;  %v92_v6 = vld [vmem:[%s790_s0 + $0x2a0] sm:$0xff]  ;;  %v61_v8 = vld [vmem:[%s790_s0 + $0x1a8] sm:$0xff]  ;;  %v180_v10 = vmax.f32 %v179_v1, %v91_v53  ;;  %v14_v12 = vld [vmem:[%s790_s0 + $0x30] sm:$0xff]  ;;  %v174_v15 = vmax.f32 %v173_v4, %v122_v63 }
  0x10   :  { %v186_v7 = vmax.f32 %v185_v58, %v60_v55  ;;  %v193_v11 = vmax.f32 %v192_v3, %v45_v61  ;;  %v30_v13 = vld [vmem:[%s790_s0 + $0xb0] sm:$0xff]  ;;  %v123_v16 = vld [vmem:[%s790_s0 + $0x398] sm:$0xff]  ;;  %v77_v19 = vld [vmem:[%s790_s0 + $0x228] sm:$0xff] }
  0x11   :  { %v159_v56 = vmax.f32 %v158_v45, %v136_v31  ;;  %v167_v9 = vmax.f32 %v166_v62, %v137_v47  ;;  %v46_v14 = vld [vmem:[%s790_s0 + $0x130] sm:$0xff]  ;;  %v139_v17 = vld [vmem:[%s790_s0 + $0x418] sm:$0xff]  ;;  %v200_v20 = vmax.f32 %v14_v12, %v30_v13  ;;  %v181_v21 = vmax.f32 %v180_v10, %v107_v5  ;;  %v108_v22 = vld [vmem:[%s790_s0 + $0x320] sm:$0xff] }
  0x12   :  { %v187_v18 = vmax.f32 %v186_v7, %v76_v2  ;;  %v93_v23 = vld [vmem:[%s790_s0 + $0x2a8] sm:$0xff]  ;;  %v194_v24 = vmax.f32 %v193_v11, %v61_v8  ;;  %v62_v25 = vld [vmem:[%s790_s0 + $0x1b0] sm:$0xff]  ;;  %v175_v26 = vmax.f32 %v174_v15, %v138_v0  ;;  %v15_v29 = vld [vmem:[%s790_s0 + $0x38] sm:$0xff] }
  0x13   :  { %280 = vst [vmem:[%s791_s1] sm:$0xff] %v159_v56  ;;  %281 = vst [vmem:[%s791_s1 + $0x8] sm:$0xff] %v167_v9  ;;  %v201_v28 = vmax.f32 %v200_v20, %v46_v14  ;;  %v31_v30 = vld [vmem:[%s790_s0 + $0xb8] sm:$0xff]  ;;  %v182_v32 = vmax.f32 %v181_v21, %v123_v16  ;;  %v124_v33 = vld [vmem:[%s790_s0 + $0x3a0] sm:$0xff] }
  0x14   :  { %v188_v27 = vmax.f32 %v187_v18, %v92_v6  ;;  %v47_v31 = vld [vmem:[%s790_s0 + $0x138] sm:$0xff]  ;;  %v140_v34 = vld [vmem:[%s790_s0 + $0x420] sm:$0xff]  ;;  %v195_v35 = vmax.f32 %v194_v24, %v77_v19  ;;  %v78_v36 = vld [vmem:[%s790_s0 + $0x230] sm:$0xff]  ;;  %v208_v37 = vmax.f32 %v15_v29, %v31_v30  ;;  %282 = vst [vmem:[%s791_s1 + $0x10] sm:$0xff] %v175_v26 }
  0x15   :  { %v109_v39 = vld [vmem:[%s790_s0 + $0x328] sm:$0xff]  ;;  %v94_v40 = vld [vmem:[%s790_s0 + $0x2b0] sm:$0xff]  ;;  %v202_v41 = vmax.f32 %v201_v28, %v62_v25  ;;  %v63_v42 = vld [vmem:[%s790_s0 + $0x1b8] sm:$0xff]  ;;  %v183_v43 = vmax.f32 %v182_v32, %v139_v17 }
  0x16   :  { %v189_v38 = vmax.f32 %v188_v27, %v108_v22  ;;  %v196_v44 = vmax.f32 %v195_v35, %v93_v23  ;;  %v209_v45 = vmax.f32 %v208_v37, %v47_v31  ;;  %v16_v46 = vld [vmem:[%s790_s0 + $0x40] sm:$0xff]  ;;  %v125_v50 = vld [vmem:[%s790_s0 + $0x3a8] sm:$0xff]  ;;  %v79_v53 = vld [vmem:[%s790_s0 + $0x238] sm:$0xff] }
  0x17   :  { %v32_v47 = vld [vmem:[%s790_s0 + $0xc0] sm:$0xff]  ;;  %v141_v51 = vld [vmem:[%s790_s0 + $0x428] sm:$0xff]  ;;  %v203_v52 = vmax.f32 %v202_v41, %v78_v36  ;;  %283 = vst [vmem:[%s791_s1 + $0x18] sm:$0xff] %v183_v43  ;;  %v110_v56 = vld [vmem:[%s790_s0 + $0x330] sm:$0xff] }
  0x18   :  { %v48_v48 = vld [vmem:[%s790_s0 + $0x140] sm:$0xff]  ;;  %v190_v49 = vmax.f32 %v189_v38, %v124_v33  ;;  %v216_v54 = vmax.f32 %v16_v46, %v32_v47  ;;  %v197_v55 = vmax.f32 %v196_v44, %v109_v39  ;;  %v95_v57 = vld [vmem:[%s790_s0 + $0x2b8] sm:$0xff]  ;;  %v210_v58 = vmax.f32 %v209_v45, %v63_v42  ;;  %v17_v63 = vld [vmem:[%s790_s0 + $0x48] sm:$0xff] }
  0x19   :  { %v64_v59 = vld [vmem:[%s790_s0 + $0x1c0] sm:$0xff]  ;;  %v204_v61 = vmax.f32 %v203_v52, %v94_v40  ;;  %v33_v0 = vld [vmem:[%s790_s0 + $0xc8] sm:$0xff]  ;;  %v126_v3 = vld [vmem:[%s790_s0 + $0x3b0] sm:$0xff] }
  0x1a   :  { %v191_v60 = vmax.f32 %v190_v49, %v140_v34  ;;  %v217_v62 = vmax.f32 %v216_v54, %v48_v48  ;;  %v49_v1 = vld [vmem:[%s790_s0 + $0x148] sm:$0xff]  ;;  %v198_v2 = vmax.f32 %v197_v55, %v125_v50  ;;  %v142_v4 = vld [vmem:[%s790_s0 + $0x430] sm:$0xff]  ;;  %v211_v5 = vmax.f32 %v210_v58, %v79_v53  ;;  %v80_v6 = vld [vmem:[%s790_s0 + $0x240] sm:$0xff] }
  0x1b   :  { %v224_v7 = vmax.f32 %v17_v63, %v33_v0  ;;  %v205_v8 = vmax.f32 %v204_v61, %v110_v56  ;;  %v111_v9 = vld [vmem:[%s790_s0 + $0x338] sm:$0xff]  ;;  %v96_v10 = vld [vmem:[%s790_s0 + $0x2c0] sm:$0xff]  ;;  %v65_v12 = vld [vmem:[%s790_s0 + $0x1c8] sm:$0xff] }
  0x1c   :  { %284 = vst [vmem:[%s791_s1 + $0x20] sm:$0xff] %v191_v60  ;;  %v218_v11 = vmax.f32 %v217_v62, %v64_v59  ;;  %v199_v13 = vmax.f32 %v198_v2, %v141_v51  ;;  %v212_v14 = vmax.f32 %v211_v5, %v95_v57  ;;  %v18_v16 = vld [vmem:[%s790_s0 + $0x50] sm:$0xff]  ;;  %v127_v20 = vld [vmem:[%s790_s0 + $0x3b8] sm:$0xff]  ;;  %v81_v23 = vld [vmem:[%s790_s0 + $0x248] sm:$0xff] }
  0x1d   :  { %v225_v15 = vmax.f32 %v224_v7, %v49_v1  ;;  %v34_v17 = vld [vmem:[%s790_s0 + $0xd0] sm:$0xff]  ;;  %v206_v19 = vmax.f32 %v205_v8, %v126_v3  ;;  %v143_v21 = vld [vmem:[%s790_s0 + $0x438] sm:$0xff]  ;;  %v112_v26 = vld [vmem:[%s790_s0 + $0x340] sm:$0xff] }
  0x1e   :  { %v50_v18 = vld [vmem:[%s790_s0 + $0x150] sm:$0xff]  ;;  %v219_v22 = vmax.f32 %v218_v11, %v80_v6  ;;  %v232_v24 = vmax.f32 %v18_v16, %v34_v17  ;;  %285 = vst [vmem:[%s791_s1 + $0x28] sm:$0xff] %v199_v13  ;;  %v213_v25 = vmax.f32 %v212_v14, %v111_v9  ;;  %v97_v27 = vld [vmem:[%s790_s0 + $0x2c8] sm:$0xff]  ;;  %v19_v33 = vld [vmem:[%s790_s0 + $0x58] sm:$0xff] }
  0x1f   :  { %v226_v28 = vmax.f32 %v225_v15, %v65_v12  ;;  %v66_v29 = vld [vmem:[%s790_s0 + $0x1d0] sm:$0xff]  ;;  %v207_v30 = vmax.f32 %v206_v19, %v142_v4  ;;  %v35_v34 = vld [vmem:[%s790_s0 + $0xd8] sm:$0xff]  ;;  %v128_v37 = vld [vmem:[%s790_s0 + $0x3c0] sm:$0xff] }
  0x20   :  { %v220_v31 = vmax.f32 %v219_v22, %v96_v10  ;;  %v233_v32 = vmax.f32 %v232_v24, %v50_v18  ;;  %v51_v35 = vld [vmem:[%s790_s0 + $0x158] sm:$0xff]  ;;  %v214_v36 = vmax.f32 %v213_v25, %v127_v20  ;;  %v144_v38 = vld [vmem:[%s790_s0 + $0x440] sm:$0xff]  ;;  %v82_v40 = vld [vmem:[%s790_s0 + $0x250] sm:$0xff]  ;;  %v240_v41 = vmax.f32 %v19_v33, %v35_v34 }
  0x21   :  { %v227_v39 = vmax.f32 %v226_v28, %v81_v23  ;;  %286 = vst [vmem:[%s791_s1 + $0x30] sm:$0xff] %v207_v30  ;;  %v113_v43 = vld [vmem:[%s790_s0 + $0x348] sm:$0xff]  ;;  %v98_v44 = vld [vmem:[%s790_s0 + $0x2d0] sm:$0xff]  ;;  %v67_v46 = vld [vmem:[%s790_s0 + $0x1d8] sm:$0xff] }
  0x22   :  { %v221_v42 = vmax.f32 %v220_v31, %v112_v26  ;;  %v234_v45 = vmax.f32 %v233_v32, %v66_v29  ;;  %v215_v47 = vmax.f32 %v214_v36, %v143_v21  ;;  %v241_v49 = vmax.f32 %v240_v41, %v51_v35  ;;  %v20_v50 = vld [vmem:[%s790_s0 + $0x60] sm:$0xff]  ;;  %v129_v54 = vld [vmem:[%s790_s0 + $0x3c8] sm:$0xff]  ;;  %v83_v57 = vld [vmem:[%s790_s0 + $0x258] sm:$0xff] }
  0x23   :  { %v228_v48 = vmax.f32 %v227_v39, %v97_v27  ;;  %v36_v51 = vld [vmem:[%s790_s0 + $0xe0] sm:$0xff]  ;;  %v145_v55 = vld [vmem:[%s790_s0 + $0x448] sm:$0xff]  ;;  %v114_v60 = vld [vmem:[%s790_s0 + $0x350] sm:$0xff] }
  0x24   :  { %v52_v52 = vld [vmem:[%s790_s0 + $0x160] sm:$0xff]  ;;  %v222_v53 = vmax.f32 %v221_v42, %v128_v37  ;;  %v235_v56 = vmax.f32 %v234_v45, %v82_v40  ;;  %v248_v58 = vmax.f32 %v20_v50, %v36_v51  ;;  %287 = vst [vmem:[%s791_s1 + $0x38] sm:$0xff] %v215_v47  ;;  %v99_v61 = vld [vmem:[%s790_s0 + $0x2d8] sm:$0xff]  ;;  %v242_v62 = vmax.f32 %v241_v49, %v67_v46  ;;  %v21_v3 = vld [vmem:[%s790_s0 + $0x68] sm:$0xff] }
  0x25   :  { %v229_v59 = vmax.f32 %v228_v48, %v113_v43  ;;  %v68_v63 = vld [vmem:[%s790_s0 + $0x1e0] sm:$0xff]  ;;  %v37_v4 = vld [vmem:[%s790_s0 + $0xe8] sm:$0xff]  ;;  %v130_v7 = vld [vmem:[%s790_s0 + $0x3d0] sm:$0xff] }
  0x26   :  { %v223_v0 = vmax.f32 %v222_v53, %v144_v38  ;;  %v236_v1 = vmax.f32 %v235_v56, %v98_v44  ;;  %v249_v2 = vmax.f32 %v248_v58, %v52_v52  ;;  %v53_v5 = vld [vmem:[%s790_s0 + $0x168] sm:$0xff]  ;;  %v146_v8 = vld [vmem:[%s790_s0 + $0x450] sm:$0xff]  ;;  %v243_v9 = vmax.f32 %v242_v62, %v83_v57  ;;  %v84_v10 = vld [vmem:[%s790_s0 + $0x260] sm:$0xff] }
  0x27   :  { %v230_v6 = vmax.f32 %v229_v59, %v129_v54  ;;  %v256_v11 = vmax.f32 %v21_v3, %v37_v4  ;;  %v115_v13 = vld [vmem:[%s790_s0 + $0x358] sm:$0xff]  ;;  %v100_v14 = vld [vmem:[%s790_s0 + $0x2e0] sm:$0xff]  ;;  %v69_v16 = vld [vmem:[%s790_s0 + $0x1e8] sm:$0xff] }
  0x28   :  { %288 = vst [vmem:[%s791_s1 + $0x40] sm:$0xff] %v223_v0  ;;  %v237_v12 = vmax.f32 %v236_v1, %v114_v60  ;;  %v250_v15 = vmax.f32 %v249_v2, %v68_v63  ;;  %v244_v18 = vmax.f32 %v243_v9, %v99_v61  ;;  %v22_v20 = vld [vmem:[%s790_s0 + $0x70] sm:$0xff]  ;;  %v131_v24 = vld [vmem:[%s790_s0 + $0x3d8] sm:$0xff]  ;;  %v85_v27 = vld [vmem:[%s790_s0 + $0x268] sm:$0xff] }
  0x29   :  { %v231_v17 = vmax.f32 %v230_v6, %v145_v55  ;;  %v257_v19 = vmax.f32 %v256_v11, %v53_v5  ;;  %v38_v21 = vld [vmem:[%s790_s0 + $0xf0] sm:$0xff]  ;;  %v147_v25 = vld [vmem:[%s790_s0 + $0x458] sm:$0xff]  ;;  %v116_v30 = vld [vmem:[%s790_s0 + $0x360] sm:$0xff] }
  0x2a   :  { %v54_v22 = vld [vmem:[%s790_s0 + $0x170] sm:$0xff]  ;;  %v238_v23 = vmax.f32 %v237_v12, %v130_v7  ;;  %v251_v26 = vmax.f32 %v250_v15, %v84_v10  ;;  %v264_v28 = vmax.f32 %v22_v20, %v38_v21  ;;  %v245_v29 = vmax.f32 %v244_v18, %v115_v13  ;;  %v101_v31 = vld [vmem:[%s790_s0 + $0x2e8] sm:$0xff]  ;;  %v23_v37 = vld [vmem:[%s790_s0 + $0x78] sm:$0xff] }
  0x2b   :  { %289 = vst [vmem:[%s791_s1 + $0x48] sm:$0xff] %v231_v17  ;;  %v258_v32 = vmax.f32 %v257_v19, %v69_v16  ;;  %v70_v33 = vld [vmem:[%s790_s0 + $0x1f0] sm:$0xff]  ;;  %v39_v38 = vld [vmem:[%s790_s0 + $0xf8] sm:$0xff]  ;;  %v132_v41 = vld [vmem:[%s790_s0 + $0x3e0] sm:$0xff] }
  0x2c   :  { %v239_v34 = vmax.f32 %v238_v23, %v146_v8  ;;  %v252_v35 = vmax.f32 %v251_v26, %v100_v14  ;;  %v265_v36 = vmax.f32 %v264_v28, %v54_v22  ;;  %v55_v39 = vld [vmem:[%s790_s0 + $0x178] sm:$0xff]  ;;  %v246_v40 = vmax.f32 %v245_v29, %v131_v24  ;;  %v86_v43 = vld [vmem:[%s790_s0 + $0x270] sm:$0xff]  ;;  %v117_v46 = vld [vmem:[%s790_s0 + $0x368] sm:$0xff] }
  0x2d   :  { %v259_v42 = vmax.f32 %v258_v32, %v85_v27  ;;  %v272_v44 = vmax.f32 %v23_v37, %v39_v38  ;;  %v71_v48 = vld [vmem:[%s790_s0 + $0x1f8] sm:$0xff]  ;;  %v148_v50 = vld [vmem:[%s790_s0 + $0x460] sm:$0xff]  ;;  %v102_v52 = vld [vmem:[%s790_s0 + $0x2f0] sm:$0xff] }
  0x2e   :  { %290 = vst [vmem:[%s791_s1 + $0x50] sm:$0xff] %v239_v34  ;;  %v253_v45 = vmax.f32 %v252_v35, %v116_v30  ;;  %v266_v47 = vmax.f32 %v265_v36, %v70_v33  ;;  %v247_v49 = vmax.f32 %v246_v40, %v147_v25  ;;  %v133_v55 = vld [vmem:[%s790_s0 + $0x3e8] sm:$0xff]  ;;  %v87_v57 = vld [vmem:[%s790_s0 + $0x278] sm:$0xff]  ;;  %v118_v59 = vld [vmem:[%s790_s0 + $0x370] sm:$0xff] }
  0x2f   :  { %v260_v51 = vmax.f32 %v259_v42, %v101_v31  ;;  %v273_v53 = vmax.f32 %v272_v44, %v55_v39  ;;  %v149_v62 = vld [vmem:[%s790_s0 + $0x468] sm:$0xff]  ;;  %v103_v0 = vld [vmem:[%s790_s0 + $0x2f8] sm:$0xff]  ;;  %v134_v2 = vld [vmem:[%s790_s0 + $0x3f0] sm:$0xff] }
  0x30   :  { %v254_v54 = vmax.f32 %v253_v45, %v132_v41  ;;  %v267_v56 = vmax.f32 %v266_v47, %v86_v43  ;;  %291 = vst [vmem:[%s791_s1 + $0x58] sm:$0xff] %v247_v49  ;;  %v119_v5 = vld [vmem:[%s790_s0 + $0x378] sm:$0xff]  ;;  %v150_v7 = vld [vmem:[%s790_s0 + $0x470] sm:$0xff] }
  0x31   :  { %v261_v58 = vmax.f32 %v260_v51, %v117_v46  ;;  %v274_v60 = vmax.f32 %v273_v53, %v71_v48  ;;  %v135_v10 = vld [vmem:[%s790_s0 + $0x3f8] sm:$0xff] }
  0x32   :  { %v255_v61 = vmax.f32 %v254_v54, %v148_v50  ;;  %v268_v63 = vmax.f32 %v267_v56, %v102_v52  ;;  %v151_v13 = vld [vmem:[%s790_s0 + $0x478] sm:$0xff] }
  0x33   :  { %v262_v1 = vmax.f32 %v261_v58, %v133_v55  ;;  %v275_v3 = vmax.f32 %v274_v60, %v87_v57 }
  0x34   :  { %292 = vst [vmem:[%s791_s1 + $0x60] sm:$0xff] %v255_v61  ;;  %v269_v4 = vmax.f32 %v268_v63, %v118_v59 }
  0x35   :  { %v263_v6 = vmax.f32 %v262_v1, %v149_v62  ;;  %v276_v8 = vmax.f32 %v275_v3, %v103_v0 }
  0x36   :  { %v270_v9 = vmax.f32 %v269_v4, %v134_v2 }
  0x37   :  { %293 = vst [vmem:[%s791_s1 + $0x68] sm:$0xff] %v263_v6  ;;  %v277_v11 = vmax.f32 %v276_v8, %v119_v5 }
  0x38   :  { %v271_v12 = vmax.f32 %v270_v9, %v150_v7 }
  0x39   :  { %v278_v14 = vmax.f32 %v277_v11, %v135_v10 }
  0x3a   :  { %294 = vst [vmem:[%s791_s1 + $0x70] sm:$0xff] %v271_v12 }
  0x3b   :  { %v279_v15 = vmax.f32 %v278_v14, %v151_v13 }
  0x3d   :  { %295 = vst [vmem:[%s791_s1 + $0x78] sm:$0xff] %v279_v15 }

// kernel: tomato_leaf_net.25
= control target key start
LH: loop header
LB: loop body
LE: loop exit
PB: predicated region body
PF: predicated region fallthrough
CT: control target
= control target key end

     0   :  { %vm590_vm0 = vcmask 523264   ;;  %s1777_s1 = inlined_call_operand.vmem [shape: bf16[576,128], index: 1, kind: input, shape index: {}]   ;;  %s1778_s0 = inlined_call_operand.vmem [shape: bf16[128,576], index: 0, kind: input, shape index: {}]   ;;  %s1779_s2 = inlined_call_operand.vmem [shape: f32[1,128], index: 2, kind: input, shape index: {}]   ;;  %s1780_s3 = inlined_call_operand.vmem [shape: f32[1,128], index: 3, kind: input, shape index: {}]   ;;  %s1781_s4 = inlined_call_operand.vmem [shape: f32[128,128], index: 4, kind: output, shape index: {}]  }
   0x1   :  { %v1298_v0 = vld [vmem:[%s1777_s1 + $0x40] sm:$0xff]   ;;  %v1302_v4 = vld [vmem:[%s1777_s1 + $0x48] sm:$0xff]   ;;  %v1306_v8 = vld [vmem:[%s1777_s1 + $0x50] sm:$0xff]  }
   0x2   :  { %v1299_v1 = vld [vmem:[%s1777_s1 + $0xc0] sm:$0xff]   ;;  %1125 = vmatprep.subr.bf16.mxu0 %v1298_v0  ;;  %v1303_v5 = vld [vmem:[%s1777_s1 + $0xc8] sm:$0xff]   ;;  %v1307_v9 = vld [vmem:[%s1777_s1 + $0xd0] sm:$0xff]  }
   0x3   :  { %v1300_v2 = vld [vmem:[%s1777_s1] sm:$0xff]   ;;  %1189 = vmatprep.subr.bf16.mxu1 %v1299_v1  ;;  %v1304_v6 = vld [vmem:[%s1777_s1 + $0x8] sm:$0xff]   ;;  %v1308_v10 = vld [vmem:[%s1777_s1 + $0x10] sm:$0xff]  }
   0x4   :  { %v1301_v3 = vld [vmem:[%s1777_s1 + $0x80] sm:$0xff]   ;;  %1126 = vmatpush3.bf16.msra.mxu0 %v1300_v2  ;;  %v1305_v7 = vld [vmem:[%s1777_s1 + $0x88] sm:$0xff]   ;;  %v1309_v11 = vld [vmem:[%s1777_s1 + $0x90] sm:$0xff]  }
   0x5   :  { %1190 = vmatpush3.bf16.msra.mxu1 %v1301_v3  ;;  %1127 = vmatprep.subr.bf16.mxu0 %v1302_v4  ;;  %v1310_v12 = vld [vmem:[%s1777_s1 + $0x58] sm:$0xff]   ;;  %v1314_v16 = vld [vmem:[%s1777_s1 + $0x60] sm:$0xff]   ;;  %v1318_v20 = vld [vmem:[%s1777_s1 + $0x68] sm:$0xff]  }
   0x6   :  { %1191 = vmatprep.subr.bf16.mxu1 %v1303_v5  ;;  %v1311_v13 = vld [vmem:[%s1777_s1 + $0xd8] sm:$0xff]   ;;  %v1315_v17 = vld [vmem:[%s1777_s1 + $0xe0] sm:$0xff]   ;;  %v1319_v21 = vld [vmem:[%s1777_s1 + $0xe8] sm:$0xff]  }
   0x7   :  { %v1312_v14 = vld [vmem:[%s1777_s1 + $0x18] sm:$0xff]   ;;  %v1316_v18 = vld [vmem:[%s1777_s1 + $0x20] sm:$0xff]   ;;  %v1320_v22 = vld [vmem:[%s1777_s1 + $0x28] sm:$0xff]  }
   0x8   :  { %1128 = vmatpush3.bf16.msra.mxu0 %v1304_v6  ;;  %v1313_v15 = vld [vmem:[%s1777_s1 + $0x98] sm:$0xff]   ;;  %v1317_v19 = vld [vmem:[%s1777_s1 + $0xa0] sm:$0xff]   ;;  %v1321_v23 = vld [vmem:[%s1777_s1 + $0xa8] sm:$0xff]  }
   0x9   :  { %1192 = vmatpush3.bf16.msra.mxu1 %v1305_v7  ;;  %1129 = vmatprep.subr.bf16.mxu0 %v1306_v8  ;;  %v1322_v24 = vld [vmem:[%s1777_s1 + $0x70] sm:$0xff]   ;;  %v1326_v28 = vld [vmem:[%s1777_s1 + $0x78] sm:$0xff]   ;;  %v1335_v35 = vld [vmem:[%s1778_s0 + $0xc] ss:$20 sps:$4 sm:$0xff]  }
   0xa   :  { %1193 = vmatprep.subr.bf16.mxu1 %v1307_v9  ;;  %v1323_v25 = vld [vmem:[%s1777_s1 + $0xf0] sm:$0xff]   ;;  %v1327_v29 = vld [vmem:[%s1777_s1 + $0xf8] sm:$0xff]   ;;  %v1336_v36 = vld [vmem:[%s1777_s1 + $0x100] sm:$0xff]   ;;  %744 = vmatprep.mubr.bf16.mxu1 %v1335_v35 }
   0xb   :  { %v1324_v26 = vld [vmem:[%s1777_s1 + $0x30] sm:$0xff]   ;;  %v1328_v30 = vld [vmem:[%s1777_s1 + $0x38] sm:$0xff]   ;;  %v1337_v37 = vld [vmem:[%s1778_s0 + $0x2c] ss:$20 sps:$4 sm:$0xff]  }
   0xc   :  { %1130 = vmatpush3.bf16.msra.mxu0 %v1308_v10  ;;  %v1325_v27 = vld [vmem:[%s1777_s1 + $0xb0] sm:$0xff]   ;;  %v1329_v31 = vld [vmem:[%s1777_s1 + $0xb8] sm:$0xff]   ;;  %v1349_v42 = vld [vmem:[%s1777_s1 + $0x108] sm:$0xff]  }
   0xd   :  { %1194 = vmatpush3.bf16.msra.mxu1 %v1309_v11  ;;  %1131 = vmatprep.subr.bf16.mxu0 %v1310_v12  ;;  %v1330_v32 = vld [vmem:[%s1778_s0] ss:$20 sps:$4 sm:$0xff]   ;;  %v1332_v33 = vld [vmem:[%s1778_s0 + $0x4] ss:$20 sps:$4 sm:$0xff]   ;;  %v1333_v34 = vld [vmem:[%s1778_s0 + $0x8] ss:$20 sps:$4 sm:$0xff]  }
   0xe   :  { %1195 = vmatprep.subr.bf16.mxu1 %v1311_v13  ;;  %647 = vmatprep.mubr.bf16.mxu0 %v1332_v33  ;;  %v1339_v38 = vld [vmem:[%s1778_s0 + $0x34] ss:$20 sps:$4 sm:$0xff]   ;;  %v1342_v40 = vld [vmem:[%s1778_s0 + $0x30] ss:$20 sps:$4 sm:$0xff]   ;;  %v1348_v45 = vld [vmem:[%s1778_s0 + $0x58] ss:$20 sps:$4 sm:$0xff]  }
   0xf   :  { %v1341_v39 = vld [vmem:[%s1778_s0 + $0x28] ss:$20 sps:$4 sm:$0xff]   ;;  %v1347_v44 = vld [vmem:[%s1778_s0 + $0x50] ss:$20 sps:$4 sm:$0xff]   ;;  %v1354_v50 = vld [vmem:[%s1778_s0 + $0x78] ss:$20 sps:$4 sm:$0xff]  }
  0x10   :  { %1132 = vmatpush3.bf16.msra.mxu0 %v1312_v14  ;;  %v1343_v41 = vld [vmem:[%s1778_s0 + $0x54] ss:$20 sps:$4 sm:$0xff]   ;;  %v1345_v43 = vld [vmem:[%s1778_s0 + $0x5c] ss:$20 sps:$4 sm:$0xff]   ;;  %v1352_v48 = vld [vmem:[%s1778_s0 + $0x84] ss:$20 sps:$4 sm:$0xff]  }
  0x11   :  { %1196 = vmatpush3.bf16.msra.mxu1 %v1313_v15  ;;  %1133 = vmatprep.subr.bf16.mxu0 %v1314_v16  ;;  %v1362_v46 = vld [vmem:[%s1777_s1 + $0x110] sm:$0xff]   ;;  %v1375_v49 = vld [vmem:[%s1777_s1 + $0x118] sm:$0xff]   ;;  %v1358_v53 = vld [vmem:[%s1778_s0 + $0xac] ss:$20 sps:$4 sm:$0xff]  }
  0x12   :  { %1197 = vmatprep.subr.bf16.mxu1 %v1315_v17  ;;  %v1350_v47 = vld [vmem:[%s1778_s0 + $0x7c] ss:$20 sps:$4 sm:$0xff]   ;;  %v1355_v51 = vld [vmem:[%s1778_s0 + $0x80] ss:$20 sps:$4 sm:$0xff]   ;;  %v1356_v52 = vld [vmem:[%s1778_s0 + $0xa4] ss:$20 sps:$4 sm:$0xff]  }
  0x13   :  { %v1360_v54 = vld [vmem:[%s1778_s0 + $0xa0] ss:$20 sps:$4 sm:$0xff]   ;;  %v1361_v55 = vld [vmem:[%s1778_s0 + $0xa8] ss:$20 sps:$4 sm:$0xff]   ;;  %v1368_v59 = vld [vmem:[%s1778_s0 + $0xd0] ss:$20 sps:$4 sm:$0xff]  }
  0x14   :  { %1134 = vmatpush3.bf16.msra.mxu0 %v1316_v18  ;;  %v1363_v56 = vld [vmem:[%s1778_s0 + $0xcc] ss:$20 sps:$4 sm:$0xff]   ;;  %v1365_v57 = vld [vmem:[%s1778_s0 + $0xd4] ss:$20 sps:$4 sm:$0xff]   ;;  %v1371_v61 = vld [vmem:[%s1778_s0 + $0xfc] ss:$20 sps:$4 sm:$0xff]  }
  0x15   :  { %1198 = vmatpush3.bf16.msra.mxu1 %v1317_v19  ;;  %1135 = vmatprep.subr.bf16.mxu0 %v1318_v20  ;;  %v1367_v58 = vld [vmem:[%s1778_s0 + $0xc8] ss:$20 sps:$4 sm:$0xff]   ;;  %v1373_v62 = vld [vmem:[%s1778_s0 + $0xf0] ss:$20 sps:$4 sm:$0xff]   ;;  %v1374_v63 = vld [vmem:[%s1778_s0 + $0xf8] ss:$20 sps:$4 sm:$0xff]  }
  0x16   :  { %1199 = vmatprep.subr.bf16.mxu1 %v1319_v21  ;;  %v1369_v60 = vld [vmem:[%s1778_s0 + $0xf4] ss:$20 sps:$4 sm:$0xff]   ;;  %v1376_v0 = vld [vmem:[%s1778_s0 + $0x11c] ss:$20 sps:$4 sm:$0xff]   ;;  %v1378_v1 = vld [vmem:[%s1778_s0 + $0x124] ss:$20 sps:$4 sm:$0xff]  }
  0x17   :  { %v1380_v2 = vld [vmem:[%s1778_s0 + $0x118] ss:$20 sps:$4 sm:$0xff]   ;;  %v1381_v3 = vld [vmem:[%s1778_s0 + $0x120] ss:$20 sps:$4 sm:$0xff]   ;;  %v1382_v4 = vld [vmem:[%s1778_s0 + $0x10] ss:$20 sps:$4 sm:$0xff]  }
  0x18   :  { %1136 = vmatpush3.bf16.msra.mxu0 %v1320_v22  ;;  %v1383_v5 = vld [vmem:[%s1778_s0 + $0xb0] ss:$20 sps:$4 sm:$0xff]   ;;  %v1384_v6 = vld [vmem:[%s1778_s0 + $0x38] ss:$20 sps:$4 sm:$0xff]   ;;  %v1386_v8 = vld [vmem:[%s1778_s0 + $0x60] ss:$20 sps:$4 sm:$0xff]  }
  0x19   :  { %1200 = vmatpush3.bf16.msra.mxu1 %v1321_v23  ;;  %1137 = vmatprep.subr.bf16.mxu0 %v1322_v24  ;;  %v1385_v7 = vld [vmem:[%s1778_s0 + $0xd8] ss:$20 sps:$4 sm:$0xff]   ;;  %v1387_v9 = vld [vmem:[%s1778_s0 + $0x100] ss:$20 sps:$4 sm:$0xff]   ;;  %v1388_v10 = vld [vmem:[%s1778_s0 + $0x88] ss:$20 sps:$4 sm:$0xff]  }
  0x1a   :  { %1201 = vmatprep.subr.bf16.mxu1 %v1323_v25  ;;  %v1389_v11 = vld [vmem:[%s1778_s0 + $0x128] ss:$20 sps:$4 sm:$0xff]  }
  0x1c   :  { %1138 = vmatpush3.bf16.msra.mxu0 %v1324_v26 }
  0x1d   :  { %1202 = vmatpush3.bf16.msra.mxu1 %v1325_v27  ;;  %1139 = vmatprep.subr.bf16.mxu0 %v1326_v28 }
  0x1e   :  { %1203 = vmatprep.subr.bf16.mxu1 %v1327_v29 }
  0x20   :  { %1140 = vmatpush3.bf16.msra.mxu0 %v1328_v30 }
  0x21   :  { %1204 = vmatpush3.bf16.msra.mxu1 %v1329_v31  ;;  %1265 = vmatprep.subr.bf16.mxu0 %v1336_v36 }
  0x22   :  { %1289 = vmatprep.subr.bf16.mxu1 %v1336_v36 }
  0x23   :  { %648 = vmatmul.mubr.bf16.vlgmr.msra.gmra.mrb[0].mxu0 %v1330_v32 }
  0x24   :  { %745 = vmatmul.mubr.bf16.vlgmr.msra.gmra.mrb[0].mxu1 %v1333_v34  ;;  %1266 = vmatpush3.bf16.msra.mxu0 %v1336_v36 }
  0x25   :  { %1293 = vmatpush3.bf16.msra.mxu1 %v1336_v36  ;;  %655 = vmatprep.mubr.bf16.mxu0 %v1337_v37 }
  0x26   :  { %752 = vmatprep.mubr.bf16.mxu1 %v1339_v38  ;;  %1267 = vmatprep.subr.bf16.mxu0 %v1349_v42 }
  0x27   :  { %1290 = vmatprep.subr.bf16.mxu1 %v1349_v42 }
  0x28   :  { %1268 = vmatpush3.bf16.msra.mxu0 %v1349_v42 }
  0x29   :  { %1294 = vmatpush3.bf16.msra.mxu1 %v1349_v42  ;;  %1269 = vmatprep.subr.bf16.mxu0 %v1362_v46 }
  0x2a   :  { %1291 = vmatprep.subr.bf16.mxu1 %v1362_v46 }
  0x2b   :  { %656 = vmatmul.mubr.bf16.gmra.mrb[4].mxu0 %v1341_v39 }
  0x2c   :  { %753 = vmatmul.mubr.bf16.gmra.mrb[4].mxu1 %v1342_v40  ;;  %663 = vmatprep.mubr.bf16.mxu0 %v1343_v41 }
  0x2d   :  { %760 = vmatprep.mubr.bf16.mxu1 %v1345_v43  ;;  %1270 = vmatpush3.bf16.msra.mxu0 %v1362_v46 }
  0x2e   :  { %1295 = vmatpush3.bf16.msra.mxu1 %v1362_v46  ;;  %1271 = vmatprep.subr.bf16.mxu0 %v1375_v49 }
  0x2f   :  { %1292 = vmatprep.subr.bf16.mxu1 %v1375_v49 }
  0x31   :  { %1272 = vmatpush3.bf16.msra.mxu0 %v1375_v49 }
  0x32   :  { %1296 = vmatpush3.bf16.msra.mxu1 %v1375_v49 }
  0x33   :  { %664 = vmatmul.mubr.bf16.gmra.mrb[8].mxu0 %v1347_v44 }
  0x34   :  { %761 = vmatmul.mubr.bf16.gmra.mrb[8].mxu1 %v1348_v45  ;;  %671 = vmatprep.mubr.bf16.mxu0 %v1350_v47 }
  0x35   :  { %768 = vmatprep.mubr.bf16.mxu1 %v1352_v48 }
  0x3b   :  { %672 = vmatmul.mubr.bf16.gmra.mrb[12].mxu0 %v1354_v50 }
  0x3c   :  { %769 = vmatmul.mubr.bf16.gmra.mrb[12].mxu1 %v1355_v51  ;;  %679 = vmatprep.mubr.bf16.mxu0 %v1356_v52 }
  0x3d   :  { %776 = vmatprep.mubr.bf16.mxu1 %v1358_v53 }
  0x43   :  { %680 = vmatmul.mubr.bf16.gmra.mrb[16].mxu0 %v1360_v54 }
  0x44   :  { %777 = vmatmul.mubr.bf16.gmra.mrb[16].mxu1 %v1361_v55  ;;  %687 = vmatprep.mubr.bf16.mxu0 %v1363_v56 }
  0x45   :  { %784 = vmatprep.mubr.bf16.mxu1 %v1365_v57 }
  0x4b   :  { %688 = vmatmul.mubr.bf16.gmra.mrb[20].mxu0 %v1367_v58 }
  0x4c   :  { %785 = vmatmul.mubr.bf16.gmra.mrb[20].mxu1 %v1368_v59  ;;  %695 = vmatprep.mubr.bf16.mxu0 %v1369_v60 }
  0x4d   :  { %792 = vmatprep.mubr.bf16.mxu1 %v1371_v61 }
  0x53   :  { %696 = vmatmul.mubr.bf16.gmra.mrb[24].mxu0 %v1373_v62 }
  0x54   :  { %793 = vmatmul.mubr.bf16.gmra.mrb[24].mxu1 %v1374_v63  ;;  %703 = vmatprep.mubr.bf16.mxu0 %v1376_v0 }
  0x55   :  { %800 = vmatprep.mubr.bf16.mxu1 %v1378_v1 }
  0x5b   :  { %704 = vmatmul.mubr.bf16.gmra.mrb[28].mxu0 %v1380_v2 }
  0x5c   :  { %801 = vmatmul.mubr.bf16.gmra.mrb[28].mxu1 %v1381_v3  ;;  %1273 = vmatprep.mubr.msk.bf16.mxu0 %vm590_vm0, %v1382_v4 }
  0x5d   :  { %1281 = vmatprep.mubr.msk.bf16.mxu1 %vm590_vm0, %v1383_v5 }
  0x63   :  { %1274 = vmatmul.mubr.msk.bf16.vlgmr.msra.gmra.mrb[32].mxu0 %vm590_vm0, %v1384_v6 }
  0x64   :  { %1282 = vmatmul.mubr.msk.bf16.vlgmr.msra.gmra.mrb[32].mxu1 %vm590_vm0, %v1385_v7  ;;  %1277 = vmatprep.mubr.msk.bf16.mxu0 %vm590_vm0, %v1386_v8 }
  0x65   :  { %1285 = vmatprep.mubr.msk.bf16.mxu1 %vm590_vm0, %v1387_v9 }
  0x6b   :  { %1278 = vmatmul.mubr.msk.bf16.gmra.mrb[36].mxu0 %vm590_vm0, %v1388_v10 }
  0x6c   :  { %1286 = vmatmul.mubr.msk.bf16.gmra.mrb[36].mxu1 %vm590_vm0, %v1389_v11 }
  0xf6   :  { %v1141_v12 = vpop.f32.mrb[0].mxu0 }
  0xf7   :  { %v1205_v13 = vpop.f32.mrb[0].mxu1  ;;  %v1142_v14 = vpop.f32.mrb[1].mxu0 }
  0xf8   :  { %v1143_v15 = vadd.f32 %v1142_v14, %v1141_v12  ;;  %v1206_v16 = vpop.f32.mrb[1].mxu1  ;;  %v1144_v17 = vpop.f32.mrb[2].mxu0 }
  0xf9   :  { %v1207_v18 = vadd.f32 %v1206_v16, %v1205_v13  ;;  %v1208_v19 = vpop.f32.mrb[2].mxu1  ;;  %v1145_v20 = vpop.f32.mrb[3].mxu0 }
  0xfa   :  { %v1146_v21 = vadd.f32 %v1145_v20, %v1144_v17  ;;  %v1209_v22 = vpop.f32.mrb[3].mxu1 }
  0xfb   :  { %v1210_v23 = vadd.f32 %v1209_v22, %v1208_v19  ;;  %v1651_v24 = vadd.f32 %v1207_v18, %v1143_v15 }
  0xfd   :  { %v1653_v25 = vadd.f32 %v1210_v23, %v1146_v21 }
  0xfe   :  { %v1147_v26 = vpop.f32.mrb[4].mxu0 }
  0xff   :  { %v1211_v27 = vpop.f32.mrb[4].mxu1  ;;  %v1148_v28 = vpop.f32.mrb[5].mxu0 }
 0x100   :  { %v1149_v29 = vadd.f32 %v1148_v28, %v1147_v26  ;;  %v1212_v30 = vpop.f32.mrb[5].mxu1  ;;  %v1150_v31 = vpop.f32.mrb[6].mxu0 }
 0x101   :  { %v1213_v32 = vadd.f32 %v1212_v30, %v1211_v27  ;;  %v1214_v33 = vpop.f32.mrb[6].mxu1  ;;  %v1151_v34 = vpop.f32.mrb[7].mxu0 }
 0x102   :  { %v1152_v35 = vadd.f32 %v1151_v34, %v1150_v31  ;;  %v1215_v36 = vpop.f32.mrb[7].mxu1 }
 0x103   :  { %v1216_v37 = vadd.f32 %v1215_v36, %v1214_v33  ;;  %v1655_v38 = vadd.f32 %v1213_v32, %v1149_v29 }
 0x105   :  { %v1657_v39 = vadd.f32 %v1216_v37, %v1152_v35 }
 0x106   :  { %v1153_v40 = vpop.f32.mrb[8].mxu0 }
 0x107   :  { %v1217_v41 = vpop.f32.mrb[8].mxu1  ;;  %v1154_v42 = vpop.f32.mrb[9].mxu0 }
 0x108   :  { %v1155_v43 = vadd.f32 %v1154_v42, %v1153_v40  ;;  %v1218_v44 = vpop.f32.mrb[9].mxu1  ;;  %v1156_v45 = vpop.f32.mrb[10].mxu0 }
 0x109   :  { %v1219_v46 = vadd.f32 %v1218_v44, %v1217_v41  ;;  %v1220_v47 = vpop.f32.mrb[10].mxu1  ;;  %v1157_v48 = vpop.f32.mrb[11].mxu0 }
 0x10a   :  { %v1158_v49 = vadd.f32 %v1157_v48, %v1156_v45  ;;  %v1221_v50 = vpop.f32.mrb[11].mxu1 }
 0x10b   :  { %v1222_v51 = vadd.f32 %v1221_v50, %v1220_v47  ;;  %v1659_v52 = vadd.f32 %v1219_v46, %v1155_v43 }
 0x10d   :  { %v1661_v53 = vadd.f32 %v1222_v51, %v1158_v49 }
 0x10e   :  { %v1159_v54 = vpop.f32.mrb[12].mxu0 }
 0x10f   :  { %v1223_v55 = vpop.f32.mrb[12].mxu1  ;;  %v1160_v56 = vpop.f32.mrb[13].mxu0 }
 0x110   :  { %v1161_v57 = vadd.f32 %v1160_v56, %v1159_v54  ;;  %v1224_v58 = vpop.f32.mrb[13].mxu1  ;;  %v1162_v59 = vpop.f32.mrb[14].mxu0 }
 0x111   :  { %v1225_v60 = vadd.f32 %v1224_v58, %v1223_v55  ;;  %v1226_v61 = vpop.f32.mrb[14].mxu1  ;;  %v1163_v62 = vpop.f32.mrb[15].mxu0 }
 0x112   :  { %v1164_v63 = vadd.f32 %v1163_v62, %v1162_v59  ;;  %v1227_v0 = vpop.f32.mrb[15].mxu1 }
 0x113   :  { %v1228_v1 = vadd.f32 %v1227_v0, %v1226_v61  ;;  %v1663_v2 = vadd.f32 %v1225_v60, %v1161_v57 }
 0x115   :  { %v1665_v3 = vadd.f32 %v1228_v1, %v1164_v63 }
 0x116   :  { %v1165_v4 = vpop.f32.mrb[16].mxu0 }
 0x117   :  { %v1229_v5 = vpop.f32.mrb[16].mxu1  ;;  %v1166_v6 = vpop.f32.mrb[17].mxu0 }
 0x118   :  { %v1167_v7 = vadd.f32 %v1166_v6, %v1165_v4  ;;  %v1230_v8 = vpop.f32.mrb[17].mxu1  ;;  %v1168_v9 = vpop.f32.mrb[18].mxu0 }
 0x119   :  { %v1231_v10 = vadd.f32 %v1230_v8, %v1229_v5  ;;  %v1232_v11 = vpop.f32.mrb[18].mxu1  ;;  %v1169_v12 = vpop.f32.mrb[19].mxu0  ;;  %v1679_v8 = vld [vmem:[%s1779_s2] ss:$0 sm:$0xff] }
 0x11a   :  { %v1170_v13 = vadd.f32 %v1169_v12, %v1168_v9  ;;  %v1233_v14 = vpop.f32.mrb[19].mxu1 }
 0x11b   :  { %v1234_v15 = vadd.f32 %v1233_v14, %v1232_v11  ;;  %v779_v16 = vadd.f32 %v1231_v10, %v1167_v7 }
 0x11d   :  { %v1667_v17 = vadd.f32 %v1234_v15, %v1170_v13 }
 0x11e   :  { %v1171_v18 = vpop.f32.mrb[20].mxu0 }
 0x11f   :  { %v1235_v19 = vpop.f32.mrb[20].mxu1  ;;  %v1172_v20 = vpop.f32.mrb[21].mxu0 }
 0x120   :  { %v1173_v21 = vadd.f32 %v1172_v20, %v1171_v18  ;;  %v1236_v22 = vpop.f32.mrb[21].mxu1  ;;  %v1174_v23 = vpop.f32.mrb[22].mxu0 }
 0x121   :  { %v1237_v26 = vadd.f32 %v1236_v22, %v1235_v19  ;;  %v1238_v27 = vpop.f32.mrb[22].mxu1  ;;  %v1175_v28 = vpop.f32.mrb[23].mxu0 }
 0x122   :  { %v1176_v29 = vadd.f32 %v1175_v28, %v1174_v23  ;;  %v1239_v30 = vpop.f32.mrb[23].mxu1 }
 0x123   :  { %v1240_v31 = vadd.f32 %v1239_v30, %v1238_v27  ;;  %v787_v32 = vadd.f32 %v1237_v26, %v1173_v21 }
 0x125   :  { %v790_v33 = vadd.f32 %v1240_v31, %v1176_v29 }
 0x126   :  { %v1177_v34 = vpop.f32.mrb[24].mxu0 }
 0x127   :  { %v1241_v35 = vpop.f32.mrb[24].mxu1  ;;  %v1178_v36 = vpop.f32.mrb[25].mxu0 }
 0x128   :  { %v1179_v37 = vadd.f32 %v1178_v36, %v1177_v34  ;;  %v1242_v40 = vpop.f32.mrb[25].mxu1  ;;  %v1180_v41 = vpop.f32.mrb[26].mxu0 }
 0x129   :  { %v1243_v42 = vadd.f32 %v1242_v40, %v1241_v35  ;;  %v1244_v43 = vpop.f32.mrb[26].mxu1  ;;  %v1181_v44 = vpop.f32.mrb[27].mxu0 }
 0x12a   :  { %v1182_v45 = vadd.f32 %v1181_v44, %v1180_v41  ;;  %v1245_v46 = vpop.f32.mrb[27].mxu1 }
 0x12b   :  { %v1246_v47 = vadd.f32 %v1245_v46, %v1244_v43  ;;  %v1669_v48 = vadd.f32 %v1243_v42, %v1179_v37 }
 0x12d   :  { %v1671_v49 = vadd.f32 %v1246_v47, %v1182_v45 }
 0x12e   :  { %v1183_v50 = vpop.f32.mrb[28].mxu0 }
 0x12f   :  { %v1247_v51 = vpop.f32.mrb[28].mxu1  ;;  %v1184_v54 = vpop.f32.mrb[29].mxu0 }
 0x130   :  { %v1185_v55 = vadd.f32 %v1184_v54, %v1183_v50  ;;  %v1248_v56 = vpop.f32.mrb[29].mxu1  ;;  %v1186_v57 = vpop.f32.mrb[30].mxu0 }
 0x131   :  { %v1249_v58 = vadd.f32 %v1248_v56, %v1247_v51  ;;  %v1250_v59 = vpop.f32.mrb[30].mxu1  ;;  %v1187_v60 = vpop.f32.mrb[31].mxu0 }
 0x132   :  { %v1188_v61 = vadd.f32 %v1187_v60, %v1186_v57  ;;  %v1251_v62 = vpop.f32.mrb[31].mxu1 }
 0x133   :  { %v1252_v63 = vadd.f32 %v1251_v62, %v1250_v59  ;;  %v803_v0 = vadd.f32 %v1249_v58, %v1185_v55 }
 0x135   :  { %v1673_v1 = vadd.f32 %v1252_v63, %v1188_v61 }
 0x136   :  { %v1275_v4 = vpop.f32.mrb[32].mxu0 }
 0x137   :  { %v852_v5 = vadd.f32 %v1275_v4, %v1655_v38  ;;  %v1283_v6 = vpop.f32.mrb[32].mxu1  ;;  %v843_v7 = vpop.f32.mrb[33].mxu0  ;;  %v1686_v38 = vld [vmem:[%s1780_s3] ss:$0 sm:$0xff] }
 0x138   :  { %v884_v9 = vadd.f32 %v1283_v6, %v787_v32  ;;  %v844_v10 = vadd.f32 %v843_v7, %v1651_v24  ;;  %v875_v11 = vpop.f32.mrb[33].mxu1  ;;  %v1276_v12 = vpop.f32.mrb[34].mxu0 }
 0x139   :  { %v876_v13 = vadd.f32 %v875_v11, %v779_v16  ;;  %v855_v14 = vadd.f32 %v1276_v12, %v1657_v39  ;;  %v1284_v15 = vpop.f32.mrb[34].mxu1  ;;  %v846_v18 = vpop.f32.mrb[35].mxu0  ;;  %v966_v22 = vmul.f32 %v1679_v8, %v852_v5 }
 0x13a   :  { %v887_v19 = vadd.f32 %v1284_v15, %v790_v33  ;;  %v847_v20 = vadd.f32 %v846_v18, %v1653_v25  ;;  %v878_v21 = vpop.f32.mrb[35].mxu1  ;;  %v974_v23 = vmul.f32 %v1679_v8, %v884_v9  ;;  %v964_v16 = vmul.f32 %v1679_v8, %v844_v10 }
 0x13b   :  { %v879_v24 = vadd.f32 %v878_v21, %v1667_v17  ;;  %v989_v39 = vadd.f32 %v1686_v38, %v966_v22  ;;  %v972_v26 = vmul.f32 %v1679_v8, %v876_v13  ;;  %v967_v27 = vmul.f32 %v1679_v8, %v855_v14 }
 0x13c   :  { %v997_v28 = vadd.f32 %v1686_v38, %v974_v23  ;;  %v987_v29 = vadd.f32 %v1686_v38, %v964_v16  ;;  %v975_v25 = vmul.f32 %v1679_v8, %v887_v19  ;;  %v965_v30 = vmul.f32 %v1679_v8, %v847_v20 }
 0x13d   :  { %v1005_v17 = vmax.f32 %v989_v39, 0.0  ;;  %v995_v32 = vadd.f32 %v1686_v38, %v972_v26  ;;  %v990_v33 = vadd.f32 %v1686_v38, %v967_v27  ;;  %v973_v34 = vmul.f32 %v1679_v8, %v879_v24 }
 0x13e   :  { %v1279_v31 = vpop.f32.mrb[36].mxu0  ;;  %v1013_v37 = vmax.f32 %v997_v28, 0.0  ;;  %v1003_v40 = vmax.f32 %v987_v29, 0.0  ;;  %v998_v41 = vadd.f32 %v1686_v38, %v975_v25  ;;  %v988_v42 = vadd.f32 %v1686_v38, %v965_v30 }
 0x13f   :  { %v1287_v35 = vpop.f32.mrb[36].mxu1  ;;  %v859_v36 = vpop.f32.mrb[37].mxu0  ;;  %1021 = vst [vmem:[%s1781_s4 + $0x10] sm:$0xff] %v1005_v17  ;;  %v1011_v45 = vmax.f32 %v995_v32, 0.0  ;;  %v1006_v46 = vmax.f32 %v990_v33, 0.0  ;;  %v996_v47 = vadd.f32 %v1686_v38, %v973_v34  ;;  %v868_v50 = vadd.f32 %v1279_v31, %v1663_v2 }
 0x140   :  { %v891_v43 = vpop.f32.mrb[37].mxu1  ;;  %v1280_v44 = vpop.f32.mrb[38].mxu0  ;;  %1029 = vst [vmem:[%s1781_s4 + $0x50] sm:$0xff] %v1013_v37  ;;  %1019 = vst [vmem:[%s1781_s4] sm:$0xff] %v1003_v40  ;;  %v1014_v55 = vmax.f32 %v998_v41, 0.0  ;;  %v1004_v56 = vmax.f32 %v988_v42, 0.0  ;;  %v900_v57 = vadd.f32 %v1287_v35, %v803_v0  ;;  %v860_v58 = vadd.f32 %v859_v36, %v1659_v52 }
 0x141   :  { %v1288_v51 = vpop.f32.mrb[38].mxu1  ;;  %v862_v54 = vpop.f32.mrb[39].mxu0  ;;  %1027 = vst [vmem:[%s1781_s4 + $0x40] sm:$0xff] %v1011_v45  ;;  %1022 = vst [vmem:[%s1781_s4 + $0x18] sm:$0xff] %v1006_v46  ;;  %v1012_v2 = vmax.f32 %v996_v47, 0.0  ;;  %v892_v60 = vadd.f32 %v891_v43, %v1669_v48  ;;  %v871_v61 = vadd.f32 %v1280_v44, %v1665_v3  ;;  %v970_v48 = vmul.f32 %v1679_v8, %v868_v50 }
 0x142   :  { %v894_v59 = vpop.f32.mrb[39].mxu1  ;;  %1030 = vst [vmem:[%s1781_s4 + $0x58] sm:$0xff] %v1014_v55  ;;  %1020 = vst [vmem:[%s1781_s4 + $0x8] sm:$0xff] %v1004_v56  ;;  %v903_v52 = vadd.f32 %v1288_v51, %v1673_v1  ;;  %v863_v62 = vadd.f32 %v862_v54, %v1661_v53  ;;  %v978_v63 = vmul.f32 %v1679_v8, %v900_v57 }
 0x143   :  { %1028 = vst [vmem:[%s1781_s4 + $0x48] sm:$0xff] %v1012_v2  ;;  %v895_v3 = vadd.f32 %v894_v59, %v1671_v49  ;;  %v968_v0 = vmul.f32 %v1679_v8, %v860_v58  ;;  %v993_v4 = vadd.f32 %v1686_v38, %v970_v48  ;;  %v976_v5 = vmul.f32 %v1679_v8, %v892_v60 }
 0x144   :  { %v971_v1 = vmul.f32 %v1679_v8, %v871_v61  ;;  %v1001_v53 = vadd.f32 %v1686_v38, %v978_v63  ;;  %v979_v7 = vmul.f32 %v1679_v8, %v903_v52  ;;  %v969_v9 = vmul.f32 %v1679_v8, %v863_v62 }
 0x145   :  { %v991_v6 = vadd.f32 %v1686_v38, %v968_v0  ;;  %v1009_v10 = vmax.f32 %v993_v4, 0.0  ;;  %v999_v49 = vadd.f32 %v1686_v38, %v976_v5  ;;  %v977_v12 = vmul.f32 %v1679_v8, %v895_v3 }
 0x146   :  { %v994_v11 = vadd.f32 %v1686_v38, %v971_v1  ;;  %v1017_v13 = vmax.f32 %v1001_v53, 0.0  ;;  %v1002_v15 = vadd.f32 %v1686_v38, %v979_v7  ;;  %v992_v18 = vadd.f32 %v1686_v38, %v969_v9 }
 0x147   :  { %v1007_v14 = vmax.f32 %v991_v6, 0.0  ;;  %1025 = vst [vmem:[%s1781_s4 + $0x30] sm:$0xff] %v1009_v10  ;;  %v1015_v19 = vmax.f32 %v999_v49, 0.0  ;;  %v1000_v21 = vadd.f32 %v1686_v38, %v977_v12 }
 0x148   :  { %v1010_v20 = vmax.f32 %v994_v11, 0.0  ;;  %1033 = vst [vmem:[%s1781_s4 + $0x70] sm:$0xff] %v1017_v13  ;;  %v1018_v8 = vmax.f32 %v1002_v15, 0.0  ;;  %v1008_v22 = vmax.f32 %v992_v18, 0.0 }
 0x149   :  { %1023 = vst [vmem:[%s1781_s4 + $0x20] sm:$0xff] %v1007_v14  ;;  %1031 = vst [vmem:[%s1781_s4 + $0x60] sm:$0xff] %v1015_v19  ;;  %v1016_v24 = vmax.f32 %v1000_v21, 0.0 }
 0x14a   :  { %1026 = vst [vmem:[%s1781_s4 + $0x38] sm:$0xff] %v1010_v20  ;;  %1034 = vst [vmem:[%s1781_s4 + $0x78] sm:$0xff] %v1018_v8 }
 0x14b   :  { %1024 = vst [vmem:[%s1781_s4 + $0x28] sm:$0xff] %v1008_v22  ;;  %1032 = vst [vmem:[%s1781_s4 + $0x68] sm:$0xff] %v1016_v24 }

// kernel: tomato_leaf_net.26
= control target key start
LH: loop header
LB: loop body
LE: loop exit
PB: predicated region body
PF: predicated region fallthrough
CT: control target
= control target key end

     0   :  { %vm593_vm0 = vcmask 523264   ;;  %s1868_s1 = inlined_call_operand.vmem [shape: bf16[576,128], index: 1, kind: input, shape index: {}]   ;;  %s1869_s0 = inlined_call_operand.vmem [shape: bf16[128,576], index: 0, kind: input, shape index: {}]   ;;  %s1870_s2 = inlined_call_operand.vmem [shape: f32[1,128], index: 2, kind: input, shape index: {}]   ;;  %s1871_s3 = inlined_call_operand.vmem [shape: f32[1,128], index: 3, kind: input, shape index: {}]   ;;  %s1872_s4 = inlined_call_operand.vmem [shape: f32[128,128], index: 4, kind: input, shape index: {}]   ;;  %s1873_s5 = inlined_call_operand.vmem [shape: f32[128,128], index: 5, kind: output, shape index: {}]  }
   0x1   :  { %v1333_v0 = vld [vmem:[%s1868_s1 + $0x40] sm:$0xff]   ;;  %v1337_v4 = vld [vmem:[%s1868_s1 + $0x48] sm:$0xff]   ;;  %v1341_v8 = vld [vmem:[%s1868_s1 + $0x50] sm:$0xff]  }
   0x2   :  { %v1334_v1 = vld [vmem:[%s1868_s1 + $0xc0] sm:$0xff]   ;;  %1160 = vmatprep.subr.bf16.mxu0 %v1333_v0  ;;  %v1338_v5 = vld [vmem:[%s1868_s1 + $0xc8] sm:$0xff]   ;;  %v1342_v9 = vld [vmem:[%s1868_s1 + $0xd0] sm:$0xff]  }
   0x3   :  { %v1335_v2 = vld [vmem:[%s1868_s1] sm:$0xff]   ;;  %1224 = vmatprep.subr.bf16.mxu1 %v1334_v1  ;;  %v1339_v6 = vld [vmem:[%s1868_s1 + $0x8] sm:$0xff]   ;;  %v1343_v10 = vld [vmem:[%s1868_s1 + $0x10] sm:$0xff]  }
   0x4   :  { %v1336_v3 = vld [vmem:[%s1868_s1 + $0x80] sm:$0xff]   ;;  %1161 = vmatpush3.bf16.msra.mxu0 %v1335_v2  ;;  %v1340_v7 = vld [vmem:[%s1868_s1 + $0x88] sm:$0xff]   ;;  %v1344_v11 = vld [vmem:[%s1868_s1 + $0x90] sm:$0xff]  }
   0x5   :  { %1225 = vmatpush3.bf16.msra.mxu1 %v1336_v3  ;;  %1162 = vmatprep.subr.bf16.mxu0 %v1337_v4  ;;  %v1345_v12 = vld [vmem:[%s1868_s1 + $0x58] sm:$0xff]   ;;  %v1349_v16 = vld [vmem:[%s1868_s1 + $0x60] sm:$0xff]   ;;  %v1353_v20 = vld [vmem:[%s1868_s1 + $0x68] sm:$0xff]  }
   0x6   :  { %1226 = vmatprep.subr.bf16.mxu1 %v1338_v5  ;;  %v1346_v13 = vld [vmem:[%s1868_s1 + $0xd8] sm:$0xff]   ;;  %v1350_v17 = vld [vmem:[%s1868_s1 + $0xe0] sm:$0xff]   ;;  %v1354_v21 = vld [vmem:[%s1868_s1 + $0xe8] sm:$0xff]  }
   0x7   :  { %v1347_v14 = vld [vmem:[%s1868_s1 + $0x18] sm:$0xff]   ;;  %v1351_v18 = vld [vmem:[%s1868_s1 + $0x20] sm:$0xff]   ;;  %v1355_v22 = vld [vmem:[%s1868_s1 + $0x28] sm:$0xff]  }
   0x8   :  { %1163 = vmatpush3.bf16.msra.mxu0 %v1339_v6  ;;  %v1348_v15 = vld [vmem:[%s1868_s1 + $0x98] sm:$0xff]   ;;  %v1352_v19 = vld [vmem:[%s1868_s1 + $0xa0] sm:$0xff]   ;;  %v1356_v23 = vld [vmem:[%s1868_s1 + $0xa8] sm:$0xff]  }
   0x9   :  { %1227 = vmatpush3.bf16.msra.mxu1 %v1340_v7  ;;  %1164 = vmatprep.subr.bf16.mxu0 %v1341_v8  ;;  %v1357_v24 = vld [vmem:[%s1868_s1 + $0x70] sm:$0xff]   ;;  %v1361_v28 = vld [vmem:[%s1868_s1 + $0x78] sm:$0xff]   ;;  %v1370_v35 = vld [vmem:[%s1869_s0 + $0xc] ss:$20 sps:$4 sm:$0xff]  }
   0xa   :  { %1228 = vmatprep.subr.bf16.mxu1 %v1342_v9  ;;  %v1358_v25 = vld [vmem:[%s1868_s1 + $0xf0] sm:$0xff]   ;;  %v1362_v29 = vld [vmem:[%s1868_s1 + $0xf8] sm:$0xff]   ;;  %v1371_v36 = vld [vmem:[%s1868_s1 + $0x100] sm:$0xff]   ;;  %747 = vmatprep.mubr.bf16.mxu1 %v1370_v35 }
   0xb   :  { %v1359_v26 = vld [vmem:[%s1868_s1 + $0x30] sm:$0xff]   ;;  %v1363_v30 = vld [vmem:[%s1868_s1 + $0x38] sm:$0xff]   ;;  %v1372_v37 = vld [vmem:[%s1869_s0 + $0x2c] ss:$20 sps:$4 sm:$0xff]  }
   0xc   :  { %1165 = vmatpush3.bf16.msra.mxu0 %v1343_v10  ;;  %v1360_v27 = vld [vmem:[%s1868_s1 + $0xb0] sm:$0xff]   ;;  %v1364_v31 = vld [vmem:[%s1868_s1 + $0xb8] sm:$0xff]   ;;  %v1384_v42 = vld [vmem:[%s1868_s1 + $0x108] sm:$0xff]  }
   0xd   :  { %1229 = vmatpush3.bf16.msra.mxu1 %v1344_v11  ;;  %1166 = vmatprep.subr.bf16.mxu0 %v1345_v12  ;;  %v1365_v32 = vld [vmem:[%s1869_s0] ss:$20 sps:$4 sm:$0xff]   ;;  %v1367_v33 = vld [vmem:[%s1869_s0 + $0x4] ss:$20 sps:$4 sm:$0xff]   ;;  %v1368_v34 = vld [vmem:[%s1869_s0 + $0x8] ss:$20 sps:$4 sm:$0xff]  }
   0xe   :  { %1230 = vmatprep.subr.bf16.mxu1 %v1346_v13  ;;  %650 = vmatprep.mubr.bf16.mxu0 %v1367_v33  ;;  %v1374_v38 = vld [vmem:[%s1869_s0 + $0x34] ss:$20 sps:$4 sm:$0xff]   ;;  %v1377_v40 = vld [vmem:[%s1869_s0 + $0x30] ss:$20 sps:$4 sm:$0xff]   ;;  %v1383_v45 = vld [vmem:[%s1869_s0 + $0x58] ss:$20 sps:$4 sm:$0xff]  }
   0xf   :  { %v1376_v39 = vld [vmem:[%s1869_s0 + $0x28] ss:$20 sps:$4 sm:$0xff]   ;;  %v1382_v44 = vld [vmem:[%s1869_s0 + $0x50] ss:$20 sps:$4 sm:$0xff]   ;;  %v1389_v50 = vld [vmem:[%s1869_s0 + $0x78] ss:$20 sps:$4 sm:$0xff]  }
  0x10   :  { %1167 = vmatpush3.bf16.msra.mxu0 %v1347_v14  ;;  %v1378_v41 = vld [vmem:[%s1869_s0 + $0x54] ss:$20 sps:$4 sm:$0xff]   ;;  %v1380_v43 = vld [vmem:[%s1869_s0 + $0x5c] ss:$20 sps:$4 sm:$0xff]   ;;  %v1387_v48 = vld [vmem:[%s1869_s0 + $0x84] ss:$20 sps:$4 sm:$0xff]  }
  0x11   :  { %1231 = vmatpush3.bf16.msra.mxu1 %v1348_v15  ;;  %1168 = vmatprep.subr.bf16.mxu0 %v1349_v16  ;;  %v1397_v46 = vld [vmem:[%s1868_s1 + $0x110] sm:$0xff]   ;;  %v1410_v49 = vld [vmem:[%s1868_s1 + $0x118] sm:$0xff]   ;;  %v1393_v53 = vld [vmem:[%s1869_s0 + $0xac] ss:$20 sps:$4 sm:$0xff]  }
  0x12   :  { %1232 = vmatprep.subr.bf16.mxu1 %v1350_v17  ;;  %v1385_v47 = vld [vmem:[%s1869_s0 + $0x7c] ss:$20 sps:$4 sm:$0xff]   ;;  %v1390_v51 = vld [vmem:[%s1869_s0 + $0x80] ss:$20 sps:$4 sm:$0xff]   ;;  %v1391_v52 = vld [vmem:[%s1869_s0 + $0xa4] ss:$20 sps:$4 sm:$0xff]  }
  0x13   :  { %v1395_v54 = vld [vmem:[%s1869_s0 + $0xa0] ss:$20 sps:$4 sm:$0xff]   ;;  %v1396_v55 = vld [vmem:[%s1869_s0 + $0xa8] ss:$20 sps:$4 sm:$0xff]   ;;  %v1403_v59 = vld [vmem:[%s1869_s0 + $0xd0] ss:$20 sps:$4 sm:$0xff]  }
  0x14   :  { %1169 = vmatpush3.bf16.msra.mxu0 %v1351_v18  ;;  %v1398_v56 = vld [vmem:[%s1869_s0 + $0xcc] ss:$20 sps:$4 sm:$0xff]   ;;  %v1400_v57 = vld [vmem:[%s1869_s0 + $0xd4] ss:$20 sps:$4 sm:$0xff]   ;;  %v1406_v61 = vld [vmem:[%s1869_s0 + $0xfc] ss:$20 sps:$4 sm:$0xff]  }
  0x15   :  { %1233 = vmatpush3.bf16.msra.mxu1 %v1352_v19  ;;  %1170 = vmatprep.subr.bf16.mxu0 %v1353_v20  ;;  %v1402_v58 = vld [vmem:[%s1869_s0 + $0xc8] ss:$20 sps:$4 sm:$0xff]   ;;  %v1408_v62 = vld [vmem:[%s1869_s0 + $0xf0] ss:$20 sps:$4 sm:$0xff]   ;;  %v1409_v63 = vld [vmem:[%s1869_s0 + $0xf8] ss:$20 sps:$4 sm:$0xff]  }
  0x16   :  { %1234 = vmatprep.subr.bf16.mxu1 %v1354_v21  ;;  %v1404_v60 = vld [vmem:[%s1869_s0 + $0xf4] ss:$20 sps:$4 sm:$0xff]   ;;  %v1411_v0 = vld [vmem:[%s1869_s0 + $0x11c] ss:$20 sps:$4 sm:$0xff]   ;;  %v1413_v1 = vld [vmem:[%s1869_s0 + $0x124] ss:$20 sps:$4 sm:$0xff]  }
  0x17   :  { %v1415_v2 = vld [vmem:[%s1869_s0 + $0x118] ss:$20 sps:$4 sm:$0xff]   ;;  %v1416_v3 = vld [vmem:[%s1869_s0 + $0x120] ss:$20 sps:$4 sm:$0xff]   ;;  %v1417_v4 = vld [vmem:[%s1869_s0 + $0x10] ss:$20 sps:$4 sm:$0xff]  }
  0x18   :  { %1171 = vmatpush3.bf16.msra.mxu0 %v1355_v22  ;;  %v1418_v5 = vld [vmem:[%s1869_s0 + $0xb0] ss:$20 sps:$4 sm:$0xff]   ;;  %v1419_v6 = vld [vmem:[%s1869_s0 + $0x38] ss:$20 sps:$4 sm:$0xff]   ;;  %v1421_v8 = vld [vmem:[%s1869_s0 + $0x60] ss:$20 sps:$4 sm:$0xff]  }
  0x19   :  { %1235 = vmatpush3.bf16.msra.mxu1 %v1356_v23  ;;  %1172 = vmatprep.subr.bf16.mxu0 %v1357_v24  ;;  %v1420_v7 = vld [vmem:[%s1869_s0 + $0xd8] ss:$20 sps:$4 sm:$0xff]   ;;  %v1422_v9 = vld [vmem:[%s1869_s0 + $0x100] ss:$20 sps:$4 sm:$0xff]   ;;  %v1423_v10 = vld [vmem:[%s1869_s0 + $0x88] ss:$20 sps:$4 sm:$0xff]  }
  0x1a   :  { %1236 = vmatprep.subr.bf16.mxu1 %v1358_v25  ;;  %v1424_v11 = vld [vmem:[%s1869_s0 + $0x128] ss:$20 sps:$4 sm:$0xff]  }
  0x1c   :  { %1173 = vmatpush3.bf16.msra.mxu0 %v1359_v26 }
  0x1d   :  { %1237 = vmatpush3.bf16.msra.mxu1 %v1360_v27  ;;  %1174 = vmatprep.subr.bf16.mxu0 %v1361_v28 }
  0x1e   :  { %1238 = vmatprep.subr.bf16.mxu1 %v1362_v29 }
  0x20   :  { %1175 = vmatpush3.bf16.msra.mxu0 %v1363_v30 }
  0x21   :  { %1239 = vmatpush3.bf16.msra.mxu1 %v1364_v31  ;;  %1300 = vmatprep.subr.bf16.mxu0 %v1371_v36 }
  0x22   :  { %1324 = vmatprep.subr.bf16.mxu1 %v1371_v36 }
  0x23   :  { %651 = vmatmul.mubr.bf16.vlgmr.msra.gmra.mrb[0].mxu0 %v1365_v32 }
  0x24   :  { %748 = vmatmul.mubr.bf16.vlgmr.msra.gmra.mrb[0].mxu1 %v1368_v34  ;;  %1301 = vmatpush3.bf16.msra.mxu0 %v1371_v36 }
  0x25   :  { %1328 = vmatpush3.bf16.msra.mxu1 %v1371_v36  ;;  %658 = vmatprep.mubr.bf16.mxu0 %v1372_v37 }
  0x26   :  { %755 = vmatprep.mubr.bf16.mxu1 %v1374_v38  ;;  %1302 = vmatprep.subr.bf16.mxu0 %v1384_v42 }
  0x27   :  { %1325 = vmatprep.subr.bf16.mxu1 %v1384_v42 }
  0x28   :  { %1303 = vmatpush3.bf16.msra.mxu0 %v1384_v42 }
  0x29   :  { %1329 = vmatpush3.bf16.msra.mxu1 %v1384_v42  ;;  %1304 = vmatprep.subr.bf16.mxu0 %v1397_v46 }
  0x2a   :  { %1326 = vmatprep.subr.bf16.mxu1 %v1397_v46 }
  0x2b   :  { %659 = vmatmul.mubr.bf16.gmra.mrb[4].mxu0 %v1376_v39 }
  0x2c   :  { %756 = vmatmul.mubr.bf16.gmra.mrb[4].mxu1 %v1377_v40  ;;  %666 = vmatprep.mubr.bf16.mxu0 %v1378_v41 }
  0x2d   :  { %763 = vmatprep.mubr.bf16.mxu1 %v1380_v43  ;;  %1305 = vmatpush3.bf16.msra.mxu0 %v1397_v46 }
  0x2e   :  { %1330 = vmatpush3.bf16.msra.mxu1 %v1397_v46  ;;  %1306 = vmatprep.subr.bf16.mxu0 %v1410_v49 }
  0x2f   :  { %1327 = vmatprep.subr.bf16.mxu1 %v1410_v49 }
  0x31   :  { %1307 = vmatpush3.bf16.msra.mxu0 %v1410_v49 }
  0x32   :  { %1331 = vmatpush3.bf16.msra.mxu1 %v1410_v49 }
  0x33   :  { %667 = vmatmul.mubr.bf16.gmra.mrb[8].mxu0 %v1382_v44 }
  0x34   :  { %764 = vmatmul.mubr.bf16.gmra.mrb[8].mxu1 %v1383_v45  ;;  %674 = vmatprep.mubr.bf16.mxu0 %v1385_v47 }
  0x35   :  { %771 = vmatprep.mubr.bf16.mxu1 %v1387_v48 }
  0x3b   :  { %675 = vmatmul.mubr.bf16.gmra.mrb[12].mxu0 %v1389_v50 }
  0x3c   :  { %772 = vmatmul.mubr.bf16.gmra.mrb[12].mxu1 %v1390_v51  ;;  %682 = vmatprep.mubr.bf16.mxu0 %v1391_v52 }
  0x3d   :  { %779 = vmatprep.mubr.bf16.mxu1 %v1393_v53 }
  0x43   :  { %683 = vmatmul.mubr.bf16.gmra.mrb[16].mxu0 %v1395_v54 }
  0x44   :  { %780 = vmatmul.mubr.bf16.gmra.mrb[16].mxu1 %v1396_v55  ;;  %690 = vmatprep.mubr.bf16.mxu0 %v1398_v56 }
  0x45   :  { %787 = vmatprep.mubr.bf16.mxu1 %v1400_v57 }
  0x4b   :  { %691 = vmatmul.mubr.bf16.gmra.mrb[20].mxu0 %v1402_v58 }
  0x4c   :  { %788 = vmatmul.mubr.bf16.gmra.mrb[20].mxu1 %v1403_v59  ;;  %698 = vmatprep.mubr.bf16.mxu0 %v1404_v60 }
  0x4d   :  { %795 = vmatprep.mubr.bf16.mxu1 %v1406_v61 }
  0x53   :  { %699 = vmatmul.mubr.bf16.gmra.mrb[24].mxu0 %v1408_v62 }
  0x54   :  { %796 = vmatmul.mubr.bf16.gmra.mrb[24].mxu1 %v1409_v63  ;;  %706 = vmatprep.mubr.bf16.mxu0 %v1411_v0 }
  0x55   :  { %803 = vmatprep.mubr.bf16.mxu1 %v1413_v1 }
  0x5b   :  { %707 = vmatmul.mubr.bf16.gmra.mrb[28].mxu0 %v1415_v2 }
  0x5c   :  { %804 = vmatmul.mubr.bf16.gmra.mrb[28].mxu1 %v1416_v3  ;;  %1308 = vmatprep.mubr.msk.bf16.mxu0 %vm593_vm0, %v1417_v4 }
  0x5d   :  { %1316 = vmatprep.mubr.msk.bf16.mxu1 %vm593_vm0, %v1418_v5 }
  0x63   :  { %1309 = vmatmul.mubr.msk.bf16.vlgmr.msra.gmra.mrb[32].mxu0 %vm593_vm0, %v1419_v6 }
  0x64   :  { %1317 = vmatmul.mubr.msk.bf16.vlgmr.msra.gmra.mrb[32].mxu1 %vm593_vm0, %v1420_v7  ;;  %1312 = vmatprep.mubr.msk.bf16.mxu0 %vm593_vm0, %v1421_v8 }
  0x65   :  { %1320 = vmatprep.mubr.msk.bf16.mxu1 %vm593_vm0, %v1422_v9 }
  0x6b   :  { %1313 = vmatmul.mubr.msk.bf16.gmra.mrb[36].mxu0 %vm593_vm0, %v1423_v10 }
  0x6c   :  { %1321 = vmatmul.mubr.msk.bf16.gmra.mrb[36].mxu1 %vm593_vm0, %v1424_v11 }
  0xf6   :  { %v1176_v12 = vpop.f32.mrb[0].mxu0 }
  0xf7   :  { %v1240_v13 = vpop.f32.mrb[0].mxu1  ;;  %v1177_v14 = vpop.f32.mrb[1].mxu0 }
  0xf8   :  { %v1178_v15 = vadd.f32 %v1177_v14, %v1176_v12  ;;  %v1241_v16 = vpop.f32.mrb[1].mxu1  ;;  %v1179_v17 = vpop.f32.mrb[2].mxu0 }
  0xf9   :  { %v1242_v18 = vadd.f32 %v1241_v16, %v1240_v13  ;;  %v1243_v19 = vpop.f32.mrb[2].mxu1  ;;  %v1180_v20 = vpop.f32.mrb[3].mxu0 }
  0xfa   :  { %v1181_v21 = vadd.f32 %v1180_v20, %v1179_v17  ;;  %v1244_v22 = vpop.f32.mrb[3].mxu1 }
  0xfb   :  { %v1245_v23 = vadd.f32 %v1244_v22, %v1243_v19  ;;  %v1691_v24 = vadd.f32 %v1242_v18, %v1178_v15 }
  0xfd   :  { %v1693_v25 = vadd.f32 %v1245_v23, %v1181_v21 }
  0xfe   :  { %v1182_v26 = vpop.f32.mrb[4].mxu0 }
  0xff   :  { %v1246_v27 = vpop.f32.mrb[4].mxu1  ;;  %v1183_v28 = vpop.f32.mrb[5].mxu0 }
 0x100   :  { %v1184_v29 = vadd.f32 %v1183_v28, %v1182_v26  ;;  %v1247_v30 = vpop.f32.mrb[5].mxu1  ;;  %v1185_v31 = vpop.f32.mrb[6].mxu0 }
 0x101   :  { %v1248_v32 = vadd.f32 %v1247_v30, %v1246_v27  ;;  %v1249_v33 = vpop.f32.mrb[6].mxu1  ;;  %v1186_v34 = vpop.f32.mrb[7].mxu0 }
 0x102   :  { %v1187_v35 = vadd.f32 %v1186_v34, %v1185_v31  ;;  %v1250_v36 = vpop.f32.mrb[7].mxu1 }
 0x103   :  { %v1251_v37 = vadd.f32 %v1250_v36, %v1249_v33  ;;  %v1695_v38 = vadd.f32 %v1248_v32, %v1184_v29 }
 0x105   :  { %v1697_v39 = vadd.f32 %v1251_v37, %v1187_v35 }
 0x106   :  { %v1188_v40 = vpop.f32.mrb[8].mxu0 }
 0x107   :  { %v1252_v41 = vpop.f32.mrb[8].mxu1  ;;  %v1189_v42 = vpop.f32.mrb[9].mxu0 }
 0x108   :  { %v1190_v43 = vadd.f32 %v1189_v42, %v1188_v40  ;;  %v1253_v44 = vpop.f32.mrb[9].mxu1  ;;  %v1191_v45 = vpop.f32.mrb[10].mxu0 }
 0x109   :  { %v1254_v46 = vadd.f32 %v1253_v44, %v1252_v41  ;;  %v1255_v47 = vpop.f32.mrb[10].mxu1  ;;  %v1192_v48 = vpop.f32.mrb[11].mxu0 }
 0x10a   :  { %v1193_v49 = vadd.f32 %v1192_v48, %v1191_v45  ;;  %v1256_v50 = vpop.f32.mrb[11].mxu1 }
 0x10b   :  { %v1257_v51 = vadd.f32 %v1256_v50, %v1255_v47  ;;  %v1699_v52 = vadd.f32 %v1254_v46, %v1190_v43 }
 0x10d   :  { %v1701_v53 = vadd.f32 %v1257_v51, %v1193_v49 }
 0x10e   :  { %v1194_v54 = vpop.f32.mrb[12].mxu0 }
 0x10f   :  { %v1258_v55 = vpop.f32.mrb[12].mxu1  ;;  %v1195_v56 = vpop.f32.mrb[13].mxu0 }
 0x110   :  { %v1196_v57 = vadd.f32 %v1195_v56, %v1194_v54  ;;  %v1259_v58 = vpop.f32.mrb[13].mxu1  ;;  %v1197_v59 = vpop.f32.mrb[14].mxu0 }
 0x111   :  { %v1260_v60 = vadd.f32 %v1259_v58, %v1258_v55  ;;  %v1261_v61 = vpop.f32.mrb[14].mxu1  ;;  %v1198_v62 = vpop.f32.mrb[15].mxu0 }
 0x112   :  { %v1199_v63 = vadd.f32 %v1198_v62, %v1197_v59  ;;  %v1262_v0 = vpop.f32.mrb[15].mxu1 }
 0x113   :  { %v1263_v1 = vadd.f32 %v1262_v0, %v1261_v61  ;;  %v1703_v2 = vadd.f32 %v1260_v60, %v1196_v57 }
 0x115   :  { %v1705_v3 = vadd.f32 %v1263_v1, %v1199_v63 }
 0x116   :  { %v1200_v4 = vpop.f32.mrb[16].mxu0 }
 0x117   :  { %v1264_v5 = vpop.f32.mrb[16].mxu1  ;;  %v1201_v6 = vpop.f32.mrb[17].mxu0 }
 0x118   :  { %v1202_v7 = vadd.f32 %v1201_v6, %v1200_v4  ;;  %v1265_v8 = vpop.f32.mrb[17].mxu1  ;;  %v1203_v9 = vpop.f32.mrb[18].mxu0 }
 0x119   :  { %v1266_v10 = vadd.f32 %v1265_v8, %v1264_v5  ;;  %v1267_v11 = vpop.f32.mrb[18].mxu1  ;;  %v1204_v12 = vpop.f32.mrb[19].mxu0  ;;  %v1721_v8 = vld [vmem:[%s1870_s2] ss:$0 sm:$0xff] }
 0x11a   :  { %v1205_v13 = vadd.f32 %v1204_v12, %v1203_v9  ;;  %v1268_v14 = vpop.f32.mrb[19].mxu1 }
 0x11b   :  { %v1269_v15 = vadd.f32 %v1268_v14, %v1267_v11  ;;  %v782_v16 = vadd.f32 %v1266_v10, %v1202_v7 }
 0x11d   :  { %v1707_v17 = vadd.f32 %v1269_v15, %v1205_v13 }
 0x11e   :  { %v1206_v18 = vpop.f32.mrb[20].mxu0 }
 0x11f   :  { %v1270_v19 = vpop.f32.mrb[20].mxu1  ;;  %v1207_v20 = vpop.f32.mrb[21].mxu0 }
 0x120   :  { %v1208_v21 = vadd.f32 %v1207_v20, %v1206_v18  ;;  %v1271_v22 = vpop.f32.mrb[21].mxu1  ;;  %v1209_v23 = vpop.f32.mrb[22].mxu0 }
 0x121   :  { %v1272_v26 = vadd.f32 %v1271_v22, %v1270_v19  ;;  %v1273_v27 = vpop.f32.mrb[22].mxu1  ;;  %v1210_v28 = vpop.f32.mrb[23].mxu0 }
 0x122   :  { %v1211_v29 = vadd.f32 %v1210_v28, %v1209_v23  ;;  %v1274_v30 = vpop.f32.mrb[23].mxu1 }
 0x123   :  { %v1275_v31 = vadd.f32 %v1274_v30, %v1273_v27  ;;  %v790_v32 = vadd.f32 %v1272_v26, %v1208_v21  ;;  %v1016_v27 = vld [vmem:[%s1872_s4 + $0x50] sm:$0xff] }
 0x125   :  { %v793_v33 = vadd.f32 %v1275_v31, %v1211_v29  ;;  %v1014_v31 = vld [vmem:[%s1872_s4 + $0x40] sm:$0xff] }
 0x126   :  { %v1212_v34 = vpop.f32.mrb[24].mxu0 }
 0x127   :  { %v1276_v35 = vpop.f32.mrb[24].mxu1  ;;  %v1213_v36 = vpop.f32.mrb[25].mxu0 }
 0x128   :  { %v1214_v37 = vadd.f32 %v1213_v36, %v1212_v34  ;;  %v1277_v40 = vpop.f32.mrb[25].mxu1  ;;  %v1215_v41 = vpop.f32.mrb[26].mxu0 }
 0x129   :  { %v1278_v42 = vadd.f32 %v1277_v40, %v1276_v35  ;;  %v1279_v43 = vpop.f32.mrb[26].mxu1  ;;  %v1216_v44 = vpop.f32.mrb[27].mxu0 }
 0x12a   :  { %v1217_v45 = vadd.f32 %v1216_v44, %v1215_v41  ;;  %v1280_v46 = vpop.f32.mrb[27].mxu1  ;;  %v1017_v41 = vld [vmem:[%s1872_s4 + $0x58] sm:$0xff] }
 0x12b   :  { %v1281_v47 = vadd.f32 %v1280_v46, %v1279_v43  ;;  %v1709_v48 = vadd.f32 %v1278_v42, %v1214_v37  ;;  %v1007_v42 = vld [vmem:[%s1872_s4 + $0x8] sm:$0xff] }
 0x12d   :  { %v1711_v49 = vadd.f32 %v1281_v47, %v1217_v45 }
 0x12e   :  { %v1218_v50 = vpop.f32.mrb[28].mxu0 }
 0x12f   :  { %v1282_v51 = vpop.f32.mrb[28].mxu1  ;;  %v1219_v54 = vpop.f32.mrb[29].mxu0 }
 0x130   :  { %v1220_v55 = vadd.f32 %v1219_v54, %v1218_v50  ;;  %v1283_v56 = vpop.f32.mrb[29].mxu1  ;;  %v1221_v57 = vpop.f32.mrb[30].mxu0  ;;  %v1015_v54 = vld [vmem:[%s1872_s4 + $0x48] sm:$0xff] }
 0x131   :  { %v1284_v58 = vadd.f32 %v1283_v56, %v1282_v51  ;;  %v1285_v59 = vpop.f32.mrb[30].mxu1  ;;  %v1222_v60 = vpop.f32.mrb[31].mxu0 }
 0x132   :  { %v1223_v61 = vadd.f32 %v1222_v60, %v1221_v57  ;;  %v1286_v62 = vpop.f32.mrb[31].mxu1 }
 0x133   :  { %v1287_v63 = vadd.f32 %v1286_v62, %v1285_v59  ;;  %v1713_v0 = vadd.f32 %v1284_v58, %v1220_v55 }
 0x135   :  { %v1715_v1 = vadd.f32 %v1287_v63, %v1223_v61 }
 0x136   :  { %v1310_v4 = vpop.f32.mrb[32].mxu0 }
 0x137   :  { %v855_v5 = vadd.f32 %v1310_v4, %v1695_v38  ;;  %v1318_v6 = vpop.f32.mrb[32].mxu1  ;;  %v846_v7 = vpop.f32.mrb[33].mxu0  ;;  %v1728_v38 = vld [vmem:[%s1871_s3] ss:$0 sm:$0xff] }
 0x138   :  { %v887_v9 = vadd.f32 %v1318_v6, %v790_v32  ;;  %v847_v10 = vadd.f32 %v846_v7, %v1691_v24  ;;  %v878_v11 = vpop.f32.mrb[33].mxu1  ;;  %v1311_v12 = vpop.f32.mrb[34].mxu0  ;;  %v1009_v32 = vld [vmem:[%s1872_s4 + $0x18] sm:$0xff] }
 0x139   :  { %v879_v13 = vadd.f32 %v878_v11, %v782_v16  ;;  %v858_v14 = vadd.f32 %v1311_v12, %v1697_v39  ;;  %v1319_v15 = vpop.f32.mrb[34].mxu1  ;;  %v849_v18 = vpop.f32.mrb[35].mxu0  ;;  %v969_v22 = vmul.f32 %v1721_v8, %v855_v5  ;;  %v1008_v16 = vld [vmem:[%s1872_s4 + $0x10] sm:$0xff] }
 0x13a   :  { %v890_v19 = vadd.f32 %v1319_v15, %v793_v33  ;;  %v850_v20 = vadd.f32 %v849_v18, %v1693_v25  ;;  %v881_v21 = vpop.f32.mrb[35].mxu1  ;;  %v977_v39 = vmul.f32 %v1721_v8, %v887_v9  ;;  %v967_v23 = vmul.f32 %v1721_v8, %v847_v10  ;;  %v1006_v25 = vld [vmem:[%s1872_s4] sm:$0xff] }
 0x13b   :  { %v882_v24 = vadd.f32 %v881_v21, %v1707_v17  ;;  %v992_v26 = vadd.f32 %v1728_v38, %v969_v22  ;;  %v975_v17 = vmul.f32 %v1721_v8, %v879_v13  ;;  %v970_v28 = vmul.f32 %v1721_v8, %v858_v14  ;;  %v1012_v21 = vld [vmem:[%s1872_s4 + $0x30] sm:$0xff] }
 0x13c   :  { %v1000_v29 = vadd.f32 %v1728_v38, %v977_v39  ;;  %v990_v30 = vadd.f32 %v1728_v38, %v967_v23  ;;  %v978_v33 = vmul.f32 %v1721_v8, %v890_v19  ;;  %v968_v34 = vmul.f32 %v1721_v8, %v850_v20 }
 0x13d   :  { %v1024_v36 = vadd.f32 %v1008_v16, %v992_v26  ;;  %v998_v37 = vadd.f32 %v1728_v38, %v975_v17  ;;  %v993_v40 = vadd.f32 %v1728_v38, %v970_v28  ;;  %v976_v43 = vmul.f32 %v1721_v8, %v882_v24  ;;  %v1010_v16 = vld [vmem:[%s1872_s4 + $0x20] sm:$0xff] }
 0x13e   :  { %v1314_v35 = vpop.f32.mrb[36].mxu0  ;;  %v1032_v46 = vadd.f32 %v1016_v27, %v1000_v29  ;;  %v1022_v47 = vadd.f32 %v1006_v25, %v990_v30  ;;  %v1001_v50 = vadd.f32 %v1728_v38, %v978_v33  ;;  %v991_v51 = vadd.f32 %v1728_v38, %v968_v34  ;;  %v1018_v27 = vld [vmem:[%s1872_s4 + $0x60] sm:$0xff]  ;;  %v1013_v25 = vld [vmem:[%s1872_s4 + $0x38] sm:$0xff]  ;;  %v1011_v33 = vld [vmem:[%s1872_s4 + $0x28] sm:$0xff] }
 0x13f   :  { %v1322_v44 = vpop.f32.mrb[36].mxu1  ;;  %v862_v45 = vpop.f32.mrb[37].mxu0  ;;  %v1040_v57 = vmax.f32 %v1024_v36, 0.0  ;;  %v1030_v58 = vadd.f32 %v1014_v31, %v998_v37  ;;  %v1025_v59 = vadd.f32 %v1009_v32, %v993_v40  ;;  %v999_v60 = vadd.f32 %v1728_v38, %v976_v43  ;;  %v1021_v32 = vld [vmem:[%s1872_s4 + $0x78] sm:$0xff] }
 0x140   :  { %v894_v55 = vpop.f32.mrb[37].mxu1  ;;  %v1315_v56 = vpop.f32.mrb[38].mxu0  ;;  %v1048_v63 = vmax.f32 %v1032_v46, 0.0  ;;  %v1038_v4 = vmax.f32 %v1022_v47, 0.0  ;;  %v1033_v5 = vadd.f32 %v1017_v41, %v1001_v50  ;;  %v1023_v6 = vadd.f32 %v1007_v42, %v991_v51  ;;  %v1019_v41 = vld [vmem:[%s1872_s4 + $0x68] sm:$0xff] }
 0x141   :  { %v1323_v61 = vpop.f32.mrb[38].mxu1  ;;  %v865_v62 = vpop.f32.mrb[39].mxu0  ;;  %1056 = vst [vmem:[%s1873_s5 + $0x10] sm:$0xff] %v1040_v57  ;;  %v1046_v9 = vmax.f32 %v1030_v58, 0.0  ;;  %v1041_v10 = vmax.f32 %v1025_v59, 0.0  ;;  %v1031_v11 = vadd.f32 %v1015_v54, %v999_v60  ;;  %v871_v12 = vadd.f32 %v1314_v35, %v1703_v2 }
 0x142   :  { %v897_v7 = vpop.f32.mrb[39].mxu1  ;;  %1064 = vst [vmem:[%s1873_s5 + $0x50] sm:$0xff] %v1048_v63  ;;  %1054 = vst [vmem:[%s1873_s5] sm:$0xff] %v1038_v4  ;;  %v1049_v13 = vmax.f32 %v1033_v5, 0.0  ;;  %v1039_v14 = vmax.f32 %v1023_v6, 0.0  ;;  %v903_v15 = vadd.f32 %v1322_v44, %v1713_v0  ;;  %v863_v18 = vadd.f32 %v862_v45, %v1699_v52 }
 0x143   :  { %1062 = vst [vmem:[%s1873_s5 + $0x40] sm:$0xff] %v1046_v9  ;;  %1057 = vst [vmem:[%s1873_s5 + $0x18] sm:$0xff] %v1041_v10  ;;  %v1047_v2 = vmax.f32 %v1031_v11, 0.0  ;;  %v895_v19 = vadd.f32 %v894_v55, %v1709_v48  ;;  %v874_v20 = vadd.f32 %v1315_v56, %v1705_v3  ;;  %v906_v52 = vadd.f32 %v1323_v61, %v1715_v1 }
 0x144   :  { %1065 = vst [vmem:[%s1873_s5 + $0x58] sm:$0xff] %v1049_v13  ;;  %1055 = vst [vmem:[%s1873_s5 + $0x8] sm:$0xff] %v1039_v14  ;;  %v866_v0 = vadd.f32 %v865_v62, %v1701_v53  ;;  %v973_v48 = vmul.f32 %v1721_v8, %v871_v12  ;;  %v898_v3 = vadd.f32 %v897_v7, %v1711_v49  ;;  %v1020_v53 = vld [vmem:[%s1872_s4 + $0x70] sm:$0xff] }
 0x145   :  { %1063 = vst [vmem:[%s1873_s5 + $0x48] sm:$0xff] %v1047_v2  ;;  %v981_v22 = vmul.f32 %v1721_v8, %v903_v15  ;;  %v971_v24 = vmul.f32 %v1721_v8, %v863_v18  ;;  %v979_v49 = vmul.f32 %v1721_v8, %v895_v19  ;;  %v974_v39 = vmul.f32 %v1721_v8, %v874_v20 }
 0x146   :  { %v996_v1 = vadd.f32 %v1728_v38, %v973_v48  ;;  %v982_v17 = vmul.f32 %v1721_v8, %v906_v52  ;;  %v972_v28 = vmul.f32 %v1721_v8, %v866_v0  ;;  %v980_v34 = vmul.f32 %v1721_v8, %v898_v3 }
 0x147   :  { %v1004_v23 = vadd.f32 %v1728_v38, %v981_v22  ;;  %v994_v26 = vadd.f32 %v1728_v38, %v971_v24  ;;  %v1002_v30 = vadd.f32 %v1728_v38, %v979_v49  ;;  %v997_v31 = vadd.f32 %v1728_v38, %v974_v39 }
 0x148   :  { %v1028_v29 = vadd.f32 %v1012_v21, %v996_v1  ;;  %v1005_v37 = vadd.f32 %v1728_v38, %v982_v17  ;;  %v995_v40 = vadd.f32 %v1728_v38, %v972_v28  ;;  %v1003_v45 = vadd.f32 %v1728_v38, %v980_v34 }
 0x149   :  { %v1036_v35 = vadd.f32 %v1020_v53, %v1004_v23  ;;  %v1026_v36 = vadd.f32 %v1010_v16, %v994_v26  ;;  %v1034_v43 = vadd.f32 %v1018_v27, %v1002_v30  ;;  %v1029_v44 = vadd.f32 %v1013_v25, %v997_v31 }
 0x14a   :  { %v1044_v42 = vmax.f32 %v1028_v29, 0.0  ;;  %v1037_v50 = vadd.f32 %v1021_v32, %v1005_v37  ;;  %v1027_v51 = vadd.f32 %v1011_v33, %v995_v40  ;;  %v1035_v55 = vadd.f32 %v1019_v41, %v1003_v45 }
 0x14b   :  { %v1052_v46 = vmax.f32 %v1036_v35, 0.0  ;;  %v1042_v47 = vmax.f32 %v1026_v36, 0.0  ;;  %v1050_v8 = vmax.f32 %v1034_v43, 0.0  ;;  %v1045_v54 = vmax.f32 %v1029_v44, 0.0 }
 0x14c   :  { %1060 = vst [vmem:[%s1873_s5 + $0x30] sm:$0xff] %v1044_v42  ;;  %v1053_v38 = vmax.f32 %v1037_v50, 0.0  ;;  %v1043_v56 = vmax.f32 %v1027_v51, 0.0  ;;  %v1051_v57 = vmax.f32 %v1035_v55, 0.0 }
 0x14d   :  { %1068 = vst [vmem:[%s1873_s5 + $0x70] sm:$0xff] %v1052_v46  ;;  %1058 = vst [vmem:[%s1873_s5 + $0x20] sm:$0xff] %v1042_v47 }
 0x14e   :  { %1066 = vst [vmem:[%s1873_s5 + $0x60] sm:$0xff] %v1050_v8  ;;  %1061 = vst [vmem:[%s1873_s5 + $0x38] sm:$0xff] %v1045_v54 }
 0x14f   :  { %1069 = vst [vmem:[%s1873_s5 + $0x78] sm:$0xff] %v1053_v38  ;;  %1059 = vst [vmem:[%s1873_s5 + $0x28] sm:$0xff] %v1043_v56 }
 0x150   :  { %1067 = vst [vmem:[%s1873_s5 + $0x68] sm:$0xff] %v1051_v57 }

// kernel: tomato_leaf_net.29
= control target key start
LH: loop header
LB: loop body
LE: loop exit
PB: predicated region body
PF: predicated region fallthrough
CT: control target
= control target key end

     0   :  { %vm380_vm0 = vcmask 523264   ;;  %s939_s1 = inlined_call_operand.vmem [shape: bf16[576,128], index: 1, kind: input, shape index: {}]   ;;  %s940_s0 = inlined_call_operand.vmem [shape: bf16[32,576], index: 0, kind: input, shape index: {}]   ;;  %s941_s2 = inlined_call_operand.vmem [shape: f32[1,128], index: 2, kind: input, shape index: {}]   ;;  %s942_s3 = inlined_call_operand.vmem [shape: f32[1,128], index: 3, kind: input, shape index: {}]   ;;  %s943_s4 = inlined_call_operand.vmem [shape: f32[32,128], index: 4, kind: output, shape index: {}]  }
   0x1   :  { %v708_v0 = vld [vmem:[%s939_s1 + $0x40] sm:$0xff]   ;;  %v712_v4 = vld [vmem:[%s939_s1 + $0x48] sm:$0xff]   ;;  %v716_v8 = vld [vmem:[%s939_s1 + $0x50] sm:$0xff]  }
   0x2   :  { %v709_v1 = vld [vmem:[%s939_s1 + $0xc0] sm:$0xff]   ;;  %633 = vmatprep.subr.bf16.mxu0 %v708_v0  ;;  %v713_v5 = vld [vmem:[%s939_s1 + $0xc8] sm:$0xff]   ;;  %v717_v9 = vld [vmem:[%s939_s1 + $0xd0] sm:$0xff]  }
   0x3   :  { %v710_v2 = vld [vmem:[%s939_s1] sm:$0xff]   ;;  %661 = vmatprep.subr.bf16.mxu1 %v709_v1  ;;  %v714_v6 = vld [vmem:[%s939_s1 + $0x8] sm:$0xff]   ;;  %v718_v10 = vld [vmem:[%s939_s1 + $0x10] sm:$0xff]  }
   0x4   :  { %v711_v3 = vld [vmem:[%s939_s1 + $0x80] sm:$0xff]   ;;  %634 = vmatpush3.bf16.msra.mxu0 %v710_v2  ;;  %v715_v7 = vld [vmem:[%s939_s1 + $0x88] sm:$0xff]   ;;  %v719_v11 = vld [vmem:[%s939_s1 + $0x90] sm:$0xff]  }
   0x5   :  { %662 = vmatpush3.bf16.msra.mxu1 %v711_v3  ;;  %635 = vmatprep.subr.bf16.mxu0 %v712_v4  ;;  %v720_v12 = vld [vmem:[%s939_s1 + $0x58] sm:$0xff]   ;;  %v724_v16 = vld [vmem:[%s939_s1 + $0x60] sm:$0xff]   ;;  %v728_v20 = vld [vmem:[%s939_s1 + $0x68] sm:$0xff]  }
   0x6   :  { %663 = vmatprep.subr.bf16.mxu1 %v713_v5  ;;  %v721_v13 = vld [vmem:[%s939_s1 + $0xd8] sm:$0xff]   ;;  %v725_v17 = vld [vmem:[%s939_s1 + $0xe0] sm:$0xff]   ;;  %v729_v21 = vld [vmem:[%s939_s1 + $0xe8] sm:$0xff]  }
   0x7   :  { %v722_v14 = vld [vmem:[%s939_s1 + $0x18] sm:$0xff]   ;;  %v726_v18 = vld [vmem:[%s939_s1 + $0x20] sm:$0xff]   ;;  %v730_v22 = vld [vmem:[%s939_s1 + $0x28] sm:$0xff]  }
   0x8   :  { %636 = vmatpush3.bf16.msra.mxu0 %v714_v6  ;;  %v723_v15 = vld [vmem:[%s939_s1 + $0x98] sm:$0xff]   ;;  %v727_v19 = vld [vmem:[%s939_s1 + $0xa0] sm:$0xff]   ;;  %v731_v23 = vld [vmem:[%s939_s1 + $0xa8] sm:$0xff]  }
   0x9   :  { %664 = vmatpush3.bf16.msra.mxu1 %v715_v7  ;;  %637 = vmatprep.subr.bf16.mxu0 %v716_v8  ;;  %v732_v24 = vld [vmem:[%s939_s1 + $0x70] sm:$0xff]   ;;  %v736_v28 = vld [vmem:[%s939_s1 + $0x78] sm:$0xff]   ;;  %v745_v35 = vld [vmem:[%s940_s0 + $0xc] ss:$20 sps:$4 sm:$0xff]  }
   0xa   :  { %665 = vmatprep.subr.bf16.mxu1 %v717_v9  ;;  %v733_v25 = vld [vmem:[%s939_s1 + $0xf0] sm:$0xff]   ;;  %v737_v29 = vld [vmem:[%s939_s1 + $0xf8] sm:$0xff]   ;;  %v746_v36 = vld [vmem:[%s939_s1 + $0x100] sm:$0xff]   ;;  %468 = vmatprep.mubr.bf16.mxu1 %v745_v35 }
   0xb   :  { %v734_v26 = vld [vmem:[%s939_s1 + $0x30] sm:$0xff]   ;;  %v738_v30 = vld [vmem:[%s939_s1 + $0x38] sm:$0xff]   ;;  %v747_v37 = vld [vmem:[%s939_s1 + $0x108] sm:$0xff]  }
   0xc   :  { %638 = vmatpush3.bf16.msra.mxu0 %v718_v10  ;;  %v735_v27 = vld [vmem:[%s939_s1 + $0xb0] sm:$0xff]   ;;  %v739_v31 = vld [vmem:[%s939_s1 + $0xb8] sm:$0xff]   ;;  %v748_v38 = vld [vmem:[%s940_s0 + $0x2c] ss:$20 sps:$4 sm:$0xff]  }
   0xd   :  { %666 = vmatpush3.bf16.msra.mxu1 %v719_v11  ;;  %639 = vmatprep.subr.bf16.mxu0 %v720_v12  ;;  %v740_v32 = vld [vmem:[%s940_s0] ss:$20 sps:$4 sm:$0xff]   ;;  %v742_v33 = vld [vmem:[%s940_s0 + $0x4] ss:$20 sps:$4 sm:$0xff]   ;;  %v743_v34 = vld [vmem:[%s940_s0 + $0x8] ss:$20 sps:$4 sm:$0xff]  }
   0xe   :  { %667 = vmatprep.subr.bf16.mxu1 %v721_v13  ;;  %419 = vmatprep.mubr.bf16.mxu0 %v742_v33  ;;  %v750_v39 = vld [vmem:[%s940_s0 + $0x34] ss:$20 sps:$4 sm:$0xff]   ;;  %v753_v42 = vld [vmem:[%s940_s0 + $0x30] ss:$20 sps:$4 sm:$0xff]   ;;  %v755_v44 = vld [vmem:[%s939_s1 + $0x118] sm:$0xff]  }
   0xf   :  { %v752_v40 = vld [vmem:[%s940_s0 + $0x28] ss:$20 sps:$4 sm:$0xff]   ;;  %v754_v41 = vld [vmem:[%s939_s1 + $0x110] sm:$0xff]   ;;  %v757_v45 = vld [vmem:[%s940_s0 + $0x38] ss:$20 sps:$4 sm:$0xff]  }
  0x10   :  { %640 = vmatpush3.bf16.msra.mxu0 %v722_v14  ;;  %v756_v43 = vld [vmem:[%s940_s0 + $0x10] ss:$20 sps:$4 sm:$0xff]   ;;  %v631_v13 = vld [vmem:[%s941_s2] ss:$0 sm:$0xff] }
  0x11   :  { %668 = vmatpush3.bf16.msra.mxu1 %v723_v15  ;;  %641 = vmatprep.subr.bf16.mxu0 %v724_v16 }
  0x12   :  { %669 = vmatprep.subr.bf16.mxu1 %v725_v17 }
  0x14   :  { %642 = vmatpush3.bf16.msra.mxu0 %v726_v18  ;;  %v632_v18 = vld [vmem:[%s942_s3] ss:$0 sm:$0xff] }
  0x15   :  { %670 = vmatpush3.bf16.msra.mxu1 %v727_v19  ;;  %643 = vmatprep.subr.bf16.mxu0 %v728_v20 }
  0x16   :  { %671 = vmatprep.subr.bf16.mxu1 %v729_v21 }
  0x18   :  { %644 = vmatpush3.bf16.msra.mxu0 %v730_v22 }
  0x19   :  { %672 = vmatpush3.bf16.msra.mxu1 %v731_v23  ;;  %645 = vmatprep.subr.bf16.mxu0 %v732_v24 }
  0x1a   :  { %673 = vmatprep.subr.bf16.mxu1 %v733_v25 }
  0x1c   :  { %646 = vmatpush3.bf16.msra.mxu0 %v734_v26 }
  0x1d   :  { %674 = vmatpush3.bf16.msra.mxu1 %v735_v27  ;;  %647 = vmatprep.subr.bf16.mxu0 %v736_v28 }
  0x1e   :  { %675 = vmatprep.subr.bf16.mxu1 %v737_v29 }
  0x20   :  { %648 = vmatpush3.bf16.msra.mxu0 %v738_v30 }
  0x21   :  { %676 = vmatpush3.bf16.msra.mxu1 %v739_v31  ;;  %695 = vmatprep.subr.bf16.mxu0 %v746_v36 }
  0x23   :  { %420 = vmatmul.mubr.bf16.vlgmr.msra.gmra.mrb[0].mxu0 %v740_v32 }
  0x24   :  { %469 = vmatmul.mubr.bf16.vlgmr.msra.gmra.mrb[0].mxu1 %v743_v34  ;;  %696 = vmatpush3.bf16.msra.mxu0 %v746_v36 }
  0x25   :  { %697 = vmatprep.subr.bf16.mxu0 %v747_v37  ;;  %427 = vmatprep.mubr.bf16.mxu0 %v748_v38 }
  0x26   :  { %476 = vmatprep.mubr.bf16.mxu1 %v750_v39 }
  0x28   :  { %698 = vmatpush3.bf16.msra.mxu0 %v747_v37 }
  0x29   :  { %699 = vmatprep.subr.bf16.mxu0 %v754_v41 }
  0x2b   :  { %428 = vmatmul.mubr.bf16.gmra.mrb[4].mxu0 %v752_v40 }
  0x2c   :  { %477 = vmatmul.mubr.bf16.gmra.mrb[4].mxu1 %v753_v42  ;;  %703 = vmatprep.mubr.msk.bf16.mxu0 %vm380_vm0, %v756_v43 }
  0x2d   :  { %700 = vmatpush3.bf16.msra.mxu0 %v754_v41 }
  0x2e   :  { %701 = vmatprep.subr.bf16.mxu0 %v755_v44 }
  0x31   :  { %702 = vmatpush3.bf16.msra.mxu0 %v755_v44 }
  0x34   :  { %704 = vmatmul.mubr.msk.bf16.vlgmr.msra.gmra.mrb[8].mxu0 %vm380_vm0, %v757_v45 }
  0xf6   :  { %v649_v46 = vpop.f32.mrb[0].mxu0 }
  0xf7   :  { %v677_v47 = vpop.f32.mrb[0].mxu1  ;;  %v650_v48 = vpop.f32.mrb[1].mxu0 }
  0xf8   :  { %v651_v49 = vadd.f32 %v650_v48, %v649_v46  ;;  %v678_v50 = vpop.f32.mrb[1].mxu1  ;;  %v652_v51 = vpop.f32.mrb[2].mxu0 }
  0xf9   :  { %v679_v52 = vadd.f32 %v678_v50, %v677_v47  ;;  %v680_v53 = vpop.f32.mrb[2].mxu1  ;;  %v653_v54 = vpop.f32.mrb[3].mxu0 }
  0xfa   :  { %v654_v55 = vadd.f32 %v653_v54, %v652_v51  ;;  %v681_v56 = vpop.f32.mrb[3].mxu1 }
  0xfb   :  { %v682_v57 = vadd.f32 %v681_v56, %v680_v53  ;;  %v471_v58 = vadd.f32 %v679_v52, %v651_v49 }
  0xfd   :  { %v474_v59 = vadd.f32 %v682_v57, %v654_v55 }
  0xfe   :  { %v655_v60 = vpop.f32.mrb[4].mxu0 }
  0xff   :  { %v683_v61 = vpop.f32.mrb[4].mxu1  ;;  %v656_v62 = vpop.f32.mrb[5].mxu0 }
 0x100   :  { %v657_v63 = vadd.f32 %v656_v62, %v655_v60  ;;  %v684_v0 = vpop.f32.mrb[5].mxu1  ;;  %v658_v1 = vpop.f32.mrb[6].mxu0 }
 0x101   :  { %v685_v2 = vadd.f32 %v684_v0, %v683_v61  ;;  %v686_v3 = vpop.f32.mrb[6].mxu1  ;;  %v659_v4 = vpop.f32.mrb[7].mxu0 }
 0x102   :  { %v660_v5 = vadd.f32 %v659_v4, %v658_v1  ;;  %v687_v6 = vpop.f32.mrb[7].mxu1 }
 0x103   :  { %v688_v7 = vadd.f32 %v687_v6, %v686_v3  ;;  %v479_v8 = vadd.f32 %v685_v2, %v657_v63 }
 0x105   :  { %v482_v9 = vadd.f32 %v688_v7, %v660_v5 }
 0x107   :  { %v705_v10 = vpop.f32.mrb[8].mxu0 }
 0x108   :  { %v528_v11 = vadd.f32 %v705_v10, %v479_v8  ;;  %v519_v12 = vpop.f32.mrb[9].mxu0 }
 0x109   :  { %v520_v14 = vadd.f32 %v519_v12, %v471_v58  ;;  %v706_v15 = vpop.f32.mrb[10].mxu0 }
 0x10a   :  { %v531_v16 = vadd.f32 %v706_v15, %v482_v9  ;;  %v522_v17 = vpop.f32.mrb[11].mxu0  ;;  %v558_v20 = vmul.f32 %v631_v13, %v528_v11 }
 0x10b   :  { %v523_v19 = vadd.f32 %v522_v17, %v474_v59  ;;  %v556_v21 = vmul.f32 %v631_v13, %v520_v14 }
 0x10c   :  { %v569_v22 = vadd.f32 %v632_v18, %v558_v20  ;;  %v559_v23 = vmul.f32 %v631_v13, %v531_v16 }
 0x10d   :  { %v567_v24 = vadd.f32 %v632_v18, %v556_v21  ;;  %v557_v25 = vmul.f32 %v631_v13, %v523_v19 }
 0x10e   :  { %v573_v26 = vmax.f32 %v569_v22, 0.0  ;;  %v570_v27 = vadd.f32 %v632_v18, %v559_v23 }
 0x10f   :  { %v571_v28 = vmax.f32 %v567_v24, 0.0  ;;  %v568_v29 = vadd.f32 %v632_v18, %v557_v25 }
 0x110   :  { %577 = vst [vmem:[%s943_s4 + $0x10] sm:$0xff] %v573_v26  ;;  %v574_v30 = vmax.f32 %v570_v27, 0.0 }
 0x111   :  { %575 = vst [vmem:[%s943_s4] sm:$0xff] %v571_v28  ;;  %v572_v31 = vmax.f32 %v568_v29, 0.0 }
 0x112   :  { %578 = vst [vmem:[%s943_s4 + $0x18] sm:$0xff] %v574_v30 }
 0x113   :  { %576 = vst [vmem:[%s943_s4 + $0x8] sm:$0xff] %v572_v31 }

// kernel: tomato_leaf_net.30
= control target key start
LH: loop header
LB: loop body
LE: loop exit
PB: predicated region body
PF: predicated region fallthrough
CT: control target
= control target key end

     0   :  { %vm76_vm0 = vcmask 523264   ;;  %s273_s1 = inlined_call_operand.vmem [shape: bf16[64,128], index: 1, kind: input, shape index: {}]   ;;  %s274_s0 = inlined_call_operand.vmem [shape: bf16[32,64], index: 0, kind: input, shape index: {}]   ;;  %s275_s2 = inlined_call_operand.vmem [shape: f32[1,128], index: 2, kind: input, shape index: {}]   ;;  %s276_s3 = inlined_call_operand.vmem [shape: f32[1,128], index: 3, kind: input, shape index: {}]   ;;  %s277_s4 = inlined_call_operand.vmem [shape: f32[32,128], index: 4, kind: output, shape index: {}]  }
   0x1   :  { %v206_v0 = vld [vmem:[%s273_s1] sm:$0xff]   ;;  %v207_v1 = vld [vmem:[%s273_s1 + $0x8] sm:$0xff]   ;;  %v208_v2 = vld [vmem:[%s273_s1 + $0x10] sm:$0xff]  }
   0x2   :  { %193 = vmatprep.subr.bf16.mxu0 %v206_v0  ;;  %v210_v3 = vld [vmem:[%s274_s0] sm:$0xff]   ;;  %v209_v4 = vld [vmem:[%s273_s1 + $0x18] sm:$0xff]   ;;  %v211_v5 = vld [vmem:[%s274_s0 + $0x8] sm:$0xff]  }
   0x3   :  { %194 = vmatpush3.bf16.msra.mxu0 %v206_v0  ;;  %201 = vmatprep.mubr.msk.bf16.mxu0 %vm76_vm0, %v210_v3  ;;  %v185_v7 = vld [vmem:[%s275_s2] ss:$0 sm:$0xff] }
   0x4   :  { %195 = vmatprep.subr.bf16.mxu0 %v207_v1  ;;  %v186_v9 = vld [vmem:[%s276_s3] ss:$0 sm:$0xff] }
   0x7   :  { %196 = vmatpush3.bf16.msra.mxu0 %v207_v1 }
   0x8   :  { %197 = vmatprep.subr.bf16.mxu0 %v208_v2 }
   0xb   :  { %198 = vmatpush3.bf16.msra.mxu0 %v208_v2 }
   0xc   :  { %199 = vmatprep.subr.bf16.mxu0 %v209_v4 }
   0xf   :  { %200 = vmatpush3.bf16.msra.mxu0 %v209_v4 }
  0x12   :  { %202 = vmatmul.mubr.msk.bf16.vlgmr.msra.gmra.mrb[0].mxu0 %vm76_vm0, %v211_v5 }
  0xe5   :  { %v203_v6 = vpop.f32.mrb[0].mxu0 }
  0xe6   :  { %v117_v8 = vpop.f32.mrb[1].mxu0  ;;  %v156_v11 = vmul.f32 %v203_v6, %v185_v7 }
  0xe7   :  { %v204_v10 = vpop.f32.mrb[2].mxu0  ;;  %v154_v13 = vmul.f32 %v185_v7, %v117_v8 }
  0xe8   :  { %v120_v12 = vpop.f32.mrb[3].mxu0  ;;  %v167_v14 = vadd.f32 %v186_v9, %v156_v11  ;;  %v157_v15 = vmul.f32 %v204_v10, %v185_v7 }
  0xe9   :  { %v165_v16 = vadd.f32 %v186_v9, %v154_v13  ;;  %v155_v17 = vmul.f32 %v185_v7, %v120_v12 }
  0xea   :  { %171 = vst [vmem:[%s277_s4 + $0x10] sm:$0xff] %v167_v14  ;;  %v168_v18 = vadd.f32 %v186_v9, %v157_v15 }
  0xeb   :  { %169 = vst [vmem:[%s277_s4] sm:$0xff] %v165_v16  ;;  %v166_v19 = vadd.f32 %v186_v9, %v155_v17 }
  0xec   :  { %172 = vst [vmem:[%s277_s4 + $0x18] sm:$0xff] %v168_v18 }
  0xed   :  { %170 = vst [vmem:[%s277_s4 + $0x8] sm:$0xff] %v166_v19 }

// kernel: tomato_leaf_net.31
= control target key start
LH: loop header
LB: loop body
LE: loop exit
PB: predicated region body
PF: predicated region fallthrough
CT: control target
= control target key end

     0   :  { %s1199_s18 = smov 0   ;;  %s1201_s19 = smov 0   ;;  %s1378_s0 = inlined_call_operand.vmem [shape: bf16[32,1152], index: 0, kind: input, shape index: {}]   ;;  %s1379_s1 = inlined_call_operand.vmem [shape: bf16[1152,128], index: 1, kind: input, shape index: {}]   ;;  %s1380_s2 = inlined_call_operand.vmem [shape: f32[1,128], index: 2, kind: input, shape index: {}]   ;;  %s1381_s3 = inlined_call_operand.vmem [shape: f32[1,128], index: 3, kind: input, shape index: {}]   ;;  %s1382_s4 = inlined_call_operand.vmem [shape: f32[32,128], index: 4, kind: input, shape index: {}]   ;;  %s1383_s5 = inlined_call_operand.vmem [shape: f32[32,128], index: 5, kind: output, shape index: {}]  }
   0x1   :  { %s1203_s20 = smov 0   ;;  %s1205_s21 = smov 0  }
   0x2   :  { %s1207_s22 = smov 0  }
   0x3 LB: > { %s27_s23 = sadd.s32 1, %s1162_s21  ;;  %p50_p1 = scmp.ne.s32.totalorder %s1154_s19, %s1150_s18  ;;  %s1166_s22 = sphi %s1207_s22, %s15_s22   ;;  %s1162_s21 = sphi %s1205_s21, %s1387_s21   ;;  %s1158_s20 = sphi %s1203_s20, %s1386_s20   ;;  %s1154_s19 = sphi %s1201_s19, %s1385_s19   ;;  %s1150_s18 = sphi %s1199_s18, %s1384_s18  }
   0x4   : > { %p28_p0 = scmp.ge.s32.totalorder %s27_s23, 3  ;;  %p51_p2 = scmp.eq.s32.totalorder %s1166_s22, 0 }
   0x5   : > { %s43_s25 = sadd.s32 1, %s1154_s19  ;;  %p944_p5 = scmp.ge.s32.totalorder %s1166_s22, 3 }
   0x6   : > { %s1389_s23 = smov (%p28_p0, %s27_s23), 0  ;;  %p52_p3 = por %p51_p2, %p50_p1 }
   0x7   : > { %s39_s24 = ssub.s32 %s1162_s21, %s1389_s23  ;;  %236 = sbr.rel (%p944_p5) target bundleno = 23 (0x17), region = 28 }
   0x8   : > { %p41_p4 = scmp.eq.s32.totalorder %s39_s24, 0 }
   0xa   : > { %s1234_s26 = scalar_select %p41_p4, %s1154_s19, %s43_s25  }
   0xe   : > { %239 = sbr.rel (!%p52_p3) target bundleno = 23 (0x17), region = 32  ;;  %s241_s27 = sand.u32 (%p52_p3), 1, %s1154_s19  }
   0xf   : > { %s994_s28 = smul.u32 (%p52_p3), 12, %s1162_s21 }
  0x10   : > { %s1053_s29 = smul.u32 (%p52_p3), 48, %s241_s27 }
  0x11   : > { %s249_s7 = scalar_lea.vmem (%p52_p3), %s1378_s0, %s994_s28 }
  0x12   : > { %v264_v0 = vld [vmem:[%s249_s7] sm:$0xff] (%p52_p3)  ;;  %v268_v2 = vld [vmem:[%s249_s7 + $0x48] sm:$0xff] (%p52_p3)  ;;  %s243_s8 = scalar_lea.vmem (%p52_p3), [#allocation2], %s1053_s29  ;;  %v950_v6 = vld [vmem:[%s249_s7 + $0x50] sm:$0xf] (%p52_p3) }
  0x13   : > { %v266_v1 = vld [vmem:[%s249_s7 + $0x24] sm:$0xff] (%p52_p3)  ;;  %265 = vst [vmem:[%s243_s8] sm:$0xff] (%p52_p3), %v264_v0  ;;  %269 = vst [vmem:[%s243_s8 + $0x18] sm:$0xff] (%p52_p3), %v268_v2  ;;  %v270_v3 = vld [vmem:[%s249_s7 + $0x6c] sm:$0xff] (%p52_p3) }
  0x14   : > { %267 = vst [vmem:[%s243_s8 + $0xc] sm:$0xff] (%p52_p3), %v266_v1  ;;  %v946_v4 = vld [vmem:[%s249_s7 + $0x8] sm:$0xf] (%p52_p3)  ;;  %v948_v5 = vld [vmem:[%s249_s7 + $0x2c] sm:$0xf] (%p52_p3)  ;;  %271 = vst [vmem:[%s243_s8 + $0x24] sm:$0xff] (%p52_p3), %v270_v3 }
  0x15   : > { %947 = vst [vmem:[%s243_s8 + $0x8] sm:$0xf] %v946_v4  ;;  %949 = vst [vmem:[%s243_s8 + $0x14] sm:$0xf] %v948_v5  ;;  %v952_v7 = vld [vmem:[%s249_s7 + $0x74] sm:$0xf] }
  0x16   : > { %951 = vst [vmem:[%s243_s8 + $0x20] sm:$0xf] %v950_v6  ;;  %953 = vst [vmem:[%s243_s8 + $0x2c] sm:$0xf] %v952_v7 }
  0x17 PF: > { %p954_p6 = scmp.ge.s32.totalorder %s1166_s22, 1  ;;  %p303_p7 = scmp.lt.s32.totalorder %s1166_s22, 4 }
  0x19   : > { %p304_p8 = pnand %p954_p6, %p303_p7 }
  0x1a   : > { %s310_s9 = sand.u32 (!%p304_p8), 1, %s1150_s18   ;;  %s364_s10 = smul.u32 (!%p304_p8), 48, %s1158_s20 }
  0x1b   : > { %307 = sbr.rel (%p304_p8) target bundleno = 320 (0x140), region = 62  ;;  %p956_p10 = scmp.ne.s32.totalorder (!%p304_p8), %s1158_s20, 0 }
  0x1c   : > { %s1054_s11 = smul.u32 (!%p304_p8), 48, %s310_s9  ;;  %p365_p9 = scmp.lt.s32.totalorder (!%p304_p8), %s364_s10, 143 }
  0x1e   : > { %s1251_s16 = scalar_lea.vmem (!%p304_p8), [#allocation2], %s1054_s11 }
  0x22   : > { %s1391_s10 = smov (!%p365_p9, %s364_s10), 143  ;;  %401 = sbr.rel (%p956_p10) target bundleno = 41 (0x29), region = 70 }
  0x23   : > { %s955_s12 = sshll.u32 %s1391_s10, 2  ;;  %v1168_v8 = vmov (!%p956_p10), 0.0  }
  0x24   : > { %s1249_s15 = scalar_lea.vmem %s1379_s1, %s955_s12  ;;  %402 = vst [vmem:[%s1383_s5] sm:$0xff] (!%p956_p10), %v1168_v8  ;;  %403 = vst [vmem:[%s1383_s5 + $0x8] sm:$0xff] (!%p956_p10), %v1168_v8 }
  0x25   : > { %404 = vst [vmem:[%s1383_s5 + $0x10] sm:$0xff] (!%p956_p10), %v1168_v8  ;;  %405 = vst [vmem:[%s1383_s5 + $0x18] sm:$0xff] (!%p956_p10), %v1168_v8 }
  0x29 PF: > { %v1096_v9 = vld [vmem:[%s1249_s15 + $0x40] sm:$0xff]   ;;  %v1099_v12 = vld [vmem:[%s1249_s15 + $0x48] sm:$0xff]   ;;  %v1102_v15 = vld [vmem:[%s1249_s15 + $0x50] sm:$0xff]   ;;  %p987_p11 = scmp.ne.s32.totalorder %s1158_s20, 2 }
  0x2a   : > { %v1097_v10 = vld [vmem:[%s1249_s15] sm:$0xff]   ;;  %995 = vmatprep.subr.bf16.mxu0 %v1096_v9  ;;  %v1100_v13 = vld [vmem:[%s1249_s15 + $0x8] sm:$0xff]   ;;  %v1103_v16 = vld [vmem:[%s1249_s15 + $0x10] sm:$0xff]  }
  0x2b   : > { %v1098_v11 = vld [vmem:[%s1249_s15 + $0x80] sm:$0xff]   ;;  %996 = vmatpush3.bf16.msra.mxu0 %v1097_v10  ;;  %v1101_v14 = vld [vmem:[%s1249_s15 + $0x88] sm:$0xff]   ;;  %v1104_v17 = vld [vmem:[%s1249_s15 + $0x90] sm:$0xff]  }
  0x2c   : > { %1033 = vmatprep.subr.bf16.mxu1 %v1098_v11  ;;  %997 = vmatprep.subr.bf16.mxu0 %v1099_v12  ;;  %v1105_v18 = vld [vmem:[%s1249_s15 + $0x58] sm:$0xff]   ;;  %v1108_v21 = vld [vmem:[%s1249_s15 + $0x60] sm:$0xff]   ;;  %v1111_v24 = vld [vmem:[%s1249_s15 + $0x68] sm:$0xff]  }
  0x2d   : > { %1034 = vmatpush3.bf16.msra.mxu1 %v1098_v11  ;;  %v1106_v19 = vld [vmem:[%s1249_s15 + $0x18] sm:$0xff]   ;;  %v1110_v22 = vld [vmem:[%s1249_s15 + $0xa0] sm:$0xff]   ;;  %v1113_v25 = vld [vmem:[%s1249_s15 + $0xa8] sm:$0xff]  }
  0x2e   : > { %1035 = vmatprep.subr.bf16.mxu1 %v1101_v14  ;;  %v1107_v20 = vld [vmem:[%s1249_s15 + $0x98] sm:$0xff]   ;;  %v1109_v23 = vld [vmem:[%s1249_s15 + $0x20] sm:$0xff]   ;;  %v1112_v26 = vld [vmem:[%s1249_s15 + $0x28] sm:$0xff]  }
  0x2f   : > { %998 = vmatpush3.bf16.msra.mxu0 %v1100_v13  ;;  %v1114_v27 = vld [vmem:[%s1249_s15 + $0x70] sm:$0xff]   ;;  %v1117_v30 = vld [vmem:[%s1249_s15 + $0x78] sm:$0xff]   ;;  %v406_v45 = vld [vmem:[%s1383_s5] sm:$0xff] }
  0x30   : > { %999 = vmatprep.subr.bf16.mxu0 %v1102_v15  ;;  %v1115_v28 = vld [vmem:[%s1249_s15 + $0x30] sm:$0xff]   ;;  %v1119_v31 = vld [vmem:[%s1249_s15 + $0xb8] sm:$0xff]   ;;  %v407_v50 = vld [vmem:[%s1383_s5 + $0x8] sm:$0xff] }
  0x31   : > { %1036 = vmatpush3.bf16.msra.mxu1 %v1101_v14  ;;  %v1116_v29 = vld [vmem:[%s1249_s15 + $0xb0] sm:$0xff]   ;;  %v1118_v34 = vld [vmem:[%s1249_s15 + $0x38] sm:$0xff]   ;;  %v988_v4 = vld [vmem:[%s1380_s2] ss:$0 sm:$0xff] (!%p987_p11) }
  0x32   : > { %1037 = vmatprep.subr.bf16.mxu1 %v1104_v17  ;;  %v1122_v32 = vld [vmem:[%s1251_s16 + $0x4] ss:$12 sps:$4 sm:$0xff]   ;;  %v1123_v33 = vld [vmem:[%s1251_s16 + $0x8] ss:$12 sps:$4 sm:$0xff]   ;;  %v1120_v35 = vld [vmem:[%s1251_s16] ss:$12 sps:$4 sm:$0xff]  }
  0x33   : > { %1000 = vmatpush3.bf16.msra.mxu0 %v1103_v16  ;;  %674 = vmatprep.mubr.bf16.mxu0 %v1122_v32  ;;  %v1125_v36 = vld [vmem:[%s1251_s16 + $0x1c] ss:$12 sps:$4 sm:$0xff]   ;;  %v1124_v37 = vld [vmem:[%s1251_s16 + $0x20] ss:$12 sps:$4 sm:$0xff]   ;;  %v1127_v38 = vld [vmem:[%s1251_s16 + $0x18] ss:$12 sps:$4 sm:$0xff]  }
  0x34   : > { %1001 = vmatprep.subr.bf16.mxu0 %v1105_v18  ;;  %1049 = vmatprep.mubr.bf16.mxu1 %v1123_v33  ;;  %v408_v59 = vld [vmem:[%s1383_s5 + $0x10] sm:$0xff]  ;;  %v409_v63 = vld [vmem:[%s1383_s5 + $0x18] sm:$0xff]  ;;  %v989_v5 = vld [vmem:[%s1381_s3] ss:$0 sm:$0xff] (!%p987_p11) }
  0x35   : > { %1038 = vmatpush3.bf16.msra.mxu1 %v1104_v17  ;;  %v778_v8 = vld [vmem:[%s1382_s4] sm:$0xff] (!%p987_p11)  ;;  %v779_v13 = vld [vmem:[%s1382_s4 + $0x8] sm:$0xff] (!%p987_p11)  ;;  %v780_v17 = vld [vmem:[%s1382_s4 + $0x10] sm:$0xff] (!%p987_p11) }
  0x36   : > { %1039 = vmatprep.subr.bf16.mxu1 %v1107_v20  ;;  %v781_v18 = vld [vmem:[%s1382_s4 + $0x18] sm:$0xff] (!%p987_p11) }
  0x37   : > { %1002 = vmatpush3.bf16.msra.mxu0 %v1106_v19 }
  0x38   : > { %1003 = vmatprep.subr.bf16.mxu0 %v1108_v21 }
  0x39   : > { %1040 = vmatpush3.bf16.msra.mxu1 %v1107_v20 }
  0x3a   : > { %1041 = vmatprep.subr.bf16.mxu1 %v1110_v22 }
  0x3b   : > { %1004 = vmatpush3.bf16.msra.mxu0 %v1109_v23 }
  0x3c   : > { %1005 = vmatprep.subr.bf16.mxu0 %v1111_v24 }
  0x3d   : > { %1042 = vmatpush3.bf16.msra.mxu1 %v1110_v22 }
  0x3e   : > { %1043 = vmatprep.subr.bf16.mxu1 %v1113_v25 }
  0x3f   : > { %1006 = vmatpush3.bf16.msra.mxu0 %v1112_v26 }
  0x40   : > { %1007 = vmatprep.subr.bf16.mxu0 %v1114_v27 }
  0x41   : > { %1044 = vmatpush3.bf16.msra.mxu1 %v1113_v25 }
  0x42   : > { %1045 = vmatprep.subr.bf16.mxu1 %v1116_v29 }
  0x43   : > { %1008 = vmatpush3.bf16.msra.mxu0 %v1115_v28 }
  0x44   : > { %1009 = vmatprep.subr.bf16.mxu0 %v1117_v30 }
  0x45   : > { %1046 = vmatpush3.bf16.msra.mxu1 %v1116_v29 }
  0x46   : > { %1047 = vmatprep.subr.bf16.mxu1 %v1119_v31 }
  0x47   : > { %1010 = vmatpush3.bf16.msra.mxu0 %v1118_v34 }
  0x49   : > { %1048 = vmatpush3.bf16.msra.mxu1 %v1119_v31 }
  0x4a   : > { %675 = vmatmul.mubr.bf16.vlgmr.msra.gmra.mrb[0].mxu0 %v1120_v35 }
  0x4b   : > { %682 = vmatprep.mubr.bf16.mxu0 %v1125_v36 }
  0x4c   : > { %1050 = vmatmul.mubr.bf16.vlgmr.msra.gmra.mrb[0].mxu1 %v1124_v37 }
  0x52   : > { %683 = vmatmul.mubr.bf16.gmra.mrb[4].mxu0 %v1127_v38 }
 0x11d   : > { %v1011_v39 = vpop.f32.mrb[0].mxu0 }
 0x11e   : > { %v1012_v40 = vpop.f32.mrb[1].mxu0 }
 0x11f   : > { %v1013_v41 = vadd.f32 %v1012_v40, %v1011_v39  ;;  %v1014_v42 = vpop.f32.mrb[2].mxu0  ;;  %v1051_v43 = vpop.f32.mrb[0].mxu1 }
 0x120   : > { %v1015_v44 = vpop.f32.mrb[3].mxu0  ;;  %v725_v46 = vpop.f32.mrb[1].mxu1 }
 0x121   : > { %v1016_v47 = vadd.f32 %v1015_v44, %v1014_v42  ;;  %v726_v48 = vadd.f32 %v1013_v41, %v725_v46  ;;  %v1052_v49 = vpop.f32.mrb[2].mxu1 }
 0x122   : > { %v728_v51 = vpop.f32.mrb[3].mxu1 }
 0x123   : > { %v740_v52 = vadd.f32 %v726_v48, %v406_v45  ;;  %v729_v53 = vadd.f32 %v1016_v47, %v728_v51 }
 0x125   : > { %744 = vst [vmem:[%s1383_s5] sm:$0xff] %v740_v52  ;;  %v741_v54 = vadd.f32 %v729_v53, %v407_v50  ;;  %v1017_v55 = vpop.f32.mrb[4].mxu0 }
 0x126   : > { %v1018_v56 = vpop.f32.mrb[5].mxu0 }
 0x127   : > { %745 = vst [vmem:[%s1383_s5 + $0x8] sm:$0xff] %v741_v54  ;;  %v1019_v57 = vadd.f32 %v1018_v56, %v1017_v55  ;;  %v1020_v58 = vpop.f32.mrb[6].mxu0 }
 0x128   : > { %v1021_v60 = vpop.f32.mrb[7].mxu0 }
 0x129   : > { %v734_v61 = vadd.f32 %v1051_v43, %v1019_v57  ;;  %v1022_v62 = vadd.f32 %v1021_v60, %v1020_v58  ;;  %751 = sbr.rel (%p987_p11) target bundleno = 320 (0x140), region = 74 }
 0x12b   : > { %v742_v0 = vadd.f32 %v734_v61, %v408_v59  ;;  %v737_v1 = vadd.f32 %v1052_v49, %v1022_v62 }
 0x12c   : > { %v752_v3 = vld [vmem:[%s1383_s5] sm:$0xff] (!%p987_p11) }
 0x12d   : > { %746 = vst [vmem:[%s1383_s5 + $0x10] sm:$0xff] %v742_v0  ;;  %v743_v2 = vadd.f32 %v737_v1, %v409_v63  ;;  %v763_v6 = vmul.f32 (!%p987_p11), %v988_v4, %v752_v3 }
 0x12e   : > { %v753_v7 = vld [vmem:[%s1383_s5 + $0x8] sm:$0xff] (!%p987_p11) }
 0x12f   : > { %747 = vst [vmem:[%s1383_s5 + $0x18] sm:$0xff] %v743_v2  ;;  %v764_v9 = vmul.f32 (!%p987_p11), %v988_v4, %v753_v7  ;;  %v774_v12 = vadd.f32 (!%p987_p11), %v989_v5, %v763_v6 }
 0x131   : > { %v775_v16 = vadd.f32 %v989_v5, %v764_v9  ;;  %v782_v19 = vadd.f32 %v778_v8, %v774_v12 }
 0x133   : > { %v783_v22 = vadd.f32 %v779_v13, %v775_v16  ;;  %v786_v23 = vmax.f32 %v782_v19, 0.0 }
 0x134   : > { %v754_v10 = vld [vmem:[%s1383_s5 + $0x10] sm:$0xff] }
 0x135   : > { %v765_v14 = vmul.f32 %v988_v4, %v754_v10  ;;  %v787_v26 = vmax.f32 %v783_v22, 0.0  ;;  %790 = vst [vmem:[%s1383_s5] sm:$0xff] %v786_v23 }
 0x136   : > { %v755_v11 = vld [vmem:[%s1383_s5 + $0x18] sm:$0xff] }
 0x137   : > { %v766_v15 = vmul.f32 %v988_v4, %v755_v11  ;;  %v776_v20 = vadd.f32 %v989_v5, %v765_v14  ;;  %791 = vst [vmem:[%s1383_s5 + $0x8] sm:$0xff] %v787_v26 }
 0x139   : > { %v777_v21 = vadd.f32 %v989_v5, %v766_v15  ;;  %v784_v24 = vadd.f32 %v780_v17, %v776_v20 }
 0x13b   : > { %v785_v25 = vadd.f32 %v781_v18, %v777_v21  ;;  %v788_v27 = vmax.f32 %v784_v24, 0.0 }
 0x13d   : > { %v789_v28 = vmax.f32 %v785_v25, 0.0  ;;  %792 = vst [vmem:[%s1383_s5 + $0x10] sm:$0xff] %v788_v27 }
 0x13f   : > { %793 = vst [vmem:[%s1383_s5 + $0x18] sm:$0xff] %v789_v28 }
 0x140 PF: > { %s15_s22 = sadd.s32 1, %s1166_s22   ;;  %s1384_s18 = smov %s1154_s19 }
 0x141   : > { %p12_p12 = scmp.ge.s32.totalorder %s15_s22, 5   ;;  %s1385_s19 = smov %s1234_s26 }
 0x142   : > { %s1386_s20 = smov %s1162_s21  ;;  %s1387_s21 = smov %s1389_s23 }
 0x143   :  { %14 = sbr.rel (!%p12_p12) target bundleno = 3 (0x3), region = 127 }

// kernel: tomato_leaf_net.32
= control target key start
LH: loop header
LB: loop body
LE: loop exit
PB: predicated region body
PF: predicated region fallthrough
CT: control target
= control target key end

     0   :  { %s1107_s15 = smov 0   ;;  %s1109_s16 = smov 0   ;;  %s1274_s0 = inlined_call_operand.vmem [shape: bf16[32,1152], index: 0, kind: input, shape index: {}]   ;;  %s1275_s1 = inlined_call_operand.vmem [shape: bf16[1152,128], index: 1, kind: input, shape index: {}]   ;;  %s1276_s2 = inlined_call_operand.vmem [shape: f32[1,128], index: 2, kind: input, shape index: {}]   ;;  %s1277_s3 = inlined_call_operand.vmem [shape: f32[1,128], index: 3, kind: input, shape index: {}]   ;;  %s1278_s4 = inlined_call_operand.vmem [shape: f32[32,128], index: 4, kind: output, shape index: {}]  }
   0x1   :  { %s1111_s17 = smov 0   ;;  %s1113_s18 = smov 0  }
   0x2   :  { %s1115_s19 = smov 0  }
   0x3 LB: > { %s26_s20 = sadd.s32 1, %s1075_s18  ;;  %p49_p1 = scmp.ne.s32.totalorder %s1067_s16, %s1063_s15  ;;  %s1079_s19 = sphi %s1115_s19, %s14_s19   ;;  %s1075_s18 = sphi %s1113_s18, %s1282_s18   ;;  %s1071_s17 = sphi %s1111_s17, %s1281_s17   ;;  %s1067_s16 = sphi %s1109_s16, %s1280_s16   ;;  %s1063_s15 = sphi %s1107_s15, %s1279_s15  }
   0x4   : > { %p27_p0 = scmp.ge.s32.totalorder %s26_s20, 3  ;;  %p50_p2 = scmp.eq.s32.totalorder %s1079_s19, 0 }
   0x5   : > { %s42_s22 = sadd.s32 1, %s1067_s16  ;;  %p857_p5 = scmp.ge.s32.totalorder %s1079_s19, 3 }
   0x6   : > { %s1284_s20 = smov (%p27_p0, %s26_s20), 0  ;;  %p51_p3 = por %p50_p2, %p49_p1 }
   0x7   : > { %s38_s21 = ssub.s32 %s1075_s18, %s1284_s20  ;;  %195 = sbr.rel (%p857_p5) target bundleno = 23 (0x17), region = 24 }
   0x8   : > { %p40_p4 = scmp.eq.s32.totalorder %s38_s21, 0 }
   0xa   : > { %s1142_s23 = scalar_select %p40_p4, %s1067_s16, %s42_s22  }
   0xe   : > { %198 = sbr.rel (!%p51_p3) target bundleno = 23 (0x17), region = 28  ;;  %s200_s24 = sand.u32 (%p51_p3), 1, %s1067_s16  }
   0xf   : > { %s907_s25 = smul.u32 (%p51_p3), 12, %s1075_s18 }
  0x10   : > { %s966_s26 = smul.u32 (%p51_p3), 48, %s200_s24 }
  0x11   : > { %s208_s29 = scalar_lea.vmem (%p51_p3), %s1274_s0, %s907_s25 }
  0x12   : > { %v223_v0 = vld [vmem:[%s208_s29] sm:$0xff] (%p51_p3)  ;;  %v227_v2 = vld [vmem:[%s208_s29 + $0x48] sm:$0xff] (%p51_p3)  ;;  %s202_s30 = scalar_lea.vmem (%p51_p3), [#allocation2], %s966_s26  ;;  %v863_v6 = vld [vmem:[%s208_s29 + $0x50] sm:$0xf] (%p51_p3) }
  0x13   : > { %v225_v1 = vld [vmem:[%s208_s29 + $0x24] sm:$0xff] (%p51_p3)  ;;  %224 = vst [vmem:[%s202_s30] sm:$0xff] (%p51_p3), %v223_v0  ;;  %228 = vst [vmem:[%s202_s30 + $0x18] sm:$0xff] (%p51_p3), %v227_v2  ;;  %v229_v3 = vld [vmem:[%s208_s29 + $0x6c] sm:$0xff] (%p51_p3) }
  0x14   : > { %226 = vst [vmem:[%s202_s30 + $0xc] sm:$0xff] (%p51_p3), %v225_v1  ;;  %v859_v4 = vld [vmem:[%s208_s29 + $0x8] sm:$0xf] (%p51_p3)  ;;  %v861_v5 = vld [vmem:[%s208_s29 + $0x2c] sm:$0xf] (%p51_p3)  ;;  %230 = vst [vmem:[%s202_s30 + $0x24] sm:$0xff] (%p51_p3), %v229_v3 }
  0x15   : > { %860 = vst [vmem:[%s202_s30 + $0x8] sm:$0xf] %v859_v4  ;;  %862 = vst [vmem:[%s202_s30 + $0x14] sm:$0xf] %v861_v5  ;;  %v865_v7 = vld [vmem:[%s208_s29 + $0x74] sm:$0xf] }
  0x16   : > { %864 = vst [vmem:[%s202_s30 + $0x20] sm:$0xf] %v863_v6  ;;  %866 = vst [vmem:[%s202_s30 + $0x2c] sm:$0xf] %v865_v7 }
  0x17 PF: > { %p867_p6 = scmp.ge.s32.totalorder %s1079_s19, 1  ;;  %p262_p7 = scmp.lt.s32.totalorder %s1079_s19, 4 }
  0x19   : > { %p263_p8 = pnand %p867_p6, %p262_p7 }
  0x1a   : > { %s269_s5 = sand.u32 (!%p263_p8), 1, %s1063_s15   ;;  %s313_s6 = smul.u32 (!%p263_p8), 48, %s1071_s17 }
  0x1b   : > { %266 = sbr.rel (%p263_p8) target bundleno = 318 (0x13e), region = 58  ;;  %p869_p10 = scmp.ne.s32.totalorder (!%p263_p8), %s1071_s17, 0 }
  0x1c   : > { %s967_s7 = smul.u32 (!%p263_p8), 48, %s269_s5  ;;  %p314_p9 = scmp.lt.s32.totalorder (!%p263_p8), %s313_s6, 143 }
  0x1e   : > { %s1159_s12 = scalar_lea.vmem (!%p263_p8), [#allocation2], %s967_s7 }
  0x22   : > { %s1286_s6 = smov (!%p314_p9, %s313_s6), 143  ;;  %341 = sbr.rel (%p869_p10) target bundleno = 41 (0x29), region = 66 }
  0x23   : > { %s868_s8 = sshll.u32 %s1286_s6, 2  ;;  %v1081_v8 = vmov (!%p869_p10), 0.0  }
  0x24   : > { %s1157_s11 = scalar_lea.vmem %s1275_s1, %s868_s8  ;;  %342 = vst [vmem:[%s1278_s4] sm:$0xff] (!%p869_p10), %v1081_v8  ;;  %343 = vst [vmem:[%s1278_s4 + $0x8] sm:$0xff] (!%p869_p10), %v1081_v8 }
  0x25   : > { %344 = vst [vmem:[%s1278_s4 + $0x10] sm:$0xff] (!%p869_p10), %v1081_v8  ;;  %345 = vst [vmem:[%s1278_s4 + $0x18] sm:$0xff] (!%p869_p10), %v1081_v8 }
  0x29 PF: > { %v1009_v9 = vld [vmem:[%s1157_s11 + $0x40] sm:$0xff]   ;;  %v1012_v12 = vld [vmem:[%s1157_s11 + $0x48] sm:$0xff]   ;;  %v1015_v15 = vld [vmem:[%s1157_s11 + $0x50] sm:$0xff]   ;;  %p900_p11 = scmp.ne.s32.totalorder %s1071_s17, 2 }
  0x2a   : > { %v1010_v10 = vld [vmem:[%s1157_s11] sm:$0xff]   ;;  %908 = vmatprep.subr.bf16.mxu0 %v1009_v9  ;;  %v1013_v13 = vld [vmem:[%s1157_s11 + $0x8] sm:$0xff]   ;;  %v1016_v16 = vld [vmem:[%s1157_s11 + $0x10] sm:$0xff]  }
  0x2b   : > { %v1011_v11 = vld [vmem:[%s1157_s11 + $0x80] sm:$0xff]   ;;  %909 = vmatpush3.bf16.msra.mxu0 %v1010_v10  ;;  %v1014_v14 = vld [vmem:[%s1157_s11 + $0x88] sm:$0xff]   ;;  %v1017_v17 = vld [vmem:[%s1157_s11 + $0x90] sm:$0xff]  }
  0x2c   : > { %946 = vmatprep.subr.bf16.mxu1 %v1011_v11  ;;  %910 = vmatprep.subr.bf16.mxu0 %v1012_v12  ;;  %v1018_v18 = vld [vmem:[%s1157_s11 + $0x58] sm:$0xff]   ;;  %v1021_v21 = vld [vmem:[%s1157_s11 + $0x60] sm:$0xff]   ;;  %v1024_v24 = vld [vmem:[%s1157_s11 + $0x68] sm:$0xff]  }
  0x2d   : > { %947 = vmatpush3.bf16.msra.mxu1 %v1011_v11  ;;  %v1019_v19 = vld [vmem:[%s1157_s11 + $0x18] sm:$0xff]   ;;  %v1023_v22 = vld [vmem:[%s1157_s11 + $0xa0] sm:$0xff]   ;;  %v1026_v25 = vld [vmem:[%s1157_s11 + $0xa8] sm:$0xff]  }
  0x2e   : > { %948 = vmatprep.subr.bf16.mxu1 %v1014_v14  ;;  %v1020_v20 = vld [vmem:[%s1157_s11 + $0x98] sm:$0xff]   ;;  %v1022_v23 = vld [vmem:[%s1157_s11 + $0x20] sm:$0xff]   ;;  %v1025_v26 = vld [vmem:[%s1157_s11 + $0x28] sm:$0xff]  }
  0x2f   : > { %911 = vmatpush3.bf16.msra.mxu0 %v1013_v13  ;;  %v1027_v27 = vld [vmem:[%s1157_s11 + $0x70] sm:$0xff]   ;;  %v1030_v30 = vld [vmem:[%s1157_s11 + $0x78] sm:$0xff]   ;;  %v346_v45 = vld [vmem:[%s1278_s4] sm:$0xff] }
  0x30   : > { %912 = vmatprep.subr.bf16.mxu0 %v1015_v15  ;;  %v1028_v28 = vld [vmem:[%s1157_s11 + $0x30] sm:$0xff]   ;;  %v1032_v31 = vld [vmem:[%s1157_s11 + $0xb8] sm:$0xff]   ;;  %v347_v50 = vld [vmem:[%s1278_s4 + $0x8] sm:$0xff] }
  0x31   : > { %949 = vmatpush3.bf16.msra.mxu1 %v1014_v14  ;;  %v1029_v29 = vld [vmem:[%s1157_s11 + $0xb0] sm:$0xff]   ;;  %v1031_v34 = vld [vmem:[%s1157_s11 + $0x38] sm:$0xff]   ;;  %v901_v4 = vld [vmem:[%s1276_s2] ss:$0 sm:$0xff] (!%p900_p11) }
  0x32   : > { %950 = vmatprep.subr.bf16.mxu1 %v1017_v17  ;;  %v1035_v32 = vld [vmem:[%s1159_s12 + $0x4] ss:$12 sps:$4 sm:$0xff]   ;;  %v1036_v33 = vld [vmem:[%s1159_s12 + $0x8] ss:$12 sps:$4 sm:$0xff]   ;;  %v1033_v35 = vld [vmem:[%s1159_s12] ss:$12 sps:$4 sm:$0xff]  }
  0x33   : > { %913 = vmatpush3.bf16.msra.mxu0 %v1016_v16  ;;  %614 = vmatprep.mubr.bf16.mxu0 %v1035_v32  ;;  %v1038_v36 = vld [vmem:[%s1159_s12 + $0x1c] ss:$12 sps:$4 sm:$0xff]   ;;  %v1037_v37 = vld [vmem:[%s1159_s12 + $0x20] ss:$12 sps:$4 sm:$0xff]   ;;  %v1040_v38 = vld [vmem:[%s1159_s12 + $0x18] ss:$12 sps:$4 sm:$0xff]  }
  0x34   : > { %914 = vmatprep.subr.bf16.mxu0 %v1018_v18  ;;  %962 = vmatprep.mubr.bf16.mxu1 %v1036_v33  ;;  %v348_v59 = vld [vmem:[%s1278_s4 + $0x10] sm:$0xff]  ;;  %v349_v63 = vld [vmem:[%s1278_s4 + $0x18] sm:$0xff]  ;;  %v902_v5 = vld [vmem:[%s1277_s3] ss:$0 sm:$0xff] (!%p900_p11) }
  0x35   : > { %951 = vmatpush3.bf16.msra.mxu1 %v1017_v17 }
  0x36   : > { %952 = vmatprep.subr.bf16.mxu1 %v1020_v20 }
  0x37   : > { %915 = vmatpush3.bf16.msra.mxu0 %v1019_v19 }
  0x38   : > { %916 = vmatprep.subr.bf16.mxu0 %v1021_v21 }
  0x39   : > { %953 = vmatpush3.bf16.msra.mxu1 %v1020_v20 }
  0x3a   : > { %954 = vmatprep.subr.bf16.mxu1 %v1023_v22 }
  0x3b   : > { %917 = vmatpush3.bf16.msra.mxu0 %v1022_v23 }
  0x3c   : > { %918 = vmatprep.subr.bf16.mxu0 %v1024_v24 }
  0x3d   : > { %955 = vmatpush3.bf16.msra.mxu1 %v1023_v22 }
  0x3e   : > { %956 = vmatprep.subr.bf16.mxu1 %v1026_v25 }
  0x3f   : > { %919 = vmatpush3.bf16.msra.mxu0 %v1025_v26 }
  0x40   : > { %920 = vmatprep.subr.bf16.mxu0 %v1027_v27 }
  0x41   : > { %957 = vmatpush3.bf16.msra.mxu1 %v1026_v25 }
  0x42   : > { %958 = vmatprep.subr.bf16.mxu1 %v1029_v29 }
  0x43   : > { %921 = vmatpush3.bf16.msra.mxu0 %v1028_v28 }
  0x44   : > { %922 = vmatprep.subr.bf16.mxu0 %v1030_v30 }
  0x45   : > { %959 = vmatpush3.bf16.msra.mxu1 %v1029_v29 }
  0x46   : > { %960 = vmatprep.subr.bf16.mxu1 %v1032_v31 }
  0x47   : > { %923 = vmatpush3.bf16.msra.mxu0 %v1031_v34 }
  0x49   : > { %961 = vmatpush3.bf16.msra.mxu1 %v1032_v31 }
  0x4a   : > { %615 = vmatmul.mubr.bf16.vlgmr.msra.gmra.mrb[0].mxu0 %v1033_v35 }
  0x4b   : > { %622 = vmatprep.mubr.bf16.mxu0 %v1038_v36 }
  0x4c   : > { %963 = vmatmul.mubr.bf16.vlgmr.msra.gmra.mrb[0].mxu1 %v1037_v37 }
  0x52   : > { %623 = vmatmul.mubr.bf16.gmra.mrb[4].mxu0 %v1040_v38 }
 0x11d   : > { %v924_v39 = vpop.f32.mrb[0].mxu0 }
 0x11e   : > { %v925_v40 = vpop.f32.mrb[1].mxu0 }
 0x11f   : > { %v926_v41 = vadd.f32 %v925_v40, %v924_v39  ;;  %v927_v42 = vpop.f32.mrb[2].mxu0  ;;  %v964_v43 = vpop.f32.mrb[0].mxu1 }
 0x120   : > { %v928_v44 = vpop.f32.mrb[3].mxu0  ;;  %v665_v46 = vpop.f32.mrb[1].mxu1 }
 0x121   : > { %v929_v47 = vadd.f32 %v928_v44, %v927_v42  ;;  %v666_v48 = vadd.f32 %v926_v41, %v665_v46  ;;  %v965_v49 = vpop.f32.mrb[2].mxu1 }
 0x122   : > { %v668_v51 = vpop.f32.mrb[3].mxu1 }
 0x123   : > { %v680_v52 = vadd.f32 %v666_v48, %v346_v45  ;;  %v669_v53 = vadd.f32 %v929_v47, %v668_v51 }
 0x125   : > { %684 = vst [vmem:[%s1278_s4] sm:$0xff] %v680_v52  ;;  %v681_v54 = vadd.f32 %v669_v53, %v347_v50  ;;  %v930_v55 = vpop.f32.mrb[4].mxu0 }
 0x126   : > { %v931_v56 = vpop.f32.mrb[5].mxu0 }
 0x127   : > { %685 = vst [vmem:[%s1278_s4 + $0x8] sm:$0xff] %v681_v54  ;;  %v932_v57 = vadd.f32 %v931_v56, %v930_v55  ;;  %v933_v58 = vpop.f32.mrb[6].mxu0 }
 0x128   : > { %v934_v60 = vpop.f32.mrb[7].mxu0 }
 0x129   : > { %v674_v61 = vadd.f32 %v964_v43, %v932_v57  ;;  %v935_v62 = vadd.f32 %v934_v60, %v933_v58  ;;  %691 = sbr.rel (%p900_p11) target bundleno = 318 (0x13e), region = 70 }
 0x12b   : > { %v682_v0 = vadd.f32 %v674_v61, %v348_v59  ;;  %v677_v1 = vadd.f32 %v965_v49, %v935_v62 }
 0x12c   : > { %v692_v3 = vld [vmem:[%s1278_s4] sm:$0xff] (!%p900_p11) }
 0x12d   : > { %686 = vst [vmem:[%s1278_s4 + $0x10] sm:$0xff] %v682_v0  ;;  %v683_v2 = vadd.f32 %v677_v1, %v349_v63  ;;  %v703_v6 = vmul.f32 (!%p900_p11), %v901_v4, %v692_v3 }
 0x12e   : > { %v693_v7 = vld [vmem:[%s1278_s4 + $0x8] sm:$0xff] (!%p900_p11) }
 0x12f   : > { %687 = vst [vmem:[%s1278_s4 + $0x18] sm:$0xff] %v683_v2  ;;  %v704_v10 = vmul.f32 (!%p900_p11), %v901_v4, %v693_v7  ;;  %v714_v13 = vadd.f32 (!%p900_p11), %v902_v5, %v703_v6 }
 0x131   : > { %v715_v14 = vadd.f32 %v902_v5, %v704_v10  ;;  %v718_v17 = vmax.f32 %v714_v13, 0.0 }
 0x133   : > { %v719_v18 = vmax.f32 %v715_v14, 0.0  ;;  %722 = vst [vmem:[%s1278_s4] sm:$0xff] %v718_v17 }
 0x134   : > { %v694_v8 = vld [vmem:[%s1278_s4 + $0x10] sm:$0xff] }
 0x135   : > { %v705_v11 = vmul.f32 %v901_v4, %v694_v8  ;;  %723 = vst [vmem:[%s1278_s4 + $0x8] sm:$0xff] %v719_v18 }
 0x136   : > { %v695_v9 = vld [vmem:[%s1278_s4 + $0x18] sm:$0xff] }
 0x137   : > { %v706_v12 = vmul.f32 %v901_v4, %v695_v9  ;;  %v716_v15 = vadd.f32 %v902_v5, %v705_v11 }
 0x139   : > { %v717_v16 = vadd.f32 %v902_v5, %v706_v12  ;;  %v720_v19 = vmax.f32 %v716_v15, 0.0 }
 0x13b   : > { %v721_v20 = vmax.f32 %v717_v16, 0.0  ;;  %724 = vst [vmem:[%s1278_s4 + $0x10] sm:$0xff] %v720_v19 }
 0x13d   : > { %725 = vst [vmem:[%s1278_s4 + $0x18] sm:$0xff] %v721_v20 }
 0x13e PF: > { %s14_s19 = sadd.s32 1, %s1079_s19   ;;  %s1279_s15 = smov %s1067_s16 }
 0x13f   : > { %p11_p12 = scmp.ge.s32.totalorder %s14_s19, 5   ;;  %s1280_s16 = smov %s1142_s23 }
 0x140   : > { %s1281_s17 = smov %s1075_s18  ;;  %s1282_s18 = smov %s1284_s20 }
 0x141   :  { %13 = sbr.rel (!%p11_p12) target bundleno = 3 (0x3), region = 120 }

// kernel: tomato_leaf_net.34
= control target key start
LH: loop header
LB: loop body
LE: loop exit
PB: predicated region body
PF: predicated region fallthrough
CT: control target
= control target key end

     0   :  { %s1105_s15 = smov 0   ;;  %s1107_s16 = smov 0   ;;  %s1234_s0 = inlined_call_operand.vmem [shape: bf16[8,1152], index: 0, kind: input, shape index: {}]   ;;  %s1235_s1 = inlined_call_operand.vmem [shape: bf16[1152,256], index: 1, kind: input, shape index: {}]   ;;  %s1236_s2 = inlined_call_operand.vmem [shape: f32[1,256], index: 2, kind: input, shape index: {}]   ;;  %s1237_s3 = inlined_call_operand.vmem [shape: f32[1,256], index: 3, kind: input, shape index: {}]   ;;  %s1238_s4 = inlined_call_operand.vmem [shape: f32[8,256], index: 4, kind: output, shape index: {}]  }
   0x1   :  { %s1109_s17 = smov 0  }
   0x2 LB: > { %s26_s18 = sadd.s32 1, %s1072_s16  ;;  %p891_p0 = scmp.ge.s32.totalorder %s1076_s17, 1  ;;  %s1076_s17 = sphi %s1109_s17, %s14_s17   ;;  %s1072_s16 = sphi %s1107_s16, %s1240_s16   ;;  %s1068_s15 = sphi %s1105_s15, %s1239_s15  }
   0x3   : > { %p27_p1 = scmp.ge.s32.totalorder %s26_s18, 3  ;;  %p229_p2 = scmp.lt.s32.totalorder %s1076_s17, 4 }
   0x5   : > { %s1242_s18 = smov (%p27_p1, %s26_s18), 0  ;;  %p230_p3 = pnand %p891_p0, %p229_p2 }
   0x6   : > { %s281_s19 = smul.u32 (!%p230_p3), 3, %s1068_s15  ;;  %p895_p6 = scmp.ne.s32.totalorder (!%p230_p3), %s1068_s15, 0 }
   0x7   : > { %233 = sbr.rel (%p230_p3) target bundleno = 321 (0x141), region = 36 }
   0x8   : > { %s291_s20 = smul.u32 (!%p230_p3), 48, %s1068_s15  ;;  %p284_p4 = scmp.lt.s32.totalorder (!%p230_p3), %s281_s19, 8 }
   0xa   : > { %p293_p5 = scmp.lt.s32.totalorder (!%p230_p3), %s291_s20, 143 }
   0xe   : > { %s1244_s19 = smov (!%p284_p4, %s281_s19), 8  ;;  %s1246_s20 = smov (!%p293_p5, %s291_s20), 143 }
   0xf   : > { %s892_s21 = sshll.u32 %s1244_s19, 2  ;;  %s952_s25 = sshll.u32 %s1246_s20, 3  ;;  %v1078_v0 = vmov (!%p895_p6), 0.0  }
  0x10   : > { %s1130_s24 = scalar_lea.vmem %s1234_s0, %s892_s21  ;;  %s1135_s28 = scalar_lea.vmem %s1235_s1, %s952_s25  ;;  %328 = vst [vmem:[%s1238_s4] sm:$0xff] (!%p895_p6), %v1078_v0  ;;  %329 = vst [vmem:[%s1238_s4 + $0x8] sm:$0xff] (!%p895_p6), %v1078_v0 }
  0x11   : > { %327 = sbr.rel (%p895_p6) target bundleno = 24 (0x18), region = 40 }
  0x18 PF: > { %v979_v1 = vld [vmem:[%s1135_s28 + $0x4] ss:$8 sps:$4 sm:$0xff]   ;;  %v981_v2 = vld [vmem:[%s1135_s28] ss:$8 sps:$4 sm:$0xff]   ;;  %v1079_v3 = vmov 0   ;;  %p947_p7 = scmp.ne.s32.totalorder %s1068_s15, 2 }
  0x19   : > { %706 = vmatprep.mubr.bf16.mxu1 %v1079_v3  ;;  %633 = vmatprep.subr.bf16.mxu0 %v979_v1  ;;  %v982_v4 = vld [vmem:[%s1135_s28 + $0x14] ss:$8 sps:$4 sm:$0xff]   ;;  %v984_v5 = vld [vmem:[%s1135_s28 + $0x10] ss:$8 sps:$4 sm:$0xff]   ;;  %v985_v6 = vld [vmem:[%s1135_s28 + $0x24] ss:$8 sps:$4 sm:$0xff]  }
  0x1a   : > { %634 = vmatpush1.bf16.msra.mxu0 %v981_v2  ;;  %v987_v7 = vld [vmem:[%s1135_s28 + $0x20] ss:$8 sps:$4 sm:$0xff]   ;;  %v988_v8 = vld [vmem:[%s1135_s28 + $0x34] ss:$8 sps:$4 sm:$0xff]   ;;  %v990_v9 = vld [vmem:[%s1135_s28 + $0x30] ss:$8 sps:$4 sm:$0xff]  }
  0x1b   : > { %635 = vmatprep.subr.bf16.mxu0 %v982_v4  ;;  %v1003_v10 = vld [vmem:[%s1135_s28 + $0x104] ss:$8 sps:$4 sm:$0xff]   ;;  %v1005_v11 = vld [vmem:[%s1135_s28 + $0x100] ss:$8 sps:$4 sm:$0xff]   ;;  %v1009_v13 = vld [vmem:[%s1135_s28 + $0x114] ss:$8 sps:$4 sm:$0xff]   ;;  %v727_v4 = vlaneseq (!%p947_p7) }
  0x1c   : > { %v991_v12 = vld [vmem:[%s1135_s28 + $0x44] ss:$8 sps:$4 sm:$0xff]   ;;  %674 = vmatprep.subr.bf16.mxu1 %v1003_v10  ;;  %v1011_v14 = vld [vmem:[%s1135_s28 + $0x110] ss:$8 sps:$4 sm:$0xff]   ;;  %v993_v15 = vld [vmem:[%s1135_s28 + $0x40] ss:$8 sps:$4 sm:$0xff]  }
  0x1d   : > { %675 = vmatpush1.bf16.msra.mxu1 %v1005_v11  ;;  %v994_v16 = vld [vmem:[%s1135_s28 + $0x54] ss:$8 sps:$4 sm:$0xff]   ;;  %v1015_v17 = vld [vmem:[%s1135_s28 + $0x124] ss:$8 sps:$4 sm:$0xff]   ;;  %v1017_v18 = vld [vmem:[%s1135_s28 + $0x120] ss:$8 sps:$4 sm:$0xff]  }
  0x1e   : > { %636 = vmatpush1.bf16.msra.mxu0 %v984_v5  ;;  %676 = vmatprep.subr.bf16.mxu1 %v1009_v13  ;;  %v996_v19 = vld [vmem:[%s1135_s28 + $0x50] ss:$8 sps:$4 sm:$0xff]   ;;  %v1021_v20 = vld [vmem:[%s1135_s28 + $0x134] ss:$8 sps:$4 sm:$0xff]   ;;  %v997_v21 = vld [vmem:[%s1135_s28 + $0x64] ss:$8 sps:$4 sm:$0xff]  }
  0x1f   : > { %637 = vmatprep.subr.bf16.mxu0 %v985_v6  ;;  %v1023_v22 = vld [vmem:[%s1135_s28 + $0x130] ss:$8 sps:$4 sm:$0xff]   ;;  %v999_v23 = vld [vmem:[%s1135_s28 + $0x60] ss:$8 sps:$4 sm:$0xff]   ;;  %v1027_v24 = vld [vmem:[%s1135_s28 + $0x144] ss:$8 sps:$4 sm:$0xff]  }
  0x20   : > { %v1000_v25 = vld [vmem:[%s1135_s28 + $0x74] ss:$8 sps:$4 sm:$0xff]   ;;  %v1029_v26 = vld [vmem:[%s1135_s28 + $0x140] ss:$8 sps:$4 sm:$0xff]   ;;  %v1002_v27 = vld [vmem:[%s1135_s28 + $0x70] ss:$8 sps:$4 sm:$0xff]  }
  0x21   : > { %677 = vmatpush1.bf16.msra.mxu1 %v1011_v14  ;;  %v1033_v28 = vld [vmem:[%s1135_s28 + $0x154] ss:$8 sps:$4 sm:$0xff]   ;;  %v1006_v29 = vld [vmem:[%s1135_s28 + $0x84] ss:$8 sps:$4 sm:$0xff]   ;;  %v1035_v30 = vld [vmem:[%s1135_s28 + $0x150] ss:$8 sps:$4 sm:$0xff]  }
  0x22   : > { %638 = vmatpush1.bf16.msra.mxu0 %v987_v7  ;;  %678 = vmatprep.subr.bf16.mxu1 %v1015_v17  ;;  %v1008_v31 = vld [vmem:[%s1135_s28 + $0x80] ss:$8 sps:$4 sm:$0xff]   ;;  %v1039_v32 = vld [vmem:[%s1135_s28 + $0x164] ss:$8 sps:$4 sm:$0xff]   ;;  %v1012_v33 = vld [vmem:[%s1135_s28 + $0x94] ss:$8 sps:$4 sm:$0xff]  }
  0x23   : > { %639 = vmatprep.subr.bf16.mxu0 %v988_v8  ;;  %v332_v34 = vld [vmem:[%s1130_s24] sm:$0xff]  ;;  %v1014_v37 = vld [vmem:[%s1135_s28 + $0x90] ss:$8 sps:$4 sm:$0xff]   ;;  %v1045_v38 = vld [vmem:[%s1135_s28 + $0x174] ss:$8 sps:$4 sm:$0xff]   ;;  %v728_v5 = vshrl.u32 (!%p947_p7), %v727_v4, 7 }
  0x24   : > { %v897_v35 = vcombine.high %v332_v34, %v332_v34  ;;  %v1041_v36 = vld [vmem:[%s1135_s28 + $0x160] ss:$8 sps:$4 sm:$0xff]   ;;  %v1018_v39 = vld [vmem:[%s1135_s28 + $0xa4] ss:$8 sps:$4 sm:$0xff]   ;;  %v1047_v40 = vld [vmem:[%s1135_s28 + $0x170] ss:$8 sps:$4 sm:$0xff]   ;;  %v896_v53 = vcombine.low %v332_v34, %v332_v34 }
  0x25   : > { %679 = vmatpush1.bf16.msra.mxu1 %v1017_v18  ;;  %v1020_v41 = vld [vmem:[%s1135_s28 + $0xa0] ss:$8 sps:$4 sm:$0xff]   ;;  %v1024_v42 = vld [vmem:[%s1135_s28 + $0xb4] ss:$8 sps:$4 sm:$0xff]   ;;  %v1026_v44 = vld [vmem:[%s1135_s28 + $0xb0] ss:$8 sps:$4 sm:$0xff]  }
  0x26   : > { %640 = vmatpush1.bf16.msra.mxu0 %v990_v9  ;;  %680 = vmatprep.subr.bf16.mxu1 %v1021_v20  ;;  %v1051_v43 = vld [vmem:[%s1130_s24 + $0x8] ss:$0 sps:$4 sm:$0xff]   ;;  %v1030_v45 = vld [vmem:[%s1135_s28 + $0xc4] ss:$8 sps:$4 sm:$0xff]   ;;  %v1036_v47 = vld [vmem:[%s1135_s28 + $0xd4] ss:$8 sps:$4 sm:$0xff]  }
  0x27   : > { %641 = vmatprep.subr.bf16.mxu0 %v991_v12  ;;  %665 = vmatprep.mubr.bf16.mxu0 %v897_v35  ;;  %v1032_v46 = vld [vmem:[%s1135_s28 + $0xc0] ss:$8 sps:$4 sm:$0xff]   ;;  %v1038_v48 = vld [vmem:[%s1135_s28 + $0xd0] ss:$8 sps:$4 sm:$0xff]   ;;  %v1042_v49 = vld [vmem:[%s1135_s28 + $0xe4] ss:$8 sps:$4 sm:$0xff]  }
  0x28   : > { %v1044_v50 = vld [vmem:[%s1135_s28 + $0xe0] ss:$8 sps:$4 sm:$0xff]   ;;  %v1048_v51 = vld [vmem:[%s1135_s28 + $0xf4] ss:$8 sps:$4 sm:$0xff]   ;;  %v1050_v52 = vld [vmem:[%s1135_s28 + $0xf0] ss:$8 sps:$4 sm:$0xff]  }
  0x29   : > { %681 = vmatpush1.bf16.msra.mxu1 %v1023_v22  ;;  %v330_v58 = vld [vmem:[%s1238_s4] sm:$0xff]  ;;  %v331_v61 = vld [vmem:[%s1238_s4 + $0x8] sm:$0xff]  ;;  %v729_v8 = vsub.s32 (!%p947_p7), 0, %v728_v5  ;;  %v733_v9 = vsub.s32 (!%p947_p7), 1, %v728_v5 }
  0x2a   : > { %642 = vmatpush1.bf16.msra.mxu0 %v993_v15  ;;  %682 = vmatprep.subr.bf16.mxu1 %v1027_v24  ;;  %v725_v6 = vld [vmem:[%s1236_s2] sm:$0x3] (!%p947_p7) }
  0x2b   : > { %643 = vmatprep.subr.bf16.mxu0 %v994_v16  ;;  %v739_v7 = vld [vmem:[%s1237_s3] sm:$0x3] (!%p947_p7)  ;;  %v730_v12 = vrot.slane (!%p947_p7), %v725_v6, %v729_v8  ;;  %v734_v14 = vrot.slane (!%p947_p7), %v725_v6, %v733_v9 }
  0x2c   : > { %v744_v13 = vrot.slane (!%p947_p7), %v739_v7, %v729_v8  ;;  %v748_v15 = vrot.slane (!%p947_p7), %v739_v7, %v733_v9 }
  0x2d   : > { %683 = vmatpush1.bf16.msra.mxu1 %v1029_v26 }
  0x2e   : > { %644 = vmatpush1.bf16.msra.mxu0 %v996_v19  ;;  %684 = vmatprep.subr.bf16.mxu1 %v1033_v28 }
  0x2f   : > { %645 = vmatprep.subr.bf16.mxu0 %v997_v21 }
  0x31   : > { %685 = vmatpush1.bf16.msra.mxu1 %v1035_v30 }
  0x32   : > { %646 = vmatpush1.bf16.msra.mxu0 %v999_v23  ;;  %686 = vmatprep.subr.bf16.mxu1 %v1039_v32 }
  0x33   : > { %647 = vmatprep.subr.bf16.mxu0 %v1000_v25 }
  0x35   : > { %687 = vmatpush1.bf16.msra.mxu1 %v1041_v36 }
  0x36   : > { %648 = vmatpush1.bf16.msra.mxu0 %v1002_v27  ;;  %688 = vmatprep.subr.bf16.mxu1 %v1045_v38 }
  0x37   : > { %649 = vmatprep.subr.bf16.mxu0 %v1006_v29 }
  0x39   : > { %689 = vmatpush1.bf16.msra.mxu1 %v1047_v40 }
  0x3a   : > { %650 = vmatpush1.bf16.msra.mxu0 %v1008_v31 }
  0x3b   : > { %651 = vmatprep.subr.bf16.mxu0 %v1012_v33 }
  0x3c   : > { %707 = vmatmul.mubr.bf16.vlgmr.msra.gmra.mrb[0].mxu1 %v1051_v43 }
  0x3e   : > { %652 = vmatpush1.bf16.msra.mxu0 %v1014_v37 }
  0x3f   : > { %653 = vmatprep.subr.bf16.mxu0 %v1018_v39 }
  0x42   : > { %654 = vmatpush1.bf16.msra.mxu0 %v1020_v41 }
  0x43   : > { %655 = vmatprep.subr.bf16.mxu0 %v1024_v42 }
  0x46   : > { %656 = vmatpush1.bf16.msra.mxu0 %v1026_v44 }
  0x47   : > { %657 = vmatprep.subr.bf16.mxu0 %v1030_v45 }
  0x4a   : > { %658 = vmatpush1.bf16.msra.mxu0 %v1032_v46 }
  0x4b   : > { %659 = vmatprep.subr.bf16.mxu0 %v1036_v47 }
  0x4e   : > { %660 = vmatpush1.bf16.msra.mxu0 %v1038_v48 }
  0x4f   : > { %661 = vmatprep.subr.bf16.mxu0 %v1042_v49 }
  0x52   : > { %662 = vmatpush1.bf16.msra.mxu0 %v1044_v50 }
  0x53   : > { %663 = vmatprep.subr.bf16.mxu0 %v1048_v51 }
  0x56   : > { %664 = vmatpush1.bf16.msra.mxu0 %v1050_v52 }
  0x59   : > { %666 = vmatmul.mubr.bf16.vlgmr.msra.gmra.mrb[0].mxu0 %v896_v53 }
 0x10f   : > { %v708_v54 = vpop.f32.mrb[0].mxu1 }
 0x110   : > { %v710_v55 = vpop.f32.mrb[1].mxu1 }
 0x111   : > { %v712_v56 = vpop.f32.mrb[2].mxu1 }
 0x112   : > { %v713_v57 = vpop.f32.mrb[3].mxu1 }
 0x12c   : > { %v667_v59 = vpop.f32.mrb[0].mxu0  ;;  %722 = sbr.rel (%p947_p7) target bundleno = 321 (0x141), region = 44 }
 0x12d   : > { %v709_v60 = vadd.f32 %v708_v54, %v667_v59  ;;  %v669_v62 = vpop.f32.mrb[1].mxu0 }
 0x12e   : > { %v711_v63 = vadd.f32 %v710_v55, %v669_v62  ;;  %v671_v0 = vpop.f32.mrb[2].mxu0 }
 0x12f   : > { %v715_v1 = vadd.f32 %v709_v60, %v330_v58  ;;  %v672_v2 = vpop.f32.mrb[3].mxu0 }
 0x130   : > { %v716_v3 = vadd.f32 %v711_v63, %v331_v61 }
 0x131   : > { %717 = vst [vmem:[%s1238_s4] sm:$0xff] %v715_v1 }
 0x132   : > { %718 = vst [vmem:[%s1238_s4 + $0x8] sm:$0xff] %v716_v3 }
 0x138   : > { %v723_v10 = vld [vmem:[%s1238_s4] sm:$0xff] }
 0x139   : > { %v724_v11 = vld [vmem:[%s1238_s4 + $0x8] sm:$0xff]  ;;  %v737_v16 = vmul.f32 %v730_v12, %v723_v10 }
 0x13a   : > { %v738_v17 = vmul.f32 %v734_v14, %v724_v11 }
 0x13b   : > { %v751_v18 = vadd.f32 %v744_v13, %v737_v16 }
 0x13c   : > { %v752_v19 = vadd.f32 %v748_v15, %v738_v17 }
 0x13d   : > { %v753_v20 = vmax.f32 %v751_v18, 0.0 }
 0x13e   : > { %v754_v21 = vmax.f32 %v752_v19, 0.0 }
 0x13f   : > { %755 = vst [vmem:[%s1238_s4] sm:$0xff] %v753_v20 }
 0x140   : > { %756 = vst [vmem:[%s1238_s4 + $0x8] sm:$0xff] %v754_v21 }
 0x141 PF: > { %s14_s17 = sadd.s32 1, %s1076_s17   ;;  %s1239_s15 = smov %s1072_s16 }
 0x142   : > { %p11_p8 = scmp.ge.s32.totalorder %s14_s17, 5   ;;  %s1240_s16 = smov %s1242_s18 }
 0x144   :  { %13 = sbr.rel (!%p11_p8) target bundleno = 2 (0x2), region = 83 }

// kernel: tomato_leaf_net.35
= control target key start
LH: loop header
LB: loop body
LE: loop exit
PB: predicated region body
PF: predicated region fallthrough
CT: control target
= control target key end

     0   :  { %v249_v1 = vmov 0   ;;  %v175_v18 = vlaneseq  ;;  %s338_s1 = inlined_call_operand.vmem [shape: bf16[128,256], index: 1, kind: input, shape index: {}]   ;;  %s339_s0 = inlined_call_operand.vmem [shape: bf16[8,128], index: 0, kind: input, shape index: {}]   ;;  %s340_s2 = inlined_call_operand.vmem [shape: f32[1,256], index: 2, kind: input, shape index: {}]   ;;  %s341_s3 = inlined_call_operand.vmem [shape: f32[1,256], index: 3, kind: input, shape index: {}]   ;;  %s342_s4 = inlined_call_operand.vmem [shape: f32[8,256], index: 4, kind: output, shape index: {}]  }
   0x1   :  { %v225_v0 = vld [vmem:[%s338_s1 + $0x4] ss:$8 sps:$4 sm:$0xff]   ;;  %155 = vmatprep.mubr.bf16.mxu0 %v249_v1  ;;  %v227_v2 = vld [vmem:[%s338_s1] ss:$8 sps:$4 sm:$0xff]   ;;  %v228_v3 = vld [vmem:[%s338_s1 + $0x14] ss:$8 sps:$4 sm:$0xff]  }
   0x2   :  { %123 = vmatprep.subr.bf16.mxu0 %v225_v0  ;;  %v230_v4 = vld [vmem:[%s338_s1 + $0x10] ss:$8 sps:$4 sm:$0xff]   ;;  %v231_v5 = vld [vmem:[%s338_s1 + $0x24] ss:$8 sps:$4 sm:$0xff]   ;;  %v233_v6 = vld [vmem:[%s338_s1 + $0x20] ss:$8 sps:$4 sm:$0xff]  }
   0x3   :  { %124 = vmatpush1.bf16.msra.mxu0 %v227_v2  ;;  %v234_v7 = vld [vmem:[%s338_s1 + $0x34] ss:$8 sps:$4 sm:$0xff]   ;;  %v236_v8 = vld [vmem:[%s338_s1 + $0x30] ss:$8 sps:$4 sm:$0xff]   ;;  %v237_v9 = vld [vmem:[%s338_s1 + $0x44] ss:$8 sps:$4 sm:$0xff]  }
   0x4   :  { %125 = vmatprep.subr.bf16.mxu0 %v228_v3  ;;  %v239_v10 = vld [vmem:[%s338_s1 + $0x40] ss:$8 sps:$4 sm:$0xff]   ;;  %v240_v11 = vld [vmem:[%s338_s1 + $0x54] ss:$8 sps:$4 sm:$0xff]   ;;  %v242_v12 = vld [vmem:[%s338_s1 + $0x50] ss:$8 sps:$4 sm:$0xff]  }
   0x5   :  { %v243_v13 = vld [vmem:[%s338_s1 + $0x64] ss:$8 sps:$4 sm:$0xff]   ;;  %v245_v14 = vld [vmem:[%s338_s1 + $0x60] ss:$8 sps:$4 sm:$0xff]   ;;  %v246_v15 = vld [vmem:[%s338_s1 + $0x74] ss:$8 sps:$4 sm:$0xff]  }
   0x6   :  { %v248_v16 = vld [vmem:[%s338_s1 + $0x70] ss:$8 sps:$4 sm:$0xff]   ;;  %v26_v17 = vld [vmem:[%s339_s0] sm:$0xf]  ;;  %v176_v19 = vshrl.u32 %v175_v18, 7 }
   0x7   :  { %126 = vmatpush1.bf16.msra.mxu0 %v230_v4  ;;  %v173_v21 = vld [vmem:[%s340_s2] sm:$0x3] }
   0x8   :  { %127 = vmatprep.subr.bf16.mxu0 %v231_v5  ;;  %v177_v20 = vsub.s32 0, %v176_v19  ;;  %v181_v22 = vsub.s32 1, %v176_v19  ;;  %v187_v23 = vld [vmem:[%s341_s3] sm:$0x3] }
   0xa   :  { %v178_v24 = vrot.slane %v173_v21, %v177_v20  ;;  %v182_v26 = vrot.slane %v173_v21, %v181_v22  ;;  %v192_v27 = vrot.slane %v187_v23, %v177_v20  ;;  %v196_v29 = vrot.slane %v187_v23, %v181_v22 }
   0xb   :  { %128 = vmatpush1.bf16.msra.mxu0 %v233_v6 }
   0xc   :  { %129 = vmatprep.subr.bf16.mxu0 %v234_v7 }
   0xf   :  { %130 = vmatpush1.bf16.msra.mxu0 %v236_v8 }
  0x10   :  { %131 = vmatprep.subr.bf16.mxu0 %v237_v9 }
  0x13   :  { %132 = vmatpush1.bf16.msra.mxu0 %v239_v10 }
  0x14   :  { %133 = vmatprep.subr.bf16.mxu0 %v240_v11 }
  0x17   :  { %134 = vmatpush1.bf16.msra.mxu0 %v242_v12 }
  0x18   :  { %135 = vmatprep.subr.bf16.mxu0 %v243_v13 }
  0x1b   :  { %136 = vmatpush1.bf16.msra.mxu0 %v245_v14 }
  0x1c   :  { %137 = vmatprep.subr.bf16.mxu0 %v246_v15 }
  0x1f   :  { %138 = vmatpush1.bf16.msra.mxu0 %v248_v16 }
  0x22   :  { %156 = vmatmul.mubr.bf16.vlgmr.msra.gmra.mrb[0].mxu0 %v26_v17 }
  0xf5   :  { %v157_v25 = vpop.f32.mrb[0].mxu0 }
  0xf6   :  { %v159_v28 = vpop.f32.mrb[1].mxu0  ;;  %v185_v31 = vmul.f32 %v178_v24, %v157_v25 }
  0xf7   :  { %v161_v30 = vpop.f32.mrb[2].mxu0  ;;  %v186_v33 = vmul.f32 %v182_v26, %v159_v28 }
  0xf8   :  { %v162_v32 = vpop.f32.mrb[3].mxu0  ;;  %v199_v34 = vadd.f32 %v192_v27, %v185_v31 }
  0xf9   :  { %v200_v35 = vadd.f32 %v196_v29, %v186_v33 }
  0xfa   :  { %201 = vst [vmem:[%s342_s4] sm:$0xff] %v199_v34 }
  0xfb   :  { %202 = vst [vmem:[%s342_s4 + $0x8] sm:$0xff] %v200_v35 }

// kernel: tomato_leaf_net.37
= control target key start
LH: loop header
LB: loop body
LE: loop exit
PB: predicated region body
PF: predicated region fallthrough
CT: control target
= control target key end

     0   :  { %s1105_s15 = smov 0   ;;  %s1107_s16 = smov 0   ;;  %s1234_s0 = inlined_call_operand.vmem [shape: bf16[8,2304], index: 0, kind: input, shape index: {}]   ;;  %s1235_s1 = inlined_call_operand.vmem [shape: bf16[2304,256], index: 1, kind: input, shape index: {}]   ;;  %s1236_s2 = inlined_call_operand.vmem [shape: f32[1,256], index: 2, kind: input, shape index: {}]   ;;  %s1237_s3 = inlined_call_operand.vmem [shape: f32[1,256], index: 3, kind: input, shape index: {}]   ;;  %s1238_s4 = inlined_call_operand.vmem [shape: f32[8,256], index: 4, kind: output, shape index: {}]  }
   0x1   :  { %s1109_s17 = smov 0  }
   0x2 LB: > { %s26_s18 = sadd.s32 1, %s1072_s16  ;;  %p891_p0 = scmp.ge.s32.totalorder %s1076_s17, 1  ;;  %s1076_s17 = sphi %s1109_s17, %s14_s17   ;;  %s1072_s16 = sphi %s1107_s16, %s1240_s16   ;;  %s1068_s15 = sphi %s1105_s15, %s1239_s15  }
   0x3   : > { %p27_p1 = scmp.ge.s32.totalorder %s26_s18, 6  ;;  %p229_p2 = scmp.lt.s32.totalorder %s1076_s17, 7 }
   0x5   : > { %s1242_s18 = smov (%p27_p1, %s26_s18), 0  ;;  %p230_p3 = pnand %p891_p0, %p229_p2 }
   0x6   : > { %s281_s19 = smul.u32 (!%p230_p3), 3, %s1068_s15  ;;  %p895_p6 = scmp.ne.s32.totalorder (!%p230_p3), %s1068_s15, 0 }
   0x7   : > { %233 = sbr.rel (%p230_p3) target bundleno = 321 (0x141), region = 36 }
   0x8   : > { %s291_s20 = smul.u32 (!%p230_p3), 48, %s1068_s15  ;;  %p284_p4 = scmp.lt.s32.totalorder (!%p230_p3), %s281_s19, 17 }
   0xa   : > { %p293_p5 = scmp.lt.s32.totalorder (!%p230_p3), %s291_s20, 287 }
   0xe   : > { %s1244_s19 = smov (!%p284_p4, %s281_s19), 17  ;;  %s1246_s20 = smov (!%p293_p5, %s291_s20), 287 }
   0xf   : > { %s892_s21 = sshll.u32 %s1244_s19, 2  ;;  %s952_s25 = sshll.u32 %s1246_s20, 3  ;;  %v1078_v0 = vmov (!%p895_p6), 0.0  }
  0x10   : > { %s1130_s24 = scalar_lea.vmem %s1234_s0, %s892_s21  ;;  %s1135_s28 = scalar_lea.vmem %s1235_s1, %s952_s25  ;;  %328 = vst [vmem:[%s1238_s4] sm:$0xff] (!%p895_p6), %v1078_v0  ;;  %329 = vst [vmem:[%s1238_s4 + $0x8] sm:$0xff] (!%p895_p6), %v1078_v0 }
  0x11   : > { %327 = sbr.rel (%p895_p6) target bundleno = 24 (0x18), region = 40 }
  0x18 PF: > { %v979_v1 = vld [vmem:[%s1135_s28 + $0x4] ss:$8 sps:$4 sm:$0xff]   ;;  %v981_v2 = vld [vmem:[%s1135_s28] ss:$8 sps:$4 sm:$0xff]   ;;  %v1079_v3 = vmov 0   ;;  %p947_p7 = scmp.ne.s32.totalorder %s1068_s15, 5 }
  0x19   : > { %706 = vmatprep.mubr.bf16.mxu1 %v1079_v3  ;;  %633 = vmatprep.subr.bf16.mxu0 %v979_v1  ;;  %v982_v4 = vld [vmem:[%s1135_s28 + $0x14] ss:$8 sps:$4 sm:$0xff]   ;;  %v984_v5 = vld [vmem:[%s1135_s28 + $0x10] ss:$8 sps:$4 sm:$0xff]   ;;  %v985_v6 = vld [vmem:[%s1135_s28 + $0x24] ss:$8 sps:$4 sm:$0xff]  }
  0x1a   : > { %634 = vmatpush1.bf16.msra.mxu0 %v981_v2  ;;  %v987_v7 = vld [vmem:[%s1135_s28 + $0x20] ss:$8 sps:$4 sm:$0xff]   ;;  %v988_v8 = vld [vmem:[%s1135_s28 + $0x34] ss:$8 sps:$4 sm:$0xff]   ;;  %v990_v9 = vld [vmem:[%s1135_s28 + $0x30] ss:$8 sps:$4 sm:$0xff]  }
  0x1b   : > { %635 = vmatprep.subr.bf16.mxu0 %v982_v4  ;;  %v1003_v10 = vld [vmem:[%s1135_s28 + $0x104] ss:$8 sps:$4 sm:$0xff]   ;;  %v1005_v11 = vld [vmem:[%s1135_s28 + $0x100] ss:$8 sps:$4 sm:$0xff]   ;;  %v1009_v13 = vld [vmem:[%s1135_s28 + $0x114] ss:$8 sps:$4 sm:$0xff]   ;;  %v727_v4 = vlaneseq (!%p947_p7) }
  0x1c   : > { %v991_v12 = vld [vmem:[%s1135_s28 + $0x44] ss:$8 sps:$4 sm:$0xff]   ;;  %674 = vmatprep.subr.bf16.mxu1 %v1003_v10  ;;  %v1011_v14 = vld [vmem:[%s1135_s28 + $0x110] ss:$8 sps:$4 sm:$0xff]   ;;  %v993_v15 = vld [vmem:[%s1135_s28 + $0x40] ss:$8 sps:$4 sm:$0xff]  }
  0x1d   : > { %675 = vmatpush1.bf16.msra.mxu1 %v1005_v11  ;;  %v994_v16 = vld [vmem:[%s1135_s28 + $0x54] ss:$8 sps:$4 sm:$0xff]   ;;  %v1015_v17 = vld [vmem:[%s1135_s28 + $0x124] ss:$8 sps:$4 sm:$0xff]   ;;  %v1017_v18 = vld [vmem:[%s1135_s28 + $0x120] ss:$8 sps:$4 sm:$0xff]  }
  0x1e   : > { %636 = vmatpush1.bf16.msra.mxu0 %v984_v5  ;;  %676 = vmatprep.subr.bf16.mxu1 %v1009_v13  ;;  %v996_v19 = vld [vmem:[%s1135_s28 + $0x50] ss:$8 sps:$4 sm:$0xff]   ;;  %v1021_v20 = vld [vmem:[%s1135_s28 + $0x134] ss:$8 sps:$4 sm:$0xff]   ;;  %v997_v21 = vld [vmem:[%s1135_s28 + $0x64] ss:$8 sps:$4 sm:$0xff]  }
  0x1f   : > { %637 = vmatprep.subr.bf16.mxu0 %v985_v6  ;;  %v1023_v22 = vld [vmem:[%s1135_s28 + $0x130] ss:$8 sps:$4 sm:$0xff]   ;;  %v999_v23 = vld [vmem:[%s1135_s28 + $0x60] ss:$8 sps:$4 sm:$0xff]   ;;  %v1027_v24 = vld [vmem:[%s1135_s28 + $0x144] ss:$8 sps:$4 sm:$0xff]  }
  0x20   : > { %v1000_v25 = vld [vmem:[%s1135_s28 + $0x74] ss:$8 sps:$4 sm:$0xff]   ;;  %v1029_v26 = vld [vmem:[%s1135_s28 + $0x140] ss:$8 sps:$4 sm:$0xff]   ;;  %v1002_v27 = vld [vmem:[%s1135_s28 + $0x70] ss:$8 sps:$4 sm:$0xff]  }
  0x21   : > { %677 = vmatpush1.bf16.msra.mxu1 %v1011_v14  ;;  %v1033_v28 = vld [vmem:[%s1135_s28 + $0x154] ss:$8 sps:$4 sm:$0xff]   ;;  %v1006_v29 = vld [vmem:[%s1135_s28 + $0x84] ss:$8 sps:$4 sm:$0xff]   ;;  %v1035_v30 = vld [vmem:[%s1135_s28 + $0x150] ss:$8 sps:$4 sm:$0xff]  }
  0x22   : > { %638 = vmatpush1.bf16.msra.mxu0 %v987_v7  ;;  %678 = vmatprep.subr.bf16.mxu1 %v1015_v17  ;;  %v1008_v31 = vld [vmem:[%s1135_s28 + $0x80] ss:$8 sps:$4 sm:$0xff]   ;;  %v1039_v32 = vld [vmem:[%s1135_s28 + $0x164] ss:$8 sps:$4 sm:$0xff]   ;;  %v1012_v33 = vld [vmem:[%s1135_s28 + $0x94] ss:$8 sps:$4 sm:$0xff]  }
  0x23   : > { %639 = vmatprep.subr.bf16.mxu0 %v988_v8  ;;  %v332_v34 = vld [vmem:[%s1130_s24] sm:$0xff]  ;;  %v1014_v37 = vld [vmem:[%s1135_s28 + $0x90] ss:$8 sps:$4 sm:$0xff]   ;;  %v1045_v38 = vld [vmem:[%s1135_s28 + $0x174] ss:$8 sps:$4 sm:$0xff]   ;;  %v728_v5 = vshrl.u32 (!%p947_p7), %v727_v4, 7 }
  0x24   : > { %v897_v35 = vcombine.high %v332_v34, %v332_v34  ;;  %v1041_v36 = vld [vmem:[%s1135_s28 + $0x160] ss:$8 sps:$4 sm:$0xff]   ;;  %v1018_v39 = vld [vmem:[%s1135_s28 + $0xa4] ss:$8 sps:$4 sm:$0xff]   ;;  %v1047_v40 = vld [vmem:[%s1135_s28 + $0x170] ss:$8 sps:$4 sm:$0xff]   ;;  %v896_v53 = vcombine.low %v332_v34, %v332_v34 }
  0x25   : > { %679 = vmatpush1.bf16.msra.mxu1 %v1017_v18  ;;  %v1020_v41 = vld [vmem:[%s1135_s28 + $0xa0] ss:$8 sps:$4 sm:$0xff]   ;;  %v1024_v42 = vld [vmem:[%s1135_s28 + $0xb4] ss:$8 sps:$4 sm:$0xff]   ;;  %v1026_v44 = vld [vmem:[%s1135_s28 + $0xb0] ss:$8 sps:$4 sm:$0xff]  }
  0x26   : > { %640 = vmatpush1.bf16.msra.mxu0 %v990_v9  ;;  %680 = vmatprep.subr.bf16.mxu1 %v1021_v20  ;;  %v1051_v43 = vld [vmem:[%s1130_s24 + $0x8] ss:$0 sps:$4 sm:$0xff]   ;;  %v1030_v45 = vld [vmem:[%s1135_s28 + $0xc4] ss:$8 sps:$4 sm:$0xff]   ;;  %v1036_v47 = vld [vmem:[%s1135_s28 + $0xd4] ss:$8 sps:$4 sm:$0xff]  }
  0x27   : > { %641 = vmatprep.subr.bf16.mxu0 %v991_v12  ;;  %665 = vmatprep.mubr.bf16.mxu0 %v897_v35  ;;  %v1032_v46 = vld [vmem:[%s1135_s28 + $0xc0] ss:$8 sps:$4 sm:$0xff]   ;;  %v1038_v48 = vld [vmem:[%s1135_s28 + $0xd0] ss:$8 sps:$4 sm:$0xff]   ;;  %v1042_v49 = vld [vmem:[%s1135_s28 + $0xe4] ss:$8 sps:$4 sm:$0xff]  }
  0x28   : > { %v1044_v50 = vld [vmem:[%s1135_s28 + $0xe0] ss:$8 sps:$4 sm:$0xff]   ;;  %v1048_v51 = vld [vmem:[%s1135_s28 + $0xf4] ss:$8 sps:$4 sm:$0xff]   ;;  %v1050_v52 = vld [vmem:[%s1135_s28 + $0xf0] ss:$8 sps:$4 sm:$0xff]  }
  0x29   : > { %681 = vmatpush1.bf16.msra.mxu1 %v1023_v22  ;;  %v330_v58 = vld [vmem:[%s1238_s4] sm:$0xff]  ;;  %v331_v61 = vld [vmem:[%s1238_s4 + $0x8] sm:$0xff]  ;;  %v729_v8 = vsub.s32 (!%p947_p7), 0, %v728_v5  ;;  %v733_v9 = vsub.s32 (!%p947_p7), 1, %v728_v5 }
  0x2a   : > { %642 = vmatpush1.bf16.msra.mxu0 %v993_v15  ;;  %682 = vmatprep.subr.bf16.mxu1 %v1027_v24  ;;  %v725_v6 = vld [vmem:[%s1236_s2] sm:$0x3] (!%p947_p7) }
  0x2b   : > { %643 = vmatprep.subr.bf16.mxu0 %v994_v16  ;;  %v739_v7 = vld [vmem:[%s1237_s3] sm:$0x3] (!%p947_p7)  ;;  %v730_v12 = vrot.slane (!%p947_p7), %v725_v6, %v729_v8  ;;  %v734_v14 = vrot.slane (!%p947_p7), %v725_v6, %v733_v9 }
  0x2c   : > { %v744_v13 = vrot.slane (!%p947_p7), %v739_v7, %v729_v8  ;;  %v748_v15 = vrot.slane (!%p947_p7), %v739_v7, %v733_v9 }
  0x2d   : > { %683 = vmatpush1.bf16.msra.mxu1 %v1029_v26 }
  0x2e   : > { %644 = vmatpush1.bf16.msra.mxu0 %v996_v19  ;;  %684 = vmatprep.subr.bf16.mxu1 %v1033_v28 }
  0x2f   : > { %645 = vmatprep.subr.bf16.mxu0 %v997_v21 }
  0x31   : > { %685 = vmatpush1.bf16.msra.mxu1 %v1035_v30 }
  0x32   : > { %646 = vmatpush1.bf16.msra.mxu0 %v999_v23  ;;  %686 = vmatprep.subr.bf16.mxu1 %v1039_v32 }
  0x33   : > { %647 = vmatprep.subr.bf16.mxu0 %v1000_v25 }
  0x35   : > { %687 = vmatpush1.bf16.msra.mxu1 %v1041_v36 }
  0x36   : > { %648 = vmatpush1.bf16.msra.mxu0 %v1002_v27  ;;  %688 = vmatprep.subr.bf16.mxu1 %v1045_v38 }
  0x37   : > { %649 = vmatprep.subr.bf16.mxu0 %v1006_v29 }
  0x39   : > { %689 = vmatpush1.bf16.msra.mxu1 %v1047_v40 }
  0x3a   : > { %650 = vmatpush1.bf16.msra.mxu0 %v1008_v31 }
  0x3b   : > { %651 = vmatprep.subr.bf16.mxu0 %v1012_v33 }
  0x3c   : > { %707 = vmatmul.mubr.bf16.vlgmr.msra.gmra.mrb[0].mxu1 %v1051_v43 }
  0x3e   : > { %652 = vmatpush1.bf16.msra.mxu0 %v1014_v37 }
  0x3f   : > { %653 = vmatprep.subr.bf16.mxu0 %v1018_v39 }
  0x42   : > { %654 = vmatpush1.bf16.msra.mxu0 %v1020_v41 }
  0x43   : > { %655 = vmatprep.subr.bf16.mxu0 %v1024_v42 }
  0x46   : > { %656 = vmatpush1.bf16.msra.mxu0 %v1026_v44 }
  0x47   : > { %657 = vmatprep.subr.bf16.mxu0 %v1030_v45 }
  0x4a   : > { %658 = vmatpush1.bf16.msra.mxu0 %v1032_v46 }
  0x4b   : > { %659 = vmatprep.subr.bf16.mxu0 %v1036_v47 }
  0x4e   : > { %660 = vmatpush1.bf16.msra.mxu0 %v1038_v48 }
  0x4f   : > { %661 = vmatprep.subr.bf16.mxu0 %v1042_v49 }
  0x52   : > { %662 = vmatpush1.bf16.msra.mxu0 %v1044_v50 }
  0x53   : > { %663 = vmatprep.subr.bf16.mxu0 %v1048_v51 }
  0x56   : > { %664 = vmatpush1.bf16.msra.mxu0 %v1050_v52 }
  0x59   : > { %666 = vmatmul.mubr.bf16.vlgmr.msra.gmra.mrb[0].mxu0 %v896_v53 }
 0x10f   : > { %v708_v54 = vpop.f32.mrb[0].mxu1 }
 0x110   : > { %v710_v55 = vpop.f32.mrb[1].mxu1 }
 0x111   : > { %v712_v56 = vpop.f32.mrb[2].mxu1 }
 0x112   : > { %v713_v57 = vpop.f32.mrb[3].mxu1 }
 0x12c   : > { %v667_v59 = vpop.f32.mrb[0].mxu0  ;;  %722 = sbr.rel (%p947_p7) target bundleno = 321 (0x141), region = 44 }
 0x12d   : > { %v709_v60 = vadd.f32 %v708_v54, %v667_v59  ;;  %v669_v62 = vpop.f32.mrb[1].mxu0 }
 0x12e   : > { %v711_v63 = vadd.f32 %v710_v55, %v669_v62  ;;  %v671_v0 = vpop.f32.mrb[2].mxu0 }
 0x12f   : > { %v715_v1 = vadd.f32 %v709_v60, %v330_v58  ;;  %v672_v2 = vpop.f32.mrb[3].mxu0 }
 0x130   : > { %v716_v3 = vadd.f32 %v711_v63, %v331_v61 }
 0x131   : > { %717 = vst [vmem:[%s1238_s4] sm:$0xff] %v715_v1 }
 0x132   : > { %718 = vst [vmem:[%s1238_s4 + $0x8] sm:$0xff] %v716_v3 }
 0x138   : > { %v723_v10 = vld [vmem:[%s1238_s4] sm:$0xff] }
 0x139   : > { %v724_v11 = vld [vmem:[%s1238_s4 + $0x8] sm:$0xff]  ;;  %v737_v16 = vmul.f32 %v730_v12, %v723_v10 }
 0x13a   : > { %v738_v17 = vmul.f32 %v734_v14, %v724_v11 }
 0x13b   : > { %v751_v18 = vadd.f32 %v744_v13, %v737_v16 }
 0x13c   : > { %v752_v19 = vadd.f32 %v748_v15, %v738_v17 }
 0x13d   : > { %v753_v20 = vmax.f32 %v751_v18, 0.0 }
 0x13e   : > { %v754_v21 = vmax.f32 %v752_v19, 0.0 }
 0x13f   : > { %755 = vst [vmem:[%s1238_s4] sm:$0xff] %v753_v20 }
 0x140   : > { %756 = vst [vmem:[%s1238_s4 + $0x8] sm:$0xff] %v754_v21 }
 0x141 PF: > { %s14_s17 = sadd.s32 1, %s1076_s17   ;;  %s1239_s15 = smov %s1072_s16 }
 0x142   : > { %p11_p8 = scmp.ge.s32.totalorder %s14_s17, 8   ;;  %s1240_s16 = smov %s1242_s18 }
 0x144   :  { %13 = sbr.rel (!%p11_p8) target bundleno = 2 (0x2), region = 83 }

// kernel: tomato_leaf_net.36
= control target key start
LH: loop header
LB: loop body
LE: loop exit
PB: predicated region body
PF: predicated region fallthrough
CT: control target
= control target key end

     0   :  { %s1199_s18 = smov 0   ;;  %s1201_s19 = smov 0   ;;  %s1334_s0 = inlined_call_operand.vmem [shape: bf16[8,2304], index: 0, kind: input, shape index: {}]   ;;  %s1335_s1 = inlined_call_operand.vmem [shape: bf16[2304,256], index: 1, kind: input, shape index: {}]   ;;  %s1336_s2 = inlined_call_operand.vmem [shape: f32[1,256], index: 2, kind: input, shape index: {}]   ;;  %s1337_s3 = inlined_call_operand.vmem [shape: f32[1,256], index: 3, kind: input, shape index: {}]   ;;  %s1338_s4 = inlined_call_operand.vmem [shape: f32[8,256], index: 4, kind: input, shape index: {}]   ;;  %s1339_s5 = inlined_call_operand.vmem [shape: f32[8,256], index: 5, kind: output, shape index: {}]  }
   0x1   :  { %s1203_s20 = smov 0  }
   0x2 LB: > { %s27_s21 = sadd.s32 1, %s1161_s19  ;;  %p980_p0 = scmp.ge.s32.totalorder %s1165_s20, 1  ;;  %s1165_s20 = sphi %s1203_s20, %s15_s20   ;;  %s1161_s19 = sphi %s1201_s19, %s1341_s19   ;;  %s1157_s18 = sphi %s1199_s18, %s1340_s18  }
   0x3   : > { %p28_p1 = scmp.ge.s32.totalorder %s27_s21, 6  ;;  %p271_p2 = scmp.lt.s32.totalorder %s1165_s20, 7 }
   0x5   : > { %s1343_s21 = smov (%p28_p1, %s27_s21), 0  ;;  %p272_p3 = pnand %p980_p0, %p271_p2 }
   0x6   : > { %s334_s22 = smul.u32 (!%p272_p3), 3, %s1157_s18  ;;  %p984_p6 = scmp.ne.s32.totalorder (!%p272_p3), %s1157_s18, 0 }
   0x7   : > { %275 = sbr.rel (%p272_p3) target bundleno = 323 (0x143), region = 40 }
   0x8   : > { %s344_s23 = smul.u32 (!%p272_p3), 48, %s1157_s18  ;;  %p337_p4 = scmp.lt.s32.totalorder (!%p272_p3), %s334_s22, 17 }
   0xa   : > { %p346_p5 = scmp.lt.s32.totalorder (!%p272_p3), %s344_s23, 287 }
   0xe   : > { %s1345_s22 = smov (!%p337_p4, %s334_s22), 17  ;;  %s1347_s23 = smov (!%p346_p5, %s344_s23), 287 }
   0xf   : > { %s981_s24 = sshll.u32 %s1345_s22, 2  ;;  %s1041_s28 = sshll.u32 %s1347_s23, 3  ;;  %v1167_v0 = vmov (!%p984_p6), 0.0  }
  0x10   : > { %s1224_s27 = scalar_lea.vmem %s1334_s0, %s981_s24  ;;  %s1229_s6 = scalar_lea.vmem %s1335_s1, %s1041_s28  ;;  %391 = vst [vmem:[%s1339_s5] sm:$0xff] (!%p984_p6), %v1167_v0  ;;  %392 = vst [vmem:[%s1339_s5 + $0x8] sm:$0xff] (!%p984_p6), %v1167_v0 }
  0x11   : > { %390 = sbr.rel (%p984_p6) target bundleno = 24 (0x18), region = 44 }
  0x18 PF: > { %v1068_v1 = vld [vmem:[%s1229_s6 + $0x4] ss:$8 sps:$4 sm:$0xff]   ;;  %v1070_v2 = vld [vmem:[%s1229_s6] ss:$8 sps:$4 sm:$0xff]   ;;  %v1168_v3 = vmov 0   ;;  %p1036_p7 = scmp.ne.s32.totalorder %s1157_s18, 5 }
  0x19   : > { %769 = vmatprep.mubr.bf16.mxu1 %v1168_v3  ;;  %696 = vmatprep.subr.bf16.mxu0 %v1068_v1  ;;  %v1071_v4 = vld [vmem:[%s1229_s6 + $0x14] ss:$8 sps:$4 sm:$0xff]   ;;  %v1073_v5 = vld [vmem:[%s1229_s6 + $0x10] ss:$8 sps:$4 sm:$0xff]   ;;  %v1074_v6 = vld [vmem:[%s1229_s6 + $0x24] ss:$8 sps:$4 sm:$0xff]  }
  0x1a   : > { %697 = vmatpush1.bf16.msra.mxu0 %v1070_v2  ;;  %v1076_v7 = vld [vmem:[%s1229_s6 + $0x20] ss:$8 sps:$4 sm:$0xff]   ;;  %v1077_v8 = vld [vmem:[%s1229_s6 + $0x34] ss:$8 sps:$4 sm:$0xff]   ;;  %v1079_v9 = vld [vmem:[%s1229_s6 + $0x30] ss:$8 sps:$4 sm:$0xff]  }
  0x1b   : > { %698 = vmatprep.subr.bf16.mxu0 %v1071_v4  ;;  %v1092_v10 = vld [vmem:[%s1229_s6 + $0x104] ss:$8 sps:$4 sm:$0xff]   ;;  %v1094_v11 = vld [vmem:[%s1229_s6 + $0x100] ss:$8 sps:$4 sm:$0xff]   ;;  %v1098_v13 = vld [vmem:[%s1229_s6 + $0x114] ss:$8 sps:$4 sm:$0xff]   ;;  %v790_v4 = vlaneseq (!%p1036_p7) }
  0x1c   : > { %v1080_v12 = vld [vmem:[%s1229_s6 + $0x44] ss:$8 sps:$4 sm:$0xff]   ;;  %737 = vmatprep.subr.bf16.mxu1 %v1092_v10  ;;  %v1100_v14 = vld [vmem:[%s1229_s6 + $0x110] ss:$8 sps:$4 sm:$0xff]   ;;  %v1082_v15 = vld [vmem:[%s1229_s6 + $0x40] ss:$8 sps:$4 sm:$0xff]  }
  0x1d   : > { %738 = vmatpush1.bf16.msra.mxu1 %v1094_v11  ;;  %v1083_v16 = vld [vmem:[%s1229_s6 + $0x54] ss:$8 sps:$4 sm:$0xff]   ;;  %v1104_v17 = vld [vmem:[%s1229_s6 + $0x124] ss:$8 sps:$4 sm:$0xff]   ;;  %v1106_v18 = vld [vmem:[%s1229_s6 + $0x120] ss:$8 sps:$4 sm:$0xff]  }
  0x1e   : > { %699 = vmatpush1.bf16.msra.mxu0 %v1073_v5  ;;  %739 = vmatprep.subr.bf16.mxu1 %v1098_v13  ;;  %v1085_v19 = vld [vmem:[%s1229_s6 + $0x50] ss:$8 sps:$4 sm:$0xff]   ;;  %v1110_v20 = vld [vmem:[%s1229_s6 + $0x134] ss:$8 sps:$4 sm:$0xff]   ;;  %v1086_v21 = vld [vmem:[%s1229_s6 + $0x64] ss:$8 sps:$4 sm:$0xff]  }
  0x1f   : > { %700 = vmatprep.subr.bf16.mxu0 %v1074_v6  ;;  %v1112_v22 = vld [vmem:[%s1229_s6 + $0x130] ss:$8 sps:$4 sm:$0xff]   ;;  %v1088_v23 = vld [vmem:[%s1229_s6 + $0x60] ss:$8 sps:$4 sm:$0xff]   ;;  %v1116_v24 = vld [vmem:[%s1229_s6 + $0x144] ss:$8 sps:$4 sm:$0xff]  }
  0x20   : > { %v1089_v25 = vld [vmem:[%s1229_s6 + $0x74] ss:$8 sps:$4 sm:$0xff]   ;;  %v1118_v26 = vld [vmem:[%s1229_s6 + $0x140] ss:$8 sps:$4 sm:$0xff]   ;;  %v1091_v27 = vld [vmem:[%s1229_s6 + $0x70] ss:$8 sps:$4 sm:$0xff]  }
  0x21   : > { %740 = vmatpush1.bf16.msra.mxu1 %v1100_v14  ;;  %v1122_v28 = vld [vmem:[%s1229_s6 + $0x154] ss:$8 sps:$4 sm:$0xff]   ;;  %v1095_v29 = vld [vmem:[%s1229_s6 + $0x84] ss:$8 sps:$4 sm:$0xff]   ;;  %v1124_v30 = vld [vmem:[%s1229_s6 + $0x150] ss:$8 sps:$4 sm:$0xff]  }
  0x22   : > { %701 = vmatpush1.bf16.msra.mxu0 %v1076_v7  ;;  %741 = vmatprep.subr.bf16.mxu1 %v1104_v17  ;;  %v1097_v31 = vld [vmem:[%s1229_s6 + $0x80] ss:$8 sps:$4 sm:$0xff]   ;;  %v1128_v32 = vld [vmem:[%s1229_s6 + $0x164] ss:$8 sps:$4 sm:$0xff]   ;;  %v1101_v33 = vld [vmem:[%s1229_s6 + $0x94] ss:$8 sps:$4 sm:$0xff]  }
  0x23   : > { %702 = vmatprep.subr.bf16.mxu0 %v1077_v8  ;;  %v395_v34 = vld [vmem:[%s1224_s27] sm:$0xff]  ;;  %v1103_v37 = vld [vmem:[%s1229_s6 + $0x90] ss:$8 sps:$4 sm:$0xff]   ;;  %v1134_v38 = vld [vmem:[%s1229_s6 + $0x174] ss:$8 sps:$4 sm:$0xff]   ;;  %v791_v5 = vshrl.u32 (!%p1036_p7), %v790_v4, 7 }
  0x24   : > { %v986_v35 = vcombine.high %v395_v34, %v395_v34  ;;  %v1130_v36 = vld [vmem:[%s1229_s6 + $0x160] ss:$8 sps:$4 sm:$0xff]   ;;  %v1107_v39 = vld [vmem:[%s1229_s6 + $0xa4] ss:$8 sps:$4 sm:$0xff]   ;;  %v1136_v40 = vld [vmem:[%s1229_s6 + $0x170] ss:$8 sps:$4 sm:$0xff]   ;;  %v985_v53 = vcombine.low %v395_v34, %v395_v34 }
  0x25   : > { %742 = vmatpush1.bf16.msra.mxu1 %v1106_v18  ;;  %v1109_v41 = vld [vmem:[%s1229_s6 + $0xa0] ss:$8 sps:$4 sm:$0xff]   ;;  %v1113_v42 = vld [vmem:[%s1229_s6 + $0xb4] ss:$8 sps:$4 sm:$0xff]   ;;  %v1115_v44 = vld [vmem:[%s1229_s6 + $0xb0] ss:$8 sps:$4 sm:$0xff]  }
  0x26   : > { %703 = vmatpush1.bf16.msra.mxu0 %v1079_v9  ;;  %743 = vmatprep.subr.bf16.mxu1 %v1110_v20  ;;  %v1140_v43 = vld [vmem:[%s1224_s27 + $0x8] ss:$0 sps:$4 sm:$0xff]   ;;  %v1119_v45 = vld [vmem:[%s1229_s6 + $0xc4] ss:$8 sps:$4 sm:$0xff]   ;;  %v1125_v47 = vld [vmem:[%s1229_s6 + $0xd4] ss:$8 sps:$4 sm:$0xff]  }
  0x27   : > { %704 = vmatprep.subr.bf16.mxu0 %v1080_v12  ;;  %728 = vmatprep.mubr.bf16.mxu0 %v986_v35  ;;  %v1121_v46 = vld [vmem:[%s1229_s6 + $0xc0] ss:$8 sps:$4 sm:$0xff]   ;;  %v1127_v48 = vld [vmem:[%s1229_s6 + $0xd0] ss:$8 sps:$4 sm:$0xff]   ;;  %v1131_v49 = vld [vmem:[%s1229_s6 + $0xe4] ss:$8 sps:$4 sm:$0xff]  }
  0x28   : > { %v1133_v50 = vld [vmem:[%s1229_s6 + $0xe0] ss:$8 sps:$4 sm:$0xff]   ;;  %v1137_v51 = vld [vmem:[%s1229_s6 + $0xf4] ss:$8 sps:$4 sm:$0xff]   ;;  %v1139_v52 = vld [vmem:[%s1229_s6 + $0xf0] ss:$8 sps:$4 sm:$0xff]  }
  0x29   : > { %744 = vmatpush1.bf16.msra.mxu1 %v1112_v22  ;;  %v393_v58 = vld [vmem:[%s1339_s5] sm:$0xff]  ;;  %v394_v61 = vld [vmem:[%s1339_s5 + $0x8] sm:$0xff]  ;;  %v792_v8 = vsub.s32 (!%p1036_p7), 0, %v791_v5  ;;  %v796_v9 = vsub.s32 (!%p1036_p7), 1, %v791_v5 }
  0x2a   : > { %705 = vmatpush1.bf16.msra.mxu0 %v1082_v15  ;;  %745 = vmatprep.subr.bf16.mxu1 %v1116_v24  ;;  %v788_v6 = vld [vmem:[%s1336_s2] sm:$0x3] (!%p1036_p7) }
  0x2b   : > { %706 = vmatprep.subr.bf16.mxu0 %v1083_v16  ;;  %v802_v7 = vld [vmem:[%s1337_s3] sm:$0x3] (!%p1036_p7)  ;;  %v793_v12 = vrot.slane (!%p1036_p7), %v788_v6, %v792_v8  ;;  %v797_v14 = vrot.slane (!%p1036_p7), %v788_v6, %v796_v9 }
  0x2c   : > { %v807_v13 = vrot.slane (!%p1036_p7), %v802_v7, %v792_v8  ;;  %v811_v15 = vrot.slane (!%p1036_p7), %v802_v7, %v796_v9  ;;  %v816_v18 = vld [vmem:[%s1338_s4] sm:$0xff] (!%p1036_p7) }
  0x2d   : > { %746 = vmatpush1.bf16.msra.mxu1 %v1118_v26 }
  0x2e   : > { %707 = vmatpush1.bf16.msra.mxu0 %v1085_v19  ;;  %747 = vmatprep.subr.bf16.mxu1 %v1122_v28  ;;  %v817_v19 = vld [vmem:[%s1338_s4 + $0x8] sm:$0xff] (!%p1036_p7) }
  0x2f   : > { %708 = vmatprep.subr.bf16.mxu0 %v1086_v21 }
  0x31   : > { %748 = vmatpush1.bf16.msra.mxu1 %v1124_v30 }
  0x32   : > { %709 = vmatpush1.bf16.msra.mxu0 %v1088_v23  ;;  %749 = vmatprep.subr.bf16.mxu1 %v1128_v32 }
  0x33   : > { %710 = vmatprep.subr.bf16.mxu0 %v1089_v25 }
  0x35   : > { %750 = vmatpush1.bf16.msra.mxu1 %v1130_v36 }
  0x36   : > { %711 = vmatpush1.bf16.msra.mxu0 %v1091_v27  ;;  %751 = vmatprep.subr.bf16.mxu1 %v1134_v38 }
  0x37   : > { %712 = vmatprep.subr.bf16.mxu0 %v1095_v29 }
  0x39   : > { %752 = vmatpush1.bf16.msra.mxu1 %v1136_v40 }
  0x3a   : > { %713 = vmatpush1.bf16.msra.mxu0 %v1097_v31 }
  0x3b   : > { %714 = vmatprep.subr.bf16.mxu0 %v1101_v33 }
  0x3c   : > { %770 = vmatmul.mubr.bf16.vlgmr.msra.gmra.mrb[0].mxu1 %v1140_v43 }
  0x3e   : > { %715 = vmatpush1.bf16.msra.mxu0 %v1103_v37 }
  0x3f   : > { %716 = vmatprep.subr.bf16.mxu0 %v1107_v39 }
  0x42   : > { %717 = vmatpush1.bf16.msra.mxu0 %v1109_v41 }
  0x43   : > { %718 = vmatprep.subr.bf16.mxu0 %v1113_v42 }
  0x46   : > { %719 = vmatpush1.bf16.msra.mxu0 %v1115_v44 }
  0x47   : > { %720 = vmatprep.subr.bf16.mxu0 %v1119_v45 }
  0x4a   : > { %721 = vmatpush1.bf16.msra.mxu0 %v1121_v46 }
  0x4b   : > { %722 = vmatprep.subr.bf16.mxu0 %v1125_v47 }
  0x4e   : > { %723 = vmatpush1.bf16.msra.mxu0 %v1127_v48 }
  0x4f   : > { %724 = vmatprep.subr.bf16.mxu0 %v1131_v49 }
  0x52   : > { %725 = vmatpush1.bf16.msra.mxu0 %v1133_v50 }
  0x53   : > { %726 = vmatprep.subr.bf16.mxu0 %v1137_v51 }
  0x56   : > { %727 = vmatpush1.bf16.msra.mxu0 %v1139_v52 }
  0x59   : > { %729 = vmatmul.mubr.bf16.vlgmr.msra.gmra.mrb[0].mxu0 %v985_v53 }
 0x10f   : > { %v771_v54 = vpop.f32.mrb[0].mxu1 }
 0x110   : > { %v773_v55 = vpop.f32.mrb[1].mxu1 }
 0x111   : > { %v775_v56 = vpop.f32.mrb[2].mxu1 }
 0x112   : > { %v776_v57 = vpop.f32.mrb[3].mxu1 }
 0x12c   : > { %v730_v59 = vpop.f32.mrb[0].mxu0  ;;  %785 = sbr.rel (%p1036_p7) target bundleno = 323 (0x143), region = 48 }
 0x12d   : > { %v772_v60 = vadd.f32 %v771_v54, %v730_v59  ;;  %v732_v62 = vpop.f32.mrb[1].mxu0 }
 0x12e   : > { %v774_v63 = vadd.f32 %v773_v55, %v732_v62  ;;  %v734_v0 = vpop.f32.mrb[2].mxu0 }
 0x12f   : > { %v778_v1 = vadd.f32 %v772_v60, %v393_v58  ;;  %v735_v2 = vpop.f32.mrb[3].mxu0 }
 0x130   : > { %v779_v3 = vadd.f32 %v774_v63, %v394_v61 }
 0x131   : > { %780 = vst [vmem:[%s1339_s5] sm:$0xff] %v778_v1 }
 0x132   : > { %781 = vst [vmem:[%s1339_s5 + $0x8] sm:$0xff] %v779_v3 }
 0x138   : > { %v786_v10 = vld [vmem:[%s1339_s5] sm:$0xff] }
 0x139   : > { %v787_v11 = vld [vmem:[%s1339_s5 + $0x8] sm:$0xff]  ;;  %v800_v16 = vmul.f32 %v793_v12, %v786_v10 }
 0x13a   : > { %v801_v17 = vmul.f32 %v797_v14, %v787_v11 }
 0x13b   : > { %v814_v20 = vadd.f32 %v807_v13, %v800_v16 }
 0x13c   : > { %v815_v21 = vadd.f32 %v811_v15, %v801_v17 }
 0x13d   : > { %v818_v22 = vadd.f32 %v816_v18, %v814_v20 }
 0x13e   : > { %v819_v23 = vadd.f32 %v817_v19, %v815_v21 }
 0x13f   : > { %v820_v24 = vmax.f32 %v818_v22, 0.0 }
 0x140   : > { %v821_v25 = vmax.f32 %v819_v23, 0.0 }
 0x141   : > { %822 = vst [vmem:[%s1339_s5] sm:$0xff] %v820_v24 }
 0x142   : > { %823 = vst [vmem:[%s1339_s5 + $0x8] sm:$0xff] %v821_v25 }
 0x143 PF: > { %s15_s20 = sadd.s32 1, %s1165_s20   ;;  %s1340_s18 = smov %s1161_s19 }
 0x144   : > { %p12_p8 = scmp.ge.s32.totalorder %s15_s20, 8   ;;  %s1341_s19 = smov %s1343_s21 }
 0x146   :  { %14 = sbr.rel (!%p12_p8) target bundleno = 2 (0x2), region = 90 }

// kernel: tomato_leaf_net.39
= control target key start
LH: loop header
LB: loop body
LE: loop exit
PB: predicated region body
PF: predicated region fallthrough
CT: control target
= control target key end

     0   :  { %s1633_s15 = smov 0   ;;  %s1635_s16 = smov 0   ;;  %s1850_s0 = inlined_call_operand.vmem [shape: bf16[8,2304], index: 0, kind: input, shape index: {}]   ;;  %s1851_s1 = inlined_call_operand.vmem [shape: bf16[2304,512], index: 1, kind: input, shape index: {}]   ;;  %s1852_s2 = inlined_call_operand.vmem [shape: f32[1,512], index: 2, kind: input, shape index: {}]   ;;  %s1853_s3 = inlined_call_operand.vmem [shape: f32[1,512], index: 3, kind: input, shape index: {}]   ;;  %s1854_s4 = inlined_call_operand.vmem [shape: f32[8,512], index: 4, kind: output, shape index: {}]  }
   0x1   :  { %s1637_s17 = smov 0  }
   0x2 LB: > { %s26_s18 = sadd.s32 1, %s1600_s16  ;;  %p1299_p0 = scmp.ge.s32.totalorder %s1604_s17, 1  ;;  %s1604_s17 = sphi %s1637_s17, %s14_s17   ;;  %s1600_s16 = sphi %s1635_s16, %s1856_s16   ;;  %s1596_s15 = sphi %s1633_s15, %s1855_s15  }
   0x3   : > { %p27_p1 = scmp.ge.s32.totalorder %s26_s18, 6  ;;  %p229_p2 = scmp.lt.s32.totalorder %s1604_s17, 7 }
   0x5   : > { %s1858_s18 = smov (%p27_p1, %s26_s18), 0  ;;  %p230_p3 = pnand %p1299_p0, %p229_p2 }
   0x6   : > { %s281_s19 = smul.u32 (!%p230_p3), 3, %s1596_s15  ;;  %p1303_p6 = scmp.ne.s32.totalorder (!%p230_p3), %s1596_s15, 0 }
   0x7   : > { %233 = sbr.rel (%p230_p3) target bundleno = 354 (0x162), region = 36 }
   0x8   : > { %s291_s20 = smul.u32 (!%p230_p3), 48, %s1596_s15  ;;  %p284_p4 = scmp.lt.s32.totalorder (!%p230_p3), %s281_s19, 17 }
   0xa   : > { %p293_p5 = scmp.lt.s32.totalorder (!%p230_p3), %s291_s20, 287 }
   0xe   : > { %s1860_s19 = smov (!%p284_p4, %s281_s19), 17  ;;  %s1862_s20 = smov (!%p293_p5, %s291_s20), 287 }
   0xf   : > { %s1300_s21 = sshll.u32 %s1860_s19, 2  ;;  %s1408_s25 = sshll.u32 %s1862_s20, 4  ;;  %v1606_v0 = vmov (!%p1303_p6), 0.0  }
  0x10   : > { %s1658_s24 = scalar_lea.vmem %s1850_s0, %s1300_s21  ;;  %s1663_s28 = scalar_lea.vmem %s1851_s1, %s1408_s25  ;;  %328 = vst [vmem:[%s1854_s4] sm:$0xff] (!%p1303_p6), %v1606_v0  ;;  %329 = vst [vmem:[%s1854_s4 + $0x8] sm:$0xff] (!%p1303_p6), %v1606_v0 }
  0x11   : > { %327 = sbr.rel (%p1303_p6) target bundleno = 24 (0x18), region = 40  ;;  %330 = vst [vmem:[%s1854_s4 + $0x10] sm:$0xff] (!%p1303_p6), %v1606_v0  ;;  %331 = vst [vmem:[%s1854_s4 + $0x18] sm:$0xff] (!%p1303_p6), %v1606_v0 }
  0x18 PF: > { %v1435_v1 = vld [vmem:[%s1663_s28 + $0x4] ss:$16 sps:$4 sm:$0xff]   ;;  %v1607_v3 = vmov 0   ;;  %v1439_v4 = vld [vmem:[%s1663_s28] ss:$16 sps:$4 sm:$0xff]   ;;  %p1403_p7 = scmp.ne.s32.totalorder %s1596_s15, 5 }
  0x19   : > { %v1437_v2 = vld [vmem:[%s1663_s28 + $0x204] ss:$16 sps:$4 sm:$0xff]   ;;  %998 = vmatprep.mubr.bf16.mxu1 %v1607_v3  ;;  %925 = vmatprep.subr.bf16.mxu0 %v1435_v1  ;;  %v1440_v5 = vld [vmem:[%s1663_s28 + $0x200] ss:$16 sps:$4 sm:$0xff]   ;;  %v1488_v35 = vld [vmem:[%s1663_s28 + $0xc] ss:$16 sps:$4 sm:$0xff]  }
  0x1a   : > { %966 = vmatprep.subr.bf16.mxu1 %v1437_v2  ;;  %v1441_v6 = vld [vmem:[%s1663_s28 + $0x24] ss:$16 sps:$4 sm:$0xff]   ;;  %926 = vmatpush1.bf16.msra.mxu0 %v1439_v4  ;;  %v1445_v8 = vld [vmem:[%s1663_s28 + $0x20] ss:$16 sps:$4 sm:$0xff]   ;;  %v1714_v36 = vld [vmem:[%s1658_s24 + $0x8] ss:$0 sps:$4 sm:$0xff]  }
  0x1b   : > { %967 = vmatpush1.bf16.msra.mxu1 %v1440_v5  ;;  %v1443_v7 = vld [vmem:[%s1663_s28 + $0x224] ss:$16 sps:$4 sm:$0xff]   ;;  %927 = vmatprep.subr.bf16.mxu0 %v1441_v6  ;;  %v1446_v9 = vld [vmem:[%s1663_s28 + $0x220] ss:$16 sps:$4 sm:$0xff]   ;;  %v1486_v37 = vld [vmem:[%s1663_s28 + $0x8] ss:$16 sps:$4 sm:$0xff]  }
  0x1c   : > { %968 = vmatprep.subr.bf16.mxu1 %v1443_v7  ;;  %v1447_v10 = vld [vmem:[%s1663_s28 + $0x44] ss:$16 sps:$4 sm:$0xff]   ;;  %v1451_v12 = vld [vmem:[%s1663_s28 + $0x40] ss:$16 sps:$4 sm:$0xff]   ;;  %v1494_v40 = vld [vmem:[%s1663_s28 + $0x2c] ss:$16 sps:$4 sm:$0xff]  }
  0x1d   : > { %v1449_v11 = vld [vmem:[%s1663_s28 + $0x244] ss:$16 sps:$4 sm:$0xff]   ;;  %v1452_v13 = vld [vmem:[%s1663_s28 + $0x240] ss:$16 sps:$4 sm:$0xff]   ;;  %v1492_v41 = vld [vmem:[%s1663_s28 + $0x28] ss:$16 sps:$4 sm:$0xff]  }
  0x1e   : > { %928 = vmatpush1.bf16.msra.mxu0 %v1445_v8  ;;  %v1453_v14 = vld [vmem:[%s1663_s28 + $0x64] ss:$16 sps:$4 sm:$0xff]   ;;  %v1457_v16 = vld [vmem:[%s1663_s28 + $0x60] ss:$16 sps:$4 sm:$0xff]   ;;  %v1500_v44 = vld [vmem:[%s1663_s28 + $0x4c] ss:$16 sps:$4 sm:$0xff]  }
  0x1f   : > { %969 = vmatpush1.bf16.msra.mxu1 %v1446_v9  ;;  %929 = vmatprep.subr.bf16.mxu0 %v1447_v10  ;;  %v1455_v15 = vld [vmem:[%s1663_s28 + $0x264] ss:$16 sps:$4 sm:$0xff]   ;;  %v1458_v17 = vld [vmem:[%s1663_s28 + $0x260] ss:$16 sps:$4 sm:$0xff]   ;;  %v1498_v45 = vld [vmem:[%s1663_s28 + $0x48] ss:$16 sps:$4 sm:$0xff]  }
  0x20   : > { %970 = vmatprep.subr.bf16.mxu1 %v1449_v11  ;;  %v1459_v18 = vld [vmem:[%s1663_s28 + $0x84] ss:$16 sps:$4 sm:$0xff]   ;;  %v1463_v20 = vld [vmem:[%s1663_s28 + $0x80] ss:$16 sps:$4 sm:$0xff]   ;;  %v1506_v48 = vld [vmem:[%s1663_s28 + $0x6c] ss:$16 sps:$4 sm:$0xff]  }
  0x21   : > { %v1461_v19 = vld [vmem:[%s1663_s28 + $0x284] ss:$16 sps:$4 sm:$0xff]   ;;  %v1464_v21 = vld [vmem:[%s1663_s28 + $0x280] ss:$16 sps:$4 sm:$0xff]   ;;  %v1504_v49 = vld [vmem:[%s1663_s28 + $0x68] ss:$16 sps:$4 sm:$0xff]  }
  0x22   : > { %930 = vmatpush1.bf16.msra.mxu0 %v1451_v12  ;;  %v1465_v22 = vld [vmem:[%s1663_s28 + $0xa4] ss:$16 sps:$4 sm:$0xff]   ;;  %v1469_v24 = vld [vmem:[%s1663_s28 + $0xa0] ss:$16 sps:$4 sm:$0xff]   ;;  %v1512_v54 = vld [vmem:[%s1663_s28 + $0x8c] ss:$16 sps:$4 sm:$0xff]  }
  0x23   : > { %971 = vmatpush1.bf16.msra.mxu1 %v1452_v13  ;;  %931 = vmatprep.subr.bf16.mxu0 %v1453_v14  ;;  %v1467_v23 = vld [vmem:[%s1663_s28 + $0x2a4] ss:$16 sps:$4 sm:$0xff]   ;;  %v1470_v25 = vld [vmem:[%s1663_s28 + $0x2a0] ss:$16 sps:$4 sm:$0xff]   ;;  %v1510_v55 = vld [vmem:[%s1663_s28 + $0x88] ss:$16 sps:$4 sm:$0xff]  }
  0x24   : > { %972 = vmatprep.subr.bf16.mxu1 %v1455_v15  ;;  %v1471_v26 = vld [vmem:[%s1663_s28 + $0xc4] ss:$16 sps:$4 sm:$0xff]   ;;  %v1475_v28 = vld [vmem:[%s1663_s28 + $0xc0] ss:$16 sps:$4 sm:$0xff]   ;;  %v1518_v58 = vld [vmem:[%s1663_s28 + $0xac] ss:$16 sps:$4 sm:$0xff]  }
  0x25   : > { %v1473_v27 = vld [vmem:[%s1663_s28 + $0x2c4] ss:$16 sps:$4 sm:$0xff]   ;;  %v1476_v29 = vld [vmem:[%s1663_s28 + $0x2c0] ss:$16 sps:$4 sm:$0xff]   ;;  %v1516_v59 = vld [vmem:[%s1663_s28 + $0xa8] ss:$16 sps:$4 sm:$0xff]  }
  0x26   : > { %932 = vmatpush1.bf16.msra.mxu0 %v1457_v16  ;;  %v1477_v30 = vld [vmem:[%s1663_s28 + $0xe4] ss:$16 sps:$4 sm:$0xff]   ;;  %v1481_v32 = vld [vmem:[%s1663_s28 + $0xe0] ss:$16 sps:$4 sm:$0xff]   ;;  %v1524_v62 = vld [vmem:[%s1663_s28 + $0xcc] ss:$16 sps:$4 sm:$0xff]  }
  0x27   : > { %973 = vmatpush1.bf16.msra.mxu1 %v1458_v17  ;;  %933 = vmatprep.subr.bf16.mxu0 %v1459_v18  ;;  %v1479_v31 = vld [vmem:[%s1663_s28 + $0x2e4] ss:$16 sps:$4 sm:$0xff]   ;;  %v1482_v33 = vld [vmem:[%s1663_s28 + $0x2e0] ss:$16 sps:$4 sm:$0xff]   ;;  %v1522_v63 = vld [vmem:[%s1663_s28 + $0xc8] ss:$16 sps:$4 sm:$0xff]  }
  0x28   : > { %974 = vmatprep.subr.bf16.mxu1 %v1461_v19  ;;  %v1483_v34 = vld [vmem:[%s1663_s28 + $0x104] ss:$16 sps:$4 sm:$0xff]   ;;  %v1489_v38 = vld [vmem:[%s1663_s28 + $0x100] ss:$16 sps:$4 sm:$0xff]   ;;  %v1530_v2 = vld [vmem:[%s1663_s28 + $0xec] ss:$16 sps:$4 sm:$0xff]  }
  0x29   : > { %v1490_v39 = vld [vmem:[%s1663_s28 + $0x124] ss:$16 sps:$4 sm:$0xff]   ;;  %v1495_v42 = vld [vmem:[%s1663_s28 + $0x120] ss:$16 sps:$4 sm:$0xff]   ;;  %v1528_v4 = vld [vmem:[%s1663_s28 + $0xe8] ss:$16 sps:$4 sm:$0xff]  }
  0x2a   : > { %934 = vmatpush1.bf16.msra.mxu0 %v1463_v20  ;;  %v1496_v43 = vld [vmem:[%s1663_s28 + $0x144] ss:$16 sps:$4 sm:$0xff]   ;;  %v1501_v46 = vld [vmem:[%s1663_s28 + $0x140] ss:$16 sps:$4 sm:$0xff]   ;;  %v1536_v6 = vld [vmem:[%s1663_s28 + $0x10c] ss:$16 sps:$4 sm:$0xff]  }
  0x2b   : > { %975 = vmatpush1.bf16.msra.mxu1 %v1464_v21  ;;  %935 = vmatprep.subr.bf16.mxu0 %v1465_v22  ;;  %v1502_v47 = vld [vmem:[%s1663_s28 + $0x164] ss:$16 sps:$4 sm:$0xff]   ;;  %v1507_v51 = vld [vmem:[%s1663_s28 + $0x160] ss:$16 sps:$4 sm:$0xff]   ;;  %v1539_v7 = vld [vmem:[%s1663_s28 + $0x20c] ss:$16 sps:$4 sm:$0xff]  }
  0x2c   : > { %976 = vmatprep.subr.bf16.mxu1 %v1467_v23  ;;  %v336_v50 = vld [vmem:[%s1658_s24] sm:$0xff]  ;;  %v1534_v9 = vld [vmem:[%s1663_s28 + $0x108] ss:$16 sps:$4 sm:$0xff]   ;;  %v1542_v11 = vld [vmem:[%s1663_s28 + $0x12c] ss:$16 sps:$4 sm:$0xff]  }
  0x2d   : > { %v1508_v52 = vld [vmem:[%s1663_s28 + $0x184] ss:$16 sps:$4 sm:$0xff]   ;;  %v1305_v53 = vcombine.high %v336_v50, %v336_v50  ;;  %v1513_v56 = vld [vmem:[%s1663_s28 + $0x180] ss:$16 sps:$4 sm:$0xff]   ;;  %v1750_v8 = vcombine.low %v336_v50, %v336_v50  ;;  %v1537_v10 = vld [vmem:[%s1663_s28 + $0x208] ss:$16 sps:$4 sm:$0xff]  }
  0x2e   : > { %936 = vmatpush1.bf16.msra.mxu0 %v1469_v24  ;;  %v1514_v57 = vld [vmem:[%s1663_s28 + $0x1a4] ss:$16 sps:$4 sm:$0xff]   ;;  %v1519_v60 = vld [vmem:[%s1663_s28 + $0x1a0] ss:$16 sps:$4 sm:$0xff]   ;;  %v1545_v12 = vld [vmem:[%s1663_s28 + $0x22c] ss:$16 sps:$4 sm:$0xff]  }
  0x2f   : > { %977 = vmatpush1.bf16.msra.mxu1 %v1470_v25  ;;  %937 = vmatprep.subr.bf16.mxu0 %v1471_v26  ;;  %v1520_v61 = vld [vmem:[%s1663_s28 + $0x1c4] ss:$16 sps:$4 sm:$0xff]   ;;  %v1525_v0 = vld [vmem:[%s1663_s28 + $0x1c0] ss:$16 sps:$4 sm:$0xff]   ;;  %v1540_v13 = vld [vmem:[%s1663_s28 + $0x128] ss:$16 sps:$4 sm:$0xff]  }
  0x30   : > { %978 = vmatprep.subr.bf16.mxu1 %v1473_v27  ;;  %957 = vmatprep.mubr.bf16.mxu0 %v1305_v53  ;;  %v1526_v1 = vld [vmem:[%s1663_s28 + $0x1e4] ss:$16 sps:$4 sm:$0xff]   ;;  %v1531_v5 = vld [vmem:[%s1663_s28 + $0x1e0] ss:$16 sps:$4 sm:$0xff]   ;;  %v1543_v14 = vld [vmem:[%s1663_s28 + $0x228] ss:$16 sps:$4 sm:$0xff]  }
  0x31   : > { %v1548_v15 = vld [vmem:[%s1663_s28 + $0x14c] ss:$16 sps:$4 sm:$0xff]   ;;  %v1546_v17 = vld [vmem:[%s1663_s28 + $0x148] ss:$16 sps:$4 sm:$0xff]  }
  0x32   : > { %938 = vmatpush1.bf16.msra.mxu0 %v1475_v28  ;;  %v1551_v16 = vld [vmem:[%s1663_s28 + $0x24c] ss:$16 sps:$4 sm:$0xff]   ;;  %v1549_v18 = vld [vmem:[%s1663_s28 + $0x248] ss:$16 sps:$4 sm:$0xff]  }
  0x33   : > { %979 = vmatpush1.bf16.msra.mxu1 %v1476_v29  ;;  %939 = vmatprep.subr.bf16.mxu0 %v1477_v30  ;;  %v1554_v19 = vld [vmem:[%s1663_s28 + $0x16c] ss:$16 sps:$4 sm:$0xff]   ;;  %v1552_v21 = vld [vmem:[%s1663_s28 + $0x168] ss:$16 sps:$4 sm:$0xff]  }
  0x34   : > { %980 = vmatprep.subr.bf16.mxu1 %v1479_v31  ;;  %v1557_v20 = vld [vmem:[%s1663_s28 + $0x26c] ss:$16 sps:$4 sm:$0xff]   ;;  %v1555_v22 = vld [vmem:[%s1663_s28 + $0x268] ss:$16 sps:$4 sm:$0xff]  }
  0x35   : > { %v1563_v23 = vld [vmem:[%s1663_s28 + $0x28c] ss:$16 sps:$4 sm:$0xff]   ;;  %v1558_v24 = vld [vmem:[%s1663_s28 + $0x188] ss:$16 sps:$4 sm:$0xff]  }
  0x36   : > { %940 = vmatpush1.bf16.msra.mxu0 %v1481_v32  ;;  %v1561_v25 = vld [vmem:[%s1663_s28 + $0x288] ss:$16 sps:$4 sm:$0xff]   ;;  %v1566_v26 = vld [vmem:[%s1663_s28 + $0x1ac] ss:$16 sps:$4 sm:$0xff]  }
  0x37   : > { %981 = vmatpush1.bf16.msra.mxu1 %v1482_v33  ;;  %941 = vmatprep.subr.bf16.mxu0 %v1483_v34  ;;  %v1569_v27 = vld [vmem:[%s1663_s28 + $0x2ac] ss:$16 sps:$4 sm:$0xff]   ;;  %v1564_v28 = vld [vmem:[%s1663_s28 + $0x1a8] ss:$16 sps:$4 sm:$0xff]  }
  0x38   : > { %1007 = vmatprep.subr.bf16.mxu1 %v1488_v35  ;;  %v1567_v29 = vld [vmem:[%s1663_s28 + $0x2a8] ss:$16 sps:$4 sm:$0xff]   ;;  %v1572_v30 = vld [vmem:[%s1663_s28 + $0x1cc] ss:$16 sps:$4 sm:$0xff]  }
  0x39   : > { %v1575_v31 = vld [vmem:[%s1663_s28 + $0x2cc] ss:$16 sps:$4 sm:$0xff]   ;;  %v1570_v32 = vld [vmem:[%s1663_s28 + $0x1c8] ss:$16 sps:$4 sm:$0xff]  }
  0x3a   : > { %999 = vmatmul.mubr.bf16.vlgmr.msra.gmra.mrb[0].mxu1 %v1714_v36  ;;  %942 = vmatpush1.bf16.msra.mxu0 %v1489_v38  ;;  %v1573_v33 = vld [vmem:[%s1663_s28 + $0x2c8] ss:$16 sps:$4 sm:$0xff]   ;;  %v1578_v34 = vld [vmem:[%s1663_s28 + $0x1ec] ss:$16 sps:$4 sm:$0xff]  }
  0x3b   : > { %1008 = vmatpush1.bf16.msra.mxu1 %v1486_v37  ;;  %943 = vmatprep.subr.bf16.mxu0 %v1490_v39  ;;  %v1581_v35 = vld [vmem:[%s1663_s28 + $0x2ec] ss:$16 sps:$4 sm:$0xff]   ;;  %v1576_v37 = vld [vmem:[%s1663_s28 + $0x1e8] ss:$16 sps:$4 sm:$0xff]  }
  0x3c   : > { %1009 = vmatprep.subr.bf16.mxu1 %v1494_v40  ;;  %1039 = vmatprep.mubr.bf16.mxu1 %v1305_v53  ;;  %v1579_v38 = vld [vmem:[%s1663_s28 + $0x2e8] ss:$16 sps:$4 sm:$0xff]   ;;  %v334_v53 = vld [vmem:[%s1854_s4 + $0x10] sm:$0xff] }
  0x3e   : > { %944 = vmatpush1.bf16.msra.mxu0 %v1495_v42 }
  0x3f   : > { %1010 = vmatpush1.bf16.msra.mxu1 %v1492_v41  ;;  %945 = vmatprep.subr.bf16.mxu0 %v1496_v43  ;;  %v332_v43 = vld [vmem:[%s1854_s4] sm:$0xff] }
  0x40   : > { %1011 = vmatprep.subr.bf16.mxu1 %v1500_v44 }
  0x42   : > { %946 = vmatpush1.bf16.msra.mxu0 %v1501_v46  ;;  %v333_v46 = vld [vmem:[%s1854_s4 + $0x8] sm:$0xff] }
  0x43   : > { %1012 = vmatpush1.bf16.msra.mxu1 %v1498_v45  ;;  %947 = vmatprep.subr.bf16.mxu0 %v1502_v47 }
  0x44   : > { %1013 = vmatprep.subr.bf16.mxu1 %v1506_v48 }
  0x46   : > { %948 = vmatpush1.bf16.msra.mxu0 %v1507_v51 }
  0x47   : > { %1014 = vmatpush1.bf16.msra.mxu1 %v1504_v49  ;;  %949 = vmatprep.subr.bf16.mxu0 %v1508_v52 }
  0x48   : > { %1015 = vmatprep.subr.bf16.mxu1 %v1512_v54 }
  0x4a   : > { %950 = vmatpush1.bf16.msra.mxu0 %v1513_v56 }
  0x4b   : > { %1016 = vmatpush1.bf16.msra.mxu1 %v1510_v55  ;;  %951 = vmatprep.subr.bf16.mxu0 %v1514_v57  ;;  %v335_v57 = vld [vmem:[%s1854_s4 + $0x18] sm:$0xff] }
  0x4c   : > { %1017 = vmatprep.subr.bf16.mxu1 %v1518_v58 }
  0x4e   : > { %952 = vmatpush1.bf16.msra.mxu0 %v1519_v60 }
  0x4f   : > { %1018 = vmatpush1.bf16.msra.mxu1 %v1516_v59  ;;  %953 = vmatprep.subr.bf16.mxu0 %v1520_v61 }
  0x50   : > { %1019 = vmatprep.subr.bf16.mxu1 %v1524_v62 }
  0x52   : > { %954 = vmatpush1.bf16.msra.mxu0 %v1525_v0 }
  0x53   : > { %1020 = vmatpush1.bf16.msra.mxu1 %v1522_v63  ;;  %955 = vmatprep.subr.bf16.mxu0 %v1526_v1 }
  0x54   : > { %1021 = vmatprep.subr.bf16.mxu1 %v1530_v2  ;;  %v1107_v2 = vlaneseq (!%p1403_p7) }
  0x56   : > { %956 = vmatpush1.bf16.msra.mxu0 %v1531_v5  ;;  %v1105_v5 = vld [vmem:[%s1852_s2] sm:$0xf] (!%p1403_p7) }
  0x57   : > { %1022 = vmatpush1.bf16.msra.mxu1 %v1528_v4  ;;  %1048 = vmatprep.subr.bf16.mxu0 %v1539_v7  ;;  %v1108_v4 = vshrl.u32 (!%p1403_p7), %v1107_v2, 7 }
  0x58   : > { %1023 = vmatprep.subr.bf16.mxu1 %v1536_v6  ;;  %v1131_v6 = vld [vmem:[%s1853_s3] sm:$0xf] (!%p1403_p7) }
  0x59   : > { %958 = vmatmul.mubr.bf16.vlgmr.msra.gmra.mrb[0].mxu0 %v1750_v8  ;;  %v1109_v7 = vsub.s32 (!%p1403_p7), 0, %v1108_v4 }
  0x5a   : > { %1049 = vmatpush1.bf16.msra.mxu0 %v1537_v10  ;;  %1080 = vmatprep.mubr.bf16.mxu0 %v1607_v3  ;;  %v1560_v3 = vld [vmem:[%s1663_s28 + $0x18c] ss:$16 sps:$4 sm:$0xff]   ;;  %v1121_v10 = vsub.s32 (!%p1403_p7), 3, %v1108_v4 }
  0x5b   : > { %1024 = vmatpush1.bf16.msra.mxu1 %v1534_v9  ;;  %1050 = vmatprep.subr.bf16.mxu0 %v1545_v12  ;;  %v1117_v9 = vsub.s32 (!%p1403_p7), 2, %v1108_v4 }
  0x5c   : > { %1025 = vmatprep.subr.bf16.mxu1 %v1542_v11 }
  0x5e   : > { %1051 = vmatpush1.bf16.msra.mxu0 %v1543_v14  ;;  %v1136_v14 = vrot.slane (!%p1403_p7), %v1131_v6, %v1109_v7 }
  0x5f   : > { %1026 = vmatpush1.bf16.msra.mxu1 %v1540_v13  ;;  %1052 = vmatprep.subr.bf16.mxu0 %v1551_v16  ;;  %v1110_v13 = vrot.slane (!%p1403_p7), %v1105_v5, %v1109_v7 }
  0x60   : > { %1027 = vmatprep.subr.bf16.mxu1 %v1548_v15 }
  0x62   : > { %1053 = vmatpush1.bf16.msra.mxu0 %v1549_v18 }
  0x63   : > { %1028 = vmatpush1.bf16.msra.mxu1 %v1546_v17  ;;  %1054 = vmatprep.subr.bf16.mxu0 %v1557_v20  ;;  %v1144_v20 = vrot.slane (!%p1403_p7), %v1131_v6, %v1117_v9 }
  0x64   : > { %1029 = vmatprep.subr.bf16.mxu1 %v1554_v19  ;;  %v1118_v19 = vrot.slane (!%p1403_p7), %v1105_v5, %v1117_v9 }
  0x66   : > { %1055 = vmatpush1.bf16.msra.mxu0 %v1555_v22  ;;  %v1148_v22 = vrot.slane (!%p1403_p7), %v1131_v6, %v1121_v10 }
  0x67   : > { %1030 = vmatpush1.bf16.msra.mxu1 %v1552_v21  ;;  %1056 = vmatprep.subr.bf16.mxu0 %v1563_v23  ;;  %v1122_v21 = vrot.slane (!%p1403_p7), %v1105_v5, %v1121_v10 }
  0x68   : > { %1031 = vmatprep.subr.bf16.mxu1 %v1560_v3 }
  0x6a   : > { %1057 = vmatpush1.bf16.msra.mxu0 %v1561_v25 }
  0x6b   : > { %1032 = vmatpush1.bf16.msra.mxu1 %v1558_v24  ;;  %1058 = vmatprep.subr.bf16.mxu0 %v1569_v27 }
  0x6c   : > { %1033 = vmatprep.subr.bf16.mxu1 %v1566_v26 }
  0x6e   : > { %1059 = vmatpush1.bf16.msra.mxu0 %v1567_v29 }
  0x6f   : > { %1034 = vmatpush1.bf16.msra.mxu1 %v1564_v28  ;;  %1060 = vmatprep.subr.bf16.mxu0 %v1575_v31 }
  0x70   : > { %1035 = vmatprep.subr.bf16.mxu1 %v1572_v30 }
  0x72   : > { %1061 = vmatpush1.bf16.msra.mxu0 %v1573_v33 }
  0x73   : > { %1036 = vmatpush1.bf16.msra.mxu1 %v1570_v32  ;;  %1062 = vmatprep.subr.bf16.mxu0 %v1581_v35 }
  0x74   : > { %1037 = vmatprep.subr.bf16.mxu1 %v1578_v34 }
  0x76   : > { %1063 = vmatpush1.bf16.msra.mxu0 %v1579_v38 }
  0x77   : > { %1038 = vmatpush1.bf16.msra.mxu1 %v1576_v37 }
  0x79   : > { %1081 = vmatmul.mubr.bf16.vlgmr.msra.gmra.mrb[4].mxu0 %v1714_v36 }
  0x7a   : > { %1040 = vmatmul.mubr.bf16.vlgmr.msra.gmra.mrb[4].mxu1 %v1750_v8  ;;  %v1113_v8 = vsub.s32 (!%p1403_p7), 1, %v1108_v4 }
  0x7c   : > { %v1114_v15 = vrot.slane (!%p1403_p7), %v1105_v5, %v1113_v8  ;;  %v1140_v16 = vrot.slane (!%p1403_p7), %v1131_v6, %v1113_v8 }
 0x10d   : > { %v1000_v39 = vpop.f32.mrb[0].mxu1 }
 0x10e   : > { %v1002_v40 = vpop.f32.mrb[1].mxu1 }
 0x10f   : > { %v1004_v41 = vpop.f32.mrb[2].mxu1 }
 0x110   : > { %v1005_v42 = vpop.f32.mrb[3].mxu1 }
 0x12c   : > { %v959_v44 = vpop.f32.mrb[0].mxu0 }
 0x12d   : > { %v1001_v45 = vadd.f32 %v1000_v39, %v959_v44  ;;  %v961_v47 = vpop.f32.mrb[1].mxu0 }
 0x12e   : > { %v1003_v48 = vadd.f32 %v1002_v40, %v961_v47  ;;  %v963_v49 = vpop.f32.mrb[2].mxu0 }
 0x12f   : > { %v1089_v50 = vadd.f32 %v1001_v45, %v332_v43  ;;  %v964_v51 = vpop.f32.mrb[3].mxu0 }
 0x130   : > { %v1090_v36 = vadd.f32 %v1003_v48, %v333_v46 }
 0x131   : > { %1093 = vst [vmem:[%s1854_s4] sm:$0xff] %v1089_v50 }
 0x132   : > { %1094 = vst [vmem:[%s1854_s4 + $0x8] sm:$0xff] %v1090_v36 }
 0x138   : > { %v1101_v11 = vld [vmem:[%s1854_s4] sm:$0xff] (!%p1403_p7) }
 0x139   : > { %v1102_v12 = vld [vmem:[%s1854_s4 + $0x8] sm:$0xff] (!%p1403_p7)  ;;  %v1127_v3 = vmul.f32 (!%p1403_p7), %v1110_v13, %v1101_v11 }
 0x13a   : > { %v1128_v23 = vmul.f32 (!%p1403_p7), %v1114_v15, %v1102_v12 }
 0x13b   : > { %v1153_v26 = vadd.f32 (!%p1403_p7), %v1136_v14, %v1127_v3 }
 0x13c   : > { %v1154_v27 = vadd.f32 (!%p1403_p7), %v1140_v16, %v1128_v23 }
 0x13d   : > { %v1157_v30 = vmax.f32 (!%p1403_p7), %v1153_v26, 0.0 }
 0x13e   : > { %v1158_v31 = vmax.f32 (!%p1403_p7), %v1154_v27, 0.0 }
 0x13f   : > { %1161 = vst [vmem:[%s1854_s4] sm:$0xff] (!%p1403_p7), %v1157_v30 }
 0x140   : > { %1162 = vst [vmem:[%s1854_s4 + $0x8] sm:$0xff] (!%p1403_p7), %v1158_v31 }
 0x14c   : > { %v1082_v54 = vpop.f32.mrb[4].mxu0 }
 0x14d   : > { %v1041_v52 = vpop.f32.mrb[4].mxu1  ;;  %v1084_v58 = vpop.f32.mrb[5].mxu0  ;;  %1100 = sbr.rel (%p1403_p7) target bundleno = 354 (0x162), region = 44 }
 0x14e   : > { %v1083_v55 = vadd.f32 %v1082_v54, %v1041_v52  ;;  %v1043_v56 = vpop.f32.mrb[5].mxu1  ;;  %v1086_v61 = vpop.f32.mrb[6].mxu0 }
 0x14f   : > { %v1085_v59 = vadd.f32 %v1084_v58, %v1043_v56  ;;  %v1045_v60 = vpop.f32.mrb[6].mxu1  ;;  %v1087_v0 = vpop.f32.mrb[7].mxu0 }
 0x150   : > { %v1091_v62 = vadd.f32 %v1083_v55, %v334_v53  ;;  %v1046_v63 = vpop.f32.mrb[7].mxu1 }
 0x151   : > { %v1092_v1 = vadd.f32 %v1085_v59, %v335_v57 }
 0x152   : > { %1095 = vst [vmem:[%s1854_s4 + $0x10] sm:$0xff] %v1091_v62 }
 0x153   : > { %1096 = vst [vmem:[%s1854_s4 + $0x18] sm:$0xff] %v1092_v1 }
 0x159   : > { %v1103_v17 = vld [vmem:[%s1854_s4 + $0x10] sm:$0xff] }
 0x15a   : > { %v1104_v18 = vld [vmem:[%s1854_s4 + $0x18] sm:$0xff]  ;;  %v1129_v24 = vmul.f32 %v1118_v19, %v1103_v17 }
 0x15b   : > { %v1130_v25 = vmul.f32 %v1122_v21, %v1104_v18 }
 0x15c   : > { %v1155_v28 = vadd.f32 %v1144_v20, %v1129_v24 }
 0x15d   : > { %v1156_v29 = vadd.f32 %v1148_v22, %v1130_v25 }
 0x15e   : > { %v1159_v32 = vmax.f32 %v1155_v28, 0.0 }
 0x15f   : > { %v1160_v33 = vmax.f32 %v1156_v29, 0.0 }
 0x160   : > { %1163 = vst [vmem:[%s1854_s4 + $0x10] sm:$0xff] %v1159_v32 }
 0x161   : > { %1164 = vst [vmem:[%s1854_s4 + $0x18] sm:$0xff] %v1160_v33 }
 0x162 PF: > { %s14_s17 = sadd.s32 1, %s1604_s17   ;;  %s1855_s15 = smov %s1600_s16 }
 0x163   : > { %p11_p8 = scmp.ge.s32.totalorder %s14_s17, 8   ;;  %s1856_s16 = smov %s1858_s18 }
 0x165   :  { %13 = sbr.rel (!%p11_p8) target bundleno = 2 (0x2), region = 83 }

// kernel: tomato_leaf_net.40
= control target key start
LH: loop header
LB: loop body
LE: loop exit
PB: predicated region body
PF: predicated region fallthrough
CT: control target
= control target key end

     0   :  { %s981_s1 = inlined_call_operand.vmem [shape: bf16[256,512], index: 1, kind: input, shape index: {}]   ;;  %s982_s0 = inlined_call_operand.vmem [shape: bf16[8,256], index: 0, kind: input, shape index: {}]   ;;  %s983_s2 = inlined_call_operand.vmem [shape: f32[1,512], index: 2, kind: input, shape index: {}]   ;;  %s984_s3 = inlined_call_operand.vmem [shape: f32[1,512], index: 3, kind: input, shape index: {}]   ;;  %s985_s4 = inlined_call_operand.vmem [shape: f32[8,512], index: 4, kind: output, shape index: {}]  }
   0x1   :  { %v645_v0 = vld [vmem:[%s981_s1 + $0x4] ss:$16 sps:$4 sm:$0xff]   ;;  %v647_v1 = vld [vmem:[%s981_s1 + $0xc] ss:$16 sps:$4 sm:$0xff]   ;;  %v649_v2 = vld [vmem:[%s981_s1] ss:$16 sps:$4 sm:$0xff]  }
   0x2   :  { %421 = vmatprep.subr.bf16.mxu0 %v645_v0  ;;  %v650_v3 = vld [vmem:[%s981_s1 + $0x8] ss:$16 sps:$4 sm:$0xff]   ;;  %462 = vmatprep.subr.bf16.mxu1 %v647_v1  ;;  %v651_v4 = vld [vmem:[%s981_s1 + $0x24] ss:$16 sps:$4 sm:$0xff]   ;;  %v653_v5 = vld [vmem:[%s981_s1 + $0x2c] ss:$16 sps:$4 sm:$0xff]  }
   0x3   :  { %422 = vmatpush1.bf16.msra.mxu0 %v649_v2  ;;  %463 = vmatpush1.bf16.msra.mxu1 %v650_v3  ;;  %v655_v6 = vld [vmem:[%s981_s1 + $0x20] ss:$16 sps:$4 sm:$0xff]   ;;  %v656_v7 = vld [vmem:[%s981_s1 + $0x28] ss:$16 sps:$4 sm:$0xff]   ;;  %v657_v8 = vld [vmem:[%s981_s1 + $0x44] ss:$16 sps:$4 sm:$0xff]   ;;  %v520_v3 = vlaneseq }
   0x4   :  { %423 = vmatprep.subr.bf16.mxu0 %v651_v4  ;;  %464 = vmatprep.subr.bf16.mxu1 %v653_v5  ;;  %v659_v9 = vld [vmem:[%s981_s1 + $0x4c] ss:$16 sps:$4 sm:$0xff]   ;;  %v661_v10 = vld [vmem:[%s981_s1 + $0x40] ss:$16 sps:$4 sm:$0xff]   ;;  %v662_v11 = vld [vmem:[%s981_s1 + $0x48] ss:$16 sps:$4 sm:$0xff]  }
   0x5   :  { %v663_v12 = vld [vmem:[%s981_s1 + $0x64] ss:$16 sps:$4 sm:$0xff]   ;;  %v665_v13 = vld [vmem:[%s981_s1 + $0x6c] ss:$16 sps:$4 sm:$0xff]   ;;  %v667_v14 = vld [vmem:[%s981_s1 + $0x60] ss:$16 sps:$4 sm:$0xff]  }
   0x6   :  { %v668_v15 = vld [vmem:[%s981_s1 + $0x68] ss:$16 sps:$4 sm:$0xff]   ;;  %v669_v16 = vld [vmem:[%s981_s1 + $0x84] ss:$16 sps:$4 sm:$0xff]   ;;  %v671_v17 = vld [vmem:[%s981_s1 + $0x8c] ss:$16 sps:$4 sm:$0xff]  }
   0x7   :  { %424 = vmatpush1.bf16.msra.mxu0 %v655_v6  ;;  %465 = vmatpush1.bf16.msra.mxu1 %v656_v7  ;;  %v673_v18 = vld [vmem:[%s981_s1 + $0x80] ss:$16 sps:$4 sm:$0xff]   ;;  %v674_v19 = vld [vmem:[%s981_s1 + $0x88] ss:$16 sps:$4 sm:$0xff]   ;;  %v675_v20 = vld [vmem:[%s981_s1 + $0xa4] ss:$16 sps:$4 sm:$0xff]  }
   0x8   :  { %425 = vmatprep.subr.bf16.mxu0 %v657_v8  ;;  %466 = vmatprep.subr.bf16.mxu1 %v659_v9  ;;  %v677_v21 = vld [vmem:[%s981_s1 + $0xac] ss:$16 sps:$4 sm:$0xff]   ;;  %v679_v22 = vld [vmem:[%s981_s1 + $0xa0] ss:$16 sps:$4 sm:$0xff]   ;;  %v680_v23 = vld [vmem:[%s981_s1 + $0xa8] ss:$16 sps:$4 sm:$0xff]  }
   0x9   :  { %v681_v24 = vld [vmem:[%s981_s1 + $0xc4] ss:$16 sps:$4 sm:$0xff]   ;;  %v683_v25 = vld [vmem:[%s981_s1 + $0xcc] ss:$16 sps:$4 sm:$0xff]   ;;  %v685_v26 = vld [vmem:[%s981_s1 + $0xc0] ss:$16 sps:$4 sm:$0xff]  }
   0xa   :  { %v686_v27 = vld [vmem:[%s981_s1 + $0xc8] ss:$16 sps:$4 sm:$0xff]   ;;  %v687_v28 = vld [vmem:[%s981_s1 + $0xe4] ss:$16 sps:$4 sm:$0xff]   ;;  %v689_v29 = vld [vmem:[%s981_s1 + $0xec] ss:$16 sps:$4 sm:$0xff]  }
   0xb   :  { %426 = vmatpush1.bf16.msra.mxu0 %v661_v10  ;;  %467 = vmatpush1.bf16.msra.mxu1 %v662_v11  ;;  %v691_v30 = vld [vmem:[%s981_s1 + $0xe0] ss:$16 sps:$4 sm:$0xff]   ;;  %v692_v31 = vld [vmem:[%s981_s1 + $0xe8] ss:$16 sps:$4 sm:$0xff]   ;;  %v693_v32 = vld [vmem:[%s981_s1 + $0x104] ss:$16 sps:$4 sm:$0xff]  }
   0xc   :  { %427 = vmatprep.subr.bf16.mxu0 %v663_v12  ;;  %468 = vmatprep.subr.bf16.mxu1 %v665_v13  ;;  %v695_v33 = vld [vmem:[%s981_s1 + $0x10c] ss:$16 sps:$4 sm:$0xff]   ;;  %v697_v34 = vld [vmem:[%s981_s1 + $0x100] ss:$16 sps:$4 sm:$0xff]   ;;  %v698_v35 = vld [vmem:[%s981_s1 + $0x108] ss:$16 sps:$4 sm:$0xff]  }
   0xd   :  { %v699_v36 = vld [vmem:[%s981_s1 + $0x124] ss:$16 sps:$4 sm:$0xff]   ;;  %v701_v37 = vld [vmem:[%s981_s1 + $0x12c] ss:$16 sps:$4 sm:$0xff]   ;;  %v703_v38 = vld [vmem:[%s981_s1 + $0x120] ss:$16 sps:$4 sm:$0xff]  }
   0xe   :  { %v704_v39 = vld [vmem:[%s981_s1 + $0x128] ss:$16 sps:$4 sm:$0xff]   ;;  %v705_v40 = vld [vmem:[%s981_s1 + $0x144] ss:$16 sps:$4 sm:$0xff]   ;;  %v707_v41 = vld [vmem:[%s981_s1 + $0x14c] ss:$16 sps:$4 sm:$0xff]  }
   0xf   :  { %428 = vmatpush1.bf16.msra.mxu0 %v667_v14  ;;  %469 = vmatpush1.bf16.msra.mxu1 %v668_v15  ;;  %v709_v42 = vld [vmem:[%s981_s1 + $0x140] ss:$16 sps:$4 sm:$0xff]   ;;  %v710_v43 = vld [vmem:[%s981_s1 + $0x148] ss:$16 sps:$4 sm:$0xff]   ;;  %v711_v44 = vld [vmem:[%s981_s1 + $0x164] ss:$16 sps:$4 sm:$0xff]  }
  0x10   :  { %429 = vmatprep.subr.bf16.mxu0 %v669_v16  ;;  %470 = vmatprep.subr.bf16.mxu1 %v671_v17  ;;  %v713_v45 = vld [vmem:[%s981_s1 + $0x16c] ss:$16 sps:$4 sm:$0xff]   ;;  %v29_v46 = vld [vmem:[%s982_s0] sm:$0xff]  ;;  %v716_v49 = vld [vmem:[%s981_s1 + $0x168] ss:$16 sps:$4 sm:$0xff]   ;;  %v521_v4 = vshrl.u32 %v520_v3, 7 }
  0x11   :  { %v579_v47 = vcombine.high %v29_v46, %v29_v46  ;;  %v715_v48 = vld [vmem:[%s981_s1 + $0x160] ss:$16 sps:$4 sm:$0xff]   ;;  %v717_v50 = vld [vmem:[%s981_s1 + $0x184] ss:$16 sps:$4 sm:$0xff]   ;;  %v719_v51 = vld [vmem:[%s981_s1 + $0x18c] ss:$16 sps:$4 sm:$0xff]   ;;  %v578_v2 = vcombine.low %v29_v46, %v29_v46 }
  0x12   :  { %v721_v52 = vld [vmem:[%s981_s1 + $0x180] ss:$16 sps:$4 sm:$0xff]   ;;  %v722_v53 = vld [vmem:[%s981_s1 + $0x188] ss:$16 sps:$4 sm:$0xff]   ;;  %v723_v54 = vld [vmem:[%s981_s1 + $0x1a4] ss:$16 sps:$4 sm:$0xff]  }
  0x13   :  { %430 = vmatpush1.bf16.msra.mxu0 %v673_v18  ;;  %471 = vmatpush1.bf16.msra.mxu1 %v674_v19  ;;  %v725_v55 = vld [vmem:[%s981_s1 + $0x1ac] ss:$16 sps:$4 sm:$0xff]   ;;  %v727_v56 = vld [vmem:[%s981_s1 + $0x1a0] ss:$16 sps:$4 sm:$0xff]   ;;  %v728_v57 = vld [vmem:[%s981_s1 + $0x1a8] ss:$16 sps:$4 sm:$0xff]  }
  0x14   :  { %431 = vmatprep.subr.bf16.mxu0 %v675_v20  ;;  %472 = vmatprep.subr.bf16.mxu1 %v677_v21  ;;  %v729_v58 = vld [vmem:[%s981_s1 + $0x1c4] ss:$16 sps:$4 sm:$0xff]   ;;  %v731_v59 = vld [vmem:[%s981_s1 + $0x1cc] ss:$16 sps:$4 sm:$0xff]   ;;  %v733_v60 = vld [vmem:[%s981_s1 + $0x1c0] ss:$16 sps:$4 sm:$0xff]  }
  0x15   :  { %453 = vmatprep.mubr.bf16.mxu0 %v579_v47  ;;  %494 = vmatprep.mubr.bf16.mxu1 %v579_v47  ;;  %v734_v61 = vld [vmem:[%s981_s1 + $0x1c8] ss:$16 sps:$4 sm:$0xff]   ;;  %v735_v62 = vld [vmem:[%s981_s1 + $0x1e4] ss:$16 sps:$4 sm:$0xff]   ;;  %v737_v63 = vld [vmem:[%s981_s1 + $0x1ec] ss:$16 sps:$4 sm:$0xff]  }
  0x16   :  { %v739_v0 = vld [vmem:[%s981_s1 + $0x1e0] ss:$16 sps:$4 sm:$0xff]   ;;  %v740_v1 = vld [vmem:[%s981_s1 + $0x1e8] ss:$16 sps:$4 sm:$0xff]   ;;  %v522_v5 = vsub.s32 0, %v521_v4  ;;  %v530_v6 = vsub.s32 2, %v521_v4 }
  0x17   :  { %432 = vmatpush1.bf16.msra.mxu0 %v679_v22  ;;  %473 = vmatpush1.bf16.msra.mxu1 %v680_v23  ;;  %v518_v7 = vld [vmem:[%s983_s2] sm:$0xf]  ;;  %v526_v8 = vsub.s32 1, %v521_v4  ;;  %v534_v9 = vsub.s32 3, %v521_v4 }
  0x18   :  { %433 = vmatprep.subr.bf16.mxu0 %v681_v24  ;;  %474 = vmatprep.subr.bf16.mxu1 %v683_v25  ;;  %v544_v10 = vld [vmem:[%s984_s3] sm:$0xf]  ;;  %v523_v11 = vrot.slane %v518_v7, %v522_v5  ;;  %v531_v12 = vrot.slane %v518_v7, %v530_v6 }
  0x19   :  { %v527_v15 = vrot.slane %v518_v7, %v526_v8  ;;  %v535_v16 = vrot.slane %v518_v7, %v534_v9  ;;  %v549_v17 = vrot.slane %v544_v10, %v522_v5  ;;  %v557_v18 = vrot.slane %v544_v10, %v530_v6 }
  0x1a   :  { %v553_v21 = vrot.slane %v544_v10, %v526_v8  ;;  %v561_v22 = vrot.slane %v544_v10, %v534_v9 }
  0x1b   :  { %434 = vmatpush1.bf16.msra.mxu0 %v685_v26  ;;  %475 = vmatpush1.bf16.msra.mxu1 %v686_v27 }
  0x1c   :  { %435 = vmatprep.subr.bf16.mxu0 %v687_v28  ;;  %476 = vmatprep.subr.bf16.mxu1 %v689_v29 }
  0x1f   :  { %436 = vmatpush1.bf16.msra.mxu0 %v691_v30  ;;  %477 = vmatpush1.bf16.msra.mxu1 %v692_v31 }
  0x20   :  { %437 = vmatprep.subr.bf16.mxu0 %v693_v32  ;;  %478 = vmatprep.subr.bf16.mxu1 %v695_v33 }
  0x23   :  { %438 = vmatpush1.bf16.msra.mxu0 %v697_v34  ;;  %479 = vmatpush1.bf16.msra.mxu1 %v698_v35 }
  0x24   :  { %439 = vmatprep.subr.bf16.mxu0 %v699_v36  ;;  %480 = vmatprep.subr.bf16.mxu1 %v701_v37 }
  0x27   :  { %440 = vmatpush1.bf16.msra.mxu0 %v703_v38  ;;  %481 = vmatpush1.bf16.msra.mxu1 %v704_v39 }
  0x28   :  { %441 = vmatprep.subr.bf16.mxu0 %v705_v40  ;;  %482 = vmatprep.subr.bf16.mxu1 %v707_v41 }
  0x2b   :  { %442 = vmatpush1.bf16.msra.mxu0 %v709_v42  ;;  %483 = vmatpush1.bf16.msra.mxu1 %v710_v43 }
  0x2c   :  { %443 = vmatprep.subr.bf16.mxu0 %v711_v44  ;;  %484 = vmatprep.subr.bf16.mxu1 %v713_v45 }
  0x2f   :  { %444 = vmatpush1.bf16.msra.mxu0 %v715_v48  ;;  %485 = vmatpush1.bf16.msra.mxu1 %v716_v49 }
  0x30   :  { %445 = vmatprep.subr.bf16.mxu0 %v717_v50  ;;  %486 = vmatprep.subr.bf16.mxu1 %v719_v51 }
  0x33   :  { %446 = vmatpush1.bf16.msra.mxu0 %v721_v52  ;;  %487 = vmatpush1.bf16.msra.mxu1 %v722_v53 }
  0x34   :  { %447 = vmatprep.subr.bf16.mxu0 %v723_v54  ;;  %488 = vmatprep.subr.bf16.mxu1 %v725_v55 }
  0x37   :  { %448 = vmatpush1.bf16.msra.mxu0 %v727_v56  ;;  %489 = vmatpush1.bf16.msra.mxu1 %v728_v57 }
  0x38   :  { %449 = vmatprep.subr.bf16.mxu0 %v729_v58  ;;  %490 = vmatprep.subr.bf16.mxu1 %v731_v59 }
  0x3b   :  { %450 = vmatpush1.bf16.msra.mxu0 %v733_v60  ;;  %491 = vmatpush1.bf16.msra.mxu1 %v734_v61 }
  0x3c   :  { %451 = vmatprep.subr.bf16.mxu0 %v735_v62  ;;  %492 = vmatprep.subr.bf16.mxu1 %v737_v63 }
  0x3f   :  { %452 = vmatpush1.bf16.msra.mxu0 %v739_v0  ;;  %493 = vmatpush1.bf16.msra.mxu1 %v740_v1 }
  0x42   :  { %454 = vmatmul.mubr.bf16.vlgmr.msra.gmra.mrb[0].mxu0 %v578_v2  ;;  %495 = vmatmul.mubr.bf16.vlgmr.msra.gmra.mrb[0].mxu1 %v578_v2 }
 0x115   :  { %v455_v13 = vpop.f32.mrb[0].mxu0  ;;  %v496_v14 = vpop.f32.mrb[0].mxu1 }
 0x116   :  { %v457_v19 = vpop.f32.mrb[1].mxu0  ;;  %v498_v20 = vpop.f32.mrb[1].mxu1  ;;  %v540_v25 = vmul.f32 %v523_v11, %v455_v13  ;;  %v542_v26 = vmul.f32 %v531_v12, %v496_v14 }
 0x117   :  { %v459_v23 = vpop.f32.mrb[2].mxu0  ;;  %v500_v24 = vpop.f32.mrb[2].mxu1  ;;  %v541_v29 = vmul.f32 %v527_v15, %v457_v19  ;;  %v543_v30 = vmul.f32 %v535_v16, %v498_v20 }
 0x118   :  { %v460_v27 = vpop.f32.mrb[3].mxu0  ;;  %v501_v28 = vpop.f32.mrb[3].mxu1  ;;  %v566_v31 = vadd.f32 %v549_v17, %v540_v25  ;;  %v568_v32 = vadd.f32 %v557_v18, %v542_v26 }
 0x119   :  { %v567_v33 = vadd.f32 %v553_v21, %v541_v29  ;;  %v569_v34 = vadd.f32 %v561_v22, %v543_v30 }
 0x11a   :  { %570 = vst [vmem:[%s985_s4] sm:$0xff] %v566_v31  ;;  %572 = vst [vmem:[%s985_s4 + $0x10] sm:$0xff] %v568_v32 }
 0x11b   :  { %571 = vst [vmem:[%s985_s4 + $0x8] sm:$0xff] %v567_v33  ;;  %573 = vst [vmem:[%s985_s4 + $0x18] sm:$0xff] %v569_v34 }

// kernel: tomato_leaf_net.41
= control target key start
LH: loop header
LB: loop body
LE: loop exit
PB: predicated region body
PF: predicated region fallthrough
CT: control target
= control target key end

     0   :  { %s2007_s18 = smov 0   ;;  %s2009_s19 = smov 0   ;;  %s2270_s0 = inlined_call_operand.vmem [shape: bf16[8,4608], index: 0, kind: input, shape index: {}]   ;;  %s2271_s1 = inlined_call_operand.vmem [shape: bf16[4608,512], index: 1, kind: input, shape index: {}]   ;;  %s2272_s2 = inlined_call_operand.vmem [shape: f32[1,512], index: 2, kind: input, shape index: {}]   ;;  %s2273_s3 = inlined_call_operand.vmem [shape: f32[1,512], index: 3, kind: input, shape index: {}]   ;;  %s2274_s4 = inlined_call_operand.vmem [shape: f32[8,512], index: 4, kind: input, shape index: {}]   ;;  %s2275_s5 = inlined_call_operand.vmem [shape: f32[8,512], index: 5, kind: output, shape index: {}]  }
   0x1   :  { %s2011_s20 = smov 0  }
   0x2 LB: > { %s27_s21 = sadd.s32 1, %s1970_s19  ;;  %p1586_p0 = scmp.ge.s32.totalorder %s1974_s20, 1  ;;  %s1974_s20 = sphi %s2011_s20, %s15_s20   ;;  %s1970_s19 = sphi %s2009_s19, %s2277_s19   ;;  %s1966_s18 = sphi %s2007_s18, %s2276_s18  }
   0x3   : > { %p28_p1 = scmp.ge.s32.totalorder %s27_s21, 9  ;;  %p271_p2 = scmp.lt.s32.totalorder %s1974_s20, 10 }
   0x5   : > { %s2279_s21 = smov (%p28_p1, %s27_s21), 0  ;;  %p272_p3 = pnand %p1586_p0, %p271_p2 }
   0x6   : > { %s1587_s22 = sshll.u32 (!%p272_p3), %s1966_s18, 2  ;;  %s1589_s23 = sshll.u32 (!%p272_p3), %s1966_s18, 6 }
   0x7   : > { %275 = sbr.rel (%p272_p3) target bundleno = 388 (0x184), region = 40  ;;  %p337_p4 = scmp.lt.s32.totalorder (!%p272_p3), %s1587_s22, 35 }
   0x8   : > { %p346_p5 = scmp.lt.s32.totalorder (!%p272_p3), %s1589_s23, 575  ;;  %p1592_p6 = scmp.ne.s32.totalorder (!%p272_p3), %s1966_s18, 0 }
   0xe   : > { %s2281_s22 = smov (!%p337_p4, %s1587_s22), 35  ;;  %s2283_s23 = smov (!%p346_p5, %s1589_s23), 575 }
   0xf   : > { %s1588_s24 = sshll.u32 %s2281_s22, 2  ;;  %s1730_s28 = sshll.u32 %s2283_s23, 4  ;;  %v1976_v0 = vmov (!%p1592_p6), 0.0  }
  0x10   : > { %s2032_s27 = scalar_lea.vmem %s2270_s0, %s1588_s24  ;;  %s2037_s6 = scalar_lea.vmem %s2271_s1, %s1730_s28  ;;  %390 = vst [vmem:[%s2275_s5] sm:$0xff] (!%p1592_p6), %v1976_v0  ;;  %391 = vst [vmem:[%s2275_s5 + $0x8] sm:$0xff] (!%p1592_p6), %v1976_v0 }
  0x11   : > { %389 = sbr.rel (%p1592_p6) target bundleno = 24 (0x18), region = 44  ;;  %392 = vst [vmem:[%s2275_s5 + $0x10] sm:$0xff] (!%p1592_p6), %v1976_v0  ;;  %393 = vst [vmem:[%s2275_s5 + $0x18] sm:$0xff] (!%p1592_p6), %v1976_v0 }
  0x18 PF: > { %v1756_v1 = vld [vmem:[%s2037_s6 + $0x4] ss:$16 sps:$4 sm:$0xff]   ;;  %v1760_v3 = vld [vmem:[%s2037_s6] ss:$16 sps:$4 sm:$0xff]   ;;  %v399_v49 = vld [vmem:[%s2032_s27 + $0x8] sm:$0xff]  ;;  %p1725_p7 = scmp.ne.s32.totalorder %s1966_s18, 8 }
  0x19   : > { %v1758_v2 = vld [vmem:[%s2037_s6 + $0x204] ss:$16 sps:$4 sm:$0xff]   ;;  %1182 = vmatprep.subr.bf16.mxu0 %v1756_v1  ;;  %v1761_v4 = vld [vmem:[%s2037_s6 + $0x200] ss:$16 sps:$4 sm:$0xff]   ;;  %v1596_v52 = vcombine.high %v399_v49, %v399_v49 }
  0x1a   : > { %1223 = vmatprep.subr.bf16.mxu1 %v1758_v2  ;;  %v1762_v5 = vld [vmem:[%s2037_s6 + $0x24] ss:$16 sps:$4 sm:$0xff]   ;;  %1183 = vmatpush1.bf16.msra.mxu0 %v1760_v3  ;;  %v1766_v7 = vld [vmem:[%s2037_s6 + $0x20] ss:$16 sps:$4 sm:$0xff]  }
  0x1b   : > { %1224 = vmatpush1.bf16.msra.mxu1 %v1761_v4  ;;  %v1764_v6 = vld [vmem:[%s2037_s6 + $0x224] ss:$16 sps:$4 sm:$0xff]   ;;  %1184 = vmatprep.subr.bf16.mxu0 %v1762_v5  ;;  %v1767_v8 = vld [vmem:[%s2037_s6 + $0x220] ss:$16 sps:$4 sm:$0xff]   ;;  %v1858_v5 = vld [vmem:[%s2037_s6 + $0xc] ss:$16 sps:$4 sm:$0xff]  }
  0x1c   : > { %1225 = vmatprep.subr.bf16.mxu1 %v1764_v6  ;;  %v1768_v9 = vld [vmem:[%s2037_s6 + $0x44] ss:$16 sps:$4 sm:$0xff]   ;;  %v1772_v11 = vld [vmem:[%s2037_s6 + $0x40] ss:$16 sps:$4 sm:$0xff]   ;;  %1255 = vmatprep.mubr.bf16.mxu1 %v1596_v52  ;;  %v1861_v6 = vld [vmem:[%s2037_s6 + $0x20c] ss:$16 sps:$4 sm:$0xff]  }
  0x1d   : > { %v1770_v10 = vld [vmem:[%s2037_s6 + $0x244] ss:$16 sps:$4 sm:$0xff]   ;;  %v1773_v12 = vld [vmem:[%s2037_s6 + $0x240] ss:$16 sps:$4 sm:$0xff]  }
  0x1e   : > { %1185 = vmatpush1.bf16.msra.mxu0 %v1766_v7  ;;  %v1774_v13 = vld [vmem:[%s2037_s6 + $0x64] ss:$16 sps:$4 sm:$0xff]   ;;  %v1778_v15 = vld [vmem:[%s2037_s6 + $0x60] ss:$16 sps:$4 sm:$0xff]  }
  0x1f   : > { %1226 = vmatpush1.bf16.msra.mxu1 %v1767_v8  ;;  %1186 = vmatprep.subr.bf16.mxu0 %v1768_v9  ;;  %v1776_v14 = vld [vmem:[%s2037_s6 + $0x264] ss:$16 sps:$4 sm:$0xff]   ;;  %v1779_v16 = vld [vmem:[%s2037_s6 + $0x260] ss:$16 sps:$4 sm:$0xff]   ;;  %v2125_v8 = vcombine.low %v399_v49, %v399_v49  ;;  %v1856_v9 = vld [vmem:[%s2037_s6 + $0x8] ss:$16 sps:$4 sm:$0xff]  }
  0x20   : > { %1227 = vmatprep.subr.bf16.mxu1 %v1770_v10  ;;  %v1780_v17 = vld [vmem:[%s2037_s6 + $0x84] ss:$16 sps:$4 sm:$0xff]   ;;  %v1784_v19 = vld [vmem:[%s2037_s6 + $0x80] ss:$16 sps:$4 sm:$0xff]   ;;  %v1859_v10 = vld [vmem:[%s2037_s6 + $0x208] ss:$16 sps:$4 sm:$0xff]  }
  0x21   : > { %v1782_v18 = vld [vmem:[%s2037_s6 + $0x284] ss:$16 sps:$4 sm:$0xff]   ;;  %v1785_v20 = vld [vmem:[%s2037_s6 + $0x280] ss:$16 sps:$4 sm:$0xff]   ;;  %v1916_v49 = vld [vmem:[%s2037_s6 + $0x148] ss:$16 sps:$4 sm:$0xff]  }
  0x22   : > { %1187 = vmatpush1.bf16.msra.mxu0 %v1772_v11  ;;  %v1786_v21 = vld [vmem:[%s2037_s6 + $0xa4] ss:$16 sps:$4 sm:$0xff]   ;;  %v1790_v23 = vld [vmem:[%s2037_s6 + $0xa0] ss:$16 sps:$4 sm:$0xff]   ;;  %v1864_v11 = vld [vmem:[%s2037_s6 + $0x2c] ss:$16 sps:$4 sm:$0xff]  }
  0x23   : > { %1228 = vmatpush1.bf16.msra.mxu1 %v1773_v12  ;;  %1188 = vmatprep.subr.bf16.mxu0 %v1774_v13  ;;  %v1788_v22 = vld [vmem:[%s2037_s6 + $0x2a4] ss:$16 sps:$4 sm:$0xff]   ;;  %v1791_v24 = vld [vmem:[%s2037_s6 + $0x2a0] ss:$16 sps:$4 sm:$0xff]   ;;  %v1867_v12 = vld [vmem:[%s2037_s6 + $0x22c] ss:$16 sps:$4 sm:$0xff]  }
  0x24   : > { %1229 = vmatprep.subr.bf16.mxu1 %v1776_v14  ;;  %v1792_v25 = vld [vmem:[%s2037_s6 + $0xc4] ss:$16 sps:$4 sm:$0xff]   ;;  %v1796_v27 = vld [vmem:[%s2037_s6 + $0xc0] ss:$16 sps:$4 sm:$0xff]   ;;  %v1862_v13 = vld [vmem:[%s2037_s6 + $0x28] ss:$16 sps:$4 sm:$0xff]  }
  0x25   : > { %v1794_v26 = vld [vmem:[%s2037_s6 + $0x2c4] ss:$16 sps:$4 sm:$0xff]   ;;  %v1797_v28 = vld [vmem:[%s2037_s6 + $0x2c0] ss:$16 sps:$4 sm:$0xff]   ;;  %v1865_v14 = vld [vmem:[%s2037_s6 + $0x228] ss:$16 sps:$4 sm:$0xff]  }
  0x26   : > { %1189 = vmatpush1.bf16.msra.mxu0 %v1778_v15  ;;  %v1798_v29 = vld [vmem:[%s2037_s6 + $0xe4] ss:$16 sps:$4 sm:$0xff]   ;;  %v1802_v31 = vld [vmem:[%s2037_s6 + $0xe0] ss:$16 sps:$4 sm:$0xff]   ;;  %v1870_v15 = vld [vmem:[%s2037_s6 + $0x4c] ss:$16 sps:$4 sm:$0xff]  }
  0x27   : > { %1230 = vmatpush1.bf16.msra.mxu1 %v1779_v16  ;;  %1190 = vmatprep.subr.bf16.mxu0 %v1780_v17  ;;  %v1800_v30 = vld [vmem:[%s2037_s6 + $0x2e4] ss:$16 sps:$4 sm:$0xff]   ;;  %v1803_v32 = vld [vmem:[%s2037_s6 + $0x2e0] ss:$16 sps:$4 sm:$0xff]   ;;  %v1873_v16 = vld [vmem:[%s2037_s6 + $0x24c] ss:$16 sps:$4 sm:$0xff]  }
  0x28   : > { %1231 = vmatprep.subr.bf16.mxu1 %v1782_v18  ;;  %v1804_v33 = vld [vmem:[%s2037_s6 + $0x104] ss:$16 sps:$4 sm:$0xff]   ;;  %v1808_v35 = vld [vmem:[%s2037_s6 + $0x100] ss:$16 sps:$4 sm:$0xff]   ;;  %v1868_v17 = vld [vmem:[%s2037_s6 + $0x48] ss:$16 sps:$4 sm:$0xff]  }
  0x29   : > { %v1806_v34 = vld [vmem:[%s2037_s6 + $0x304] ss:$16 sps:$4 sm:$0xff]   ;;  %v1809_v36 = vld [vmem:[%s2037_s6 + $0x300] ss:$16 sps:$4 sm:$0xff]   ;;  %v1871_v18 = vld [vmem:[%s2037_s6 + $0x248] ss:$16 sps:$4 sm:$0xff]  }
  0x2a   : > { %1191 = vmatpush1.bf16.msra.mxu0 %v1784_v19  ;;  %v1810_v37 = vld [vmem:[%s2037_s6 + $0x124] ss:$16 sps:$4 sm:$0xff]   ;;  %v1814_v39 = vld [vmem:[%s2037_s6 + $0x120] ss:$16 sps:$4 sm:$0xff]   ;;  %v1876_v19 = vld [vmem:[%s2037_s6 + $0x6c] ss:$16 sps:$4 sm:$0xff]  }
  0x2b   : > { %1232 = vmatpush1.bf16.msra.mxu1 %v1785_v20  ;;  %1192 = vmatprep.subr.bf16.mxu0 %v1786_v21  ;;  %v1812_v38 = vld [vmem:[%s2037_s6 + $0x324] ss:$16 sps:$4 sm:$0xff]   ;;  %v1815_v40 = vld [vmem:[%s2037_s6 + $0x320] ss:$16 sps:$4 sm:$0xff]   ;;  %v1879_v20 = vld [vmem:[%s2037_s6 + $0x26c] ss:$16 sps:$4 sm:$0xff]  }
  0x2c   : > { %1233 = vmatprep.subr.bf16.mxu1 %v1788_v22  ;;  %v1816_v41 = vld [vmem:[%s2037_s6 + $0x144] ss:$16 sps:$4 sm:$0xff]   ;;  %v1820_v43 = vld [vmem:[%s2037_s6 + $0x140] ss:$16 sps:$4 sm:$0xff]   ;;  %v1874_v21 = vld [vmem:[%s2037_s6 + $0x68] ss:$16 sps:$4 sm:$0xff]  }
  0x2d   : > { %v1818_v42 = vld [vmem:[%s2037_s6 + $0x344] ss:$16 sps:$4 sm:$0xff]   ;;  %v1821_v44 = vld [vmem:[%s2037_s6 + $0x340] ss:$16 sps:$4 sm:$0xff]   ;;  %v1877_v22 = vld [vmem:[%s2037_s6 + $0x268] ss:$16 sps:$4 sm:$0xff]  }
  0x2e   : > { %1193 = vmatpush1.bf16.msra.mxu0 %v1790_v23  ;;  %v1822_v45 = vld [vmem:[%s2037_s6 + $0x164] ss:$16 sps:$4 sm:$0xff]   ;;  %v1826_v50 = vld [vmem:[%s2037_s6 + $0x160] ss:$16 sps:$4 sm:$0xff]   ;;  %v1882_v23 = vld [vmem:[%s2037_s6 + $0x8c] ss:$16 sps:$4 sm:$0xff]  }
  0x2f   : > { %1234 = vmatpush1.bf16.msra.mxu1 %v1791_v24  ;;  %1194 = vmatprep.subr.bf16.mxu0 %v1792_v25  ;;  %v1824_v46 = vld [vmem:[%s2037_s6 + $0x364] ss:$16 sps:$4 sm:$0xff]   ;;  %v1827_v51 = vld [vmem:[%s2037_s6 + $0x360] ss:$16 sps:$4 sm:$0xff]   ;;  %v1885_v24 = vld [vmem:[%s2037_s6 + $0x28c] ss:$16 sps:$4 sm:$0xff]  }
  0x30   : > { %1235 = vmatprep.subr.bf16.mxu1 %v1794_v26  ;;  %v398_v47 = vld [vmem:[%s2032_s27] sm:$0xff]  ;;  %v1880_v25 = vld [vmem:[%s2037_s6 + $0x88] ss:$16 sps:$4 sm:$0xff]  }
  0x31   : > { %v2099_v48 = vcombine.high %v398_v47, %v398_v47  ;;  %v1828_v53 = vld [vmem:[%s2037_s6 + $0x184] ss:$16 sps:$4 sm:$0xff]   ;;  %v1832_v55 = vld [vmem:[%s2037_s6 + $0x180] ss:$16 sps:$4 sm:$0xff]   ;;  %v2123_v7 = vcombine.low %v398_v47, %v398_v47  ;;  %v1883_v26 = vld [vmem:[%s2037_s6 + $0x288] ss:$16 sps:$4 sm:$0xff]  }
  0x32   : > { %1195 = vmatpush1.bf16.msra.mxu0 %v1796_v27  ;;  %v1830_v54 = vld [vmem:[%s2037_s6 + $0x384] ss:$16 sps:$4 sm:$0xff]   ;;  %v1833_v56 = vld [vmem:[%s2037_s6 + $0x380] ss:$16 sps:$4 sm:$0xff]   ;;  %v1888_v27 = vld [vmem:[%s2037_s6 + $0xac] ss:$16 sps:$4 sm:$0xff]  }
  0x33   : > { %1236 = vmatpush1.bf16.msra.mxu1 %v1797_v28  ;;  %1196 = vmatprep.subr.bf16.mxu0 %v1798_v29  ;;  %v1834_v57 = vld [vmem:[%s2037_s6 + $0x1a4] ss:$16 sps:$4 sm:$0xff]   ;;  %v1838_v59 = vld [vmem:[%s2037_s6 + $0x1a0] ss:$16 sps:$4 sm:$0xff]   ;;  %v1891_v28 = vld [vmem:[%s2037_s6 + $0x2ac] ss:$16 sps:$4 sm:$0xff]  }
  0x34   : > { %1237 = vmatprep.subr.bf16.mxu1 %v1800_v30  ;;  %1214 = vmatprep.mubr.bf16.mxu0 %v2099_v48  ;;  %v1836_v58 = vld [vmem:[%s2037_s6 + $0x3a4] ss:$16 sps:$4 sm:$0xff]   ;;  %v1839_v60 = vld [vmem:[%s2037_s6 + $0x3a0] ss:$16 sps:$4 sm:$0xff]   ;;  %v1886_v29 = vld [vmem:[%s2037_s6 + $0xa8] ss:$16 sps:$4 sm:$0xff]  }
  0x35   : > { %v1840_v61 = vld [vmem:[%s2037_s6 + $0x1c4] ss:$16 sps:$4 sm:$0xff]   ;;  %v1844_v63 = vld [vmem:[%s2037_s6 + $0x1c0] ss:$16 sps:$4 sm:$0xff]   ;;  %v1889_v30 = vld [vmem:[%s2037_s6 + $0x2a8] ss:$16 sps:$4 sm:$0xff]  }
  0x36   : > { %1197 = vmatpush1.bf16.msra.mxu0 %v1802_v31  ;;  %v1842_v62 = vld [vmem:[%s2037_s6 + $0x3c4] ss:$16 sps:$4 sm:$0xff]   ;;  %v1845_v0 = vld [vmem:[%s2037_s6 + $0x3c0] ss:$16 sps:$4 sm:$0xff]   ;;  %v1894_v31 = vld [vmem:[%s2037_s6 + $0xcc] ss:$16 sps:$4 sm:$0xff]  }
  0x37   : > { %1238 = vmatpush1.bf16.msra.mxu1 %v1803_v32  ;;  %1198 = vmatprep.subr.bf16.mxu0 %v1804_v33  ;;  %v1846_v1 = vld [vmem:[%s2037_s6 + $0x1e4] ss:$16 sps:$4 sm:$0xff]   ;;  %v1850_v3 = vld [vmem:[%s2037_s6 + $0x1e0] ss:$16 sps:$4 sm:$0xff]   ;;  %v1897_v32 = vld [vmem:[%s2037_s6 + $0x2cc] ss:$16 sps:$4 sm:$0xff]  }
  0x38   : > { %1239 = vmatprep.subr.bf16.mxu1 %v1806_v34  ;;  %v1848_v2 = vld [vmem:[%s2037_s6 + $0x3e4] ss:$16 sps:$4 sm:$0xff]   ;;  %v1851_v4 = vld [vmem:[%s2037_s6 + $0x3e0] ss:$16 sps:$4 sm:$0xff]   ;;  %v1892_v33 = vld [vmem:[%s2037_s6 + $0xc8] ss:$16 sps:$4 sm:$0xff]  }
  0x39   : > { %v1895_v34 = vld [vmem:[%s2037_s6 + $0x2c8] ss:$16 sps:$4 sm:$0xff]   ;;  %v1918_v47 = vld [vmem:[%s2037_s6 + $0x14c] ss:$16 sps:$4 sm:$0xff]  }
  0x3a   : > { %1199 = vmatpush1.bf16.msra.mxu0 %v1808_v35  ;;  %v1900_v35 = vld [vmem:[%s2037_s6 + $0xec] ss:$16 sps:$4 sm:$0xff]  }
  0x3b   : > { %1240 = vmatpush1.bf16.msra.mxu1 %v1809_v36  ;;  %1200 = vmatprep.subr.bf16.mxu0 %v1810_v37  ;;  %v1903_v36 = vld [vmem:[%s2037_s6 + $0x2ec] ss:$16 sps:$4 sm:$0xff]   ;;  %v1898_v37 = vld [vmem:[%s2037_s6 + $0xe8] ss:$16 sps:$4 sm:$0xff]  }
  0x3c   : > { %1241 = vmatprep.subr.bf16.mxu1 %v1812_v38  ;;  %v1901_v38 = vld [vmem:[%s2037_s6 + $0x2e8] ss:$16 sps:$4 sm:$0xff]  }
  0x3e   : > { %1201 = vmatpush1.bf16.msra.mxu0 %v1814_v39  ;;  %v1906_v39 = vld [vmem:[%s2037_s6 + $0x10c] ss:$16 sps:$4 sm:$0xff]  }
  0x3f   : > { %1242 = vmatpush1.bf16.msra.mxu1 %v1815_v40  ;;  %1202 = vmatprep.subr.bf16.mxu0 %v1816_v41  ;;  %v1909_v40 = vld [vmem:[%s2037_s6 + $0x30c] ss:$16 sps:$4 sm:$0xff]   ;;  %v1904_v41 = vld [vmem:[%s2037_s6 + $0x108] ss:$16 sps:$4 sm:$0xff]  }
  0x40   : > { %1243 = vmatprep.subr.bf16.mxu1 %v1818_v42  ;;  %v1907_v42 = vld [vmem:[%s2037_s6 + $0x308] ss:$16 sps:$4 sm:$0xff]  }
  0x42   : > { %1203 = vmatpush1.bf16.msra.mxu0 %v1820_v43  ;;  %v1912_v43 = vld [vmem:[%s2037_s6 + $0x12c] ss:$16 sps:$4 sm:$0xff]  }
  0x43   : > { %1244 = vmatpush1.bf16.msra.mxu1 %v1821_v44  ;;  %1204 = vmatprep.subr.bf16.mxu0 %v1822_v45  ;;  %v1915_v44 = vld [vmem:[%s2037_s6 + $0x32c] ss:$16 sps:$4 sm:$0xff]   ;;  %v1910_v45 = vld [vmem:[%s2037_s6 + $0x128] ss:$16 sps:$4 sm:$0xff]  }
  0x44   : > { %1245 = vmatprep.subr.bf16.mxu1 %v1824_v46  ;;  %v1913_v46 = vld [vmem:[%s2037_s6 + $0x328] ss:$16 sps:$4 sm:$0xff]  }
  0x46   : > { %1205 = vmatpush1.bf16.msra.mxu0 %v1826_v50  ;;  %v1919_v50 = vld [vmem:[%s2037_s6 + $0x348] ss:$16 sps:$4 sm:$0xff]  }
  0x47   : > { %1246 = vmatpush1.bf16.msra.mxu1 %v1827_v51  ;;  %1206 = vmatprep.subr.bf16.mxu0 %v1828_v53  ;;  %v1924_v51 = vld [vmem:[%s2037_s6 + $0x16c] ss:$16 sps:$4 sm:$0xff]   ;;  %v1922_v53 = vld [vmem:[%s2037_s6 + $0x168] ss:$16 sps:$4 sm:$0xff]  }
  0x48   : > { %1247 = vmatprep.subr.bf16.mxu1 %v1830_v54  ;;  %v1925_v54 = vld [vmem:[%s2037_s6 + $0x368] ss:$16 sps:$4 sm:$0xff]  }
  0x4a   : > { %1207 = vmatpush1.bf16.msra.mxu0 %v1832_v55  ;;  %v1930_v55 = vld [vmem:[%s2037_s6 + $0x18c] ss:$16 sps:$4 sm:$0xff]  }
  0x4b   : > { %1248 = vmatpush1.bf16.msra.mxu1 %v1833_v56  ;;  %1208 = vmatprep.subr.bf16.mxu0 %v1834_v57  ;;  %v1933_v56 = vld [vmem:[%s2037_s6 + $0x38c] ss:$16 sps:$4 sm:$0xff]   ;;  %v1928_v57 = vld [vmem:[%s2037_s6 + $0x188] ss:$16 sps:$4 sm:$0xff]  }
  0x4c   : > { %1249 = vmatprep.subr.bf16.mxu1 %v1836_v58  ;;  %v1931_v58 = vld [vmem:[%s2037_s6 + $0x388] ss:$16 sps:$4 sm:$0xff]  }
  0x4e   : > { %1209 = vmatpush1.bf16.msra.mxu0 %v1838_v59  ;;  %v1936_v59 = vld [vmem:[%s2037_s6 + $0x1ac] ss:$16 sps:$4 sm:$0xff]  }
  0x4f   : > { %1250 = vmatpush1.bf16.msra.mxu1 %v1839_v60  ;;  %1210 = vmatprep.subr.bf16.mxu0 %v1840_v61  ;;  %v1939_v60 = vld [vmem:[%s2037_s6 + $0x3ac] ss:$16 sps:$4 sm:$0xff]   ;;  %v1934_v61 = vld [vmem:[%s2037_s6 + $0x1a8] ss:$16 sps:$4 sm:$0xff]  }
  0x50   : > { %1251 = vmatprep.subr.bf16.mxu1 %v1842_v62  ;;  %v1937_v62 = vld [vmem:[%s2037_s6 + $0x3a8] ss:$16 sps:$4 sm:$0xff]  }
  0x52   : > { %1211 = vmatpush1.bf16.msra.mxu0 %v1844_v63  ;;  %v1942_v63 = vld [vmem:[%s2037_s6 + $0x1cc] ss:$16 sps:$4 sm:$0xff]  }
  0x53   : > { %1252 = vmatpush1.bf16.msra.mxu1 %v1845_v0  ;;  %1212 = vmatprep.subr.bf16.mxu0 %v1846_v1  ;;  %v1945_v0 = vld [vmem:[%s2037_s6 + $0x3cc] ss:$16 sps:$4 sm:$0xff]   ;;  %v1940_v1 = vld [vmem:[%s2037_s6 + $0x1c8] ss:$16 sps:$4 sm:$0xff]  }
  0x54   : > { %1253 = vmatprep.subr.bf16.mxu1 %v1848_v2  ;;  %v1943_v2 = vld [vmem:[%s2037_s6 + $0x3c8] ss:$16 sps:$4 sm:$0xff]  }
  0x56   : > { %1213 = vmatpush1.bf16.msra.mxu0 %v1850_v3  ;;  %v1948_v3 = vld [vmem:[%s2037_s6 + $0x1ec] ss:$16 sps:$4 sm:$0xff]  }
  0x57   : > { %1254 = vmatpush1.bf16.msra.mxu1 %v1851_v4  ;;  %1264 = vmatprep.subr.bf16.mxu0 %v1858_v5  ;;  %v1951_v4 = vld [vmem:[%s2037_s6 + $0x3ec] ss:$16 sps:$4 sm:$0xff]   ;;  %v1946_v5 = vld [vmem:[%s2037_s6 + $0x1e8] ss:$16 sps:$4 sm:$0xff]  }
  0x58   : > { %1305 = vmatprep.subr.bf16.mxu1 %v1861_v6  ;;  %v1949_v6 = vld [vmem:[%s2037_s6 + $0x3e8] ss:$16 sps:$4 sm:$0xff]  }
  0x59   : > { %1215 = vmatmul.mubr.bf16.vlgmr.msra.gmra.mrb[0].mxu0 %v2123_v7 }
  0x5a   : > { %1256 = vmatmul.mubr.bf16.vlgmr.msra.gmra.mrb[0].mxu1 %v2125_v8  ;;  %1265 = vmatpush1.bf16.msra.mxu0 %v1856_v9 }
  0x5b   : > { %1306 = vmatpush1.bf16.msra.mxu1 %v1859_v10  ;;  %1266 = vmatprep.subr.bf16.mxu0 %v1864_v11  ;;  %v394_v10 = vld [vmem:[%s2275_s5] sm:$0xff] }
  0x5c   : > { %1307 = vmatprep.subr.bf16.mxu1 %v1867_v12  ;;  %1296 = vmatprep.mubr.bf16.mxu0 %v2099_v48  ;;  %v1921_v48 = vld [vmem:[%s2037_s6 + $0x34c] ss:$16 sps:$4 sm:$0xff]  }
  0x5d   : > { %1337 = vmatprep.mubr.bf16.mxu1 %v1596_v52  ;;  %v1927_v52 = vld [vmem:[%s2037_s6 + $0x36c] ss:$16 sps:$4 sm:$0xff]  }
  0x5e   : > { %1267 = vmatpush1.bf16.msra.mxu0 %v1862_v13 }
  0x5f   : > { %1308 = vmatpush1.bf16.msra.mxu1 %v1865_v14  ;;  %1268 = vmatprep.subr.bf16.mxu0 %v1870_v15  ;;  %v395_v14 = vld [vmem:[%s2275_s5 + $0x8] sm:$0xff] }
  0x60   : > { %1309 = vmatprep.subr.bf16.mxu1 %v1873_v16 }
  0x62   : > { %1269 = vmatpush1.bf16.msra.mxu0 %v1868_v17 }
  0x63   : > { %1310 = vmatpush1.bf16.msra.mxu1 %v1871_v18  ;;  %1270 = vmatprep.subr.bf16.mxu0 %v1876_v19 }
  0x64   : > { %1311 = vmatprep.subr.bf16.mxu1 %v1879_v20 }
  0x66   : > { %1271 = vmatpush1.bf16.msra.mxu0 %v1874_v21 }
  0x67   : > { %1312 = vmatpush1.bf16.msra.mxu1 %v1877_v22  ;;  %1272 = vmatprep.subr.bf16.mxu0 %v1882_v23  ;;  %v396_v22 = vld [vmem:[%s2275_s5 + $0x10] sm:$0xff] }
  0x68   : > { %1313 = vmatprep.subr.bf16.mxu1 %v1885_v24 }
  0x6a   : > { %1273 = vmatpush1.bf16.msra.mxu0 %v1880_v25 }
  0x6b   : > { %1314 = vmatpush1.bf16.msra.mxu1 %v1883_v26  ;;  %1274 = vmatprep.subr.bf16.mxu0 %v1888_v27  ;;  %v397_v26 = vld [vmem:[%s2275_s5 + $0x18] sm:$0xff] }
  0x6c   : > { %1315 = vmatprep.subr.bf16.mxu1 %v1891_v28 }
  0x6e   : > { %1275 = vmatpush1.bf16.msra.mxu0 %v1886_v29 }
  0x6f   : > { %1316 = vmatpush1.bf16.msra.mxu1 %v1889_v30  ;;  %1276 = vmatprep.subr.bf16.mxu0 %v1894_v31 }
  0x70   : > { %1317 = vmatprep.subr.bf16.mxu1 %v1897_v32 }
  0x72   : > { %1277 = vmatpush1.bf16.msra.mxu0 %v1892_v33 }
  0x73   : > { %1318 = vmatpush1.bf16.msra.mxu1 %v1895_v34  ;;  %1278 = vmatprep.subr.bf16.mxu0 %v1900_v35  ;;  %v1364_v35 = vlaneseq (!%p1725_p7) }
  0x74   : > { %1319 = vmatprep.subr.bf16.mxu1 %v1903_v36 }
  0x75   : > { %v1365_v36 = vshrl.u32 (!%p1725_p7), %v1364_v35, 7 }
  0x76   : > { %1279 = vmatpush1.bf16.msra.mxu0 %v1898_v37  ;;  %v1362_v37 = vld [vmem:[%s2272_s2] sm:$0xf] (!%p1725_p7) }
  0x77   : > { %1320 = vmatpush1.bf16.msra.mxu1 %v1901_v38  ;;  %1280 = vmatprep.subr.bf16.mxu0 %v1906_v39  ;;  %v1388_v38 = vld [vmem:[%s2273_s3] sm:$0xf] (!%p1725_p7)  ;;  %v1366_v39 = vsub.s32 (!%p1725_p7), 0, %v1365_v36 }
  0x78   : > { %1321 = vmatprep.subr.bf16.mxu1 %v1909_v40  ;;  %v1370_v40 = vsub.s32 (!%p1725_p7), 1, %v1365_v36 }
  0x7a   : > { %1281 = vmatpush1.bf16.msra.mxu0 %v1904_v41  ;;  %v1374_v41 = vsub.s32 (!%p1725_p7), 2, %v1365_v36 }
  0x7b   : > { %1322 = vmatpush1.bf16.msra.mxu1 %v1907_v42  ;;  %1282 = vmatprep.subr.bf16.mxu0 %v1912_v43  ;;  %v1378_v42 = vsub.s32 (!%p1725_p7), 3, %v1365_v36 }
  0x7c   : > { %1323 = vmatprep.subr.bf16.mxu1 %v1915_v44 }
  0x7e   : > { %1283 = vmatpush1.bf16.msra.mxu0 %v1910_v45  ;;  %v1367_v45 = vrot.slane (!%p1725_p7), %v1362_v37, %v1366_v39 }
  0x7f   : > { %1324 = vmatpush1.bf16.msra.mxu1 %v1913_v46  ;;  %1284 = vmatprep.subr.bf16.mxu0 %v1918_v47  ;;  %v1393_v46 = vrot.slane (!%p1725_p7), %v1388_v38, %v1366_v39  ;;  %v1371_v47 = vrot.slane (!%p1725_p7), %v1362_v37, %v1370_v40 }
  0x80   : > { %1325 = vmatprep.subr.bf16.mxu1 %v1921_v48  ;;  %v1397_v48 = vrot.slane (!%p1725_p7), %v1388_v38, %v1370_v40 }
  0x82   : > { %1285 = vmatpush1.bf16.msra.mxu0 %v1916_v49 }
  0x83   : > { %1326 = vmatpush1.bf16.msra.mxu1 %v1919_v50  ;;  %1286 = vmatprep.subr.bf16.mxu0 %v1924_v51  ;;  %v1375_v51 = vrot.slane (!%p1725_p7), %v1362_v37, %v1374_v41 }
  0x84   : > { %1327 = vmatprep.subr.bf16.mxu1 %v1927_v52  ;;  %v1401_v52 = vrot.slane (!%p1725_p7), %v1388_v38, %v1374_v41 }
  0x86   : > { %1287 = vmatpush1.bf16.msra.mxu0 %v1922_v53  ;;  %v1379_v53 = vrot.slane (!%p1725_p7), %v1362_v37, %v1378_v42 }
  0x87   : > { %1328 = vmatpush1.bf16.msra.mxu1 %v1925_v54  ;;  %1288 = vmatprep.subr.bf16.mxu0 %v1930_v55  ;;  %v1405_v54 = vrot.slane (!%p1725_p7), %v1388_v38, %v1378_v42 }
  0x88   : > { %1329 = vmatprep.subr.bf16.mxu1 %v1933_v56 }
  0x8a   : > { %1289 = vmatpush1.bf16.msra.mxu0 %v1928_v57  ;;  %v1414_v57 = vld [vmem:[%s2274_s4] sm:$0xff] (!%p1725_p7) }
  0x8b   : > { %1330 = vmatpush1.bf16.msra.mxu1 %v1931_v58  ;;  %1290 = vmatprep.subr.bf16.mxu0 %v1936_v59  ;;  %v1415_v58 = vld [vmem:[%s2274_s4 + $0x8] sm:$0xff] (!%p1725_p7) }
  0x8c   : > { %1331 = vmatprep.subr.bf16.mxu1 %v1939_v60 }
  0x8e   : > { %1291 = vmatpush1.bf16.msra.mxu0 %v1934_v61 }
  0x8f   : > { %1332 = vmatpush1.bf16.msra.mxu1 %v1937_v62  ;;  %1292 = vmatprep.subr.bf16.mxu0 %v1942_v63  ;;  %v1416_v63 = vld [vmem:[%s2274_s4 + $0x10] sm:$0xff] (!%p1725_p7) }
  0x90   : > { %1333 = vmatprep.subr.bf16.mxu1 %v1945_v0  ;;  %v1417_v0 = vld [vmem:[%s2274_s4 + $0x18] sm:$0xff] (!%p1725_p7) }
  0x92   : > { %1293 = vmatpush1.bf16.msra.mxu0 %v1940_v1 }
  0x93   : > { %1334 = vmatpush1.bf16.msra.mxu1 %v1943_v2  ;;  %1294 = vmatprep.subr.bf16.mxu0 %v1948_v3 }
  0x94   : > { %1335 = vmatprep.subr.bf16.mxu1 %v1951_v4 }
  0x96   : > { %1295 = vmatpush1.bf16.msra.mxu0 %v1946_v5 }
  0x97   : > { %1336 = vmatpush1.bf16.msra.mxu1 %v1949_v6 }
  0x99   : > { %1297 = vmatmul.mubr.bf16.vlgmr.msra.gmra.mrb[4].mxu0 %v2123_v7 }
  0x9a   : > { %1338 = vmatmul.mubr.bf16.vlgmr.msra.gmra.mrb[4].mxu1 %v2125_v8 }
 0x12c   : > { %v1216_v9 = vpop.f32.mrb[0].mxu0 }
 0x12d   : > { %v1257_v11 = vpop.f32.mrb[0].mxu1  ;;  %v1218_v13 = vpop.f32.mrb[1].mxu0 }
 0x12e   : > { %v1258_v12 = vadd.f32 %v1257_v11, %v1216_v9  ;;  %v1259_v15 = vpop.f32.mrb[1].mxu1  ;;  %v1220_v17 = vpop.f32.mrb[2].mxu0 }
 0x12f   : > { %v1260_v16 = vadd.f32 %v1259_v15, %v1218_v13  ;;  %v1261_v18 = vpop.f32.mrb[2].mxu1  ;;  %v1221_v7 = vpop.f32.mrb[3].mxu0 }
 0x130   : > { %v1346_v19 = vadd.f32 %v1258_v12, %v394_v10  ;;  %v1262_v20 = vpop.f32.mrb[3].mxu1 }
 0x131   : > { %v1347_v8 = vadd.f32 %v1260_v16, %v395_v14 }
 0x132   : > { %1350 = vst [vmem:[%s2275_s5] sm:$0xff] %v1346_v19 }
 0x133   : > { %1351 = vst [vmem:[%s2275_s5 + $0x8] sm:$0xff] %v1347_v8 }
 0x139   : > { %v1358_v43 = vld [vmem:[%s2275_s5] sm:$0xff] (!%p1725_p7) }
 0x13a   : > { %v1359_v44 = vld [vmem:[%s2275_s5 + $0x8] sm:$0xff] (!%p1725_p7)  ;;  %v1384_v55 = vmul.f32 (!%p1725_p7), %v1367_v45, %v1358_v43 }
 0x13b   : > { %v1385_v56 = vmul.f32 (!%p1725_p7), %v1371_v47, %v1359_v44 }
 0x13c   : > { %v1410_v61 = vadd.f32 (!%p1725_p7), %v1393_v46, %v1384_v55 }
 0x13d   : > { %v1411_v62 = vadd.f32 (!%p1725_p7), %v1397_v48, %v1385_v56 }
 0x13e   : > { %v1418_v3 = vadd.f32 (!%p1725_p7), %v1414_v57, %v1410_v61 }
 0x13f   : > { %v1419_v4 = vadd.f32 (!%p1725_p7), %v1415_v58, %v1411_v62 }
 0x140   : > { %v1422_v9 = vmax.f32 (!%p1725_p7), %v1418_v3, 0.0 }
 0x141   : > { %v1423_v10 = vmax.f32 (!%p1725_p7), %v1419_v4, 0.0 }
 0x142   : > { %1426 = vst [vmem:[%s2275_s5] sm:$0xff] (!%p1725_p7), %v1422_v9 }
 0x143   : > { %1427 = vst [vmem:[%s2275_s5 + $0x8] sm:$0xff] (!%p1725_p7), %v1423_v10 }
 0x16c   : > { %v1298_v21 = vpop.f32.mrb[4].mxu0 }
 0x16d   : > { %v1339_v23 = vpop.f32.mrb[4].mxu1  ;;  %v1300_v25 = vpop.f32.mrb[5].mxu0  ;;  %1357 = sbr.rel (%p1725_p7) target bundleno = 388 (0x184), region = 48 }
 0x16e   : > { %v1340_v24 = vadd.f32 %v1339_v23, %v1298_v21  ;;  %v1341_v27 = vpop.f32.mrb[5].mxu1  ;;  %v1302_v29 = vpop.f32.mrb[6].mxu0 }
 0x16f   : > { %v1342_v28 = vadd.f32 %v1341_v27, %v1300_v25  ;;  %v1343_v30 = vpop.f32.mrb[6].mxu1  ;;  %v1303_v32 = vpop.f32.mrb[7].mxu0 }
 0x170   : > { %v1348_v31 = vadd.f32 %v1340_v24, %v396_v22  ;;  %v1344_v33 = vpop.f32.mrb[7].mxu1 }
 0x171   : > { %v1349_v34 = vadd.f32 %v1342_v28, %v397_v26 }
 0x172   : > { %1352 = vst [vmem:[%s2275_s5 + $0x10] sm:$0xff] %v1348_v31 }
 0x173   : > { %1353 = vst [vmem:[%s2275_s5 + $0x18] sm:$0xff] %v1349_v34 }
 0x179   : > { %v1360_v49 = vld [vmem:[%s2275_s5 + $0x10] sm:$0xff] }
 0x17a   : > { %v1361_v50 = vld [vmem:[%s2275_s5 + $0x18] sm:$0xff]  ;;  %v1386_v59 = vmul.f32 %v1375_v51, %v1360_v49 }
 0x17b   : > { %v1387_v60 = vmul.f32 %v1379_v53, %v1361_v50 }
 0x17c   : > { %v1412_v1 = vadd.f32 %v1401_v52, %v1386_v59 }
 0x17d   : > { %v1413_v2 = vadd.f32 %v1405_v54, %v1387_v60 }
 0x17e   : > { %v1420_v5 = vadd.f32 %v1416_v63, %v1412_v1 }
 0x17f   : > { %v1421_v6 = vadd.f32 %v1417_v0, %v1413_v2 }
 0x180   : > { %v1424_v11 = vmax.f32 %v1420_v5, 0.0 }
 0x181   : > { %v1425_v12 = vmax.f32 %v1421_v6, 0.0 }
 0x182   : > { %1428 = vst [vmem:[%s2275_s5 + $0x10] sm:$0xff] %v1424_v11 }
 0x183   : > { %1429 = vst [vmem:[%s2275_s5 + $0x18] sm:$0xff] %v1425_v12 }
 0x184 PF: > { %s15_s20 = sadd.s32 1, %s1974_s20   ;;  %s2276_s18 = smov %s1970_s19 }
 0x185   : > { %p12_p8 = scmp.ge.s32.totalorder %s15_s20, 11   ;;  %s2277_s19 = smov %s2279_s21 }
 0x187   :  { %14 = sbr.rel (!%p12_p8) target bundleno = 2 (0x2), region = 90 }

// kernel: tomato_leaf_net.42
= control target key start
LH: loop header
LB: loop body
LE: loop exit
PB: predicated region body
PF: predicated region fallthrough
CT: control target
= control target key end

     0   :  { %s1909_s15 = smov 0   ;;  %s1911_s16 = smov 0   ;;  %s2160_s0 = inlined_call_operand.vmem [shape: bf16[8,4608], index: 0, kind: input, shape index: {}]   ;;  %s2161_s1 = inlined_call_operand.vmem [shape: bf16[4608,512], index: 1, kind: input, shape index: {}]   ;;  %s2162_s2 = inlined_call_operand.vmem [shape: f32[1,512], index: 2, kind: input, shape index: {}]   ;;  %s2163_s3 = inlined_call_operand.vmem [shape: f32[1,512], index: 3, kind: input, shape index: {}]   ;;  %s2164_s4 = inlined_call_operand.vmem [shape: f32[8,512], index: 4, kind: output, shape index: {}]  }
   0x1   :  { %s1913_s17 = smov 0  }
   0x2 LB: > { %s26_s18 = sadd.s32 1, %s1877_s16  ;;  %p1493_p0 = scmp.ge.s32.totalorder %s1881_s17, 1  ;;  %s1881_s17 = sphi %s1913_s17, %s14_s17   ;;  %s1877_s16 = sphi %s1911_s16, %s2166_s16   ;;  %s1873_s15 = sphi %s1909_s15, %s2165_s15  }
   0x3   : > { %p27_p1 = scmp.ge.s32.totalorder %s26_s18, 9  ;;  %p229_p2 = scmp.lt.s32.totalorder %s1881_s17, 10 }
   0x5   : > { %s2168_s18 = smov (%p27_p1, %s26_s18), 0  ;;  %p230_p3 = pnand %p1493_p0, %p229_p2 }
   0x6   : > { %s1494_s19 = sshll.u32 (!%p230_p3), %s1873_s15, 2  ;;  %s1496_s20 = sshll.u32 (!%p230_p3), %s1873_s15, 6 }
   0x7   : > { %233 = sbr.rel (%p230_p3) target bundleno = 386 (0x182), region = 36  ;;  %p284_p4 = scmp.lt.s32.totalorder (!%p230_p3), %s1494_s19, 35 }
   0x8   : > { %p293_p5 = scmp.lt.s32.totalorder (!%p230_p3), %s1496_s20, 575  ;;  %p1499_p6 = scmp.ne.s32.totalorder (!%p230_p3), %s1873_s15, 0 }
   0xe   : > { %s2170_s19 = smov (!%p284_p4, %s1494_s19), 35  ;;  %s2172_s20 = smov (!%p293_p5, %s1496_s20), 575 }
   0xf   : > { %s1495_s21 = sshll.u32 %s2170_s19, 2  ;;  %s1637_s25 = sshll.u32 %s2172_s20, 4  ;;  %v1883_v0 = vmov (!%p1499_p6), 0.0  }
  0x10   : > { %s1934_s24 = scalar_lea.vmem %s2160_s0, %s1495_s21  ;;  %s1939_s28 = scalar_lea.vmem %s2161_s1, %s1637_s25  ;;  %327 = vst [vmem:[%s2164_s4] sm:$0xff] (!%p1499_p6), %v1883_v0  ;;  %328 = vst [vmem:[%s2164_s4 + $0x8] sm:$0xff] (!%p1499_p6), %v1883_v0 }
  0x11   : > { %326 = sbr.rel (%p1499_p6) target bundleno = 24 (0x18), region = 40  ;;  %329 = vst [vmem:[%s2164_s4 + $0x10] sm:$0xff] (!%p1499_p6), %v1883_v0  ;;  %330 = vst [vmem:[%s2164_s4 + $0x18] sm:$0xff] (!%p1499_p6), %v1883_v0 }
  0x18 PF: > { %v1663_v1 = vld [vmem:[%s1939_s28 + $0x4] ss:$16 sps:$4 sm:$0xff]   ;;  %v1667_v3 = vld [vmem:[%s1939_s28] ss:$16 sps:$4 sm:$0xff]   ;;  %v336_v49 = vld [vmem:[%s1934_s24 + $0x8] sm:$0xff]  ;;  %p1632_p7 = scmp.ne.s32.totalorder %s1873_s15, 8 }
  0x19   : > { %v1665_v2 = vld [vmem:[%s1939_s28 + $0x204] ss:$16 sps:$4 sm:$0xff]   ;;  %1119 = vmatprep.subr.bf16.mxu0 %v1663_v1  ;;  %v1668_v4 = vld [vmem:[%s1939_s28 + $0x200] ss:$16 sps:$4 sm:$0xff]   ;;  %v1503_v52 = vcombine.high %v336_v49, %v336_v49 }
  0x1a   : > { %1160 = vmatprep.subr.bf16.mxu1 %v1665_v2  ;;  %v1669_v5 = vld [vmem:[%s1939_s28 + $0x24] ss:$16 sps:$4 sm:$0xff]   ;;  %1120 = vmatpush1.bf16.msra.mxu0 %v1667_v3  ;;  %v1673_v7 = vld [vmem:[%s1939_s28 + $0x20] ss:$16 sps:$4 sm:$0xff]  }
  0x1b   : > { %1161 = vmatpush1.bf16.msra.mxu1 %v1668_v4  ;;  %v1671_v6 = vld [vmem:[%s1939_s28 + $0x224] ss:$16 sps:$4 sm:$0xff]   ;;  %1121 = vmatprep.subr.bf16.mxu0 %v1669_v5  ;;  %v1674_v8 = vld [vmem:[%s1939_s28 + $0x220] ss:$16 sps:$4 sm:$0xff]   ;;  %v1765_v5 = vld [vmem:[%s1939_s28 + $0xc] ss:$16 sps:$4 sm:$0xff]  }
  0x1c   : > { %1162 = vmatprep.subr.bf16.mxu1 %v1671_v6  ;;  %v1675_v9 = vld [vmem:[%s1939_s28 + $0x44] ss:$16 sps:$4 sm:$0xff]   ;;  %v1679_v11 = vld [vmem:[%s1939_s28 + $0x40] ss:$16 sps:$4 sm:$0xff]   ;;  %1192 = vmatprep.mubr.bf16.mxu1 %v1503_v52  ;;  %v1768_v6 = vld [vmem:[%s1939_s28 + $0x20c] ss:$16 sps:$4 sm:$0xff]  }
  0x1d   : > { %v1677_v10 = vld [vmem:[%s1939_s28 + $0x244] ss:$16 sps:$4 sm:$0xff]   ;;  %v1680_v12 = vld [vmem:[%s1939_s28 + $0x240] ss:$16 sps:$4 sm:$0xff]  }
  0x1e   : > { %1122 = vmatpush1.bf16.msra.mxu0 %v1673_v7  ;;  %v1681_v13 = vld [vmem:[%s1939_s28 + $0x64] ss:$16 sps:$4 sm:$0xff]   ;;  %v1685_v15 = vld [vmem:[%s1939_s28 + $0x60] ss:$16 sps:$4 sm:$0xff]  }
  0x1f   : > { %1163 = vmatpush1.bf16.msra.mxu1 %v1674_v8  ;;  %1123 = vmatprep.subr.bf16.mxu0 %v1675_v9  ;;  %v1683_v14 = vld [vmem:[%s1939_s28 + $0x264] ss:$16 sps:$4 sm:$0xff]   ;;  %v1686_v16 = vld [vmem:[%s1939_s28 + $0x260] ss:$16 sps:$4 sm:$0xff]   ;;  %v2027_v8 = vcombine.low %v336_v49, %v336_v49  ;;  %v1763_v9 = vld [vmem:[%s1939_s28 + $0x8] ss:$16 sps:$4 sm:$0xff]  }
  0x20   : > { %1164 = vmatprep.subr.bf16.mxu1 %v1677_v10  ;;  %v1687_v17 = vld [vmem:[%s1939_s28 + $0x84] ss:$16 sps:$4 sm:$0xff]   ;;  %v1691_v19 = vld [vmem:[%s1939_s28 + $0x80] ss:$16 sps:$4 sm:$0xff]   ;;  %v1766_v10 = vld [vmem:[%s1939_s28 + $0x208] ss:$16 sps:$4 sm:$0xff]  }
  0x21   : > { %v1689_v18 = vld [vmem:[%s1939_s28 + $0x284] ss:$16 sps:$4 sm:$0xff]   ;;  %v1692_v20 = vld [vmem:[%s1939_s28 + $0x280] ss:$16 sps:$4 sm:$0xff]   ;;  %v1823_v49 = vld [vmem:[%s1939_s28 + $0x148] ss:$16 sps:$4 sm:$0xff]  }
  0x22   : > { %1124 = vmatpush1.bf16.msra.mxu0 %v1679_v11  ;;  %v1693_v21 = vld [vmem:[%s1939_s28 + $0xa4] ss:$16 sps:$4 sm:$0xff]   ;;  %v1697_v23 = vld [vmem:[%s1939_s28 + $0xa0] ss:$16 sps:$4 sm:$0xff]   ;;  %v1771_v11 = vld [vmem:[%s1939_s28 + $0x2c] ss:$16 sps:$4 sm:$0xff]  }
  0x23   : > { %1165 = vmatpush1.bf16.msra.mxu1 %v1680_v12  ;;  %1125 = vmatprep.subr.bf16.mxu0 %v1681_v13  ;;  %v1695_v22 = vld [vmem:[%s1939_s28 + $0x2a4] ss:$16 sps:$4 sm:$0xff]   ;;  %v1698_v24 = vld [vmem:[%s1939_s28 + $0x2a0] ss:$16 sps:$4 sm:$0xff]   ;;  %v1774_v12 = vld [vmem:[%s1939_s28 + $0x22c] ss:$16 sps:$4 sm:$0xff]  }
  0x24   : > { %1166 = vmatprep.subr.bf16.mxu1 %v1683_v14  ;;  %v1699_v25 = vld [vmem:[%s1939_s28 + $0xc4] ss:$16 sps:$4 sm:$0xff]   ;;  %v1703_v27 = vld [vmem:[%s1939_s28 + $0xc0] ss:$16 sps:$4 sm:$0xff]   ;;  %v1769_v13 = vld [vmem:[%s1939_s28 + $0x28] ss:$16 sps:$4 sm:$0xff]  }
  0x25   : > { %v1701_v26 = vld [vmem:[%s1939_s28 + $0x2c4] ss:$16 sps:$4 sm:$0xff]   ;;  %v1704_v28 = vld [vmem:[%s1939_s28 + $0x2c0] ss:$16 sps:$4 sm:$0xff]   ;;  %v1772_v14 = vld [vmem:[%s1939_s28 + $0x228] ss:$16 sps:$4 sm:$0xff]  }
  0x26   : > { %1126 = vmatpush1.bf16.msra.mxu0 %v1685_v15  ;;  %v1705_v29 = vld [vmem:[%s1939_s28 + $0xe4] ss:$16 sps:$4 sm:$0xff]   ;;  %v1709_v31 = vld [vmem:[%s1939_s28 + $0xe0] ss:$16 sps:$4 sm:$0xff]   ;;  %v1777_v15 = vld [vmem:[%s1939_s28 + $0x4c] ss:$16 sps:$4 sm:$0xff]  }
  0x27   : > { %1167 = vmatpush1.bf16.msra.mxu1 %v1686_v16  ;;  %1127 = vmatprep.subr.bf16.mxu0 %v1687_v17  ;;  %v1707_v30 = vld [vmem:[%s1939_s28 + $0x2e4] ss:$16 sps:$4 sm:$0xff]   ;;  %v1710_v32 = vld [vmem:[%s1939_s28 + $0x2e0] ss:$16 sps:$4 sm:$0xff]   ;;  %v1780_v16 = vld [vmem:[%s1939_s28 + $0x24c] ss:$16 sps:$4 sm:$0xff]  }
  0x28   : > { %1168 = vmatprep.subr.bf16.mxu1 %v1689_v18  ;;  %v1711_v33 = vld [vmem:[%s1939_s28 + $0x104] ss:$16 sps:$4 sm:$0xff]   ;;  %v1715_v35 = vld [vmem:[%s1939_s28 + $0x100] ss:$16 sps:$4 sm:$0xff]   ;;  %v1775_v17 = vld [vmem:[%s1939_s28 + $0x48] ss:$16 sps:$4 sm:$0xff]  }
  0x29   : > { %v1713_v34 = vld [vmem:[%s1939_s28 + $0x304] ss:$16 sps:$4 sm:$0xff]   ;;  %v1716_v36 = vld [vmem:[%s1939_s28 + $0x300] ss:$16 sps:$4 sm:$0xff]   ;;  %v1778_v18 = vld [vmem:[%s1939_s28 + $0x248] ss:$16 sps:$4 sm:$0xff]  }
  0x2a   : > { %1128 = vmatpush1.bf16.msra.mxu0 %v1691_v19  ;;  %v1717_v37 = vld [vmem:[%s1939_s28 + $0x124] ss:$16 sps:$4 sm:$0xff]   ;;  %v1721_v39 = vld [vmem:[%s1939_s28 + $0x120] ss:$16 sps:$4 sm:$0xff]   ;;  %v1783_v19 = vld [vmem:[%s1939_s28 + $0x6c] ss:$16 sps:$4 sm:$0xff]  }
  0x2b   : > { %1169 = vmatpush1.bf16.msra.mxu1 %v1692_v20  ;;  %1129 = vmatprep.subr.bf16.mxu0 %v1693_v21  ;;  %v1719_v38 = vld [vmem:[%s1939_s28 + $0x324] ss:$16 sps:$4 sm:$0xff]   ;;  %v1722_v40 = vld [vmem:[%s1939_s28 + $0x320] ss:$16 sps:$4 sm:$0xff]   ;;  %v1786_v20 = vld [vmem:[%s1939_s28 + $0x26c] ss:$16 sps:$4 sm:$0xff]  }
  0x2c   : > { %1170 = vmatprep.subr.bf16.mxu1 %v1695_v22  ;;  %v1723_v41 = vld [vmem:[%s1939_s28 + $0x144] ss:$16 sps:$4 sm:$0xff]   ;;  %v1727_v43 = vld [vmem:[%s1939_s28 + $0x140] ss:$16 sps:$4 sm:$0xff]   ;;  %v1781_v21 = vld [vmem:[%s1939_s28 + $0x68] ss:$16 sps:$4 sm:$0xff]  }
  0x2d   : > { %v1725_v42 = vld [vmem:[%s1939_s28 + $0x344] ss:$16 sps:$4 sm:$0xff]   ;;  %v1728_v44 = vld [vmem:[%s1939_s28 + $0x340] ss:$16 sps:$4 sm:$0xff]   ;;  %v1784_v22 = vld [vmem:[%s1939_s28 + $0x268] ss:$16 sps:$4 sm:$0xff]  }
  0x2e   : > { %1130 = vmatpush1.bf16.msra.mxu0 %v1697_v23  ;;  %v1729_v45 = vld [vmem:[%s1939_s28 + $0x164] ss:$16 sps:$4 sm:$0xff]   ;;  %v1733_v50 = vld [vmem:[%s1939_s28 + $0x160] ss:$16 sps:$4 sm:$0xff]   ;;  %v1789_v23 = vld [vmem:[%s1939_s28 + $0x8c] ss:$16 sps:$4 sm:$0xff]  }
  0x2f   : > { %1171 = vmatpush1.bf16.msra.mxu1 %v1698_v24  ;;  %1131 = vmatprep.subr.bf16.mxu0 %v1699_v25  ;;  %v1731_v46 = vld [vmem:[%s1939_s28 + $0x364] ss:$16 sps:$4 sm:$0xff]   ;;  %v1734_v51 = vld [vmem:[%s1939_s28 + $0x360] ss:$16 sps:$4 sm:$0xff]   ;;  %v1792_v24 = vld [vmem:[%s1939_s28 + $0x28c] ss:$16 sps:$4 sm:$0xff]  }
  0x30   : > { %1172 = vmatprep.subr.bf16.mxu1 %v1701_v26  ;;  %v335_v47 = vld [vmem:[%s1934_s24] sm:$0xff]  ;;  %v1787_v25 = vld [vmem:[%s1939_s28 + $0x88] ss:$16 sps:$4 sm:$0xff]  }
  0x31   : > { %v2001_v48 = vcombine.high %v335_v47, %v335_v47  ;;  %v1735_v53 = vld [vmem:[%s1939_s28 + $0x184] ss:$16 sps:$4 sm:$0xff]   ;;  %v1739_v55 = vld [vmem:[%s1939_s28 + $0x180] ss:$16 sps:$4 sm:$0xff]   ;;  %v2025_v7 = vcombine.low %v335_v47, %v335_v47  ;;  %v1790_v26 = vld [vmem:[%s1939_s28 + $0x288] ss:$16 sps:$4 sm:$0xff]  }
  0x32   : > { %1132 = vmatpush1.bf16.msra.mxu0 %v1703_v27  ;;  %v1737_v54 = vld [vmem:[%s1939_s28 + $0x384] ss:$16 sps:$4 sm:$0xff]   ;;  %v1740_v56 = vld [vmem:[%s1939_s28 + $0x380] ss:$16 sps:$4 sm:$0xff]   ;;  %v1795_v27 = vld [vmem:[%s1939_s28 + $0xac] ss:$16 sps:$4 sm:$0xff]  }
  0x33   : > { %1173 = vmatpush1.bf16.msra.mxu1 %v1704_v28  ;;  %1133 = vmatprep.subr.bf16.mxu0 %v1705_v29  ;;  %v1741_v57 = vld [vmem:[%s1939_s28 + $0x1a4] ss:$16 sps:$4 sm:$0xff]   ;;  %v1745_v59 = vld [vmem:[%s1939_s28 + $0x1a0] ss:$16 sps:$4 sm:$0xff]   ;;  %v1798_v28 = vld [vmem:[%s1939_s28 + $0x2ac] ss:$16 sps:$4 sm:$0xff]  }
  0x34   : > { %1174 = vmatprep.subr.bf16.mxu1 %v1707_v30  ;;  %1151 = vmatprep.mubr.bf16.mxu0 %v2001_v48  ;;  %v1743_v58 = vld [vmem:[%s1939_s28 + $0x3a4] ss:$16 sps:$4 sm:$0xff]   ;;  %v1746_v60 = vld [vmem:[%s1939_s28 + $0x3a0] ss:$16 sps:$4 sm:$0xff]   ;;  %v1793_v29 = vld [vmem:[%s1939_s28 + $0xa8] ss:$16 sps:$4 sm:$0xff]  }
  0x35   : > { %v1747_v61 = vld [vmem:[%s1939_s28 + $0x1c4] ss:$16 sps:$4 sm:$0xff]   ;;  %v1751_v63 = vld [vmem:[%s1939_s28 + $0x1c0] ss:$16 sps:$4 sm:$0xff]   ;;  %v1796_v30 = vld [vmem:[%s1939_s28 + $0x2a8] ss:$16 sps:$4 sm:$0xff]  }
  0x36   : > { %1134 = vmatpush1.bf16.msra.mxu0 %v1709_v31  ;;  %v1749_v62 = vld [vmem:[%s1939_s28 + $0x3c4] ss:$16 sps:$4 sm:$0xff]   ;;  %v1752_v0 = vld [vmem:[%s1939_s28 + $0x3c0] ss:$16 sps:$4 sm:$0xff]   ;;  %v1801_v31 = vld [vmem:[%s1939_s28 + $0xcc] ss:$16 sps:$4 sm:$0xff]  }
  0x37   : > { %1175 = vmatpush1.bf16.msra.mxu1 %v1710_v32  ;;  %1135 = vmatprep.subr.bf16.mxu0 %v1711_v33  ;;  %v1753_v1 = vld [vmem:[%s1939_s28 + $0x1e4] ss:$16 sps:$4 sm:$0xff]   ;;  %v1757_v3 = vld [vmem:[%s1939_s28 + $0x1e0] ss:$16 sps:$4 sm:$0xff]   ;;  %v1804_v32 = vld [vmem:[%s1939_s28 + $0x2cc] ss:$16 sps:$4 sm:$0xff]  }
  0x38   : > { %1176 = vmatprep.subr.bf16.mxu1 %v1713_v34  ;;  %v1755_v2 = vld [vmem:[%s1939_s28 + $0x3e4] ss:$16 sps:$4 sm:$0xff]   ;;  %v1758_v4 = vld [vmem:[%s1939_s28 + $0x3e0] ss:$16 sps:$4 sm:$0xff]   ;;  %v1799_v33 = vld [vmem:[%s1939_s28 + $0xc8] ss:$16 sps:$4 sm:$0xff]  }
  0x39   : > { %v1802_v34 = vld [vmem:[%s1939_s28 + $0x2c8] ss:$16 sps:$4 sm:$0xff]   ;;  %v1825_v47 = vld [vmem:[%s1939_s28 + $0x14c] ss:$16 sps:$4 sm:$0xff]  }
  0x3a   : > { %1136 = vmatpush1.bf16.msra.mxu0 %v1715_v35  ;;  %v1807_v35 = vld [vmem:[%s1939_s28 + $0xec] ss:$16 sps:$4 sm:$0xff]  }
  0x3b   : > { %1177 = vmatpush1.bf16.msra.mxu1 %v1716_v36  ;;  %1137 = vmatprep.subr.bf16.mxu0 %v1717_v37  ;;  %v1810_v36 = vld [vmem:[%s1939_s28 + $0x2ec] ss:$16 sps:$4 sm:$0xff]   ;;  %v1805_v37 = vld [vmem:[%s1939_s28 + $0xe8] ss:$16 sps:$4 sm:$0xff]  }
  0x3c   : > { %1178 = vmatprep.subr.bf16.mxu1 %v1719_v38  ;;  %v1808_v38 = vld [vmem:[%s1939_s28 + $0x2e8] ss:$16 sps:$4 sm:$0xff]  }
  0x3e   : > { %1138 = vmatpush1.bf16.msra.mxu0 %v1721_v39  ;;  %v1813_v39 = vld [vmem:[%s1939_s28 + $0x10c] ss:$16 sps:$4 sm:$0xff]  }
  0x3f   : > { %1179 = vmatpush1.bf16.msra.mxu1 %v1722_v40  ;;  %1139 = vmatprep.subr.bf16.mxu0 %v1723_v41  ;;  %v1816_v40 = vld [vmem:[%s1939_s28 + $0x30c] ss:$16 sps:$4 sm:$0xff]   ;;  %v1811_v41 = vld [vmem:[%s1939_s28 + $0x108] ss:$16 sps:$4 sm:$0xff]  }
  0x40   : > { %1180 = vmatprep.subr.bf16.mxu1 %v1725_v42  ;;  %v1814_v42 = vld [vmem:[%s1939_s28 + $0x308] ss:$16 sps:$4 sm:$0xff]  }
  0x42   : > { %1140 = vmatpush1.bf16.msra.mxu0 %v1727_v43  ;;  %v1819_v43 = vld [vmem:[%s1939_s28 + $0x12c] ss:$16 sps:$4 sm:$0xff]  }
  0x43   : > { %1181 = vmatpush1.bf16.msra.mxu1 %v1728_v44  ;;  %1141 = vmatprep.subr.bf16.mxu0 %v1729_v45  ;;  %v1822_v44 = vld [vmem:[%s1939_s28 + $0x32c] ss:$16 sps:$4 sm:$0xff]   ;;  %v1817_v45 = vld [vmem:[%s1939_s28 + $0x128] ss:$16 sps:$4 sm:$0xff]  }
  0x44   : > { %1182 = vmatprep.subr.bf16.mxu1 %v1731_v46  ;;  %v1820_v46 = vld [vmem:[%s1939_s28 + $0x328] ss:$16 sps:$4 sm:$0xff]  }
  0x46   : > { %1142 = vmatpush1.bf16.msra.mxu0 %v1733_v50  ;;  %v1826_v50 = vld [vmem:[%s1939_s28 + $0x348] ss:$16 sps:$4 sm:$0xff]  }
  0x47   : > { %1183 = vmatpush1.bf16.msra.mxu1 %v1734_v51  ;;  %1143 = vmatprep.subr.bf16.mxu0 %v1735_v53  ;;  %v1831_v51 = vld [vmem:[%s1939_s28 + $0x16c] ss:$16 sps:$4 sm:$0xff]   ;;  %v1829_v53 = vld [vmem:[%s1939_s28 + $0x168] ss:$16 sps:$4 sm:$0xff]  }
  0x48   : > { %1184 = vmatprep.subr.bf16.mxu1 %v1737_v54  ;;  %v1832_v54 = vld [vmem:[%s1939_s28 + $0x368] ss:$16 sps:$4 sm:$0xff]  }
  0x4a   : > { %1144 = vmatpush1.bf16.msra.mxu0 %v1739_v55  ;;  %v1837_v55 = vld [vmem:[%s1939_s28 + $0x18c] ss:$16 sps:$4 sm:$0xff]  }
  0x4b   : > { %1185 = vmatpush1.bf16.msra.mxu1 %v1740_v56  ;;  %1145 = vmatprep.subr.bf16.mxu0 %v1741_v57  ;;  %v1840_v56 = vld [vmem:[%s1939_s28 + $0x38c] ss:$16 sps:$4 sm:$0xff]   ;;  %v1835_v57 = vld [vmem:[%s1939_s28 + $0x188] ss:$16 sps:$4 sm:$0xff]  }
  0x4c   : > { %1186 = vmatprep.subr.bf16.mxu1 %v1743_v58  ;;  %v1838_v58 = vld [vmem:[%s1939_s28 + $0x388] ss:$16 sps:$4 sm:$0xff]  }
  0x4e   : > { %1146 = vmatpush1.bf16.msra.mxu0 %v1745_v59  ;;  %v1843_v59 = vld [vmem:[%s1939_s28 + $0x1ac] ss:$16 sps:$4 sm:$0xff]  }
  0x4f   : > { %1187 = vmatpush1.bf16.msra.mxu1 %v1746_v60  ;;  %1147 = vmatprep.subr.bf16.mxu0 %v1747_v61  ;;  %v1846_v60 = vld [vmem:[%s1939_s28 + $0x3ac] ss:$16 sps:$4 sm:$0xff]   ;;  %v1841_v61 = vld [vmem:[%s1939_s28 + $0x1a8] ss:$16 sps:$4 sm:$0xff]  }
  0x50   : > { %1188 = vmatprep.subr.bf16.mxu1 %v1749_v62  ;;  %v1844_v62 = vld [vmem:[%s1939_s28 + $0x3a8] ss:$16 sps:$4 sm:$0xff]  }
  0x52   : > { %1148 = vmatpush1.bf16.msra.mxu0 %v1751_v63  ;;  %v1849_v63 = vld [vmem:[%s1939_s28 + $0x1cc] ss:$16 sps:$4 sm:$0xff]  }
  0x53   : > { %1189 = vmatpush1.bf16.msra.mxu1 %v1752_v0  ;;  %1149 = vmatprep.subr.bf16.mxu0 %v1753_v1  ;;  %v1852_v0 = vld [vmem:[%s1939_s28 + $0x3cc] ss:$16 sps:$4 sm:$0xff]   ;;  %v1847_v1 = vld [vmem:[%s1939_s28 + $0x1c8] ss:$16 sps:$4 sm:$0xff]  }
  0x54   : > { %1190 = vmatprep.subr.bf16.mxu1 %v1755_v2  ;;  %v1850_v2 = vld [vmem:[%s1939_s28 + $0x3c8] ss:$16 sps:$4 sm:$0xff]  }
  0x56   : > { %1150 = vmatpush1.bf16.msra.mxu0 %v1757_v3  ;;  %v1855_v3 = vld [vmem:[%s1939_s28 + $0x1ec] ss:$16 sps:$4 sm:$0xff]  }
  0x57   : > { %1191 = vmatpush1.bf16.msra.mxu1 %v1758_v4  ;;  %1201 = vmatprep.subr.bf16.mxu0 %v1765_v5  ;;  %v1858_v4 = vld [vmem:[%s1939_s28 + $0x3ec] ss:$16 sps:$4 sm:$0xff]   ;;  %v1853_v5 = vld [vmem:[%s1939_s28 + $0x1e8] ss:$16 sps:$4 sm:$0xff]  }
  0x58   : > { %1242 = vmatprep.subr.bf16.mxu1 %v1768_v6  ;;  %v1856_v6 = vld [vmem:[%s1939_s28 + $0x3e8] ss:$16 sps:$4 sm:$0xff]  }
  0x59   : > { %1152 = vmatmul.mubr.bf16.vlgmr.msra.gmra.mrb[0].mxu0 %v2025_v7 }
  0x5a   : > { %1193 = vmatmul.mubr.bf16.vlgmr.msra.gmra.mrb[0].mxu1 %v2027_v8  ;;  %1202 = vmatpush1.bf16.msra.mxu0 %v1763_v9 }
  0x5b   : > { %1243 = vmatpush1.bf16.msra.mxu1 %v1766_v10  ;;  %1203 = vmatprep.subr.bf16.mxu0 %v1771_v11  ;;  %v331_v10 = vld [vmem:[%s2164_s4] sm:$0xff] }
  0x5c   : > { %1244 = vmatprep.subr.bf16.mxu1 %v1774_v12  ;;  %1233 = vmatprep.mubr.bf16.mxu0 %v2001_v48  ;;  %v1828_v48 = vld [vmem:[%s1939_s28 + $0x34c] ss:$16 sps:$4 sm:$0xff]  }
  0x5d   : > { %1274 = vmatprep.mubr.bf16.mxu1 %v1503_v52  ;;  %v1834_v52 = vld [vmem:[%s1939_s28 + $0x36c] ss:$16 sps:$4 sm:$0xff]  }
  0x5e   : > { %1204 = vmatpush1.bf16.msra.mxu0 %v1769_v13 }
  0x5f   : > { %1245 = vmatpush1.bf16.msra.mxu1 %v1772_v14  ;;  %1205 = vmatprep.subr.bf16.mxu0 %v1777_v15  ;;  %v332_v14 = vld [vmem:[%s2164_s4 + $0x8] sm:$0xff] }
  0x60   : > { %1246 = vmatprep.subr.bf16.mxu1 %v1780_v16 }
  0x62   : > { %1206 = vmatpush1.bf16.msra.mxu0 %v1775_v17 }
  0x63   : > { %1247 = vmatpush1.bf16.msra.mxu1 %v1778_v18  ;;  %1207 = vmatprep.subr.bf16.mxu0 %v1783_v19 }
  0x64   : > { %1248 = vmatprep.subr.bf16.mxu1 %v1786_v20 }
  0x66   : > { %1208 = vmatpush1.bf16.msra.mxu0 %v1781_v21 }
  0x67   : > { %1249 = vmatpush1.bf16.msra.mxu1 %v1784_v22  ;;  %1209 = vmatprep.subr.bf16.mxu0 %v1789_v23  ;;  %v333_v22 = vld [vmem:[%s2164_s4 + $0x10] sm:$0xff] }
  0x68   : > { %1250 = vmatprep.subr.bf16.mxu1 %v1792_v24 }
  0x6a   : > { %1210 = vmatpush1.bf16.msra.mxu0 %v1787_v25 }
  0x6b   : > { %1251 = vmatpush1.bf16.msra.mxu1 %v1790_v26  ;;  %1211 = vmatprep.subr.bf16.mxu0 %v1795_v27  ;;  %v334_v26 = vld [vmem:[%s2164_s4 + $0x18] sm:$0xff] }
  0x6c   : > { %1252 = vmatprep.subr.bf16.mxu1 %v1798_v28 }
  0x6e   : > { %1212 = vmatpush1.bf16.msra.mxu0 %v1793_v29 }
  0x6f   : > { %1253 = vmatpush1.bf16.msra.mxu1 %v1796_v30  ;;  %1213 = vmatprep.subr.bf16.mxu0 %v1801_v31 }
  0x70   : > { %1254 = vmatprep.subr.bf16.mxu1 %v1804_v32 }
  0x72   : > { %1214 = vmatpush1.bf16.msra.mxu0 %v1799_v33 }
  0x73   : > { %1255 = vmatpush1.bf16.msra.mxu1 %v1802_v34  ;;  %1215 = vmatprep.subr.bf16.mxu0 %v1807_v35  ;;  %v1301_v35 = vlaneseq (!%p1632_p7) }
  0x74   : > { %1256 = vmatprep.subr.bf16.mxu1 %v1810_v36 }
  0x75   : > { %v1302_v36 = vshrl.u32 (!%p1632_p7), %v1301_v35, 7 }
  0x76   : > { %1216 = vmatpush1.bf16.msra.mxu0 %v1805_v37  ;;  %v1299_v37 = vld [vmem:[%s2162_s2] sm:$0xf] (!%p1632_p7) }
  0x77   : > { %1257 = vmatpush1.bf16.msra.mxu1 %v1808_v38  ;;  %1217 = vmatprep.subr.bf16.mxu0 %v1813_v39  ;;  %v1325_v38 = vld [vmem:[%s2163_s3] sm:$0xf] (!%p1632_p7)  ;;  %v1303_v39 = vsub.s32 (!%p1632_p7), 0, %v1302_v36 }
  0x78   : > { %1258 = vmatprep.subr.bf16.mxu1 %v1816_v40  ;;  %v1307_v40 = vsub.s32 (!%p1632_p7), 1, %v1302_v36 }
  0x7a   : > { %1218 = vmatpush1.bf16.msra.mxu0 %v1811_v41  ;;  %v1311_v41 = vsub.s32 (!%p1632_p7), 2, %v1302_v36 }
  0x7b   : > { %1259 = vmatpush1.bf16.msra.mxu1 %v1814_v42  ;;  %1219 = vmatprep.subr.bf16.mxu0 %v1819_v43  ;;  %v1315_v42 = vsub.s32 (!%p1632_p7), 3, %v1302_v36 }
  0x7c   : > { %1260 = vmatprep.subr.bf16.mxu1 %v1822_v44 }
  0x7e   : > { %1220 = vmatpush1.bf16.msra.mxu0 %v1817_v45  ;;  %v1304_v45 = vrot.slane (!%p1632_p7), %v1299_v37, %v1303_v39 }
  0x7f   : > { %1261 = vmatpush1.bf16.msra.mxu1 %v1820_v46  ;;  %1221 = vmatprep.subr.bf16.mxu0 %v1825_v47  ;;  %v1330_v46 = vrot.slane (!%p1632_p7), %v1325_v38, %v1303_v39  ;;  %v1308_v47 = vrot.slane (!%p1632_p7), %v1299_v37, %v1307_v40 }
  0x80   : > { %1262 = vmatprep.subr.bf16.mxu1 %v1828_v48  ;;  %v1334_v48 = vrot.slane (!%p1632_p7), %v1325_v38, %v1307_v40 }
  0x82   : > { %1222 = vmatpush1.bf16.msra.mxu0 %v1823_v49 }
  0x83   : > { %1263 = vmatpush1.bf16.msra.mxu1 %v1826_v50  ;;  %1223 = vmatprep.subr.bf16.mxu0 %v1831_v51  ;;  %v1312_v51 = vrot.slane (!%p1632_p7), %v1299_v37, %v1311_v41 }
  0x84   : > { %1264 = vmatprep.subr.bf16.mxu1 %v1834_v52  ;;  %v1338_v52 = vrot.slane (!%p1632_p7), %v1325_v38, %v1311_v41 }
  0x86   : > { %1224 = vmatpush1.bf16.msra.mxu0 %v1829_v53  ;;  %v1316_v53 = vrot.slane (!%p1632_p7), %v1299_v37, %v1315_v42 }
  0x87   : > { %1265 = vmatpush1.bf16.msra.mxu1 %v1832_v54  ;;  %1225 = vmatprep.subr.bf16.mxu0 %v1837_v55  ;;  %v1342_v54 = vrot.slane (!%p1632_p7), %v1325_v38, %v1315_v42 }
  0x88   : > { %1266 = vmatprep.subr.bf16.mxu1 %v1840_v56 }
  0x8a   : > { %1226 = vmatpush1.bf16.msra.mxu0 %v1835_v57 }
  0x8b   : > { %1267 = vmatpush1.bf16.msra.mxu1 %v1838_v58  ;;  %1227 = vmatprep.subr.bf16.mxu0 %v1843_v59 }
  0x8c   : > { %1268 = vmatprep.subr.bf16.mxu1 %v1846_v60 }
  0x8e   : > { %1228 = vmatpush1.bf16.msra.mxu0 %v1841_v61 }
  0x8f   : > { %1269 = vmatpush1.bf16.msra.mxu1 %v1844_v62  ;;  %1229 = vmatprep.subr.bf16.mxu0 %v1849_v63 }
  0x90   : > { %1270 = vmatprep.subr.bf16.mxu1 %v1852_v0 }
  0x92   : > { %1230 = vmatpush1.bf16.msra.mxu0 %v1847_v1 }
  0x93   : > { %1271 = vmatpush1.bf16.msra.mxu1 %v1850_v2  ;;  %1231 = vmatprep.subr.bf16.mxu0 %v1855_v3 }
  0x94   : > { %1272 = vmatprep.subr.bf16.mxu1 %v1858_v4 }
  0x96   : > { %1232 = vmatpush1.bf16.msra.mxu0 %v1853_v5 }
  0x97   : > { %1273 = vmatpush1.bf16.msra.mxu1 %v1856_v6 }
  0x99   : > { %1234 = vmatmul.mubr.bf16.vlgmr.msra.gmra.mrb[4].mxu0 %v2025_v7 }
  0x9a   : > { %1275 = vmatmul.mubr.bf16.vlgmr.msra.gmra.mrb[4].mxu1 %v2027_v8 }
 0x12c   : > { %v1153_v9 = vpop.f32.mrb[0].mxu0 }
 0x12d   : > { %v1194_v11 = vpop.f32.mrb[0].mxu1  ;;  %v1155_v13 = vpop.f32.mrb[1].mxu0 }
 0x12e   : > { %v1195_v12 = vadd.f32 %v1194_v11, %v1153_v9  ;;  %v1196_v15 = vpop.f32.mrb[1].mxu1  ;;  %v1157_v17 = vpop.f32.mrb[2].mxu0 }
 0x12f   : > { %v1197_v16 = vadd.f32 %v1196_v15, %v1155_v13  ;;  %v1198_v18 = vpop.f32.mrb[2].mxu1  ;;  %v1158_v7 = vpop.f32.mrb[3].mxu0 }
 0x130   : > { %v1283_v19 = vadd.f32 %v1195_v12, %v331_v10  ;;  %v1199_v20 = vpop.f32.mrb[3].mxu1 }
 0x131   : > { %v1284_v8 = vadd.f32 %v1197_v16, %v332_v14 }
 0x132   : > { %1287 = vst [vmem:[%s2164_s4] sm:$0xff] %v1283_v19 }
 0x133   : > { %1288 = vst [vmem:[%s2164_s4 + $0x8] sm:$0xff] %v1284_v8 }
 0x139   : > { %v1295_v43 = vld [vmem:[%s2164_s4] sm:$0xff] (!%p1632_p7) }
 0x13a   : > { %v1296_v44 = vld [vmem:[%s2164_s4 + $0x8] sm:$0xff] (!%p1632_p7)  ;;  %v1321_v55 = vmul.f32 (!%p1632_p7), %v1304_v45, %v1295_v43 }
 0x13b   : > { %v1322_v56 = vmul.f32 (!%p1632_p7), %v1308_v47, %v1296_v44 }
 0x13c   : > { %v1347_v59 = vadd.f32 (!%p1632_p7), %v1330_v46, %v1321_v55 }
 0x13d   : > { %v1348_v60 = vadd.f32 (!%p1632_p7), %v1334_v48, %v1322_v56 }
 0x13e   : > { %v1351_v63 = vmax.f32 (!%p1632_p7), %v1347_v59, 0.0 }
 0x13f   : > { %v1352_v0 = vmax.f32 (!%p1632_p7), %v1348_v60, 0.0 }
 0x140   : > { %1355 = vst [vmem:[%s2164_s4] sm:$0xff] (!%p1632_p7), %v1351_v63 }
 0x141   : > { %1356 = vst [vmem:[%s2164_s4 + $0x8] sm:$0xff] (!%p1632_p7), %v1352_v0 }
 0x16c   : > { %v1235_v21 = vpop.f32.mrb[4].mxu0 }
 0x16d   : > { %v1276_v23 = vpop.f32.mrb[4].mxu1  ;;  %v1237_v25 = vpop.f32.mrb[5].mxu0  ;;  %1294 = sbr.rel (%p1632_p7) target bundleno = 386 (0x182), region = 44 }
 0x16e   : > { %v1277_v24 = vadd.f32 %v1276_v23, %v1235_v21  ;;  %v1278_v27 = vpop.f32.mrb[5].mxu1  ;;  %v1239_v29 = vpop.f32.mrb[6].mxu0 }
 0x16f   : > { %v1279_v28 = vadd.f32 %v1278_v27, %v1237_v25  ;;  %v1280_v30 = vpop.f32.mrb[6].mxu1  ;;  %v1240_v32 = vpop.f32.mrb[7].mxu0 }
 0x170   : > { %v1285_v31 = vadd.f32 %v1277_v24, %v333_v22  ;;  %v1281_v33 = vpop.f32.mrb[7].mxu1 }
 0x171   : > { %v1286_v34 = vadd.f32 %v1279_v28, %v334_v26 }
 0x172   : > { %1289 = vst [vmem:[%s2164_s4 + $0x10] sm:$0xff] %v1285_v31 }
 0x173   : > { %1290 = vst [vmem:[%s2164_s4 + $0x18] sm:$0xff] %v1286_v34 }
 0x179   : > { %v1297_v49 = vld [vmem:[%s2164_s4 + $0x10] sm:$0xff] }
 0x17a   : > { %v1298_v50 = vld [vmem:[%s2164_s4 + $0x18] sm:$0xff]  ;;  %v1323_v57 = vmul.f32 %v1312_v51, %v1297_v49 }
 0x17b   : > { %v1324_v58 = vmul.f32 %v1316_v53, %v1298_v50 }
 0x17c   : > { %v1349_v61 = vadd.f32 %v1338_v52, %v1323_v57 }
 0x17d   : > { %v1350_v62 = vadd.f32 %v1342_v54, %v1324_v58 }
 0x17e   : > { %v1353_v1 = vmax.f32 %v1349_v61, 0.0 }
 0x17f   : > { %v1354_v2 = vmax.f32 %v1350_v62, 0.0 }
 0x180   : > { %1357 = vst [vmem:[%s2164_s4 + $0x10] sm:$0xff] %v1353_v1 }
 0x181   : > { %1358 = vst [vmem:[%s2164_s4 + $0x18] sm:$0xff] %v1354_v2 }
 0x182 PF: > { %s14_s17 = sadd.s32 1, %s1881_s17   ;;  %s2165_s15 = smov %s1877_s16 }
 0x183   : > { %p11_p8 = scmp.ge.s32.totalorder %s14_s17, 11   ;;  %s2166_s16 = smov %s2168_s18 }
 0x185   :  { %13 = sbr.rel (!%p11_p8) target bundleno = 2 (0x2), region = 83 }

// kernel: tomato_leaf_net.44
= control target key start
LH: loop header
LB: loop body
LE: loop exit
PB: predicated region body
PF: predicated region fallthrough
CT: control target
= control target key end

     0   :  { %s386_s6 = smov 0   ;;  %s388_s7 = smov 0   ;;  %s446_s0 = inlined_call_operand.vmem [shape: f32[8,1,512], index: 0, kind: input, shape index: {}]   ;;  %s447_s1 = inlined_call_operand.vmem [shape: f32[8,512], index: 1, kind: output, shape index: {}]  }
   0x1   :  { %s390_s8 = smov 0  }
   0x2 LB: > { %s316_s9 = sadd.s32 4294967295, %s373_s8   ;;  %s403_s10 = sadd.s32 1, %s373_s8   ;;  %s373_s8 = sphi %s390_s8, %s451_s8   ;;  %s369_s7 = sphi %s388_s7, %s450_s7   ;;  %s365_s6 = sphi %s386_s6, %s449_s6  }
   0x3   : > { %s15_s11 = ssub.s32 %s373_s8, %s403_s10  ;;  %s18_s12 = sadd.s32 1, %s369_s7 }
   0x4   : > { %p16_p0 = scmp.eq.s32.totalorder %s15_s11, 0  ;;  %p25_p1 = scmp.ne.s32.totalorder %s369_s7, %s365_s6 }
   0x5   : > { %p26_p2 = scmp.eq.s32.totalorder %s373_s8, 0  ;;  %p319_p4 = scmp.ge.s32.totalorder %s373_s8, 4 }
   0x6   : > { %s412_s13 = scalar_select %p16_p0, %s369_s7, %s18_s12  }
   0x7   : > { %p27_p3 = por %p26_p2, %p25_p1  ;;  %77 = sbr.rel (%p319_p4) target bundleno = 22 (0x16), region = 16 }
   0xe   : > { %80 = sbr.rel (!%p27_p3) target bundleno = 22 (0x16), region = 20  ;;  %s82_s14 = sand.u32 (%p27_p3), 1, %s369_s7  }
   0xf   : > { %s85_s17 = scalar_lea.vmem (%p27_p3), %s446_s0, %s373_s8  ;;  %s320_s18 = sshll.u32 (%p27_p3), %s82_s14, 3 }
  0x10   : > { %v101_v0 = vld [vmem:[%s85_s17] sm:$0x1] (%p27_p3)  ;;  %v103_v1 = vld [vmem:[%s85_s17 + $0x4] sm:$0x1] (%p27_p3)  ;;  %v105_v2 = vld [vmem:[%s85_s17 + $0x8] sm:$0x1] (%p27_p3) }
  0x11   : > { %v107_v3 = vld [vmem:[%s85_s17 + $0xc] sm:$0x1] (%p27_p3)  ;;  %s84_s19 = scalar_lea.vmem (%p27_p3), [#allocation2], %s320_s18  ;;  %v109_v4 = vld [vmem:[%s85_s17 + $0x10] sm:$0x1] (%p27_p3) }
  0x12   : > { %102 = vst [vmem:[%s84_s19] sm:$0x1] (%p27_p3), %v101_v0  ;;  %104 = vst [vmem:[%s84_s19 + $0x1] sm:$0x1] (%p27_p3), %v103_v1  ;;  %v111_v5 = vld [vmem:[%s85_s17 + $0x14] sm:$0x1] (%p27_p3) }
  0x13   : > { %106 = vst [vmem:[%s84_s19 + $0x2] sm:$0x1] (%p27_p3), %v105_v2  ;;  %108 = vst [vmem:[%s84_s19 + $0x3] sm:$0x1] (%p27_p3), %v107_v3  ;;  %v113_v6 = vld [vmem:[%s85_s17 + $0x18] sm:$0x1] (%p27_p3) }
  0x14   : > { %110 = vst [vmem:[%s84_s19 + $0x4] sm:$0x1] (%p27_p3), %v109_v4  ;;  %112 = vst [vmem:[%s84_s19 + $0x5] sm:$0x1] (%p27_p3), %v111_v5  ;;  %v115_v7 = vld [vmem:[%s85_s17 + $0x1c] sm:$0x1] (%p27_p3) }
  0x15   : > { %114 = vst [vmem:[%s84_s19 + $0x6] sm:$0x1] %v113_v6  ;;  %116 = vst [vmem:[%s84_s19 + $0x7] sm:$0x1] %v115_v7 }
  0x16 PF: > { %p321_p5 = scmp.ge.s32.totalorder %s373_s8, 1  ;;  %p154_p6 = scmp.lt.s32.totalorder %s373_s8, 5 }
  0x18   : > { %p155_p7 = pnand %p321_p5, %p154_p6 }
  0x19   : > { %s161_s20 = sand.u32 (!%p155_p7), 1, %s365_s6   ;;  %v214_v8 = vlaneseq (!%p155_p7)  ;;  %v375_v9 = vmov (!%p155_p7), 1966171168   ;;  %p425_p8 = scmp.lt.s32.totalorder (!%p155_p7), %s316_s9, 3 }
  0x1a   : > { %158 = sbr.rel (%p155_p7) target bundleno = 42 (0x2a), region = 61  ;;  %s322_s21 = sshll.u32 (!%p155_p7), %s161_s20, 3  ;;  %v212_v10 = vunpack.c.l.s4 (!%p155_p7), %v375_v9 }
  0x1b   : > { %v215_v11 = vshrl.u32 (!%p155_p7), %v214_v8, 7  ;;  %s163_s23 = scalar_lea.vmem (!%p155_p7), [#allocation2], %s322_s21 }
  0x1c   : > { %v183_v12 = vld [vmem:[%s163_s23] sm:$0x1] (!%p155_p7)  ;;  %v184_v13 = vld [vmem:[%s163_s23 + $0x1] sm:$0x1] (!%p155_p7)  ;;  %v213_v14 = vunpack.c.0.s8 (!%p155_p7), %v212_v10  ;;  %v185_v15 = vld [vmem:[%s163_s23 + $0x2] sm:$0x1] (!%p155_p7) }
  0x1d   : > { %v186_v16 = vld [vmem:[%s163_s23 + $0x3] sm:$0x1] (!%p155_p7)  ;;  %v187_v17 = vld [vmem:[%s163_s23 + $0x4] sm:$0x1] (!%p155_p7)  ;;  %v207_v18 = vcombine.low (!%p155_p7), %v183_v12, %v184_v13  ;;  %v188_v19 = vld [vmem:[%s163_s23 + $0x5] sm:$0x1] (!%p155_p7) }
  0x1e   : > { %v189_v20 = vld [vmem:[%s163_s23 + $0x6] sm:$0x1] (!%p155_p7)  ;;  %v208_v21 = vcombine.low (!%p155_p7), %v185_v15, %v186_v16  ;;  %v216_v22 = vsub.s32 (!%p155_p7), %v213_v14, %v215_v11  ;;  %v190_v23 = vld [vmem:[%s163_s23 + $0x7] sm:$0x1] (!%p155_p7)  ;;  %v209_v24 = vcombine.low (!%p155_p7), %v187_v17, %v188_v19 }
  0x1f   : > { %v210_v25 = vcombine.low (!%p155_p7), %v189_v20, %v190_v23 }
  0x20   : > { %v217_v26 = vrot.slane (!%p155_p7), %v207_v18, %v216_v22  ;;  %v224_v27 = vrot.slane (!%p155_p7), %v208_v21, %v216_v22  ;;  %v231_v28 = vrot.slane (!%p155_p7), %v209_v24, %v216_v22 }
  0x21   : > { %s453_s9 = smov (!%p425_p8, %s316_s9), 3  ;;  %v238_v29 = vrot.slane %v210_v25, %v216_v22 }
  0x22   : > { %v239_v30 = vcombine.low %v217_v26, %v224_v27  ;;  %s323_s24 = sshll.u32 %s453_s9, 3 }
  0x23   : > { %v240_v31 = vcombine.low %v231_v28, %v238_v29  ;;  %s182_s27 = scalar_lea.vmem %s447_s1, %s323_s24 }
  0x24   : > { %v247_v32 = vrot.slane %v239_v30, %v216_v22 }
  0x25   : > { %v254_v33 = vrot.slane %v240_v31, %v216_v22 }
  0x27   : > { %v255_v34 = vcombine.low %v247_v32, %v254_v33 }
  0x29   : > { %257 = vst [vmem:[%s182_s27] sm:$0xff] %v255_v34 }
  0x2a PF: > { %p8_p9 = scmp.ge.s32.totalorder %s403_s10, 6   ;;  %s449_s6 = smov %s369_s7 }
  0x2b   : > { %s450_s7 = smov %s412_s13  ;;  %s451_s8 = smov %s403_s10 }
  0x2c   :  { %10 = sbr.rel (!%p8_p9) target bundleno = 2 (0x2), region = 100 }

// kernel: tomato_leaf_net.45
= control target key start
LH: loop header
LB: loop body
LE: loop exit
PB: predicated region body
PF: predicated region fallthrough
CT: control target
= control target key end

     0   :  { %s658_s1 = inlined_call_operand.vmem [shape: bf16[512,128], index: 1, kind: input, shape index: {}]   ;;  %s659_s0 = inlined_call_operand.vmem [shape: bf16[8,512], index: 0, kind: input, shape index: {}]   ;;  %s660_s2 = inlined_call_operand.vmem [shape: f32[1,128], index: 2, kind: input, shape index: {}]   ;;  %s661_s3 = inlined_call_operand.vmem [shape: f32[1,128], index: 3, kind: input, shape index: {}]   ;;  %s662_s4 = inlined_call_operand.vmem [shape: f32[8,128], index: 4, kind: output, shape index: {}]  }
   0x1   :  { %v486_v0 = vld [vmem:[%s658_s1 + $0x40] sm:$0xff]   ;;  %v490_v4 = vld [vmem:[%s658_s1 + $0x48] sm:$0xff]   ;;  %v494_v8 = vld [vmem:[%s658_s1 + $0x50] sm:$0xff]  }
   0x2   :  { %v487_v1 = vld [vmem:[%s658_s1 + $0xc0] sm:$0xff]   ;;  %441 = vmatprep.subr.bf16.mxu0 %v486_v0  ;;  %v491_v5 = vld [vmem:[%s658_s1 + $0xc8] sm:$0xff]   ;;  %v495_v9 = vld [vmem:[%s658_s1 + $0xd0] sm:$0xff]  }
   0x3   :  { %v488_v2 = vld [vmem:[%s658_s1] sm:$0xff]   ;;  %463 = vmatprep.subr.bf16.mxu1 %v487_v1  ;;  %v492_v6 = vld [vmem:[%s658_s1 + $0x8] sm:$0xff]   ;;  %v496_v10 = vld [vmem:[%s658_s1 + $0x10] sm:$0xff]  }
   0x4   :  { %v489_v3 = vld [vmem:[%s658_s1 + $0x80] sm:$0xff]   ;;  %442 = vmatpush3.bf16.msra.mxu0 %v488_v2  ;;  %v493_v7 = vld [vmem:[%s658_s1 + $0x88] sm:$0xff]   ;;  %v497_v11 = vld [vmem:[%s658_s1 + $0x90] sm:$0xff]  }
   0x5   :  { %464 = vmatpush3.bf16.msra.mxu1 %v489_v3  ;;  %443 = vmatprep.subr.bf16.mxu0 %v490_v4  ;;  %v498_v12 = vld [vmem:[%s658_s1 + $0x58] sm:$0xff]   ;;  %v502_v16 = vld [vmem:[%s658_s1 + $0x60] sm:$0xff]   ;;  %v506_v20 = vld [vmem:[%s658_s1 + $0x68] sm:$0xff]  }
   0x6   :  { %465 = vmatprep.subr.bf16.mxu1 %v491_v5  ;;  %v499_v13 = vld [vmem:[%s658_s1 + $0xd8] sm:$0xff]   ;;  %v503_v17 = vld [vmem:[%s658_s1 + $0xe0] sm:$0xff]   ;;  %v507_v21 = vld [vmem:[%s658_s1 + $0xe8] sm:$0xff]  }
   0x7   :  { %v500_v14 = vld [vmem:[%s658_s1 + $0x18] sm:$0xff]   ;;  %v504_v18 = vld [vmem:[%s658_s1 + $0x20] sm:$0xff]   ;;  %v508_v22 = vld [vmem:[%s658_s1 + $0x28] sm:$0xff]  }
   0x8   :  { %444 = vmatpush3.bf16.msra.mxu0 %v492_v6  ;;  %v501_v15 = vld [vmem:[%s658_s1 + $0x98] sm:$0xff]   ;;  %v505_v19 = vld [vmem:[%s658_s1 + $0xa0] sm:$0xff]   ;;  %v509_v23 = vld [vmem:[%s658_s1 + $0xa8] sm:$0xff]  }
   0x9   :  { %466 = vmatpush3.bf16.msra.mxu1 %v493_v7  ;;  %445 = vmatprep.subr.bf16.mxu0 %v494_v8  ;;  %v510_v24 = vld [vmem:[%s658_s1 + $0x70] sm:$0xff]   ;;  %v514_v28 = vld [vmem:[%s658_s1 + $0x78] sm:$0xff]   ;;  %v24_v32 = vld [vmem:[%s659_s0] sm:$0xff] }
   0xa   :  { %467 = vmatprep.subr.bf16.mxu1 %v495_v9  ;;  %v511_v25 = vld [vmem:[%s658_s1 + $0xf0] sm:$0xff]   ;;  %v515_v29 = vld [vmem:[%s658_s1 + $0xf8] sm:$0xff]   ;;  %v25_v33 = vld [vmem:[%s659_s0 + $0x8] sm:$0xff]  ;;  %v403_v34 = vcombine.low %v24_v32, %v24_v32  ;;  %v404_v35 = vcombine.high %v24_v32, %v24_v32 }
   0xb   :  { %v512_v26 = vld [vmem:[%s658_s1 + $0x30] sm:$0xff]   ;;  %v516_v30 = vld [vmem:[%s658_s1 + $0x38] sm:$0xff]   ;;  %v405_v36 = vcombine.low %v25_v33, %v25_v33  ;;  %v406_v37 = vcombine.high %v25_v33, %v25_v33  ;;  %v439_v49 = vld [vmem:[%s660_s2] ss:$0 sm:$0xff] }
   0xc   :  { %446 = vmatpush3.bf16.msra.mxu0 %v496_v10  ;;  %v513_v27 = vld [vmem:[%s658_s1 + $0xb0] sm:$0xff]   ;;  %v517_v31 = vld [vmem:[%s658_s1 + $0xb8] sm:$0xff]   ;;  %328 = vmatprep.mubr.bf16.mxu0 %v404_v35  ;;  %v440_v50 = vld [vmem:[%s661_s3] ss:$0 sm:$0xff] }
   0xd   :  { %468 = vmatpush3.bf16.msra.mxu1 %v497_v11  ;;  %447 = vmatprep.subr.bf16.mxu0 %v498_v12 }
   0xe   :  { %469 = vmatprep.subr.bf16.mxu1 %v499_v13  ;;  %368 = vmatprep.mubr.bf16.mxu1 %v406_v37 }
  0x10   :  { %448 = vmatpush3.bf16.msra.mxu0 %v500_v14 }
  0x11   :  { %470 = vmatpush3.bf16.msra.mxu1 %v501_v15  ;;  %449 = vmatprep.subr.bf16.mxu0 %v502_v16 }
  0x12   :  { %471 = vmatprep.subr.bf16.mxu1 %v503_v17 }
  0x14   :  { %450 = vmatpush3.bf16.msra.mxu0 %v504_v18 }
  0x15   :  { %472 = vmatpush3.bf16.msra.mxu1 %v505_v19  ;;  %451 = vmatprep.subr.bf16.mxu0 %v506_v20 }
  0x16   :  { %473 = vmatprep.subr.bf16.mxu1 %v507_v21 }
  0x18   :  { %452 = vmatpush3.bf16.msra.mxu0 %v508_v22 }
  0x19   :  { %474 = vmatpush3.bf16.msra.mxu1 %v509_v23  ;;  %453 = vmatprep.subr.bf16.mxu0 %v510_v24 }
  0x1a   :  { %475 = vmatprep.subr.bf16.mxu1 %v511_v25 }
  0x1c   :  { %454 = vmatpush3.bf16.msra.mxu0 %v512_v26 }
  0x1d   :  { %476 = vmatpush3.bf16.msra.mxu1 %v513_v27  ;;  %455 = vmatprep.subr.bf16.mxu0 %v514_v28 }
  0x1e   :  { %477 = vmatprep.subr.bf16.mxu1 %v515_v29 }
  0x20   :  { %456 = vmatpush3.bf16.msra.mxu0 %v516_v30 }
  0x21   :  { %478 = vmatpush3.bf16.msra.mxu1 %v517_v31 }
  0x23   :  { %329 = vmatmul.mubr.bf16.vlgmr.msra.gmra.mrb[0].mxu0 %v403_v34 }
  0x24   :  { %369 = vmatmul.mubr.bf16.vlgmr.msra.gmra.mrb[0].mxu1 %v405_v36 }
  0xf6   :  { %v457_v38 = vpop.f32.mrb[0].mxu0 }
  0xf7   :  { %v479_v39 = vpop.f32.mrb[0].mxu1  ;;  %v458_v40 = vpop.f32.mrb[1].mxu0 }
  0xf8   :  { %v480_v41 = vpop.f32.mrb[1].mxu1  ;;  %v459_v42 = vadd.f32 %v458_v40, %v457_v38  ;;  %v460_v44 = vpop.f32.mrb[2].mxu0 }
  0xf9   :  { %v481_v43 = vadd.f32 %v480_v41, %v479_v39  ;;  %v482_v45 = vpop.f32.mrb[2].mxu1  ;;  %v461_v46 = vpop.f32.mrb[3].mxu0 }
  0xfa   :  { %v483_v47 = vpop.f32.mrb[3].mxu1 }
  0xfb   :  { %v371_v48 = vadd.f32 %v481_v43, %v459_v42 }
  0xfd   :  { %v389_v51 = vmul.f32 %v439_v49, %v371_v48 }
  0xff   :  { %v397_v52 = vadd.f32 %v440_v50, %v389_v51 }
 0x101   :  { %398 = vst [vmem:[%s662_s4] sm:$0xff] %v397_v52 }

</bundles_post_ra>
